<compile_context>
chip_gen: v6e
topology: v6e:2x2x1
jax: 0.10.0
libtpu: 0.0.40
codegen_flags: <defaults>
</compile_context>

<pallas_src>
import functools

import jax
import jax.numpy as jnp
from jax.experimental import pallas as pl
from jax.experimental.pallas import tpu as pltpu


# ----------------------------------------------------------------------------
# Fused conv kernel:  out = max_q  relu?( W @ cols[q] + b )
#   W    : (Cout, K)     K = 9*Cin     (resident across grid steps)
#   b    : (Cout, 1)
#   cols : (nq, K, TM)   nq = 4 (2x2 max-pool fused) or 1 (no pooling)
#   out  : (Cout, TM)    TM lanes -> lane-dense stores
# ----------------------------------------------------------------------------
def _conv_fused_kernel(nq, relu, w_ref, b_ref, x_ref, o_ref):
    w = w_ref[...]
    b = b_ref[...]
    out = None
    for q in range(nq):                       # static unroll, nq in {1, 4}
        y = jnp.dot(w, x_ref[q], preferred_element_type=jnp.float32) + b
        if relu:
            y = jnp.maximum(y, 0.0)
        out = y if out is None else jnp.maximum(out, y)
    o_ref[...] = out.astype(o_ref.dtype)


def conv_block(cols, w, b, *, relu):
    """cols: (nq, K, M), w: (Cout, K), b: (Cout, 1)  ->  (Cout, M) float32."""
    nq, K, M = cols.shape
    Cout = w.shape[0]

    # Pad Cout to a sublane multiple (only matters for the final Cout=1 conv).
    Cp = ((Cout + 7) // 8) * 8
    if Cp != Cout:
        w = jnp.pad(w, ((0, Cp - Cout), (0, 0)))
        b = jnp.pad(b, ((0, Cp - Cout), (0, 0)))

    # Lane-dense tiling of the pixel axis.
    tile_m = 128 if M <= 128 else 256
    Mp = pl.cdiv(M, tile_m) * tile_m
    if Mp != M:
        cols = jnp.pad(cols, ((0, 0), (0, 0), (0, Mp - M)))

    out = pl.pallas_call(
        functools.partial(_conv_fused_kernel, nq, relu),
        out_shape=jax.ShapeDtypeStruct((Cp, Mp), jnp.float32),
        grid=(Mp // tile_m,),
        in_specs=[
            pl.BlockSpec((Cp, K), lambda i: (0, 0)),          # weights (resident)
            pl.BlockSpec((Cp, 1), lambda i: (0, 0)),          # bias    (resident)
            pl.BlockSpec((nq, K, tile_m), lambda i: (0, 0, i)),
        ],
        out_specs=pl.BlockSpec((Cp, tile_m), lambda i: (0, i)),
        compiler_params=pltpu.CompilerParams(
            dimension_semantics=("parallel",),
            vmem_limit_bytes=32 * 1024 * 1024),
    )(w, b, cols)
    return out[:Cout, :M]


# ----------------------------------------------------------------------------
# XLA glue: im2col (K-on-sublanes / M-on-lanes layout), bilinear upsampling
# ----------------------------------------------------------------------------
def _im2col(a, pool):
    """a: (Cin, N, H, W) -> (4 or 1, 9*Cin, M) patch matrix.

    K-row order is (tap, cin) with tap = dh*3 + dw (matches prep_params).
    With pool=True the leading axis enumerates the 4 positions of each 2x2
    max-pool window and M indexes pooled output pixels (n, hp, wp).
    """
    C, N, H, W = a.shape
    ap = jnp.pad(a, ((0, 0), (0, 0), (1, 1), (1, 1)))
    pats = jnp.stack(
        [ap[:, :, dh:dh + H, dw:dw + W] for dh in range(3) for dw in range(3)],
        axis=0)                                         # (9, C, N, H, W)
    if pool:
        Hp, Wp = H // 2, W // 2
        pats = pats.reshape(9, C, N, Hp, 2, Wp, 2)
        pats = pats.transpose(4, 6, 0, 1, 2, 3, 5)      # (2, 2, 9, C, N, Hp, Wp)
        return pats.reshape(4, 9 * C, N * Hp * Wp)
    return pats.reshape(1, 9 * C, N * H * W)


def _bilinear_matrix(n_in, n_out):
    """Interpolation matrix of UpsamplingBilinear2d (align_corners=True)."""
    if n_in == 1:
        return jnp.ones((n_out, 1), jnp.float32)
    src = jnp.arange(n_out, dtype=jnp.float32) * (n_in - 1) / (n_out - 1)
    lo = jnp.clip(jnp.floor(src).astype(jnp.int32), 0, n_in - 2)
    frac = src - lo.astype(jnp.float32)
    m = jnp.zeros((n_out, n_in), jnp.float32)
    idx = jnp.arange(n_out)
    m = m.at[idx, lo].add(1.0 - frac)
    m = m.at[idx, lo + 1].add(frac)
    return m


def _upsample2(a):
    """Bilinear x2 (align_corners=True) on (C, N, h, w)."""
    _, _, h, w = a.shape
    Uh = _bilinear_matrix(h, 2 * h)
    Uw = _bilinear_matrix(w, 2 * w)
    return jnp.einsum("cnhw,Hh,Ww->cnHW", a, Uh, Uw,
                      precision=jax.lax.Precision.HIGHEST)


# ----------------------------------------------------------------------------
# Parameters
# ----------------------------------------------------------------------------
def init_params(key, feature_size):
    """Deterministic synthetic parameters (PyTorch default-init-like ranges)."""
    # TODO(synk): the module's init_once pickle save/load is file I/O and is not
    # translated; parameters are synthesized deterministically instead.
    F = feature_size
    ks = jax.random.split(key, 12)

    def u(k, shape, fan_in):
        bound = float(fan_in) ** -0.5
        return jax.random.uniform(k, shape, jnp.float32, -bound, bound)

    return {
        "w1": u(ks[0], (64, 1, 3, 3), 9),        "b1": u(ks[1], (64,), 9),
        "w2": u(ks[2], (64, 64, 3, 3), 576),     "b2": u(ks[3], (64,), 576),
        "w3": u(ks[4], (F, 64, 3, 3), 576),      "b3": u(ks[5], (F,), 576),
        "dw1": u(ks[6], (64, F, 3, 3), 9 * F),   "db1": u(ks[7], (64,), 9 * F),
        "dw2": u(ks[8], (64, 64, 3, 3), 576),    "db2": u(ks[9], (64,), 576),
        "dw3": u(ks[10], (1, 64, 3, 3), 576),    "db3": u(ks[11], (1,), 576),
    }


def prep_params(p):
    """One-time weight prep: OIHW -> (Cout, 9*Cin), K order (dh, dw, cin)."""
    def wmat(w):
        cout, cin = w.shape[0], w.shape[1]
        return jnp.transpose(w, (0, 2, 3, 1)).reshape(cout, 9 * cin)

    pp = {}
    for n in ("w1", "w2", "w3", "dw1", "dw2", "dw3"):
        pp[n] = wmat(p[n])
    for n in ("b1", "b2", "b3", "db1", "db2", "db3"):
        pp[n] = p[n].reshape(-1, 1)
    return pp


# ----------------------------------------------------------------------------
# Forward pass (returns (feature, reconstruction) like the PyTorch module)
# ----------------------------------------------------------------------------
def network_forward(x, pp, *, feature_size):
    """x: (N, 1, 28, 28) NCHW -> (f: (N, F), r: (N, 1, 28, 28))."""
    N = x.shape[0]
    F = feature_size

    # -------- encoder --------
    a = jnp.transpose(x, (1, 0, 2, 3))                                   # (1, N, 28, 28)
    a = conv_block(_im2col(a, True), pp["w1"], pp["b1"], relu=True)      # (64, N*196)
    a = a.reshape(64, N, 14, 14)
    a = conv_block(_im2col(a, True), pp["w2"], pp["b2"], relu=True)      # (64, N*49)
    a = a.reshape(64, N, 7, 7)
    a = conv_block(_im2col(a, False), pp["w3"], pp["b3"], relu=False)    # (F, N*49)
    f = jnp.mean(a.reshape(F, N, 49), axis=-1).T                         # (N, F)

    # -------- decoder --------
    d = jnp.broadcast_to(f.T[:, :, None, None], (F, N, 7, 7))            # 1x1 -> 7x7
    d = conv_block(_im2col(d, False), pp["dw1"], pp["db1"], relu=True)   # (64, N*49)
    d = _upsample2(d.reshape(64, N, 7, 7))                               # (64, N, 14, 14)
    d = conv_block(_im2col(d, False), pp["dw2"], pp["db2"], relu=True)   # (64, N*196)
    d = _upsample2(d.reshape(64, N, 14, 14))                             # (64, N, 28, 28)
    r = conv_block(_im2col(d, False), pp["dw3"], pp["db3"], relu=False)  # (1, N*784)
    r = jnp.transpose(r.reshape(1, N, 28, 28), (1, 0, 2, 3))             # (N, 1, 28, 28)
    return f, r


# ----------------------------------------------------------------------------
# Pure-JAX reference (sanity check)
# ----------------------------------------------------------------------------
def reference_forward(x, p, feature_size):
    HI = jax.lax.Precision.HIGHEST

    def conv(x, w, b):
        y = jax.lax.conv_general_dilated(
            x, w, (1, 1), [(1, 1), (1, 1)],
            dimension_numbers=("NCHW", "OIHW", "NCHW"), precision=HI)
        return y + b.reshape(1, -1, 1, 1)

    def pool(x):
        return jax.lax.reduce_window(x, -jnp.inf, jax.lax.max,
                                     (1, 1, 2, 2), (1, 1, 2, 2), "VALID")

    def up2(x):
        _, _, h, w = x.shape
        Uh = _bilinear_matrix(h, 2 * h)
        Uw = _bilinear_matrix(w, 2 * w)
        return jnp.einsum("nchw,Hh,Ww->ncHW", x, Uh, Uw, precision=HI)

    y = pool(jax.nn.relu(conv(x, p["w1"], p["b1"])))
    y = pool(jax.nn.relu(conv(y, p["w2"], p["b2"])))
    y = conv(y, p["w3"], p["b3"])
    f = jnp.mean(y, axis=(2, 3))                                         # (N, F)

    d = jnp.broadcast_to(f[:, :, None, None], (f.shape[0], feature_size, 7, 7))
    d = jax.nn.relu(conv(d, p["dw1"], p["db1"]))
    d = up2(d)
    d = jax.nn.relu(conv(d, p["dw2"], p["db2"]))
    d = up2(d)
    r = conv(d, p["dw3"], p["db3"])
    return f, r


if __name__ == "__main__":
    feature_size = 32
    key = jax.random.PRNGKey(0)
    kx, kp = jax.random.split(key)

    # Architecture (two 2x pools in the encoder; 7x -> 2x -> 2x upsampling in the
    # decoder) implies a 28x28 single-channel input.
    x = jax.random.normal(kx, (2, 1, 28, 28), dtype=jnp.float32)
    params = init_params(kp, feature_size)
    pp = prep_params(params)

    fwd = jax.jit(functools.partial(network_forward, feature_size=feature_size))
    f, r = fwd(x, pp)
    jax.block_until_ready((f, r))
    assert f.shape == (2, feature_size), f.shape
    assert r.shape == (2, 1, 28, 28), r.shape

    f_ref, r_ref = reference_forward(x, params, feature_size)
    jax.block_until_ready((f_ref, r_ref))

    def check(a, b, name):
        err = float(jnp.max(jnp.abs(a - b)))
        scale = float(jnp.max(jnp.abs(b)))
        assert err <= 5e-2 * scale + 5e-4, (name, err, scale)

    check(f, f_ref, "feature")
    check(r, r_ref, "reconstruction")
    print("KERNEL_OK")
</pallas_src>

<mosaic_0001>
module attributes {stable_mosaic.version = 11 : i64} {
  func.func @_conv_fused_kernel(%arg0: i32, %arg1: memref<64x9xf32, #tpu.memory_space<vmem>>, %arg2: memref<64x1xf32, #tpu.memory_space<vmem>>, %arg3: memref<4x9x256xf32, #tpu.memory_space<vmem>>, %arg4: memref<64x256xf32, #tpu.memory_space<vmem>>) attributes {dimension_semantics = [#tpu.dimension_semantics<parallel>], iteration_bounds = array<i64: 2>, scalar_prefetch = 0 : i64, scratch_operands = 0 : i64, tpu.core_type = #tpu.core_type<tc>, window_params = [{pipeline_mode = #tpu.pipeline_mode<synchronous>, transform_indices = @transform_0, window_bounds = array<i64: 64, 9>}, {pipeline_mode = #tpu.pipeline_mode<synchronous>, transform_indices = @transform_1, window_bounds = array<i64: 64, 1>}, {transform_indices = @transform_2, window_bounds = array<i64: 4, 9, 256>}, {transform_indices = @transform_3, window_bounds = array<i64: 64, 256>}]} {
    %c0 = arith.constant 0 : index
    %c0_0 = arith.constant 0 : index
    %0 = vector.load %arg1[%c0, %c0_0] : memref<64x9xf32, #tpu.memory_space<vmem>>, vector<64x9xf32>
    %c0_1 = arith.constant 0 : index
    %c0_2 = arith.constant 0 : index
    %1 = vector.load %arg2[%c0_1, %c0_2] : memref<64x1xf32, #tpu.memory_space<vmem>>, vector<64x1xf32>
    %c0_3 = arith.constant 0 : index
    %c0_4 = arith.constant 0 : index
    %c0_5 = arith.constant 0 : index
    %2 = vector.load %arg3[%c0_3, %c0_4, %c0_5] : memref<4x9x256xf32, #tpu.memory_space<vmem>>, vector<1x9x256xf32>
    %3 = vector.shape_cast %2 : vector<1x9x256xf32> to vector<9x256xf32>
    %cst = arith.constant dense<0.000000e+00> : vector<64x256xf32>
    %4 = tpu.matmul %0, %3, %cst {dimension_numbers = #tpu.dot_dimension_numbers<[1], [0], [0], [1], [0, 0, 1, 1], [], []>} : vector<64x9xf32>, vector<9x256xf32>, vector<64x256xf32> -> vector<64x256xf32>
    %5 = vector.broadcast %1 : vector<64x1xf32> to vector<64x256xf32>
    %6 = arith.addf %4, %5 : vector<64x256xf32>
    %cst_6 = arith.constant 0.000000e+00 : f32
    %7 = vector.broadcast %cst_6 : f32 to vector<64x256xf32>
    %8 = arith.maximumf %6, %7 : vector<64x256xf32>
    %c1 = arith.constant 1 : index
    %c0_7 = arith.constant 0 : index
    %c0_8 = arith.constant 0 : index
    %9 = vector.load %arg3[%c1, %c0_7, %c0_8] : memref<4x9x256xf32, #tpu.memory_space<vmem>>, vector<1x9x256xf32>
    %10 = vector.shape_cast %9 : vector<1x9x256xf32> to vector<9x256xf32>
    %cst_9 = arith.constant dense<0.000000e+00> : vector<64x256xf32>
    %11 = tpu.matmul %0, %10, %cst_9 {dimension_numbers = #tpu.dot_dimension_numbers<[1], [0], [0], [1], [0, 0, 1, 1], [], []>} : vector<64x9xf32>, vector<9x256xf32>, vector<64x256xf32> -> vector<64x256xf32>
    %12 = vector.broadcast %1 : vector<64x1xf32> to vector<64x256xf32>
    %13 = arith.addf %11, %12 : vector<64x256xf32>
    %cst_10 = arith.constant 0.000000e+00 : f32
    %14 = vector.broadcast %cst_10 : f32 to vector<64x256xf32>
    %15 = arith.maximumf %13, %14 : vector<64x256xf32>
    %16 = arith.maximumf %8, %15 : vector<64x256xf32>
    %c2 = arith.constant 2 : index
    %c0_11 = arith.constant 0 : index
    %c0_12 = arith.constant 0 : index
    %17 = vector.load %arg3[%c2, %c0_11, %c0_12] : memref<4x9x256xf32, #tpu.memory_space<vmem>>, vector<1x9x256xf32>
    %18 = vector.shape_cast %17 : vector<1x9x256xf32> to vector<9x256xf32>
    %cst_13 = arith.constant dense<0.000000e+00> : vector<64x256xf32>
    %19 = tpu.matmul %0, %18, %cst_13 {dimension_numbers = #tpu.dot_dimension_numbers<[1], [0], [0], [1], [0, 0, 1, 1], [], []>} : vector<64x9xf32>, vector<9x256xf32>, vector<64x256xf32> -> vector<64x256xf32>
    %20 = vector.broadcast %1 : vector<64x1xf32> to vector<64x256xf32>
    %21 = arith.addf %19, %20 : vector<64x256xf32>
    %cst_14 = arith.constant 0.000000e+00 : f32
    %22 = vector.broadcast %cst_14 : f32 to vector<64x256xf32>
    %23 = arith.maximumf %21, %22 : vector<64x256xf32>
    %24 = arith.maximumf %16, %23 : vector<64x256xf32>
    %c3 = arith.constant 3 : index
    %c0_15 = arith.constant 0 : index
    %c0_16 = arith.constant 0 : index
    %25 = vector.load %arg3[%c3, %c0_15, %c0_16] : memref<4x9x256xf32, #tpu.memory_space<vmem>>, vector<1x9x256xf32>
    %26 = vector.shape_cast %25 : vector<1x9x256xf32> to vector<9x256xf32>
    %cst_17 = arith.constant dense<0.000000e+00> : vector<64x256xf32>
    %27 = tpu.matmul %0, %26, %cst_17 {dimension_numbers = #tpu.dot_dimension_numbers<[1], [0], [0], [1], [0, 0, 1, 1], [], []>} : vector<64x9xf32>, vector<9x256xf32>, vector<64x256xf32> -> vector<64x256xf32>
    %28 = vector.broadcast %1 : vector<64x1xf32> to vector<64x256xf32>
    %29 = arith.addf %27, %28 : vector<64x256xf32>
    %cst_18 = arith.constant 0.000000e+00 : f32
    %30 = vector.broadcast %cst_18 : f32 to vector<64x256xf32>
    %31 = arith.maximumf %29, %30 : vector<64x256xf32>
    %32 = arith.maximumf %24, %31 : vector<64x256xf32>
    %c0_19 = arith.constant 0 : index
    %c0_20 = arith.constant 0 : index
    %33 = vector.load %arg4[%c0_19, %c0_20] : memref<64x256xf32, #tpu.memory_space<vmem>>, vector<64x256xf32>
    tpu.vector_store %arg4[%c0_19, %c0_20], %32 {strides = array<i32>} : memref<64x256xf32, #tpu.memory_space<vmem>>, vector<64x256xf32>,
    return
  }
  func.func @transform_0(%arg0: i32) -> (i32, i32) {
    %c0_i32 = arith.constant 0 : i32
    %c0_i32_0 = arith.constant 0 : i32
    %c0_i32_1 = arith.constant 0 : i32
    return %c0_i32, %c0_i32_0 : i32, i32
  }
  func.func @transform_1(%arg0: i32) -> (i32, i32) {
    %c0_i32 = arith.constant 0 : i32
    %c0_i32_0 = arith.constant 0 : i32
    %c0_i32_1 = arith.constant 0 : i32
    return %c0_i32, %c0_i32_0 : i32, i32
  }
  func.func @transform_2(%arg0: i32) -> (i32, i32, i32) {
    %c0_i32 = arith.constant 0 : i32
    %c0_i32_0 = arith.constant 0 : i32
    %c0_i32_1 = arith.constant 0 : i32
    return %c0_i32, %c0_i32_0, %arg0 : i32, i32, i32
  }
  func.func @transform_3(%arg0: i32) -> (i32, i32) {
    %c0_i32 = arith.constant 0 : i32
    %c0_i32_0 = arith.constant 0 : i32
    return %c0_i32, %arg0 : i32, i32
  }
}

module attributes {stable_mosaic.version = 11 : i64} {
  func.func @_conv_fused_kernel(%arg0: i32, %arg1: memref<64x576xf32, #tpu.memory_space<vmem>>, %arg2: memref<64x1xf32, #tpu.memory_space<vmem>>, %arg3: memref<4x576x128xf32, #tpu.memory_space<vmem>>, %arg4: memref<64x128xf32, #tpu.memory_space<vmem>>) attributes {dimension_semantics = [#tpu.dimension_semantics<parallel>], iteration_bounds = array<i64: 1>, scalar_prefetch = 0 : i64, scratch_operands = 0 : i64, tpu.core_type = #tpu.core_type<tc>, window_params = [{pipeline_mode = #tpu.pipeline_mode<synchronous>, transform_indices = @transform_0, window_bounds = array<i64: 64, 576>}, {pipeline_mode = #tpu.pipeline_mode<synchronous>, transform_indices = @transform_1, window_bounds = array<i64: 64, 1>}, {transform_indices = @transform_2, window_bounds = array<i64: 4, 576, 128>}, {transform_indices = @transform_3, window_bounds = array<i64: 64, 128>}]} {
    %c0 = arith.constant 0 : index
    %c0_0 = arith.constant 0 : index
    %0 = vector.load %arg1[%c0, %c0_0] : memref<64x576xf32, #tpu.memory_space<vmem>>, vector<64x576xf32>
    %c0_1 = arith.constant 0 : index
    %c0_2 = arith.constant 0 : index
    %1 = vector.load %arg2[%c0_1, %c0_2] : memref<64x1xf32, #tpu.memory_space<vmem>>, vector<64x1xf32>
    %c0_3 = arith.constant 0 : index
    %c0_4 = arith.constant 0 : index
    %c0_5 = arith.constant 0 : index
    %2 = vector.load %arg3[%c0_3, %c0_4, %c0_5] : memref<4x576x128xf32, #tpu.memory_space<vmem>>, vector<1x576x128xf32>
    %3 = vector.shape_cast %2 : vector<1x576x128xf32> to vector<576x128xf32>
    %cst = arith.constant dense<0.000000e+00> : vector<64x128xf32>
    %4 = tpu.matmul %0, %3, %cst {dimension_numbers = #tpu.dot_dimension_numbers<[1], [0], [0], [1], [0, 0, 1, 1], [], []>} : vector<64x576xf32>, vector<576x128xf32>, vector<64x128xf32> -> vector<64x128xf32>
    %5 = vector.broadcast %1 : vector<64x1xf32> to vector<64x128xf32>
    %6 = arith.addf %4, %5 : vector<64x128xf32>
    %cst_6 = arith.constant 0.000000e+00 : f32
    %7 = vector.broadcast %cst_6 : f32 to vector<64x128xf32>
    %8 = arith.maximumf %6, %7 : vector<64x128xf32>
    %c1 = arith.constant 1 : index
    %c0_7 = arith.constant 0 : index
    %c0_8 = arith.constant 0 : index
    %9 = vector.load %arg3[%c1, %c0_7, %c0_8] : memref<4x576x128xf32, #tpu.memory_space<vmem>>, vector<1x576x128xf32>
    %10 = vector.shape_cast %9 : vector<1x576x128xf32> to vector<576x128xf32>
    %cst_9 = arith.constant dense<0.000000e+00> : vector<64x128xf32>
    %11 = tpu.matmul %0, %10, %cst_9 {dimension_numbers = #tpu.dot_dimension_numbers<[1], [0], [0], [1], [0, 0, 1, 1], [], []>} : vector<64x576xf32>, vector<576x128xf32>, vector<64x128xf32> -> vector<64x128xf32>
    %12 = vector.broadcast %1 : vector<64x1xf32> to vector<64x128xf32>
    %13 = arith.addf %11, %12 : vector<64x128xf32>
    %cst_10 = arith.constant 0.000000e+00 : f32
    %14 = vector.broadcast %cst_10 : f32 to vector<64x128xf32>
    %15 = arith.maximumf %13, %14 : vector<64x128xf32>
    %16 = arith.maximumf %8, %15 : vector<64x128xf32>
    %c2 = arith.constant 2 : index
    %c0_11 = arith.constant 0 : index
    %c0_12 = arith.constant 0 : index
    %17 = vector.load %arg3[%c2, %c0_11, %c0_12] : memref<4x576x128xf32, #tpu.memory_space<vmem>>, vector<1x576x128xf32>
    %18 = vector.shape_cast %17 : vector<1x576x128xf32> to vector<576x128xf32>
    %cst_13 = arith.constant dense<0.000000e+00> : vector<64x128xf32>
    %19 = tpu.matmul %0, %18, %cst_13 {dimension_numbers = #tpu.dot_dimension_numbers<[1], [0], [0], [1], [0, 0, 1, 1], [], []>} : vector<64x576xf32>, vector<576x128xf32>, vector<64x128xf32> -> vector<64x128xf32>
    %20 = vector.broadcast %1 : vector<64x1xf32> to vector<64x128xf32>
    %21 = arith.addf %19, %20 : vector<64x128xf32>
    %cst_14 = arith.constant 0.000000e+00 : f32
    %22 = vector.broadcast %cst_14 : f32 to vector<64x128xf32>
    %23 = arith.maximumf %21, %22 : vector<64x128xf32>
    %24 = arith.maximumf %16, %23 : vector<64x128xf32>
    %c3 = arith.constant 3 : index
    %c0_15 = arith.constant 0 : index
    %c0_16 = arith.constant 0 : index
    %25 = vector.load %arg3[%c3, %c0_15, %c0_16] : memref<4x576x128xf32, #tpu.memory_space<vmem>>, vector<1x576x128xf32>
    %26 = vector.shape_cast %25 : vector<1x576x128xf32> to vector<576x128xf32>
    %cst_17 = arith.constant dense<0.000000e+00> : vector<64x128xf32>
    %27 = tpu.matmul %0, %26, %cst_17 {dimension_numbers = #tpu.dot_dimension_numbers<[1], [0], [0], [1], [0, 0, 1, 1], [], []>} : vector<64x576xf32>, vector<576x128xf32>, vector<64x128xf32> -> vector<64x128xf32>
    %28 = vector.broadcast %1 : vector<64x1xf32> to vector<64x128xf32>
    %29 = arith.addf %27, %28 : vector<64x128xf32>
    %cst_18 = arith.constant 0.000000e+00 : f32
    %30 = vector.broadcast %cst_18 : f32 to vector<64x128xf32>
    %31 = arith.maximumf %29, %30 : vector<64x128xf32>
    %32 = arith.maximumf %24, %31 : vector<64x128xf32>
    %c0_19 = arith.constant 0 : index
    %c0_20 = arith.constant 0 : index
    %33 = vector.load %arg4[%c0_19, %c0_20] : memref<64x128xf32, #tpu.memory_space<vmem>>, vector<64x128xf32>
    tpu.vector_store %arg4[%c0_19, %c0_20], %32 {strides = array<i32>} : memref<64x128xf32, #tpu.memory_space<vmem>>, vector<64x128xf32>,
    return
  }
  func.func @transform_0(%arg0: i32) -> (i32, i32) {
    %c0_i32 = arith.constant 0 : i32
    %c0_i32_0 = arith.constant 0 : i32
    %c0_i32_1 = arith.constant 0 : i32
    return %c0_i32, %c0_i32_0 : i32, i32
  }
  func.func @transform_1(%arg0: i32) -> (i32, i32) {
    %c0_i32 = arith.constant 0 : i32
    %c0_i32_0 = arith.constant 0 : i32
    %c0_i32_1 = arith.constant 0 : i32
    return %c0_i32, %c0_i32_0 : i32, i32
  }
  func.func @transform_2(%arg0: i32) -> (i32, i32, i32) {
    %c0_i32 = arith.constant 0 : i32
    %c0_i32_0 = arith.constant 0 : i32
    %c0_i32_1 = arith.constant 0 : i32
    return %c0_i32, %c0_i32_0, %arg0 : i32, i32, i32
  }
  func.func @transform_3(%arg0: i32) -> (i32, i32) {
    %c0_i32 = arith.constant 0 : i32
    %c0_i32_0 = arith.constant 0 : i32
    return %c0_i32, %arg0 : i32, i32
  }
}

module attributes {stable_mosaic.version = 11 : i64} {
  func.func @_conv_fused_kernel(%arg0: i32, %arg1: memref<32x576xf32, #tpu.memory_space<vmem>>, %arg2: memref<32x1xf32, #tpu.memory_space<vmem>>, %arg3: memref<1x576x128xf32, #tpu.memory_space<vmem>>, %arg4: memref<32x128xf32, #tpu.memory_space<vmem>>) attributes {dimension_semantics = [#tpu.dimension_semantics<parallel>], iteration_bounds = array<i64: 1>, scalar_prefetch = 0 : i64, scratch_operands = 0 : i64, tpu.core_type = #tpu.core_type<tc>, window_params = [{pipeline_mode = #tpu.pipeline_mode<synchronous>, transform_indices = @transform_0, window_bounds = array<i64: 32, 576>}, {pipeline_mode = #tpu.pipeline_mode<synchronous>, transform_indices = @transform_1, window_bounds = array<i64: 32, 1>}, {transform_indices = @transform_2, window_bounds = array<i64: 1, 576, 128>}, {transform_indices = @transform_3, window_bounds = array<i64: 32, 128>}]} {
    %c0 = arith.constant 0 : index
    %c0_0 = arith.constant 0 : index
    %0 = vector.load %arg1[%c0, %c0_0] : memref<32x576xf32, #tpu.memory_space<vmem>>, vector<32x576xf32>
    %c0_1 = arith.constant 0 : index
    %c0_2 = arith.constant 0 : index
    %1 = vector.load %arg2[%c0_1, %c0_2] : memref<32x1xf32, #tpu.memory_space<vmem>>, vector<32x1xf32>
    %c0_3 = arith.constant 0 : index
    %c0_4 = arith.constant 0 : index
    %c0_5 = arith.constant 0 : index
    %2 = vector.load %arg3[%c0_3, %c0_4, %c0_5] : memref<1x576x128xf32, #tpu.memory_space<vmem>>, vector<1x576x128xf32>
    %3 = vector.shape_cast %2 : vector<1x576x128xf32> to vector<576x128xf32>
    %cst = arith.constant dense<0.000000e+00> : vector<32x128xf32>
    %4 = tpu.matmul %0, %3, %cst {dimension_numbers = #tpu.dot_dimension_numbers<[1], [0], [0], [1], [0, 0, 1, 1], [], []>} : vector<32x576xf32>, vector<576x128xf32>, vector<32x128xf32> -> vector<32x128xf32>
    %5 = vector.broadcast %1 : vector<32x1xf32> to vector<32x128xf32>
    %6 = arith.addf %4, %5 : vector<32x128xf32>
    %c0_6 = arith.constant 0 : index
    %c0_7 = arith.constant 0 : index
    %7 = vector.load %arg4[%c0_6, %c0_7] : memref<32x128xf32, #tpu.memory_space<vmem>>, vector<32x128xf32>
    tpu.vector_store %arg4[%c0_6, %c0_7], %6 {strides = array<i32>} : memref<32x128xf32, #tpu.memory_space<vmem>>, vector<32x128xf32>,
    return
  }
  func.func @transform_0(%arg0: i32) -> (i32, i32) {
    %c0_i32 = arith.constant 0 : i32
    %c0_i32_0 = arith.constant 0 : i32
    %c0_i32_1 = arith.constant 0 : i32
    return %c0_i32, %c0_i32_0 : i32, i32
  }
  func.func @transform_1(%arg0: i32) -> (i32, i32) {
    %c0_i32 = arith.constant 0 : i32
    %c0_i32_0 = arith.constant 0 : i32
    %c0_i32_1 = arith.constant 0 : i32
    return %c0_i32, %c0_i32_0 : i32, i32
  }
  func.func @transform_2(%arg0: i32) -> (i32, i32, i32) {
    %c0_i32 = arith.constant 0 : i32
    %c0_i32_0 = arith.constant 0 : i32
    %c0_i32_1 = arith.constant 0 : i32
    return %c0_i32, %c0_i32_0, %arg0 : i32, i32, i32
  }
  func.func @transform_3(%arg0: i32) -> (i32, i32) {
    %c0_i32 = arith.constant 0 : i32
    %c0_i32_0 = arith.constant 0 : i32
    return %c0_i32, %arg0 : i32, i32
  }
}

module attributes {stable_mosaic.version = 11 : i64} {
  func.func @_conv_fused_kernel(%arg0: i32, %arg1: memref<64x288xf32, #tpu.memory_space<vmem>>, %arg2: memref<64x1xf32, #tpu.memory_space<vmem>>, %arg3: memref<1x288x128xf32, #tpu.memory_space<vmem>>, %arg4: memref<64x128xf32, #tpu.memory_space<vmem>>) attributes {dimension_semantics = [#tpu.dimension_semantics<parallel>], iteration_bounds = array<i64: 1>, scalar_prefetch = 0 : i64, scratch_operands = 0 : i64, tpu.core_type = #tpu.core_type<tc>, window_params = [{pipeline_mode = #tpu.pipeline_mode<synchronous>, transform_indices = @transform_0, window_bounds = array<i64: 64, 288>}, {pipeline_mode = #tpu.pipeline_mode<synchronous>, transform_indices = @transform_1, window_bounds = array<i64: 64, 1>}, {transform_indices = @transform_2, window_bounds = array<i64: 1, 288, 128>}, {transform_indices = @transform_3, window_bounds = array<i64: 64, 128>}]} {
    %c0 = arith.constant 0 : index
    %c0_0 = arith.constant 0 : index
    %0 = vector.load %arg1[%c0, %c0_0] : memref<64x288xf32, #tpu.memory_space<vmem>>, vector<64x288xf32>
    %c0_1 = arith.constant 0 : index
    %c0_2 = arith.constant 0 : index
    %1 = vector.load %arg2[%c0_1, %c0_2] : memref<64x1xf32, #tpu.memory_space<vmem>>, vector<64x1xf32>
    %c0_3 = arith.constant 0 : index
    %c0_4 = arith.constant 0 : index
    %c0_5 = arith.constant 0 : index
    %2 = vector.load %arg3[%c0_3, %c0_4, %c0_5] : memref<1x288x128xf32, #tpu.memory_space<vmem>>, vector<1x288x128xf32>
    %3 = vector.shape_cast %2 : vector<1x288x128xf32> to vector<288x128xf32>
    %cst = arith.constant dense<0.000000e+00> : vector<64x128xf32>
    %4 = tpu.matmul %0, %3, %cst {dimension_numbers = #tpu.dot_dimension_numbers<[1], [0], [0], [1], [0, 0, 1, 1], [], []>} : vector<64x288xf32>, vector<288x128xf32>, vector<64x128xf32> -> vector<64x128xf32>
    %5 = vector.broadcast %1 : vector<64x1xf32> to vector<64x128xf32>
    %6 = arith.addf %4, %5 : vector<64x128xf32>
    %cst_6 = arith.constant 0.000000e+00 : f32
    %7 = vector.broadcast %cst_6 : f32 to vector<64x128xf32>
    %8 = arith.maximumf %6, %7 : vector<64x128xf32>
    %c0_7 = arith.constant 0 : index
    %c0_8 = arith.constant 0 : index
    %9 = vector.load %arg4[%c0_7, %c0_8] : memref<64x128xf32, #tpu.memory_space<vmem>>, vector<64x128xf32>
    tpu.vector_store %arg4[%c0_7, %c0_8], %8 {strides = array<i32>} : memref<64x128xf32, #tpu.memory_space<vmem>>, vector<64x128xf32>,
    return
  }
  func.func @transform_0(%arg0: i32) -> (i32, i32) {
    %c0_i32 = arith.constant 0 : i32
    %c0_i32_0 = arith.constant 0 : i32
    %c0_i32_1 = arith.constant 0 : i32
    return %c0_i32, %c0_i32_0 : i32, i32
  }
  func.func @transform_1(%arg0: i32) -> (i32, i32) {
    %c0_i32 = arith.constant 0 : i32
    %c0_i32_0 = arith.constant 0 : i32
    %c0_i32_1 = arith.constant 0 : i32
    return %c0_i32, %c0_i32_0 : i32, i32
  }
  func.func @transform_2(%arg0: i32) -> (i32, i32, i32) {
    %c0_i32 = arith.constant 0 : i32
    %c0_i32_0 = arith.constant 0 : i32
    %c0_i32_1 = arith.constant 0 : i32
    return %c0_i32, %c0_i32_0, %arg0 : i32, i32, i32
  }
  func.func @transform_3(%arg0: i32) -> (i32, i32) {
    %c0_i32 = arith.constant 0 : i32
    %c0_i32_0 = arith.constant 0 : i32
    return %c0_i32, %arg0 : i32, i32
  }
}

module attributes {stable_mosaic.version = 11 : i64} {
  func.func @_conv_fused_kernel(%arg0: i32, %arg1: memref<64x576xf32, #tpu.memory_space<vmem>>, %arg2: memref<64x1xf32, #tpu.memory_space<vmem>>, %arg3: memref<1x576x256xf32, #tpu.memory_space<vmem>>, %arg4: memref<64x256xf32, #tpu.memory_space<vmem>>) attributes {dimension_semantics = [#tpu.dimension_semantics<parallel>], iteration_bounds = array<i64: 2>, scalar_prefetch = 0 : i64, scratch_operands = 0 : i64, tpu.core_type = #tpu.core_type<tc>, window_params = [{pipeline_mode = #tpu.pipeline_mode<synchronous>, transform_indices = @transform_0, window_bounds = array<i64: 64, 576>}, {pipeline_mode = #tpu.pipeline_mode<synchronous>, transform_indices = @transform_1, window_bounds = array<i64: 64, 1>}, {transform_indices = @transform_2, window_bounds = array<i64: 1, 576, 256>}, {transform_indices = @transform_3, window_bounds = array<i64: 64, 256>}]} {
    %c0 = arith.constant 0 : index
    %c0_0 = arith.constant 0 : index
    %0 = vector.load %arg1[%c0, %c0_0] : memref<64x576xf32, #tpu.memory_space<vmem>>, vector<64x576xf32>
    %c0_1 = arith.constant 0 : index
    %c0_2 = arith.constant 0 : index
    %1 = vector.load %arg2[%c0_1, %c0_2] : memref<64x1xf32, #tpu.memory_space<vmem>>, vector<64x1xf32>
    %c0_3 = arith.constant 0 : index
    %c0_4 = arith.constant 0 : index
    %c0_5 = arith.constant 0 : index
    %2 = vector.load %arg3[%c0_3, %c0_4, %c0_5] : memref<1x576x256xf32, #tpu.memory_space<vmem>>, vector<1x576x256xf32>
    %3 = vector.shape_cast %2 : vector<1x576x256xf32> to vector<576x256xf32>
    %cst = arith.constant dense<0.000000e+00> : vector<64x256xf32>
    %4 = tpu.matmul %0, %3, %cst {dimension_numbers = #tpu.dot_dimension_numbers<[1], [0], [0], [1], [0, 0, 1, 1], [], []>} : vector<64x576xf32>, vector<576x256xf32>, vector<64x256xf32> -> vector<64x256xf32>
    %5 = vector.broadcast %1 : vector<64x1xf32> to vector<64x256xf32>
    %6 = arith.addf %4, %5 : vector<64x256xf32>
    %cst_6 = arith.constant 0.000000e+00 : f32
    %7 = vector.broadcast %cst_6 : f32 to vector<64x256xf32>
    %8 = arith.maximumf %6, %7 : vector<64x256xf32>
    %c0_7 = arith.constant 0 : index
    %c0_8 = arith.constant 0 : index
    %9 = vector.load %arg4[%c0_7, %c0_8] : memref<64x256xf32, #tpu.memory_space<vmem>>, vector<64x256xf32>
    tpu.vector_store %arg4[%c0_7, %c0_8], %8 {strides = array<i32>} : memref<64x256xf32, #tpu.memory_space<vmem>>, vector<64x256xf32>,
    return
  }
  func.func @transform_0(%arg0: i32) -> (i32, i32) {
    %c0_i32 = arith.constant 0 : i32
    %c0_i32_0 = arith.constant 0 : i32
    %c0_i32_1 = arith.constant 0 : i32
    return %c0_i32, %c0_i32_0 : i32, i32
  }
  func.func @transform_1(%arg0: i32) -> (i32, i32) {
    %c0_i32 = arith.constant 0 : i32
    %c0_i32_0 = arith.constant 0 : i32
    %c0_i32_1 = arith.constant 0 : i32
    return %c0_i32, %c0_i32_0 : i32, i32
  }
  func.func @transform_2(%arg0: i32) -> (i32, i32, i32) {
    %c0_i32 = arith.constant 0 : i32
    %c0_i32_0 = arith.constant 0 : i32
    %c0_i32_1 = arith.constant 0 : i32
    return %c0_i32, %c0_i32_0, %arg0 : i32, i32, i32
  }
  func.func @transform_3(%arg0: i32) -> (i32, i32) {
    %c0_i32 = arith.constant 0 : i32
    %c0_i32_0 = arith.constant 0 : i32
    return %c0_i32, %arg0 : i32, i32
  }
}

module attributes {stable_mosaic.version = 11 : i64} {
  func.func @_conv_fused_kernel(%arg0: i32, %arg1: memref<8x576xf32, #tpu.memory_space<vmem>>, %arg2: memref<8x1xf32, #tpu.memory_space<vmem>>, %arg3: memref<1x576x256xf32, #tpu.memory_space<vmem>>, %arg4: memref<8x256xf32, #tpu.memory_space<vmem>>) attributes {dimension_semantics = [#tpu.dimension_semantics<parallel>], iteration_bounds = array<i64: 7>, scalar_prefetch = 0 : i64, scratch_operands = 0 : i64, tpu.core_type = #tpu.core_type<tc>, window_params = [{pipeline_mode = #tpu.pipeline_mode<synchronous>, transform_indices = @transform_0, window_bounds = array<i64: 8, 576>}, {pipeline_mode = #tpu.pipeline_mode<synchronous>, transform_indices = @transform_1, window_bounds = array<i64: 8, 1>}, {transform_indices = @transform_2, window_bounds = array<i64: 1, 576, 256>}, {transform_indices = @transform_3, window_bounds = array<i64: 8, 256>}]} {
    %c0 = arith.constant 0 : index
    %c0_0 = arith.constant 0 : index
    %0 = vector.load %arg1[%c0, %c0_0] : memref<8x576xf32, #tpu.memory_space<vmem>>, vector<8x576xf32>
    %c0_1 = arith.constant 0 : index
    %c0_2 = arith.constant 0 : index
    %1 = vector.load %arg2[%c0_1, %c0_2] : memref<8x1xf32, #tpu.memory_space<vmem>>, vector<8x1xf32>
    %c0_3 = arith.constant 0 : index
    %c0_4 = arith.constant 0 : index
    %c0_5 = arith.constant 0 : index
    %2 = vector.load %arg3[%c0_3, %c0_4, %c0_5] : memref<1x576x256xf32, #tpu.memory_space<vmem>>, vector<1x576x256xf32>
    %3 = vector.shape_cast %2 : vector<1x576x256xf32> to vector<576x256xf32>
    %cst = arith.constant dense<0.000000e+00> : vector<8x256xf32>
    %4 = tpu.matmul %0, %3, %cst {dimension_numbers = #tpu.dot_dimension_numbers<[1], [0], [0], [1], [0, 0, 1, 1], [], []>} : vector<8x576xf32>, vector<576x256xf32>, vector<8x256xf32> -> vector<8x256xf32>
    %5 = vector.broadcast %1 : vector<8x1xf32> to vector<8x256xf32>
    %6 = arith.addf %4, %5 : vector<8x256xf32>
    %c0_6 = arith.constant 0 : index
    %c0_7 = arith.constant 0 : index
    %7 = vector.load %arg4[%c0_6, %c0_7] : memref<8x256xf32, #tpu.memory_space<vmem>>, vector<8x256xf32>
    tpu.vector_store %arg4[%c0_6, %c0_7], %6 {strides = array<i32>} : memref<8x256xf32, #tpu.memory_space<vmem>>, vector<8x256xf32>,
    return
  }
  func.func @transform_0(%arg0: i32) -> (i32, i32) {
    %c0_i32 = arith.constant 0 : i32
    %c0_i32_0 = arith.constant 0 : i32
    %c0_i32_1 = arith.constant 0 : i32
    return %c0_i32, %c0_i32_0 : i32, i32
  }
  func.func @transform_1(%arg0: i32) -> (i32, i32) {
    %c0_i32 = arith.constant 0 : i32
    %c0_i32_0 = arith.constant 0 : i32
    %c0_i32_1 = arith.constant 0 : i32
    return %c0_i32, %c0_i32_0 : i32, i32
  }
  func.func @transform_2(%arg0: i32) -> (i32, i32, i32) {
    %c0_i32 = arith.constant 0 : i32
    %c0_i32_0 = arith.constant 0 : i32
    %c0_i32_1 = arith.constant 0 : i32
    return %c0_i32, %c0_i32_0, %arg0 : i32, i32, i32
  }
  func.func @transform_3(%arg0: i32) -> (i32, i32) {
    %c0_i32 = arith.constant 0 : i32
    %c0_i32_0 = arith.constant 0 : i32
    return %c0_i32, %arg0 : i32, i32
  }
}

</mosaic_0001>

<bundles_post_ra>
// kernel: network_forward.6
= control target key start
LH: loop header
LB: loop body
LE: loop exit
PB: predicated region body
PF: predicated region fallthrough
CT: control target
= control target key end

     0   :  { %s1178_s12 = smov 0   ;;  %s1180_s13 = smov 0   ;;  %s1593_s0 = inlined_call_operand.vmem [shape: f32[64,9], index: 0, kind: input, shape index: {}]   ;;  %s1594_s1 = inlined_call_operand.vmem [shape: f32[64,1], index: 1, kind: input, shape index: {}]   ;;  %s1595_s2 = inlined_call_operand.vmem [shape: f32[4,9,512], index: 2, kind: input, shape index: {}]   ;;  %s1596_s3 = inlined_call_operand.vmem [shape: f32[64,512], index: 3, kind: output, shape index: {}]  }
   0x1   :  { %s1182_s14 = smov 0  }
   0x2 LB: > { %s1035_s15 = sadd.s32 4294967295, %s1154_s14   ;;  %s1195_s16 = sadd.s32 1, %s1154_s14   ;;  %s1154_s14 = sphi %s1182_s14, %s1600_s14   ;;  %s1150_s13 = sphi %s1180_s13, %s1599_s13   ;;  %s1146_s12 = sphi %s1178_s12, %s1598_s12  }
   0x3   : > { %s59_s17 = ssub.s32 %s1154_s14, %s1195_s16  ;;  %s62_s18 = sadd.s32 1, %s1150_s13 }
   0x4   : > { %p60_p0 = scmp.eq.s32.totalorder %s59_s17, 0  ;;  %p69_p1 = scmp.ne.s32.totalorder %s1150_s13, %s1146_s12 }
   0x5   : > { %p70_p2 = scmp.eq.s32.totalorder %s1154_s14, 0  ;;  %p99_p3 = scmp.eq.s32.totalorder %s1035_s15, 1 }
   0x6   : > { %s1206_s19 = scalar_select %p60_p0, %s1150_s13, %s62_s18  }
   0x7   : > { %p71_p4 = por %p70_p2, %p69_p1  ;;  %p1208_p5 = por %p99_p3, %p69_p1 }
   0x8   : > { %p1038_p6 = scmp.ge.s32.totalorder %s1154_s14, 2 }
   0xa   : > { %127 = sbr.rel (%p1038_p6) target bundleno = 27 (0x1b), region = 24 }
   0xf   : > { %130 = sbr.rel (!%p71_p4) target bundleno = 27 (0x1b), region = 28  ;;  %s132_s21 = sand.u32 (%p71_p4), 1, %s1150_s13  }
  0x10   : > { %s1102_s22 = sshll.u32 (%p71_p4), %s1154_s14, 4  ;;  %s1039_s23 = sshll.u32 (%p71_p4), %s132_s21, 7 }
  0x11   : > { %s1218_s26 = scalar_lea.vmem (%p71_p4), %s1595_s2, %s1102_s22  ;;  %s134_s27 = scalar_lea.vmem (%p71_p4), [#allocation2], %s1039_s23 }
  0x12   : > { %v150_v0 = vld [vmem:[%s1218_s26] sm:$0xff] (%p71_p4)  ;;  %v152_v1 = vld [vmem:[%s1218_s26 + $0x8] sm:$0xff] (%p71_p4) }
  0x13   : > { %v154_v2 = vld [vmem:[%s1218_s26 + $0x20] sm:$0xff] (%p71_p4)  ;;  %151 = vst [vmem:[%s134_s27] sm:$0xff] (%p71_p4), %v150_v0  ;;  %153 = vst [vmem:[%s134_s27 + $0x8] sm:$0xff] (%p71_p4), %v152_v1  ;;  %v156_v3 = vld [vmem:[%s1218_s26 + $0x28] sm:$0xff] (%p71_p4) }
  0x14   : > { %155 = vst [vmem:[%s134_s27 + $0x10] sm:$0xff] %v154_v2  ;;  %v158_v4 = vld [vmem:[%s1218_s26 + $0x40] sm:$0xff]  ;;  %v160_v5 = vld [vmem:[%s1218_s26 + $0x48] sm:$0xff]  ;;  %157 = vst [vmem:[%s134_s27 + $0x18] sm:$0xff] %v156_v3 }
  0x15   : > { %159 = vst [vmem:[%s134_s27 + $0x20] sm:$0xff] %v158_v4  ;;  %161 = vst [vmem:[%s134_s27 + $0x28] sm:$0xff] %v160_v5  ;;  %v162_v6 = vld [vmem:[%s1218_s26 + $0x60] sm:$0xff]  ;;  %v164_v7 = vld [vmem:[%s1218_s26 + $0x68] sm:$0xff] }
  0x16   : > { %v166_v8 = vld [vmem:[%s1218_s26 + $0x80] sm:$0xff]  ;;  %163 = vst [vmem:[%s134_s27 + $0x30] sm:$0xff] %v162_v6  ;;  %165 = vst [vmem:[%s134_s27 + $0x38] sm:$0xff] %v164_v7  ;;  %v168_v9 = vld [vmem:[%s1218_s26 + $0x88] sm:$0xff] }
  0x17   : > { %167 = vst [vmem:[%s134_s27 + $0x40] sm:$0xff] %v166_v8  ;;  %v170_v10 = vld [vmem:[%s1218_s26 + $0xa0] sm:$0xff]  ;;  %v172_v11 = vld [vmem:[%s1218_s26 + $0xa8] sm:$0xff]  ;;  %169 = vst [vmem:[%s134_s27 + $0x48] sm:$0xff] %v168_v9 }
  0x18   : > { %171 = vst [vmem:[%s134_s27 + $0x50] sm:$0xff] %v170_v10  ;;  %173 = vst [vmem:[%s134_s27 + $0x58] sm:$0xff] %v172_v11  ;;  %v174_v12 = vld [vmem:[%s1218_s26 + $0xc0] sm:$0xff]  ;;  %v176_v13 = vld [vmem:[%s1218_s26 + $0xc8] sm:$0xff] }
  0x19   : > { %v178_v14 = vld [vmem:[%s1218_s26 + $0xe0] sm:$0xff]  ;;  %175 = vst [vmem:[%s134_s27 + $0x60] sm:$0xff] %v174_v12  ;;  %177 = vst [vmem:[%s134_s27 + $0x68] sm:$0xff] %v176_v13  ;;  %v180_v15 = vld [vmem:[%s1218_s26 + $0xe8] sm:$0xff] }
  0x1a   : > { %179 = vst [vmem:[%s134_s27 + $0x70] sm:$0xff] %v178_v14  ;;  %181 = vst [vmem:[%s134_s27 + $0x78] sm:$0xff] %v180_v15 }
  0x1b PF: > { %p1042_p7 = scmp.ge.s32.totalorder %s1154_s14, 1  ;;  %p186_p8 = scmp.lt.s32.totalorder %s1154_s14, 3 }
  0x1d   : > { %p187_p9 = pnand %p1042_p7, %p186_p8 }
  0x1e   : > { %s193_s28 = sand.u32 (!%p187_p9), 1, %s1146_s12  }
  0x1f   : > { %190 = sbr.rel (%p187_p9) target bundleno = 315 (0x13b), region = 51  ;;  %s1239_s29 = sshll.u32 (!%p187_p9), %s193_s28, 7 }
  0x20   : > { %s1244_s30 = scalar_lea.vmem (!%p187_p9), [#allocation2], %s1239_s29  ;;  %s1483_s22 = scalar_lea.vmem (!%p187_p9), [#allocation3], %s1239_s29 }
  0x24   : > { %vm302_vm0 = vcmask 1040384   ;;  %v1156_v16 = vmov 0.0   ;;  %v1157_v17 = vmov 0   ;;  %v236_v18 = vld [vmem:[%s1244_s30 + $0x18] sm:$0x1]  ;;  %v234_v22 = vld [vmem:[%s1244_s30 + $0x8] sm:$0xff] }
  0x25   : > { %373 = vmatprep.mubr.f32.mxu0 %v1156_v16  ;;  %513 = vmatprep.mubr.f32.mxu1 %v1156_v16  ;;  %v1058_v19 = vld [vmem:[%s1244_s30 + $0x38] sm:$0x1]  ;;  %v235_v20 = vld [vmem:[%s1244_s30 + $0x10] sm:$0x1]  ;;  %v1056_v23 = vld [vmem:[%s1244_s30 + $0x28] sm:$0xff]  ;;  %vm277_vm1 = vcmask 72704  }
  0x26   : > { %1130 = vset.pattern.permute.xlu0 %v1157_v17  ;;  %1131 = vset.pattern.permute.xlu1 %v1157_v17  ;;  %v1057_v21 = vld [vmem:[%s1244_s30 + $0x30] sm:$0x1]  ;;  %v233_v24 = vld [vmem:[%s1244_s30] sm:$0xff]  ;;  %v1072_v27 = vld [vmem:[%s1244_s30 + $0x58] sm:$0x1]  ;;  %s1103_s29 = sshll.u32 (%p1208_p5), %s1035_s15, 4 }
  0x27   : > { %1045 = vmatprep.subr.msk.mxu0 %vm302_vm0, %v236_v18  ;;  %1059 = vmatprep.subr.msk.mxu1 %vm302_vm0, %v1058_v19  ;;  %v1055_v25 = vld [vmem:[%s1244_s30 + $0x20] sm:$0xff]  ;;  %v1086_v28 = vld [vmem:[%s1244_s30 + $0x78] sm:$0x1]  ;;  %v1071_v29 = vld [vmem:[%s1244_s30 + $0x50] sm:$0x1]  ;;  %s931_s20 = scalar_lea.vmem (%p1208_p5), %s1596_s3, %s1103_s29 }
  0x28   : > { %1046 = vmatpush1.msk.msra.mxu0 %vm302_vm0, %v235_v20  ;;  %1060 = vmatpush1.msk.msra.mxu1 %vm302_vm0, %v1057_v21  ;;  %v1261_v26 = vld [vmem:[%s1593_s0] sm:$0xff]  ;;  %v1085_v30 = vld [vmem:[%s1244_s30 + $0x70] sm:$0x1]  ;;  %v1276_v31 = vld [vmem:[%s1593_s0 + $0x8] sm:$0xff] }
  0x29   : > { %339 = vmatprep.subr.mxu0 %v234_v22  ;;  %479 = vmatprep.subr.mxu1 %v1056_v23  ;;  %v1070_v32 = vld [vmem:[%s1244_s30 + $0x48] sm:$0xff]  ;;  %v1069_v34 = vld [vmem:[%s1244_s30 + $0x40] sm:$0xff]  ;;  %v219_v36 = vld [vmem:[%s1593_s0 + $0x10] sm:$0xff] }
  0x2a   : > { %340 = vmatpush1.msra.mxu0 %v233_v24  ;;  %480 = vmatpush1.msra.mxu1 %v1055_v25  ;;  %v1084_v33 = vld [vmem:[%s1244_s30 + $0x68] sm:$0xff]  ;;  %v1083_v35 = vld [vmem:[%s1244_s30 + $0x60] sm:$0xff]  ;;  %v227_v38 = vld [vmem:[%s1594_s1 + $0x10] sm:$0xff] }
  0x2b   : > { %1047 = vmatmul.mubr.msk.f32.vlgmr.msra.gmra.mxu0 %vm277_vm1, %v1261_v26  ;;  %1061 = vmatmul.mubr.msk.f32.vlgmr.msra.gmra.mxu1 %vm277_vm1, %v1261_v26  ;;  %v225_v37 = vld [vmem:[%s1594_s1] sm:$0xff]  ;;  %v220_v39 = vld [vmem:[%s1593_s0 + $0x18] sm:$0xff]  ;;  %v226_v40 = vld [vmem:[%s1594_s1 + $0x8] sm:$0xff] }
  0x2c   : > { %1073 = vmatprep.subr.msk.mxu0 %vm302_vm0, %v1072_v27  ;;  %1087 = vmatprep.subr.msk.mxu1 %vm302_vm0, %v1086_v28  ;;  %v228_v41 = vld [vmem:[%s1594_s1 + $0x18] sm:$0xff]  ;;  %v221_v42 = vld [vmem:[%s1593_s0 + $0x20] sm:$0xff]  ;;  %v230_v44 = vld [vmem:[%s1594_s1 + $0x28] sm:$0xff] }
  0x2d   : > { %1074 = vmatpush1.msk.msra.mxu0 %vm302_vm0, %v1071_v29  ;;  %379 = vmatprep.mubr.f32.mxu0 %v1156_v16  ;;  %v229_v43 = vld [vmem:[%s1594_s1 + $0x20] sm:$0xff]  ;;  %v222_v45 = vld [vmem:[%s1593_s0 + $0x28] sm:$0xff]  ;;  %v231_v46 = vld [vmem:[%s1594_s1 + $0x30] sm:$0xff] }
  0x2e   : > { %519 = vmatprep.mubr.f32.mxu1 %v1156_v16  ;;  %1088 = vmatpush1.msk.msra.mxu1 %vm302_vm0, %v1085_v30  ;;  %v232_v47 = vld [vmem:[%s1594_s1 + $0x38] sm:$0xff]  ;;  %v223_v48 = vld [vmem:[%s1593_s0 + $0x30] sm:$0xff] }
  0x2f   : > { %1048 = vmatmul.mubr.msk.f32.gmra.mxu0 %vm277_vm1, %v1276_v31  ;;  %1062 = vmatmul.mubr.msk.f32.gmra.mxu1 %vm277_vm1, %v1276_v31  ;;  %v224_v49 = vld [vmem:[%s1593_s0 + $0x38] sm:$0xff] }
  0x30   : > { %385 = vmatprep.mubr.f32.mxu0 %v1156_v16  ;;  %525 = vmatprep.mubr.f32.mxu1 %v1156_v16 }
  0x31   : > { %635 = vmatprep.subr.mxu0 %v1070_v32  ;;  %791 = vmatprep.subr.mxu1 %v1084_v33 }
  0x32   : > { %636 = vmatpush1.msra.mxu0 %v1069_v34  ;;  %792 = vmatpush1.msra.mxu1 %v1083_v35 }
  0x33   : > { %1049 = vmatmul.mubr.msk.f32.gmra.mxu0 %vm277_vm1, %v219_v36  ;;  %1063 = vmatmul.mubr.msk.f32.gmra.mxu1 %vm277_vm1, %v219_v36 }
  0x34   : > { %391 = vmatprep.mubr.f32.mxu0 %v1156_v16  ;;  %531 = vmatprep.mubr.f32.mxu1 %v1156_v16 }
  0x35   : > { %239 = vperm.xlu0 %1130, %v225_v37   ;;  %249 = vperm.xlu1 %1131, %v227_v38  }
  0x37   : > { %1050 = vmatmul.mubr.msk.f32.gmra.mxu0 %vm277_vm1, %v220_v39  ;;  %1064 = vmatmul.mubr.msk.f32.gmra.mxu1 %vm277_vm1, %v220_v39 }
  0x38   : > { %397 = vmatprep.mubr.f32.mxu0 %v1156_v16  ;;  %537 = vmatprep.mubr.f32.mxu1 %v1156_v16 }
  0x39   : > { %244 = vperm.xlu0 %1130, %v226_v40   ;;  %254 = vperm.xlu1 %1131, %v228_v41  }
  0x3b   : > { %1051 = vmatmul.mubr.msk.f32.gmra.mxu0 %vm277_vm1, %v221_v42  ;;  %1065 = vmatmul.mubr.msk.f32.gmra.mxu1 %vm277_vm1, %v221_v42 }
  0x3c   : > { %403 = vmatprep.mubr.f32.mxu0 %v1156_v16  ;;  %543 = vmatprep.mubr.f32.mxu1 %v1156_v16 }
  0x3d   : > { %259 = vperm.xlu0 %1130, %v229_v43   ;;  %264 = vperm.xlu1 %1131, %v230_v44  }
  0x3f   : > { %1052 = vmatmul.mubr.msk.f32.gmra.mxu0 %vm277_vm1, %v222_v45  ;;  %1066 = vmatmul.mubr.msk.f32.gmra.mxu1 %vm277_vm1, %v222_v45 }
  0x40   : > { %409 = vmatprep.mubr.f32.mxu0 %v1156_v16  ;;  %549 = vmatprep.mubr.f32.mxu1 %v1156_v16 }
  0x41   : > { %269 = vperm.xlu0 %1130, %v231_v46   ;;  %274 = vperm.xlu1 %1131, %v232_v47  }
  0x43   : > { %1053 = vmatmul.mubr.msk.f32.gmra.mxu0 %vm277_vm1, %v223_v48  ;;  %1067 = vmatmul.mubr.msk.f32.gmra.mxu1 %vm277_vm1, %v223_v48 }
  0x44   : > { %415 = vmatprep.mubr.f32.mxu0 %v1156_v16  ;;  %555 = vmatprep.mubr.f32.mxu1 %v1156_v16 }
  0x47   : > { %1054 = vmatmul.mubr.msk.f32.gmra.mxu0 %vm277_vm1, %v224_v49  ;;  %1068 = vmatmul.mubr.msk.f32.gmra.mxu1 %vm277_vm1, %v224_v49 }
  0x48   : > { %669 = vmatprep.mubr.f32.mxu0 %v1156_v16  ;;  %825 = vmatprep.mubr.f32.mxu1 %v1156_v16 }
  0x4b   : > { %1075 = vmatmul.mubr.msk.f32.vlgmr.msra.gmra.mxu0 %vm277_vm1, %v1261_v26  ;;  %1089 = vmatmul.mubr.msk.f32.vlgmr.msra.gmra.mxu1 %vm277_vm1, %v1261_v26 }
  0x4c   : > { %675 = vmatprep.mubr.f32.mxu0 %v1156_v16  ;;  %831 = vmatprep.mubr.f32.mxu1 %v1156_v16 }
  0x4f   : > { %1076 = vmatmul.mubr.msk.f32.gmra.mxu0 %vm277_vm1, %v1276_v31  ;;  %1090 = vmatmul.mubr.msk.f32.gmra.mxu1 %vm277_vm1, %v1276_v31 }
  0x50   : > { %681 = vmatprep.mubr.f32.mxu0 %v1156_v16  ;;  %837 = vmatprep.mubr.f32.mxu1 %v1156_v16 }
  0x53   : > { %1077 = vmatmul.mubr.msk.f32.gmra.mxu0 %vm277_vm1, %v219_v36  ;;  %1091 = vmatmul.mubr.msk.f32.gmra.mxu1 %vm277_vm1, %v219_v36 }
  0x54   : > { %687 = vmatprep.mubr.f32.mxu0 %v1156_v16  ;;  %843 = vmatprep.mubr.f32.mxu1 %v1156_v16 }
  0x57   : > { %1078 = vmatmul.mubr.msk.f32.gmra.mxu0 %vm277_vm1, %v220_v39  ;;  %1092 = vmatmul.mubr.msk.f32.gmra.mxu1 %vm277_vm1, %v220_v39 }
  0x58   : > { %693 = vmatprep.mubr.f32.mxu0 %v1156_v16  ;;  %849 = vmatprep.mubr.f32.mxu1 %v1156_v16 }
  0x5b   : > { %1079 = vmatmul.mubr.msk.f32.gmra.mxu0 %vm277_vm1, %v221_v42  ;;  %1093 = vmatmul.mubr.msk.f32.gmra.mxu1 %vm277_vm1, %v221_v42 }
  0x5c   : > { %699 = vmatprep.mubr.f32.mxu0 %v1156_v16  ;;  %855 = vmatprep.mubr.f32.mxu1 %v1156_v16 }
  0x5f   : > { %1080 = vmatmul.mubr.msk.f32.gmra.mxu0 %vm277_vm1, %v222_v45  ;;  %1094 = vmatmul.mubr.msk.f32.gmra.mxu1 %vm277_vm1, %v222_v45 }
  0x60   : > { %705 = vmatprep.mubr.f32.mxu0 %v1156_v16  ;;  %861 = vmatprep.mubr.f32.mxu1 %v1156_v16 }
  0x63   : > { %1081 = vmatmul.mubr.msk.f32.gmra.mxu0 %vm277_vm1, %v223_v48  ;;  %1095 = vmatmul.mubr.msk.f32.gmra.mxu1 %vm277_vm1, %v223_v48 }
  0x64   : > { %711 = vmatprep.mubr.f32.mxu0 %v1156_v16  ;;  %867 = vmatprep.mubr.f32.mxu1 %v1156_v16 }
  0x67   : > { %1082 = vmatmul.mubr.msk.f32.gmra.mxu0 %vm277_vm1, %v224_v49  ;;  %1096 = vmatmul.mubr.msk.f32.gmra.mxu1 %vm277_vm1, %v224_v49 }
  0xb0   : > { %v1392_v0 = vpop.permute.xlu0 %239  ;;  %v1394_v5 = vpop.permute.xlu1 %249 }
  0xb4   : > { %v1396_v8 = vpop.permute.xlu0 %244  ;;  %v1410_v17 = vpop.permute.xlu1 %254 }
  0xb8   : > { %v1422_v28 = vpop.permute.xlu0 %259 }
  0xeb   : > { %v375_v50 = vpop.f32.mrf.mxu0  ;;  %v515_v51 = vpop.f32.mrf.mxu1 }
  0xec   : > { %v376_v11 = vadd.f32 %v375_v50, %v1392_v0  ;;  %v516_v12 = vadd.f32 %v515_v51, %v1392_v0 }
  0xed   : > { %v377_v52 = vpop.f32.mrf.mxu0  ;;  %v517_v53 = vpop.f32.mrf.mxu1 }
  0xee   : > { %v378_v13 = vadd.f32 %v377_v52, %v1392_v0  ;;  %v518_v14 = vadd.f32 %v517_v53, %v1392_v0  ;;  %v422_v24 = vmax.f32 %v376_v11, 0.0  ;;  %v562_v25 = vmax.f32 %v516_v12, 0.0 }
  0xef   : > { %v381_v54 = vpop.f32.mrf.mxu0  ;;  %v521_v55 = vpop.f32.mrf.mxu1 }
  0xf0   : > { %v382_v18 = vadd.f32 %v381_v54, %v1396_v8  ;;  %v522_v19 = vadd.f32 %v521_v55, %v1396_v8  ;;  %v423_v31 = vmax.f32 %v378_v13, 0.0  ;;  %v563_v32 = vmax.f32 %v518_v14, 0.0 }
  0xf1   : > { %v383_v56 = vpop.f32.mrf.mxu0  ;;  %v523_v57 = vpop.f32.mrf.mxu1 }
  0xf2   : > { %v384_v20 = vadd.f32 %v383_v56, %v1396_v8  ;;  %v524_v21 = vadd.f32 %v523_v57, %v1396_v8  ;;  %v424_v39 = vmax.f32 %v382_v18, 0.0  ;;  %v564_v40 = vmax.f32 %v522_v19, 0.0 }
  0xf3   : > { %v387_v58 = vpop.f32.mrf.mxu0  ;;  %v527_v59 = vpop.f32.mrf.mxu1 }
  0xf4   : > { %v388_v29 = vadd.f32 %v387_v58, %v1394_v5  ;;  %v528_v30 = vadd.f32 %v527_v59, %v1394_v5  ;;  %v425_v41 = vmax.f32 %v384_v20, 0.0  ;;  %v565_v42 = vmax.f32 %v524_v21, 0.0 }
  0xf5   : > { %v389_v60 = vpop.f32.mrf.mxu0  ;;  %v529_v61 = vpop.f32.mrf.mxu1  ;;  %v578_v59 = vmax.f32 %v422_v24, %v562_v25 }
  0xf6   : > { %v390_v26 = vadd.f32 %v389_v60, %v1394_v5  ;;  %v530_v27 = vadd.f32 %v529_v61, %v1394_v5  ;;  %v426_v49 = vmax.f32 %v388_v29, 0.0  ;;  %v566_v50 = vmax.f32 %v528_v30, 0.0 }
  0xf7   : > { %v393_v62 = vpop.f32.mrf.mxu0  ;;  %v533_v63 = vpop.f32.mrf.mxu1  ;;  %v579_v60 = vmax.f32 %v423_v31, %v563_v32 }
  0xf8   : > { %v394_v35 = vadd.f32 %v393_v62, %v1410_v17  ;;  %v534_v36 = vadd.f32 %v533_v63, %v1410_v17  ;;  %v427_v47 = vmax.f32 %v390_v26, 0.0  ;;  %v567_v48 = vmax.f32 %v530_v27, 0.0 }
  0xf9   : > { %v395_v1 = vpop.f32.mrf.mxu0  ;;  %v535_v2 = vpop.f32.mrf.mxu1  ;;  %v580_v63 = vmax.f32 %v424_v39, %v564_v40  ;;  %v582_v11 = vmax.f32 %v426_v49, %v566_v50 }
  0xfa   : > { %v396_v37 = vadd.f32 %v395_v1, %v1410_v17  ;;  %v536_v38 = vadd.f32 %v535_v2, %v1410_v17  ;;  %v428_v55 = vmax.f32 %v394_v35, 0.0  ;;  %v568_v56 = vmax.f32 %v534_v36, 0.0 }
  0xfb   : > { %v399_v3 = vpop.f32.mrf.mxu0  ;;  %v539_v4 = vpop.f32.mrf.mxu1  ;;  %v1450_v12 = vmax.f32 %v427_v47, %v567_v48 }
  0xfc   : > { %v400_v45 = vadd.f32 %v399_v3, %v1422_v28  ;;  %v540_v46 = vadd.f32 %v539_v4, %v1422_v28  ;;  %v429_v57 = vmax.f32 %v396_v37, 0.0  ;;  %v569_v58 = vmax.f32 %v536_v38, 0.0  ;;  %v1446_v4 = vpop.permute.xlu1 %264 }
  0xfd   : > { %v401_v6 = vpop.f32.mrf.mxu0  ;;  %v541_v7 = vpop.f32.mrf.mxu1  ;;  %v581_v3 = vmax.f32 %v425_v41, %v565_v42  ;;  %v1452_v20 = vmax.f32 %v428_v55, %v568_v56 }
  0xfe   : > { %v402_v51 = vadd.f32 %v401_v6, %v1422_v28  ;;  %v542_v52 = vadd.f32 %v541_v7, %v1422_v28  ;;  %v430_v1 = vmax.f32 %v400_v45, 0.0  ;;  %v570_v2 = vmax.f32 %v540_v46, 0.0 }
  0xff   : > { %v1398_v9 = vpop.f32.mrf.mxu0  ;;  %v1400_v10 = vpop.f32.mrf.mxu1  ;;  %v1454_v21 = vmax.f32 %v429_v57, %v569_v58 }
 0x100   : > { %v431_v13 = vmax.f32 %v402_v51, 0.0  ;;  %v571_v14 = vmax.f32 %v542_v52, 0.0  ;;  %v1458_v31 = vmax.f32 %v430_v1, %v570_v2  ;;  %v1462_v32 = vadd.f32 %v1398_v9, %v1446_v4 }
 0x101   : > { %v1406_v15 = vpop.f32.mrf.mxu0  ;;  %v1408_v16 = vpop.f32.mrf.mxu1  ;;  %v1466_v35 = vadd.f32 %v1400_v10, %v1446_v4 }
 0x102   : > { %v1470_v40 = vmax.f32 %v431_v13, %v571_v14  ;;  %v548_v9 = vadd.f32 %v1408_v16, %v1446_v4  ;;  %v1476_v10 = vpop.permute.xlu0 %269 }
 0x103   : > { %v1416_v22 = vpop.f32.mrf.mxu0  ;;  %v1418_v23 = vpop.f32.mrf.mxu1  ;;  %v572_v56 = vmax.f32 %v1466_v35, 0.0 }
 0x104   : > { %v1490_v2 = vadd.f32 %v1416_v22, %v1476_v10 }
 0x105   : > { %v1426_v33 = vpop.f32.mrf.mxu0  ;;  %v1428_v34 = vpop.f32.mrf.mxu1 }
 0x107   : > { %v1434_v43 = vpop.f32.mrf.mxu0  ;;  %v1436_v44 = vpop.f32.mrf.mxu1 }
 0x109   : > { %v1442_v53 = vpop.f32.mrf.mxu0  ;;  %v1444_v54 = vpop.f32.mrf.mxu1 }
 0x10b   : > { %v671_v61 = vpop.f32.mrf.mxu0  ;;  %v827_v62 = vpop.f32.mrf.mxu1 }
 0x10c   : > { %v672_v6 = vadd.f32 %v671_v61, %v1392_v0  ;;  %v828_v7 = vadd.f32 %v827_v62, %v1392_v0  ;;  %v573_v61 = vmax.f32 %v548_v9, 0.0 }
 0x10d   : > { %v673_v18 = vpop.f32.mrf.mxu0  ;;  %v829_v19 = vpop.f32.mrf.mxu1 }
 0x10e   : > { %v718_v24 = vmax.f32 %v672_v6, 0.0  ;;  %v874_v25 = vmax.f32 %v828_v7, 0.0  ;;  %v674_v26 = vadd.f32 %v673_v18, %v1392_v0  ;;  %v830_v27 = vadd.f32 %v829_v19, %v1392_v0 }
 0x10f   : > { %v677_v29 = vpop.f32.mrf.mxu0  ;;  %v833_v30 = vpop.f32.mrf.mxu1  ;;  %v408_v0 = vadd.f32 %v1406_v15, %v1446_v4  ;;  %v432_v15 = vmax.f32 %v1462_v32, 0.0  ;;  %v1502_v32 = vadd.f32 %v1426_v33, %v1476_v10 }
 0x110   : > { %v734_v36 = vmax.f32 %v578_v59, %v718_v24  ;;  %v719_v37 = vmax.f32 %v674_v26, 0.0  ;;  %v678_v38 = vadd.f32 %v677_v29, %v1396_v8  ;;  %v834_v39 = vadd.f32 %v833_v30, %v1396_v8 }
 0x111   : > { %v875_v41 = vmax.f32 %v830_v27, 0.0  ;;  %v679_v42 = vpop.f32.mrf.mxu0  ;;  %v835_v45 = vpop.f32.mrf.mxu1  ;;  %v552_v26 = vadd.f32 %v1418_v23, %v1476_v10 }
 0x112   : > { %v890_v46 = vmax.f32 %v734_v36, %v874_v25  ;;  %v735_v47 = vmax.f32 %v579_v60, %v719_v37  ;;  %v720_v48 = vmax.f32 %v678_v38, 0.0  ;;  %v876_v49 = vmax.f32 %v834_v39, 0.0 }
 0x113   : > { %v680_v50 = vadd.f32 %v679_v42, %v1396_v8  ;;  %v836_v51 = vadd.f32 %v835_v45, %v1396_v8  ;;  %v683_v52 = vpop.f32.mrf.mxu0  ;;  %v839_v55 = vpop.f32.mrf.mxu1  ;;  %v433_v60 = vmax.f32 %v408_v0, 0.0  ;;  %v588_v42 = vmax.f32 %v432_v15, %v572_v56 }
 0x114   : > { %906 = vst [vmem:[%s1483_s22] sm:$0xff] %v890_v46  ;;  %v891_v16 = vmax.f32 %v735_v47, %v875_v41  ;;  %v736_v57 = vmax.f32 %v580_v63, %v720_v48  ;;  %v684_v58 = vadd.f32 %v683_v52, %v1394_v5  ;;  %v840_v59 = vadd.f32 %v839_v55, %v1394_v5  ;;  %v1521_v15 = vpop.permute.xlu1 %274 }
 0x115   : > { %v721_v8 = vmax.f32 %v680_v50, 0.0  ;;  %v685_v62 = vpop.f32.mrf.mxu0  ;;  %v841_v1 = vpop.f32.mrf.mxu1  ;;  %v877_v18 = vmax.f32 %v836_v51, 0.0  ;;  %v1509_v0 = vmax.f32 %v433_v60, %v573_v61  ;;  %v435_v48 = vmax.f32 %v1502_v32, 0.0 }
 0x116   : > { %907 = vst [vmem:[%s1483_s22 + $0x8] sm:$0xff] %v891_v16  ;;  %v892_v6 = vmax.f32 %v736_v57, %v876_v49  ;;  %v722_v7 = vmax.f32 %v684_v58, 0.0  ;;  %v878_v13 = vmax.f32 %v840_v59, 0.0  ;;  %v686_v63 = vadd.f32 %v685_v62, %v1394_v5 }
 0x117   : > { %v737_v14 = vmax.f32 %v581_v3, %v721_v8  ;;  %v842_v19 = vadd.f32 %v841_v1, %v1394_v5  ;;  %v689_v24 = vpop.f32.mrf.mxu0  ;;  %v845_v25 = vpop.f32.mrf.mxu1  ;;  %v1506_v5 = vadd.f32 %v1428_v34, %v1476_v10  ;;  %v574_v52 = vmax.f32 %v552_v26, 0.0 }
 0x118   : > { %908 = vst [vmem:[%s1483_s22 + $0x10] sm:$0xff] %v892_v6  ;;  %v738_v27 = vmax.f32 %v582_v11, %v722_v7  ;;  %v723_v22 = vmax.f32 %v686_v63, 0.0  ;;  %v690_v29 = vadd.f32 %v689_v24, %v1410_v17  ;;  %v846_v30 = vadd.f32 %v845_v25, %v1410_v17 }
 0x119   : > { %v893_v3 = vmax.f32 %v737_v14, %v877_v18  ;;  %v879_v35 = vmax.f32 %v842_v19, 0.0  ;;  %v691_v23 = vpop.f32.mrf.mxu0  ;;  %v847_v36 = vpop.f32.mrf.mxu1  ;;  %v575_v55 = vmax.f32 %v1506_v5, 0.0  ;;  %v418_v14 = vadd.f32 %v1434_v43, %v1521_v15 }
 0x11a   : > { %v894_v37 = vmax.f32 %v738_v27, %v878_v13  ;;  %v739_v11 = vmax.f32 %v1450_v12, %v723_v22  ;;  %v724_v38 = vmax.f32 %v690_v29, 0.0  ;;  %v880_v39 = vmax.f32 %v846_v30, 0.0 }
 0x11b   : > { %909 = vst [vmem:[%s1483_s22 + $0x18] sm:$0xff] %v893_v3  ;;  %v692_v33 = vadd.f32 %v691_v23, %v1410_v17  ;;  %v848_v9 = vadd.f32 %v847_v36, %v1410_v17  ;;  %v695_v41 = vpop.f32.mrf.mxu0  ;;  %v851_v34 = vpop.f32.mrf.mxu1  ;;  %v434_v17 = vmax.f32 %v1490_v2, 0.0  ;;  %v420_v25 = vadd.f32 %v1442_v53, %v1521_v15 }
 0x11c   : > { %910 = vst [vmem:[%s1483_s22 + $0x20] sm:$0xff] %v894_v37  ;;  %v895_v45 = vmax.f32 %v739_v11, %v879_v35  ;;  %v740_v46 = vmax.f32 %v1452_v20, %v724_v38  ;;  %v696_v47 = vadd.f32 %v695_v41, %v1422_v28  ;;  %v852_v12 = vadd.f32 %v851_v34, %v1422_v28 }
 0x11d   : > { %v725_v49 = vmax.f32 %v692_v33, 0.0  ;;  %v697_v50 = vpop.f32.mrf.mxu0  ;;  %v853_v51 = vpop.f32.mrf.mxu1  ;;  %v881_v58 = vmax.f32 %v848_v9, 0.0  ;;  %v560_v5 = vadd.f32 %v1444_v54, %v1521_v15  ;;  %v436_v23 = vmax.f32 %v418_v14, 0.0 }
 0x11e   : > { %911 = vst [vmem:[%s1483_s22 + $0x28] sm:$0xff] %v895_v45  ;;  %v896_v56 = vmax.f32 %v740_v46, %v880_v39  ;;  %v726_v20 = vmax.f32 %v696_v47, 0.0  ;;  %v698_v16 = vadd.f32 %v697_v50, %v1422_v28  ;;  %v882_v59 = vmax.f32 %v852_v12, 0.0 }
 0x11f   : > { %v741_v57 = vmax.f32 %v1454_v21, %v725_v49  ;;  %v854_v60 = vadd.f32 %v853_v51, %v1422_v28  ;;  %v701_v61 = vpop.f32.mrf.mxu0  ;;  %v857_v8 = vpop.f32.mrf.mxu1  ;;  %v590_v21 = vmax.f32 %v434_v17, %v574_v52  ;;  %v558_v28 = vadd.f32 %v1436_v44, %v1521_v15 }
 0x120   : > { %912 = vst [vmem:[%s1483_s22 + $0x30] sm:$0xff] %v896_v56  ;;  %v742_v62 = vmax.f32 %v1458_v31, %v726_v20  ;;  %v727_v1 = vmax.f32 %v698_v16, 0.0  ;;  %v702_v2 = vadd.f32 %v701_v61, %v1446_v4  ;;  %v858_v6 = vadd.f32 %v857_v8, %v1446_v4 }
 0x121   : > { %v897_v7 = vmax.f32 %v741_v57, %v881_v58  ;;  %v703_v13 = vpop.f32.mrf.mxu0  ;;  %v859_v63 = vpop.f32.mrf.mxu1  ;;  %v883_v31 = vmax.f32 %v854_v60, 0.0  ;;  %v576_v36 = vmax.f32 %v558_v28, 0.0  ;;  %v591_v37 = vmax.f32 %v435_v48, %v575_v55 }
 0x122   : > { %v898_v18 = vmax.f32 %v742_v62, %v882_v59  ;;  %v743_v19 = vmax.f32 %v1470_v40, %v727_v1  ;;  %v728_v24 = vmax.f32 %v702_v2, 0.0  ;;  %v884_v26 = vmax.f32 %v858_v6, 0.0  ;;  %v946_v2 = vld [vmem:[%s1483_s22 + $0x8] sm:$0xff] (%p1208_p5)  ;;  %v948_v6 = vld [vmem:[%s1483_s22 + $0x10] sm:$0xff] (%p1208_p5) }
 0x123   : > { %913 = vst [vmem:[%s1483_s22 + $0x38] sm:$0xff] %v897_v7  ;;  %v704_v27 = vadd.f32 %v703_v13, %v1446_v4  ;;  %v860_v22 = vadd.f32 %v859_v63, %v1446_v4  ;;  %v707_v29 = vpop.f32.mrf.mxu0  ;;  %v863_v43 = vpop.f32.mrf.mxu1  ;;  %v437_v12 = vmax.f32 %v420_v25, 0.0  ;;  %v577_v48 = vmax.f32 %v560_v5, 0.0  ;;  %v950_v7 = vld [vmem:[%s1483_s22 + $0x18] sm:$0xff] (%p1208_p5)  ;;  %v952_v13 = vld [vmem:[%s1483_s22 + $0x20] sm:$0xff] (%p1208_p5)  ;;  %947 = vst [vmem:[%s931_s20 + $0x8] sm:$0xff] (%p1208_p5), %v946_v2 }
 0x124   : > { %914 = vst [vmem:[%s1483_s22 + $0x40] sm:$0xff] %v898_v18  ;;  %v899_v30 = vmax.f32 %v743_v19, %v883_v31  ;;  %v744_v44 = vmax.f32 %v588_v42, %v728_v24  ;;  %v708_v32 = vadd.f32 %v707_v29, %v1476_v10  ;;  %v864_v40 = vadd.f32 %v863_v43, %v1476_v10 }
 0x125   : > { %v729_v53 = vmax.f32 %v704_v27, 0.0  ;;  %v709_v3 = vpop.f32.mrf.mxu0  ;;  %v865_v35 = vpop.f32.mrf.mxu1  ;;  %v885_v33 = vmax.f32 %v860_v22, 0.0  ;;  %v592_v50 = vmax.f32 %v436_v23, %v576_v36  ;;  %v593_v59 = vmax.f32 %v437_v12, %v577_v48  ;;  %v954_v63 = vld [vmem:[%s1483_s22 + $0x28] sm:$0xff] (%p1208_p5)  ;;  %949 = vst [vmem:[%s931_s20 + $0x20] sm:$0xff] (%p1208_p5), %v948_v6  ;;  %951 = vst [vmem:[%s931_s20 + $0x28] sm:$0xff] (%p1208_p5), %v950_v7 }
 0x126   : > { %915 = vst [vmem:[%s1483_s22 + $0x48] sm:$0xff] %v899_v30  ;;  %v900_v4 = vmax.f32 %v744_v44, %v884_v26  ;;  %v730_v11 = vmax.f32 %v708_v32, 0.0  ;;  %v710_v38 = vadd.f32 %v709_v3, %v1476_v10  ;;  %v886_v9 = vmax.f32 %v864_v40, 0.0  ;;  %953 = vst [vmem:[%s931_s20 + $0x40] sm:$0xff] (%p1208_p5), %v952_v13 }
 0x127   : > { %v745_v39 = vmax.f32 %v1509_v0, %v729_v53  ;;  %v866_v41 = vadd.f32 %v865_v35, %v1476_v10  ;;  %v713_v34 = vpop.f32.mrf.mxu0  ;;  %v869_v54 = vpop.f32.mrf.mxu1  ;;  %955 = vst [vmem:[%s931_s20 + $0x48] sm:$0xff] (%p1208_p5), %v954_v63 }
 0x128   : > { %916 = vst [vmem:[%s1483_s22 + $0x50] sm:$0xff] %v900_v4  ;;  %v746_v42 = vmax.f32 %v590_v21, %v730_v11  ;;  %v731_v45 = vmax.f32 %v710_v38, 0.0  ;;  %v714_v46 = vadd.f32 %v713_v34, %v1521_v15  ;;  %v870_v47 = vadd.f32 %v869_v54, %v1521_v15  ;;  %v956_v21 = vld [vmem:[%s1483_s22 + $0x30] sm:$0xff] (%p1208_p5) }
 0x129   : > { %v901_v49 = vmax.f32 %v745_v39, %v885_v33  ;;  %v715_v0 = vpop.f32.mrf.mxu0  ;;  %v871_v51 = vpop.f32.mrf.mxu1  ;;  %v887_v52 = vmax.f32 %v866_v41, 0.0  ;;  %957 = vst [vmem:[%s931_s20 + $0x60] sm:$0xff] (%p1208_p5), %v956_v21 }
 0x12a   : > { %v902_v17 = vmax.f32 %v746_v42, %v886_v9  ;;  %v747_v10 = vmax.f32 %v591_v37, %v731_v45  ;;  %v732_v55 = vmax.f32 %v714_v46, 0.0  ;;  %v716_v56 = vadd.f32 %v715_v0, %v1521_v15  ;;  %v958_v14 = vld [vmem:[%s1483_s22 + $0x38] sm:$0xff] (%p1208_p5) }
 0x12b   : > { %917 = vst [vmem:[%s1483_s22 + $0x58] sm:$0xff] %v901_v49  ;;  %v872_v20 = vadd.f32 %v871_v51, %v1521_v15  ;;  %v888_v58 = vmax.f32 %v870_v47, 0.0  ;;  %v944_v15 = vld [vmem:[%s1483_s22] sm:$0xff] (%p1208_p5)  ;;  %959 = vst [vmem:[%s931_s20 + $0x68] sm:$0xff] (%p1208_p5), %v958_v14 }
 0x12c   : > { %918 = vst [vmem:[%s1483_s22 + $0x60] sm:$0xff] %v902_v17  ;;  %v903_v16 = vmax.f32 %v747_v10, %v887_v52  ;;  %v748_v57 = vmax.f32 %v592_v50, %v732_v55  ;;  %v733_v60 = vmax.f32 %v716_v56, 0.0  ;;  %945 = vst [vmem:[%s931_s20] sm:$0xff] (%p1208_p5), %v944_v15  ;;  %v960_v28 = vld [vmem:[%s1483_s22 + $0x40] sm:$0xff] (%p1208_p5) }
 0x12d   : > { %v889_v62 = vmax.f32 %v872_v20, 0.0  ;;  %961 = vst [vmem:[%s931_s20 + $0x80] sm:$0xff] (%p1208_p5), %v960_v28  ;;  %v962_v18 = vld [vmem:[%s1483_s22 + $0x48] sm:$0xff] (%p1208_p5) }
 0x12e   : > { %919 = vst [vmem:[%s1483_s22 + $0x68] sm:$0xff] %v903_v16  ;;  %v904_v61 = vmax.f32 %v748_v57, %v888_v58  ;;  %v749_v8 = vmax.f32 %v593_v59, %v733_v60  ;;  %928 = sbr.rel (!%p1208_p5) target bundleno = 315 (0x13b), region = 59  ;;  %963 = vst [vmem:[%s931_s20 + $0x88] sm:$0xff] (%p1208_p5), %v962_v18 }
 0x12f   : > { %v964_v19 = vld [vmem:[%s1483_s22 + $0x50] sm:$0xff] (%p1208_p5) }
 0x130   : > { %920 = vst [vmem:[%s1483_s22 + $0x70] sm:$0xff] %v904_v61  ;;  %v905_v1 = vmax.f32 %v749_v8, %v889_v62  ;;  %965 = vst [vmem:[%s931_s20 + $0xa0] sm:$0xff] (%p1208_p5), %v964_v19 }
 0x132   : > { %921 = vst [vmem:[%s1483_s22 + $0x78] sm:$0xff] %v905_v1  ;;  %v966_v31 = vld [vmem:[%s1483_s22 + $0x58] sm:$0xff] (%p1208_p5) }
 0x133   : > { %967 = vst [vmem:[%s931_s20 + $0xa8] sm:$0xff] %v966_v31  ;;  %v968_v24 = vld [vmem:[%s1483_s22 + $0x60] sm:$0xff] }
 0x134   : > { %969 = vst [vmem:[%s931_s20 + $0xc0] sm:$0xff] %v968_v24 }
 0x135   : > { %v970_v25 = vld [vmem:[%s1483_s22 + $0x68] sm:$0xff] }
 0x136   : > { %971 = vst [vmem:[%s931_s20 + $0xc8] sm:$0xff] %v970_v25 }
 0x137   : > { %v972_v26 = vld [vmem:[%s1483_s22 + $0x70] sm:$0xff] }
 0x138   : > { %973 = vst [vmem:[%s931_s20 + $0xe0] sm:$0xff] %v972_v26 }
 0x139   : > { %v974_v27 = vld [vmem:[%s1483_s22 + $0x78] sm:$0xff] }
 0x13a   : > { %975 = vst [vmem:[%s931_s20 + $0xe8] sm:$0xff] %v974_v27 }
 0x13b PF: > { %p10_p10 = scmp.ge.s32.totalorder %s1195_s16, 4   ;;  %s1598_s12 = smov %s1150_s13 }
 0x13c   : > { %s1599_s13 = smov %s1206_s19  ;;  %s1600_s14 = smov %s1195_s16 }
 0x13d   :  { %12 = sbr.rel (!%p10_p10) target bundleno = 2 (0x2), region = 116 }

// kernel: network_forward.7
= control target key start
LH: loop header
LB: loop body
LE: loop exit
PB: predicated region body
PF: predicated region fallthrough
CT: control target
= control target key end

     0   :  { %v2661_v3 = vmov 0   ;;  %vm174_vm0 = vcmask 523264   ;;  %s4270_s2 = inlined_call_operand.vmem [shape: f32[4,576,128], index: 2, kind: input, shape index: {}]   ;;  %s4271_s0 = inlined_call_operand.vmem [shape: f32[64,576], index: 0, kind: input, shape index: {}]   ;;  %s4272_s1 = inlined_call_operand.vmem [shape: f32[64,1], index: 1, kind: input, shape index: {}]   ;;  %s4273_s3 = inlined_call_operand.vmem [shape: f32[64,128], index: 3, kind: output, shape index: {}]  }
   0x1   :  { %v93_v0 = vld [vmem:[%s4270_s2 + $0xf8] sm:$0xff]  ;;  %v92_v2 = vld [vmem:[%s4270_s2 + $0xf0] sm:$0xff]  ;;  %2619 = vset.pattern.permute.xlu0 %v2661_v3  ;;  %2620 = vset.pattern.permute.xlu1 %v2661_v3  ;;  %v91_v7 = vld [vmem:[%s4270_s2 + $0xe8] sm:$0xff] }
   0x2   :  { %v77_v1 = vld [vmem:[%s4270_s2 + $0x78] sm:$0xff]  ;;  %1994 = vmatprep.subr.mxu0 %v93_v0  ;;  %v76_v5 = vld [vmem:[%s4270_s2 + $0x70] sm:$0xff]  ;;  %v75_v9 = vld [vmem:[%s4270_s2 + $0x68] sm:$0xff] }
   0x3   :  { %v125_v4 = vld [vmem:[%s4270_s2 + $0x1f8] sm:$0xff]  ;;  %1995 = vmatpush3.msra.mxu0 %v77_v1  ;;  %v124_v8 = vld [vmem:[%s4270_s2 + $0x1f0] sm:$0xff]  ;;  %v123_v11 = vld [vmem:[%s4270_s2 + $0x1e8] sm:$0xff] }
   0x4   :  { %v109_v6 = vld [vmem:[%s4270_s2 + $0x178] sm:$0xff]  ;;  %2050 = vmatprep.subr.mxu1 %v125_v4  ;;  %1996 = vmatprep.subr.mxu0 %v92_v2  ;;  %v108_v10 = vld [vmem:[%s4270_s2 + $0x170] sm:$0xff]  ;;  %v90_v12 = vld [vmem:[%s4270_s2 + $0xe0] sm:$0xff] }
   0x5   :  { %2051 = vmatpush3.msra.mxu1 %v109_v6  ;;  %1997 = vmatpush3.msra.mxu0 %v76_v5  ;;  %v107_v13 = vld [vmem:[%s4270_s2 + $0x168] sm:$0xff]  ;;  %v74_v14 = vld [vmem:[%s4270_s2 + $0x60] sm:$0xff]  ;;  %v89_v16 = vld [vmem:[%s4270_s2 + $0xd8] sm:$0xff] }
   0x6   :  { %2052 = vmatprep.subr.mxu1 %v124_v8  ;;  %1998 = vmatprep.subr.mxu0 %v91_v7  ;;  %v122_v15 = vld [vmem:[%s4270_s2 + $0x1e0] sm:$0xff]  ;;  %v73_v18 = vld [vmem:[%s4270_s2 + $0x58] sm:$0xff]  ;;  %v88_v20 = vld [vmem:[%s4270_s2 + $0xd0] sm:$0xff] }
   0x7   :  { %2053 = vmatpush3.msra.mxu1 %v108_v10  ;;  %1999 = vmatpush3.msra.mxu0 %v75_v9  ;;  %v106_v17 = vld [vmem:[%s4270_s2 + $0x160] sm:$0xff]  ;;  %v121_v19 = vld [vmem:[%s4270_s2 + $0x1d8] sm:$0xff]  ;;  %v72_v22 = vld [vmem:[%s4270_s2 + $0x50] sm:$0xff] }
   0x8   :  { %2054 = vmatprep.subr.mxu1 %v123_v11  ;;  %2000 = vmatprep.subr.mxu0 %v90_v12  ;;  %v105_v21 = vld [vmem:[%s4270_s2 + $0x158] sm:$0xff]  ;;  %v120_v23 = vld [vmem:[%s4270_s2 + $0x1d0] sm:$0xff]  ;;  %v87_v24 = vld [vmem:[%s4270_s2 + $0xc8] sm:$0xff] }
   0x9   :  { %2055 = vmatpush3.msra.mxu1 %v107_v13  ;;  %2001 = vmatpush3.msra.mxu0 %v74_v14  ;;  %v104_v25 = vld [vmem:[%s4270_s2 + $0x150] sm:$0xff]  ;;  %v71_v26 = vld [vmem:[%s4270_s2 + $0x48] sm:$0xff]  ;;  %v86_v28 = vld [vmem:[%s4270_s2 + $0xc0] sm:$0xff] }
   0xa   :  { %2056 = vmatprep.subr.mxu1 %v122_v15  ;;  %2002 = vmatprep.subr.mxu0 %v89_v16  ;;  %v119_v27 = vld [vmem:[%s4270_s2 + $0x1c8] sm:$0xff]  ;;  %v70_v30 = vld [vmem:[%s4270_s2 + $0x40] sm:$0xff]  ;;  %v85_v32 = vld [vmem:[%s4270_s2 + $0xb8] sm:$0xff] }
   0xb   :  { %2057 = vmatpush3.msra.mxu1 %v106_v17  ;;  %2003 = vmatpush3.msra.mxu0 %v73_v18  ;;  %v103_v29 = vld [vmem:[%s4270_s2 + $0x148] sm:$0xff]  ;;  %v118_v31 = vld [vmem:[%s4270_s2 + $0x1c0] sm:$0xff]  ;;  %v69_v34 = vld [vmem:[%s4270_s2 + $0x38] sm:$0xff] }
   0xc   :  { %2058 = vmatprep.subr.mxu1 %v121_v19  ;;  %2004 = vmatprep.subr.mxu0 %v88_v20  ;;  %v102_v33 = vld [vmem:[%s4270_s2 + $0x140] sm:$0xff]  ;;  %v117_v35 = vld [vmem:[%s4270_s2 + $0x1b8] sm:$0xff]  ;;  %v84_v36 = vld [vmem:[%s4270_s2 + $0xb0] sm:$0xff] }
   0xd   :  { %2059 = vmatpush3.msra.mxu1 %v105_v21  ;;  %2005 = vmatpush3.msra.mxu0 %v72_v22  ;;  %v101_v37 = vld [vmem:[%s4270_s2 + $0x138] sm:$0xff]  ;;  %v68_v38 = vld [vmem:[%s4270_s2 + $0x30] sm:$0xff]  ;;  %v83_v40 = vld [vmem:[%s4270_s2 + $0xa8] sm:$0xff] }
   0xe   :  { %2060 = vmatprep.subr.mxu1 %v120_v23  ;;  %2006 = vmatprep.subr.mxu0 %v87_v24  ;;  %v116_v39 = vld [vmem:[%s4270_s2 + $0x1b0] sm:$0xff]  ;;  %v67_v42 = vld [vmem:[%s4270_s2 + $0x28] sm:$0xff]  ;;  %v82_v44 = vld [vmem:[%s4270_s2 + $0xa0] sm:$0xff] }
   0xf   :  { %2061 = vmatpush3.msra.mxu1 %v104_v25  ;;  %2007 = vmatpush3.msra.mxu0 %v71_v26  ;;  %v100_v41 = vld [vmem:[%s4270_s2 + $0x130] sm:$0xff]  ;;  %v115_v43 = vld [vmem:[%s4270_s2 + $0x1a8] sm:$0xff]  ;;  %v66_v46 = vld [vmem:[%s4270_s2 + $0x20] sm:$0xff] }
  0x10   :  { %2062 = vmatprep.subr.mxu1 %v119_v27  ;;  %2008 = vmatprep.subr.mxu0 %v86_v28  ;;  %v99_v45 = vld [vmem:[%s4270_s2 + $0x128] sm:$0xff]  ;;  %v114_v47 = vld [vmem:[%s4270_s2 + $0x1a0] sm:$0xff]  ;;  %v81_v48 = vld [vmem:[%s4270_s2 + $0x98] sm:$0xff] }
  0x11   :  { %2063 = vmatpush3.msra.mxu1 %v103_v29  ;;  %2009 = vmatpush3.msra.mxu0 %v70_v30  ;;  %v98_v49 = vld [vmem:[%s4270_s2 + $0x120] sm:$0xff]  ;;  %v65_v50 = vld [vmem:[%s4270_s2 + $0x18] sm:$0xff]  ;;  %v80_v52 = vld [vmem:[%s4270_s2 + $0x90] sm:$0xff] }
  0x12   :  { %2064 = vmatprep.subr.mxu1 %v118_v31  ;;  %2010 = vmatprep.subr.mxu0 %v85_v32  ;;  %v113_v51 = vld [vmem:[%s4270_s2 + $0x198] sm:$0xff]  ;;  %v64_v54 = vld [vmem:[%s4270_s2 + $0x10] sm:$0xff]  ;;  %v79_v56 = vld [vmem:[%s4270_s2 + $0x88] sm:$0xff] }
  0x13   :  { %2065 = vmatpush3.msra.mxu1 %v102_v33  ;;  %2011 = vmatpush3.msra.mxu0 %v69_v34  ;;  %v97_v53 = vld [vmem:[%s4270_s2 + $0x118] sm:$0xff]  ;;  %v112_v55 = vld [vmem:[%s4270_s2 + $0x190] sm:$0xff]  ;;  %v63_v58 = vld [vmem:[%s4270_s2 + $0x8] sm:$0xff] }
  0x14   :  { %2066 = vmatprep.subr.mxu1 %v117_v35  ;;  %2012 = vmatprep.subr.mxu0 %v84_v36  ;;  %v96_v57 = vld [vmem:[%s4270_s2 + $0x110] sm:$0xff]  ;;  %v111_v59 = vld [vmem:[%s4270_s2 + $0x188] sm:$0xff]  ;;  %v78_v60 = vld [vmem:[%s4270_s2 + $0x80] sm:$0xff] }
  0x15   :  { %2067 = vmatpush3.msra.mxu1 %v101_v37  ;;  %2013 = vmatpush3.msra.mxu0 %v68_v38  ;;  %v2865_v61 = vld [vmem:[%s4271_s0 + $0x8] sm:$0xff]  ;;  %v62_v62 = vld [vmem:[%s4270_s2] sm:$0xff]  ;;  %v133_v2 = vld [vmem:[%s4270_s2 + $0x238] sm:$0xff] }
  0x16   :  { %2068 = vmatprep.subr.mxu1 %v116_v39  ;;  %2014 = vmatprep.subr.mxu0 %v83_v40  ;;  %v95_v63 = vld [vmem:[%s4270_s2 + $0x108] sm:$0xff]  ;;  %v2876_v0 = vld [vmem:[%s4271_s0] sm:$0xff]  ;;  %v2891_v4 = vld [vmem:[%s4271_s0 + $0x18] sm:$0xff] }
  0x17   :  { %2069 = vmatpush3.msra.mxu1 %v100_v41  ;;  %2015 = vmatpush3.msra.mxu0 %v67_v42  ;;  %v110_v1 = vld [vmem:[%s4270_s2 + $0x180] sm:$0xff]  ;;  %v2897_v5 = vld [vmem:[%s4271_s0 + $0x10] sm:$0xff]  ;;  %v1785_v6 = vld [vmem:[%s4270_s2 + $0x338] sm:$0xff] }
  0x18   :  { %2070 = vmatprep.subr.mxu1 %v115_v43  ;;  %2016 = vmatprep.subr.mxu0 %v82_v44  ;;  %v94_v3 = vld [vmem:[%s4270_s2 + $0x100] sm:$0xff]  ;;  %v2905_v7 = vld [vmem:[%s4271_s0 + $0x30] sm:$0xff]  ;;  %v1769_v8 = vld [vmem:[%s4270_s2 + $0x2b8] sm:$0xff] }
  0x19   :  { %2071 = vmatpush3.msra.mxu1 %v99_v45  ;;  %2017 = vmatpush3.msra.mxu0 %v66_v46  ;;  %v2914_v9 = vld [vmem:[%s4271_s0 + $0x28] sm:$0xff]  ;;  %v132_v10 = vld [vmem:[%s4270_s2 + $0x230] sm:$0xff]  ;;  %v2926_v12 = vld [vmem:[%s4271_s0 + $0x40] sm:$0xff] }
  0x1a   :  { %2072 = vmatprep.subr.mxu1 %v114_v47  ;;  %2018 = vmatprep.subr.mxu0 %v81_v48  ;;  %v1784_v11 = vld [vmem:[%s4270_s2 + $0x330] sm:$0xff]  ;;  %v2936_v14 = vld [vmem:[%s4271_s0 + $0x38] sm:$0xff]  ;;  %v1783_v15 = vld [vmem:[%s4270_s2 + $0x328] sm:$0xff] }
  0x1b   :  { %2073 = vmatpush3.msra.mxu1 %v98_v49  ;;  %2019 = vmatpush3.msra.mxu0 %v65_v50  ;;  %v1768_v13 = vld [vmem:[%s4270_s2 + $0x2b0] sm:$0xff]  ;;  %v2945_v16 = vld [vmem:[%s4271_s0 + $0x58] sm:$0xff]  ;;  %v1767_v17 = vld [vmem:[%s4270_s2 + $0x2a8] sm:$0xff] }
  0x1c   :  { %2074 = vmatprep.subr.mxu1 %v113_v51  ;;  %2020 = vmatprep.subr.mxu0 %v80_v52  ;;  %v2953_v18 = vld [vmem:[%s4271_s0 + $0x50] sm:$0xff]  ;;  %v131_v19 = vld [vmem:[%s4270_s2 + $0x228] sm:$0xff]  ;;  %v1782_v20 = vld [vmem:[%s4270_s2 + $0x320] sm:$0xff] }
  0x1d   :  { %2075 = vmatpush3.msra.mxu1 %v97_v53  ;;  %2021 = vmatpush3.msra.mxu0 %v64_v54  ;;  %v2965_v21 = vld [vmem:[%s4271_s0 + $0x68] sm:$0xff]  ;;  %v1766_v22 = vld [vmem:[%s4270_s2 + $0x2a0] sm:$0xff]  ;;  %v1781_v24 = vld [vmem:[%s4270_s2 + $0x318] sm:$0xff] }
  0x1e   :  { %2076 = vmatprep.subr.mxu1 %v112_v55  ;;  %2022 = vmatprep.subr.mxu0 %v79_v56  ;;  %v2975_v23 = vld [vmem:[%s4271_s0 + $0x60] sm:$0xff]  ;;  %v1765_v26 = vld [vmem:[%s4270_s2 + $0x298] sm:$0xff]  ;;  %v1780_v29 = vld [vmem:[%s4270_s2 + $0x310] sm:$0xff] }
  0x1f   :  { %2077 = vmatpush3.msra.mxu1 %v96_v57  ;;  %2023 = vmatpush3.msra.mxu0 %v63_v58  ;;  %v2984_v25 = vld [vmem:[%s4271_s0 + $0x80] sm:$0xff]  ;;  %v2992_v27 = vld [vmem:[%s4271_s0 + $0x78] sm:$0xff]  ;;  %v3004_v30 = vld [vmem:[%s4271_s0 + $0x90] sm:$0xff] }
  0x20   :  { %2078 = vmatprep.subr.mxu1 %v111_v59  ;;  %2024 = vmatprep.subr.mxu0 %v78_v60  ;;  %v130_v28 = vld [vmem:[%s4270_s2 + $0x220] sm:$0xff]  ;;  %v1764_v31 = vld [vmem:[%s4270_s2 + $0x290] sm:$0xff]  ;;  %v3014_v32 = vld [vmem:[%s4271_s0 + $0x88] sm:$0xff] }
  0x21   :  { %263 = vmatprep.mubr.f32.mxu0 %v2865_v61  ;;  %2025 = vmatpush3.msra.mxu0 %v62_v62  ;;  %v1779_v33 = vld [vmem:[%s4270_s2 + $0x308] sm:$0xff]  ;;  %v3031_v36 = vld [vmem:[%s4271_s0 + $0xa0] sm:$0xff]  ;;  %v129_v37 = vld [vmem:[%s4270_s2 + $0x218] sm:$0xff] }
  0x22   :  { %2079 = vmatpush3.msra.mxu1 %v95_v63  ;;  %264 = vmatmul.mubr.f32.vlgmr.msra.gmra.mxu0 %v2876_v0  ;;  %v3023_v34 = vld [vmem:[%s4271_s0 + $0xa8] sm:$0xff]  ;;  %v1778_v38 = vld [vmem:[%s4270_s2 + $0x300] sm:$0xff]  ;;  %v3043_v39 = vld [vmem:[%s4271_s0 + $0xb8] sm:$0xff] }
  0x23   :  { %2080 = vmatprep.subr.mxu1 %v110_v1  ;;  %2506 = vmatprep.subr.mxu0 %v133_v2  ;;  %v1763_v35 = vld [vmem:[%s4270_s2 + $0x288] sm:$0xff]  ;;  %v1762_v40 = vld [vmem:[%s4270_s2 + $0x280] sm:$0xff]  ;;  %v3053_v41 = vld [vmem:[%s4271_s0 + $0xb0] sm:$0xff] }
  0x24   :  { %2081 = vmatpush3.msra.mxu1 %v94_v3  ;;  %368 = vmatprep.mubr.f32.mxu1 %v2891_v4  ;;  %v1777_v42 = vld [vmem:[%s4270_s2 + $0x2f8] sm:$0xff]  ;;  %v3062_v43 = vld [vmem:[%s4271_s0 + $0xd0] sm:$0xff]  ;;  %v3070_v45 = vld [vmem:[%s4271_s0 + $0xc8] sm:$0xff] }
  0x25   :  { %2507 = vmatpush3.msra.mxu0 %v133_v2  ;;  %369 = vmatmul.mubr.f32.vlgmr.msra.gmra.mxu1 %v2897_v5  ;;  %v1761_v44 = vld [vmem:[%s4270_s2 + $0x278] sm:$0xff]  ;;  %v128_v46 = vld [vmem:[%s4270_s2 + $0x210] sm:$0xff]  ;;  %v3082_v48 = vld [vmem:[%s4271_s0 + $0xe0] sm:$0xff] }
  0x26   :  { %2122 = vmatprep.subr.mxu1 %v1785_v6  ;;  %268 = vmatprep.mubr.f32.mxu0 %v2905_v7  ;;  %v1776_v47 = vld [vmem:[%s4270_s2 + $0x2f0] sm:$0xff]  ;;  %v3092_v50 = vld [vmem:[%s4271_s0 + $0xd8] sm:$0xff]  ;;  %v1775_v51 = vld [vmem:[%s4270_s2 + $0x2e8] sm:$0xff] }
  0x27   :  { %2123 = vmatpush3.msra.mxu1 %v1769_v8  ;;  %269 = vmatmul.mubr.f32.gmra.mxu0 %v2914_v9  ;;  %v1760_v49 = vld [vmem:[%s4270_s2 + $0x270] sm:$0xff]  ;;  %v3101_v52 = vld [vmem:[%s4271_s0 + $0xf8] sm:$0xff]  ;;  %v1759_v53 = vld [vmem:[%s4270_s2 + $0x268] sm:$0xff] }
  0x28   :  { %2508 = vmatprep.subr.mxu0 %v132_v10  ;;  %2124 = vmatprep.subr.mxu1 %v1784_v11  ;;  %v3109_v54 = vld [vmem:[%s4271_s0 + $0xf0] sm:$0xff]  ;;  %v127_v55 = vld [vmem:[%s4270_s2 + $0x208] sm:$0xff]  ;;  %v1774_v56 = vld [vmem:[%s4270_s2 + $0x2e0] sm:$0xff] }
  0x29   :  { %373 = vmatprep.mubr.f32.mxu1 %v2926_v12  ;;  %2509 = vmatpush3.msra.mxu0 %v132_v10  ;;  %v3121_v57 = vld [vmem:[%s4271_s0 + $0x108] sm:$0xff]  ;;  %v1758_v58 = vld [vmem:[%s4270_s2 + $0x260] sm:$0xff]  ;;  %v1773_v60 = vld [vmem:[%s4270_s2 + $0x2d8] sm:$0xff] }
  0x2a   :  { %2125 = vmatpush3.msra.mxu1 %v1768_v13  ;;  %273 = vmatprep.mubr.f32.mxu0 %v2945_v16  ;;  %v3131_v59 = vld [vmem:[%s4271_s0 + $0x100] sm:$0xff]  ;;  %v1757_v63 = vld [vmem:[%s4270_s2 + $0x258] sm:$0xff]  ;;  %v1772_v3 = vld [vmem:[%s4270_s2 + $0x2d0] sm:$0xff] }
  0x2b   :  { %374 = vmatmul.mubr.f32.gmra.mxu1 %v2936_v14  ;;  %2126 = vmatprep.subr.mxu1 %v1783_v15  ;;  %v3140_v62 = vld [vmem:[%s4271_s0 + $0x120] sm:$0xff]  ;;  %v3148_v1 = vld [vmem:[%s4271_s0 + $0x118] sm:$0xff]  ;;  %v3160_v6 = vld [vmem:[%s4271_s0 + $0x130] sm:$0xff] }
  0x2c   :  { %2127 = vmatpush3.msra.mxu1 %v1767_v17  ;;  %274 = vmatmul.mubr.f32.gmra.mxu0 %v2953_v18  ;;  %v126_v2 = vld [vmem:[%s4270_s2 + $0x200] sm:$0xff]  ;;  %v1756_v8 = vld [vmem:[%s4270_s2 + $0x250] sm:$0xff]  ;;  %v3170_v10 = vld [vmem:[%s4271_s0 + $0x128] sm:$0xff] }
  0x2d   :  { %2510 = vmatprep.subr.mxu0 %v131_v19  ;;  %2128 = vmatprep.subr.mxu1 %v1782_v20  ;;  %v1771_v11 = vld [vmem:[%s4270_s2 + $0x2c8] sm:$0xff]  ;;  %v3179_v13 = vld [vmem:[%s4271_s0 + $0x20] sm:$0xff]  ;;  %v1817_v17 = vld [vmem:[%s4270_s2 + $0x438] sm:$0xff] }
  0x2e   :  { %378 = vmatprep.mubr.f32.mxu1 %v2965_v21  ;;  %2511 = vmatpush3.msra.mxu0 %v131_v19  ;;  %v1755_v15 = vld [vmem:[%s4270_s2 + $0x248] sm:$0xff]  ;;  %v1770_v20 = vld [vmem:[%s4270_s2 + $0x2c0] sm:$0xff] }
  0x2f   :  { %2129 = vmatpush3.msra.mxu1 %v1766_v22  ;;  %278 = vmatprep.mubr.f32.mxu0 %v2984_v25  ;;  %v3190_v19 = vld [vmem:[%s4271_s0 + $0x48] sm:$0xff]  ;;  %v1801_v22 = vld [vmem:[%s4270_s2 + $0x3b8] sm:$0xff] }
  0x30   :  { %379 = vmatmul.mubr.f32.gmra.mxu1 %v2975_v23  ;;  %2130 = vmatprep.subr.mxu1 %v1781_v24  ;;  %v1754_v24 = vld [vmem:[%s4270_s2 + $0x240] sm:$0xff] }
  0x31   :  { %2131 = vmatpush3.msra.mxu1 %v1765_v26  ;;  %279 = vmatmul.mubr.f32.gmra.mxu0 %v2992_v27  ;;  %v1816_v26 = vld [vmem:[%s4270_s2 + $0x430] sm:$0xff] }
  0x32   :  { %2512 = vmatprep.subr.mxu0 %v130_v28  ;;  %2132 = vmatprep.subr.mxu1 %v1780_v29  ;;  %v3215_v29 = vld [vmem:[%s4271_s0 + $0x70] sm:$0xff] }
  0x33   :  { %383 = vmatprep.mubr.f32.mxu1 %v3004_v30  ;;  %2513 = vmatpush3.msra.mxu0 %v130_v28  ;;  %v1800_v28 = vld [vmem:[%s4270_s2 + $0x3b0] sm:$0xff] }
  0x34   :  { %2133 = vmatpush3.msra.mxu1 %v1764_v31  ;;  %283 = vmatprep.mubr.f32.mxu0 %v3023_v34  ;;  %v1815_v31 = vld [vmem:[%s4270_s2 + $0x428] sm:$0xff] }
  0x35   :  { %384 = vmatmul.mubr.f32.gmra.mxu1 %v3014_v32  ;;  %2134 = vmatprep.subr.mxu1 %v1779_v33  ;;  %v3224_v33 = vld [vmem:[%s4271_s0 + $0x98] sm:$0xff] }
  0x36   :  { %2135 = vmatpush3.msra.mxu1 %v1763_v35  ;;  %284 = vmatmul.mubr.f32.gmra.mxu0 %v3031_v36  ;;  %v1799_v35 = vld [vmem:[%s4270_s2 + $0x3a8] sm:$0xff] }
  0x37   :  { %2514 = vmatprep.subr.mxu0 %v129_v37  ;;  %2136 = vmatprep.subr.mxu1 %v1778_v38  ;;  %v1798_v38 = vld [vmem:[%s4270_s2 + $0x3a0] sm:$0xff] }
  0x38   :  { %388 = vmatprep.mubr.f32.mxu1 %v3043_v39  ;;  %2515 = vmatpush3.msra.mxu0 %v129_v37  ;;  %v1814_v37 = vld [vmem:[%s4270_s2 + $0x420] sm:$0xff] }
  0x39   :  { %2137 = vmatpush3.msra.mxu1 %v1762_v40  ;;  %288 = vmatprep.mubr.f32.mxu0 %v3062_v43  ;;  %v3243_v40 = vld [vmem:[%s4271_s0 + $0xc0] sm:$0xff] }
  0x3a   :  { %389 = vmatmul.mubr.f32.gmra.mxu1 %v3053_v41  ;;  %2138 = vmatprep.subr.mxu1 %v1777_v42  ;;  %v1813_v42 = vld [vmem:[%s4270_s2 + $0x418] sm:$0xff] }
  0x3b   :  { %2139 = vmatpush3.msra.mxu1 %v1761_v44  ;;  %289 = vmatmul.mubr.f32.gmra.mxu0 %v3070_v45  ;;  %v3252_v44 = vld [vmem:[%s4271_s0 + $0xe8] sm:$0xff] }
  0x3c   :  { %2516 = vmatprep.subr.mxu0 %v128_v46  ;;  %2140 = vmatprep.subr.mxu1 %v1776_v47  ;;  %v1812_v47 = vld [vmem:[%s4270_s2 + $0x410] sm:$0xff] }
  0x3d   :  { %393 = vmatprep.mubr.f32.mxu1 %v3082_v48  ;;  %2517 = vmatpush3.msra.mxu0 %v128_v46  ;;  %v1797_v46 = vld [vmem:[%s4270_s2 + $0x398] sm:$0xff] }
  0x3e   :  { %2141 = vmatpush3.msra.mxu1 %v1760_v49  ;;  %293 = vmatprep.mubr.f32.mxu0 %v3101_v52  ;;  %v1796_v49 = vld [vmem:[%s4270_s2 + $0x390] sm:$0xff] }
  0x3f   :  { %394 = vmatmul.mubr.f32.gmra.mxu1 %v3092_v50  ;;  %2142 = vmatprep.subr.mxu1 %v1775_v51  ;;  %v3271_v51 = vld [vmem:[%s4271_s0 + $0x110] sm:$0xff] }
  0x40   :  { %2143 = vmatpush3.msra.mxu1 %v1759_v53  ;;  %294 = vmatmul.mubr.f32.gmra.mxu0 %v3109_v54  ;;  %v1811_v53 = vld [vmem:[%s4270_s2 + $0x408] sm:$0xff] }
  0x41   :  { %2518 = vmatprep.subr.mxu0 %v127_v55  ;;  %2144 = vmatprep.subr.mxu1 %v1774_v56  ;;  %v1795_v56 = vld [vmem:[%s4270_s2 + $0x388] sm:$0xff] }
  0x42   :  { %398 = vmatprep.mubr.f32.mxu1 %v3121_v57  ;;  %2519 = vmatpush3.msra.mxu0 %v127_v55  ;;  %v3280_v55 = vld [vmem:[%s4271_s0 + $0x138] sm:$0xff] }
  0x43   :  { %2145 = vmatpush3.msra.mxu1 %v1758_v58  ;;  %298 = vmatprep.mubr.f32.mxu0 %v3140_v62  ;;  %v1810_v58 = vld [vmem:[%s4270_s2 + $0x400] sm:$0xff] }
  0x44   :  { %399 = vmatmul.mubr.f32.gmra.mxu1 %v3131_v59  ;;  %2146 = vmatprep.subr.mxu1 %v1773_v60  ;;  %v1794_v60 = vld [vmem:[%s4270_s2 + $0x380] sm:$0xff] }
  0x45   :  { %2147 = vmatpush3.msra.mxu1 %v1757_v63  ;;  %299 = vmatmul.mubr.f32.gmra.mxu0 %v3148_v1  ;;  %v1809_v63 = vld [vmem:[%s4270_s2 + $0x3f8] sm:$0xff] }
  0x46   :  { %2520 = vmatprep.subr.mxu0 %v126_v2  ;;  %2148 = vmatprep.subr.mxu1 %v1772_v3  ;;  %v1793_v3 = vld [vmem:[%s4270_s2 + $0x378] sm:$0xff] }
  0x47   :  { %403 = vmatprep.mubr.f32.mxu1 %v3160_v6  ;;  %2521 = vmatpush3.msra.mxu0 %v126_v2  ;;  %v1825_v2 = vld [vmem:[%s4270_s2 + $0x478] sm:$0xff] }
  0x48   :  { %2149 = vmatpush3.msra.mxu1 %v1756_v8  ;;  %2522 = vmatprep.mubr.msk.f32.mxu0 %vm174_vm0, %v3179_v13  ;;  %v1808_v8 = vld [vmem:[%s4270_s2 + $0x3f0] sm:$0xff] }
  0x49   :  { %404 = vmatmul.mubr.f32.gmra.mxu1 %v3170_v10  ;;  %2150 = vmatprep.subr.mxu1 %v1771_v11  ;;  %v1792_v11 = vld [vmem:[%s4270_s2 + $0x370] sm:$0xff] }
  0x4a   :  { %2151 = vmatpush3.msra.mxu1 %v1755_v15  ;;  %2178 = vmatprep.subr.mxu0 %v1817_v17  ;;  %v1824_v15 = vld [vmem:[%s4270_s2 + $0x470] sm:$0xff]  ;;  %v1807_v17 = vld [vmem:[%s4270_s2 + $0x3e8] sm:$0xff] }
  0x4b   :  { %2523 = vmatmul.mubr.msk.f32.vlgmr.msra.gmra.mxu0 %vm174_vm0, %v3190_v19  ;;  %2152 = vmatprep.subr.mxu1 %v1770_v20  ;;  %v1791_v20 = vld [vmem:[%s4270_s2 + $0x368] sm:$0xff] }
  0x4c   :  { %2179 = vmatpush3.msra.mxu0 %v1801_v22  ;;  %2153 = vmatpush3.msra.mxu1 %v1754_v24  ;;  %v1806_v22 = vld [vmem:[%s4270_s2 + $0x3e0] sm:$0xff]  ;;  %v1823_v24 = vld [vmem:[%s4270_s2 + $0x468] sm:$0xff] }
  0x4d   :  { %659 = vmatprep.mubr.f32.mxu1 %v2865_v61  ;;  %2180 = vmatprep.subr.mxu0 %v1816_v26  ;;  %v1790_v26 = vld [vmem:[%s4270_s2 + $0x360] sm:$0xff] }
  0x4e   :  { %660 = vmatmul.mubr.f32.vlgmr.msra.gmra.mxu1 %v2876_v0  ;;  %2181 = vmatpush3.msra.mxu0 %v1800_v28  ;;  %v1805_v28 = vld [vmem:[%s4270_s2 + $0x3d8] sm:$0xff] }
  0x4f   :  { %2525 = vmatprep.mubr.msk.f32.mxu0 %vm174_vm0, %v3215_v29  ;;  %2182 = vmatprep.subr.mxu0 %v1815_v31  ;;  %v1822_v31 = vld [vmem:[%s4270_s2 + $0x460] sm:$0xff] }
  0x50   :  { %2526 = vmatmul.mubr.msk.f32.gmra.mxu0 %vm174_vm0, %v3224_v33  ;;  %664 = vmatprep.mubr.f32.mxu1 %v2905_v7 }
  0x51   :  { %2183 = vmatpush3.msra.mxu0 %v1799_v35  ;;  %2528 = vmatprep.mubr.msk.f32.mxu0 %vm174_vm0, %v3243_v40  ;;  %v1789_v35 = vld [vmem:[%s4270_s2 + $0x358] sm:$0xff] }
  0x52   :  { %2184 = vmatprep.subr.mxu0 %v1814_v37  ;;  %665 = vmatmul.mubr.f32.gmra.mxu1 %v2914_v9  ;;  %v1804_v37 = vld [vmem:[%s4270_s2 + $0x3d0] sm:$0xff] }
  0x53   :  { %2185 = vmatpush3.msra.mxu0 %v1798_v38  ;;  %669 = vmatprep.mubr.f32.mxu1 %v2945_v16  ;;  %v1821_v38 = vld [vmem:[%s4270_s2 + $0x458] sm:$0xff] }
  0x54   :  { %2186 = vmatprep.subr.mxu0 %v1813_v42  ;;  %2529 = vmatmul.mubr.msk.f32.gmra.mxu0 %vm174_vm0, %v3252_v44  ;;  %v1788_v42 = vld [vmem:[%s4270_s2 + $0x350] sm:$0xff] }
  0x55   :  { %2187 = vmatpush3.msra.mxu0 %v1797_v46  ;;  %2531 = vmatprep.mubr.msk.f32.mxu0 %vm174_vm0, %v3271_v51  ;;  %v1803_v46 = vld [vmem:[%s4270_s2 + $0x3c8] sm:$0xff] }
  0x56   :  { %2188 = vmatprep.subr.mxu0 %v1812_v47  ;;  %670 = vmatmul.mubr.f32.gmra.mxu1 %v2953_v18  ;;  %v1820_v47 = vld [vmem:[%s4270_s2 + $0x450] sm:$0xff] }
  0x57   :  { %2189 = vmatpush3.msra.mxu0 %v1796_v49  ;;  %674 = vmatprep.mubr.f32.mxu1 %v2984_v25  ;;  %v1787_v49 = vld [vmem:[%s4270_s2 + $0x348] sm:$0xff] }
  0x58   :  { %2190 = vmatprep.subr.mxu0 %v1811_v53  ;;  %2532 = vmatmul.mubr.msk.f32.gmra.mxu0 %vm174_vm0, %v3280_v55  ;;  %v1802_v53 = vld [vmem:[%s4270_s2 + $0x3c0] sm:$0xff] }
  0x59   :  { %2191 = vmatpush3.msra.mxu0 %v1795_v56  ;;  %2534 = vmatprep.subr.mxu1 %v1825_v2  ;;  %v1819_v56 = vld [vmem:[%s4270_s2 + $0x448] sm:$0xff] }
  0x5a   :  { %2192 = vmatprep.subr.mxu0 %v1810_v58  ;;  %675 = vmatmul.mubr.f32.gmra.mxu1 %v2992_v27  ;;  %v1786_v58 = vld [vmem:[%s4270_s2 + $0x340] sm:$0xff] }
  0x5b   :  { %2193 = vmatpush3.msra.mxu0 %v1794_v60  ;;  %679 = vmatprep.mubr.f32.mxu1 %v3023_v34  ;;  %v1818_v60 = vld [vmem:[%s4270_s2 + $0x440] sm:$0xff] }
  0x5c   :  { %2194 = vmatprep.subr.mxu0 %v1809_v63  ;;  %2535 = vmatpush3.msra.mxu1 %v1825_v2  ;;  %v1865_v63 = vld [vmem:[%s4270_s2 + $0x578] sm:$0xff] }
  0x5d   :  { %2195 = vmatpush3.msra.mxu0 %v1793_v3  ;;  %2536 = vmatprep.subr.mxu1 %v1824_v15  ;;  %v1849_v2 = vld [vmem:[%s4270_s2 + $0x4f8] sm:$0xff]  ;;  %v1864_v3 = vld [vmem:[%s4270_s2 + $0x570] sm:$0xff] }
  0x5e   :  { %2196 = vmatprep.subr.mxu0 %v1808_v8  ;;  %680 = vmatmul.mubr.f32.gmra.mxu1 %v3031_v36  ;;  %v1897_v8 = vld [vmem:[%s4270_s2 + $0x678] sm:$0xff] }
  0x5f   :  { %2197 = vmatpush3.msra.mxu0 %v1792_v11  ;;  %2537 = vmatpush3.msra.mxu1 %v1824_v15  ;;  %v1848_v11 = vld [vmem:[%s4270_s2 + $0x4f0] sm:$0xff]  ;;  %v1881_v15 = vld [vmem:[%s4270_s2 + $0x5f8] sm:$0xff] }
  0x60   :  { %2198 = vmatprep.subr.mxu0 %v1807_v17  ;;  %684 = vmatprep.mubr.f32.mxu1 %v3062_v43  ;;  %v1863_v17 = vld [vmem:[%s4270_s2 + $0x568] sm:$0xff] }
  0x61   :  { %2199 = vmatpush3.msra.mxu0 %v1791_v20  ;;  %2538 = vmatprep.subr.mxu1 %v1823_v24  ;;  %v1896_v20 = vld [vmem:[%s4270_s2 + $0x670] sm:$0xff] }
  0x62   :  { %2200 = vmatprep.subr.mxu0 %v1806_v22  ;;  %685 = vmatmul.mubr.f32.gmra.mxu1 %v3070_v45  ;;  %v1847_v22 = vld [vmem:[%s4270_s2 + $0x4e8] sm:$0xff] }
  0x63   :  { %2201 = vmatpush3.msra.mxu0 %v1790_v26  ;;  %2539 = vmatpush3.msra.mxu1 %v1823_v24  ;;  %v1880_v24 = vld [vmem:[%s4270_s2 + $0x5f0] sm:$0xff]  ;;  %v1862_v26 = vld [vmem:[%s4270_s2 + $0x560] sm:$0xff] }
  0x64   :  { %2202 = vmatprep.subr.mxu0 %v1805_v28  ;;  %2540 = vmatprep.subr.mxu1 %v1822_v31  ;;  %v1895_v28 = vld [vmem:[%s4270_s2 + $0x668] sm:$0xff] }
  0x65   :  { %2203 = vmatpush3.msra.mxu0 %v1789_v35  ;;  %2541 = vmatpush3.msra.mxu1 %v1822_v31  ;;  %v1846_v31 = vld [vmem:[%s4270_s2 + $0x4e0] sm:$0xff]  ;;  %v1879_v35 = vld [vmem:[%s4270_s2 + $0x5e8] sm:$0xff] }
  0x66   :  { %689 = vmatprep.mubr.f32.mxu1 %v3101_v52  ;;  %2204 = vmatprep.subr.mxu0 %v1804_v37  ;;  %v1861_v37 = vld [vmem:[%s4270_s2 + $0x558] sm:$0xff] }
  0x67   :  { %2542 = vmatprep.subr.mxu1 %v1821_v38  ;;  %690 = vmatmul.mubr.f32.gmra.mxu1 %v3109_v54 }
  0x68   :  { %2205 = vmatpush3.msra.mxu0 %v1788_v42  ;;  %2543 = vmatpush3.msra.mxu1 %v1821_v38  ;;  %v1894_v38 = vld [vmem:[%s4270_s2 + $0x660] sm:$0xff]  ;;  %v1845_v42 = vld [vmem:[%s4270_s2 + $0x4d8] sm:$0xff] }
  0x69   :  { %2206 = vmatprep.subr.mxu0 %v1803_v46  ;;  %2544 = vmatprep.subr.mxu1 %v1820_v47  ;;  %v1878_v46 = vld [vmem:[%s4270_s2 + $0x5e0] sm:$0xff] }
  0x6a   :  { %2207 = vmatpush3.msra.mxu0 %v1787_v49  ;;  %2545 = vmatpush3.msra.mxu1 %v1820_v47  ;;  %v54_v47 = vld [vmem:[%s4272_s1] sm:$0xff]  ;;  %v1860_v49 = vld [vmem:[%s4270_s2 + $0x550] sm:$0xff] }
  0x6b   :  { %694 = vmatprep.mubr.f32.mxu1 %v3140_v62  ;;  %2208 = vmatprep.subr.mxu0 %v1802_v53  ;;  %v1893_v53 = vld [vmem:[%s4270_s2 + $0x658] sm:$0xff] }
  0x6c   :  { %2546 = vmatprep.subr.mxu1 %v1819_v56  ;;  %695 = vmatmul.mubr.f32.gmra.mxu1 %v3148_v1 }
  0x6d   :  { %2209 = vmatpush3.msra.mxu0 %v1786_v58  ;;  %764 = vmatprep.mubr.f32.mxu0 %v2891_v4  ;;  %v1877_v58 = vld [vmem:[%s4270_s2 + $0x5d8] sm:$0xff] }
  0x6e   :  { %2547 = vmatpush3.msra.mxu1 %v1819_v56  ;;  %765 = vmatmul.mubr.f32.vlgmr.msra.gmra.mxu0 %v2897_v5  ;;  %v1844_v56 = vld [vmem:[%s4270_s2 + $0x4d0] sm:$0xff] }
  0x6f   :  { %2548 = vmatprep.subr.mxu1 %v1818_v60  ;;  %2250 = vmatprep.subr.mxu0 %v1865_v63  ;;  %v1892_v63 = vld [vmem:[%s4270_s2 + $0x650] sm:$0xff] }
  0x70   :  { %2549 = vmatpush3.msra.mxu1 %v1818_v60  ;;  %2251 = vmatpush3.msra.mxu0 %v1849_v2  ;;  %v1859_v60 = vld [vmem:[%s4270_s2 + $0x548] sm:$0xff] }
  0x71   :  { %2550 = vmatprep.mubr.msk.f32.mxu1 %vm174_vm0, %v3179_v13  ;;  %2252 = vmatprep.subr.mxu0 %v1864_v3  ;;  %v1843_v2 = vld [vmem:[%s4270_s2 + $0x4c8] sm:$0xff]  ;;  %v1876_v3 = vld [vmem:[%s4270_s2 + $0x5d0] sm:$0xff] }
  0x72   :  { %2306 = vmatprep.subr.mxu1 %v1897_v8  ;;  %769 = vmatprep.mubr.f32.mxu0 %v2926_v12  ;;  %v55_v8 = vld [vmem:[%s4272_s1 + $0x8] sm:$0xff] }
  0x73   :  { %2551 = vmatmul.mubr.msk.f32.vlgmr.msra.gmra.mxu1 %vm174_vm0, %v3190_v19  ;;  %2253 = vmatpush3.msra.mxu0 %v1848_v11  ;;  %v1858_v11 = vld [vmem:[%s4270_s2 + $0x540] sm:$0xff] }
  0x74   :  { %2307 = vmatpush3.msra.mxu1 %v1881_v15  ;;  %770 = vmatmul.mubr.f32.gmra.mxu0 %v2936_v14  ;;  %v1891_v15 = vld [vmem:[%s4270_s2 + $0x648] sm:$0xff] }
  0x75   :  { %2254 = vmatprep.subr.mxu0 %v1863_v17  ;;  %2308 = vmatprep.subr.mxu1 %v1896_v20  ;;  %v1842_v17 = vld [vmem:[%s4270_s2 + $0x4c0] sm:$0xff]  ;;  %v1875_v20 = vld [vmem:[%s4270_s2 + $0x5c8] sm:$0xff] }
  0x76   :  { %2255 = vmatpush3.msra.mxu0 %v1847_v22  ;;  %2309 = vmatpush3.msra.mxu1 %v1880_v24  ;;  %v1857_v22 = vld [vmem:[%s4270_s2 + $0x538] sm:$0xff]  ;;  %v1890_v24 = vld [vmem:[%s4270_s2 + $0x640] sm:$0xff] }
  0x77   :  { %2256 = vmatprep.subr.mxu0 %v1862_v26  ;;  %2310 = vmatprep.subr.mxu1 %v1895_v28  ;;  %v1841_v26 = vld [vmem:[%s4270_s2 + $0x4b8] sm:$0xff]  ;;  %v1874_v28 = vld [vmem:[%s4270_s2 + $0x5c0] sm:$0xff] }
  0x78   :  { %774 = vmatprep.mubr.f32.mxu0 %v2965_v21  ;;  %2257 = vmatpush3.msra.mxu0 %v1846_v31  ;;  %v56_v31 = vld [vmem:[%s4272_s1 + $0x10] sm:$0xff] }
  0x79   :  { %2311 = vmatpush3.msra.mxu1 %v1879_v35  ;;  %775 = vmatmul.mubr.f32.gmra.mxu0 %v2975_v23  ;;  %v1856_v35 = vld [vmem:[%s4270_s2 + $0x530] sm:$0xff] }
  0x7a   :  { %2258 = vmatprep.subr.mxu0 %v1861_v37  ;;  %2312 = vmatprep.subr.mxu1 %v1894_v38  ;;  %v1889_v37 = vld [vmem:[%s4270_s2 + $0x638] sm:$0xff]  ;;  %v1840_v38 = vld [vmem:[%s4270_s2 + $0x4b0] sm:$0xff] }
  0x7b   :  { %2259 = vmatpush3.msra.mxu0 %v1845_v42  ;;  %2313 = vmatpush3.msra.mxu1 %v1878_v46  ;;  %v1873_v42 = vld [vmem:[%s4270_s2 + $0x5b8] sm:$0xff]  ;;  %v1855_v46 = vld [vmem:[%s4270_s2 + $0x528] sm:$0xff] }
  0x7c   :  { %136 = vperm.xlu0 %2619, %v54_v47   ;;  %2260 = vmatprep.subr.mxu0 %v1860_v49  ;;  %v1888_v47 = vld [vmem:[%s4270_s2 + $0x630] sm:$0xff]  ;;  %v1839_v49 = vld [vmem:[%s4270_s2 + $0x4a8] sm:$0xff] }
  0x7d   :  { %2314 = vmatprep.subr.mxu1 %v1893_v53  ;;  %779 = vmatprep.mubr.f32.mxu0 %v3004_v30  ;;  %v1872_v53 = vld [vmem:[%s4270_s2 + $0x5b0] sm:$0xff] }
  0x7e   :  { %2553 = vmatprep.mubr.msk.f32.mxu1 %vm174_vm0, %v3215_v29  ;;  %2261 = vmatpush3.msra.mxu0 %v1844_v56  ;;  %v57_v56 = vld [vmem:[%s4272_s1 + $0x18] sm:$0xff] }
  0x7f   :  { %2315 = vmatpush3.msra.mxu1 %v1877_v58  ;;  %780 = vmatmul.mubr.f32.gmra.mxu0 %v3014_v32  ;;  %v1854_v58 = vld [vmem:[%s4270_s2 + $0x520] sm:$0xff] }
  0x80   :  { %2554 = vmatmul.mubr.msk.f32.gmra.mxu1 %vm174_vm0, %v3224_v33  ;;  %2262 = vmatprep.subr.mxu0 %v1859_v60  ;;  %v1887_v60 = vld [vmem:[%s4270_s2 + $0x628] sm:$0xff] }
  0x81   :  { %2316 = vmatprep.subr.mxu1 %v1892_v63  ;;  %2263 = vmatpush3.msra.mxu0 %v1843_v2  ;;  %v1838_v63 = vld [vmem:[%s4270_s2 + $0x4a0] sm:$0xff]  ;;  %v1871_v2 = vld [vmem:[%s4270_s2 + $0x5a8] sm:$0xff] }
  0x82   :  { %2317 = vmatpush3.msra.mxu1 %v1876_v3  ;;  %141 = vperm.xlu0 %2619, %v55_v8   ;;  %v1853_v3 = vld [vmem:[%s4270_s2 + $0x518] sm:$0xff]  ;;  %v1886_v8 = vld [vmem:[%s4270_s2 + $0x620] sm:$0xff] }
  0x83   :  { %2264 = vmatprep.subr.mxu0 %v1858_v11  ;;  %2318 = vmatprep.subr.mxu1 %v1891_v15  ;;  %v1837_v11 = vld [vmem:[%s4270_s2 + $0x498] sm:$0xff]  ;;  %v1870_v15 = vld [vmem:[%s4270_s2 + $0x5a0] sm:$0xff] }
  0x84   :  { %784 = vmatprep.mubr.f32.mxu0 %v3043_v39  ;;  %2265 = vmatpush3.msra.mxu0 %v1842_v17  ;;  %v58_v17 = vld [vmem:[%s4272_s1 + $0x20] sm:$0xff] }
  0x85   :  { %2319 = vmatpush3.msra.mxu1 %v1875_v20  ;;  %785 = vmatmul.mubr.f32.gmra.mxu0 %v3053_v41  ;;  %v1852_v20 = vld [vmem:[%s4270_s2 + $0x510] sm:$0xff] }
  0x86   :  { %2266 = vmatprep.subr.mxu0 %v1857_v22  ;;  %2320 = vmatprep.subr.mxu1 %v1890_v24  ;;  %v1885_v22 = vld [vmem:[%s4270_s2 + $0x618] sm:$0xff]  ;;  %v1836_v24 = vld [vmem:[%s4270_s2 + $0x490] sm:$0xff] }
  0x87   :  { %2267 = vmatpush3.msra.mxu0 %v1841_v26  ;;  %2321 = vmatpush3.msra.mxu1 %v1874_v28  ;;  %v1869_v26 = vld [vmem:[%s4270_s2 + $0x598] sm:$0xff]  ;;  %v1851_v28 = vld [vmem:[%s4270_s2 + $0x508] sm:$0xff] }
  0x88   :  { %146 = vperm.xlu1 %2620, %v56_v31   ;;  %2268 = vmatprep.subr.mxu0 %v1856_v35  ;;  %v1884_v31 = vld [vmem:[%s4270_s2 + $0x610] sm:$0xff]  ;;  %v1835_v35 = vld [vmem:[%s4270_s2 + $0x488] sm:$0xff] }
  0x89   :  { %2322 = vmatprep.subr.mxu1 %v1889_v37  ;;  %789 = vmatprep.mubr.f32.mxu0 %v3082_v48  ;;  %v1868_v37 = vld [vmem:[%s4270_s2 + $0x590] sm:$0xff] }
  0x8a   :  { %2556 = vmatprep.mubr.msk.f32.mxu1 %vm174_vm0, %v3243_v40  ;;  %2269 = vmatpush3.msra.mxu0 %v1840_v38  ;;  %v59_v38 = vld [vmem:[%s4272_s1 + $0x28] sm:$0xff] }
  0x8b   :  { %2323 = vmatpush3.msra.mxu1 %v1873_v42  ;;  %790 = vmatmul.mubr.f32.gmra.mxu0 %v3092_v50  ;;  %v1850_v42 = vld [vmem:[%s4270_s2 + $0x500] sm:$0xff] }
  0x8c   :  { %2557 = vmatmul.mubr.msk.f32.gmra.mxu1 %vm174_vm0, %v3252_v44  ;;  %2270 = vmatprep.subr.mxu0 %v1855_v46  ;;  %v1883_v46 = vld [vmem:[%s4270_s2 + $0x608] sm:$0xff] }
  0x8d   :  { %2324 = vmatprep.subr.mxu1 %v1888_v47  ;;  %2271 = vmatpush3.msra.mxu0 %v1839_v49  ;;  %v1834_v47 = vld [vmem:[%s4270_s2 + $0x480] sm:$0xff]  ;;  %v1867_v49 = vld [vmem:[%s4270_s2 + $0x588] sm:$0xff] }
  0x8e   :  { %2325 = vmatpush3.msra.mxu1 %v1872_v53  ;;  %151 = vperm.xlu1 %2620, %v57_v56   ;;  %v1882_v53 = vld [vmem:[%s4270_s2 + $0x600] sm:$0xff]  ;;  %v1905_v56 = vld [vmem:[%s4270_s2 + $0x6b8] sm:$0xff] }
  0x8f   :  { %2272 = vmatprep.subr.mxu0 %v1854_v58  ;;  %2326 = vmatprep.subr.mxu1 %v1887_v60  ;;  %v1866_v58 = vld [vmem:[%s4270_s2 + $0x580] sm:$0xff]  ;;  %v60_v60 = vld [vmem:[%s4272_s1 + $0x30] sm:$0xff] }
  0x90   :  { %794 = vmatprep.mubr.f32.mxu0 %v3121_v57  ;;  %2273 = vmatpush3.msra.mxu0 %v1838_v63  ;;  %v1945_v63 = vld [vmem:[%s4270_s2 + $0x7b8] sm:$0xff] }
  0x91   :  { %2327 = vmatpush3.msra.mxu1 %v1871_v2  ;;  %795 = vmatmul.mubr.f32.gmra.mxu0 %v3131_v59  ;;  %v1944_v2 = vld [vmem:[%s4270_s2 + $0x7b0] sm:$0xff] }
  0x92   :  { %2274 = vmatprep.subr.mxu0 %v1853_v3  ;;  %2328 = vmatprep.subr.mxu1 %v1886_v8  ;;  %v1942_v3 = vld [vmem:[%s4270_s2 + $0x7a0] sm:$0xff]  ;;  %v1925_v8 = vld [vmem:[%s4270_s2 + $0x718] sm:$0xff] }
  0x93   :  { %2275 = vmatpush3.msra.mxu0 %v1837_v11  ;;  %2329 = vmatpush3.msra.mxu1 %v1870_v15  ;;  %v1923_v11 = vld [vmem:[%s4270_s2 + $0x708] sm:$0xff]  ;;  %v1921_v15 = vld [vmem:[%s4270_s2 + $0x6f8] sm:$0xff] }
  0x94   :  { %156 = vperm.xlu0 %2619, %v58_v17   ;;  %2276 = vmatprep.subr.mxu0 %v1852_v20  ;;  %v1919_v17 = vld [vmem:[%s4270_s2 + $0x6e8] sm:$0xff]  ;;  %v1917_v20 = vld [vmem:[%s4270_s2 + $0x6d8] sm:$0xff] }
  0x95   :  { %2330 = vmatprep.subr.mxu1 %v1885_v22  ;;  %799 = vmatprep.mubr.f32.mxu0 %v3160_v6  ;;  %v1915_v22 = vld [vmem:[%s4270_s2 + $0x6c8] sm:$0xff] }
  0x96   :  { %2559 = vmatprep.mubr.msk.f32.mxu1 %vm174_vm0, %v3271_v51  ;;  %2277 = vmatpush3.msra.mxu0 %v1836_v24  ;;  %v1930_v24 = vld [vmem:[%s4270_s2 + $0x740] sm:$0xff] }
  0x97   :  { %2331 = vmatpush3.msra.mxu1 %v1869_v26  ;;  %800 = vmatmul.mubr.f32.gmra.mxu0 %v3170_v10  ;;  %v1914_v26 = vld [vmem:[%s4270_s2 + $0x6c0] sm:$0xff] }
  0x98   :  { %2560 = vmatmul.mubr.msk.f32.gmra.mxu1 %vm174_vm0, %v3280_v55  ;;  %2278 = vmatprep.subr.mxu0 %v1851_v28  ;;  %v1975_v28 = vld [vmem:[%s4270_s2 + $0x8a8] sm:$0xff] }
  0x99   :  { %2332 = vmatprep.subr.mxu1 %v1884_v31  ;;  %2279 = vmatpush3.msra.mxu0 %v1835_v35  ;;  %v2621_v31 = vld [vmem:[%s4271_s0 + $0x8] sm:$0xff]  ;;  %v2622_v35 = vld [vmem:[%s4271_s0] sm:$0xff] }
  0x9a   :  { %2333 = vmatpush3.msra.mxu1 %v1868_v37  ;;  %161 = vperm.xlu1 %2620, %v59_v38   ;;  %v1974_v37 = vld [vmem:[%s4270_s2 + $0x8a0] sm:$0xff] }
  0x9b   :  { %2280 = vmatprep.subr.mxu0 %v1850_v42  ;;  %2334 = vmatprep.subr.mxu1 %v1883_v46  ;;  %v1958_v38 = vld [vmem:[%s4270_s2 + $0x820] sm:$0xff]  ;;  %v1973_v42 = vld [vmem:[%s4270_s2 + $0x898] sm:$0xff]  ;;  %v2624_v46 = vld [vmem:[%s4271_s0 + $0x28] sm:$0xff] }
  0x9c   :  { %2281 = vmatpush3.msra.mxu0 %v1834_v47  ;;  %1063 = vmatprep.mubr.f32.mxu0 %v2865_v61  ;;  %v1904_v61 = vld [vmem:[%s4270_s2 + $0x6b0] sm:$0xff] }
  0x9d   :  { %2335 = vmatpush3.msra.mxu1 %v1867_v49  ;;  %1064 = vmatmul.mubr.f32.vlgmr.msra.gmra.mxu0 %v2876_v0  ;;  %v1929_v0 = vld [vmem:[%s4270_s2 + $0x738] sm:$0xff]  ;;  %v1972_v47 = vld [vmem:[%s4270_s2 + $0x890] sm:$0xff] }
  0x9e   :  { %2336 = vmatprep.subr.mxu1 %v1882_v53  ;;  %2562 = vmatprep.subr.mxu0 %v1905_v56  ;;  %v2625_v49 = vld [vmem:[%s4271_s0 + $0x58] sm:$0xff]  ;;  %v1971_v53 = vld [vmem:[%s4270_s2 + $0x888] sm:$0xff] }
  0x9f   :  { %2337 = vmatpush3.msra.mxu1 %v1866_v58  ;;  %1168 = vmatprep.mubr.f32.mxu1 %v2891_v4  ;;  %v61_v4 = vld [vmem:[%s4272_s1 + $0x38] sm:$0xff]  ;;  %v1970_v58 = vld [vmem:[%s4270_s2 + $0x880] sm:$0xff] }
  0xa0   :  { %2563 = vmatpush3.msra.mxu0 %v1905_v56  ;;  %166 = vperm.xlu0 %2619, %v60_v60   ;;  %v2626_v56 = vld [vmem:[%s4271_s0 + $0x50] sm:$0xff]  ;;  %v1985_v60 = vld [vmem:[%s4270_s2 + $0x8f8] sm:$0xff] }
  0xa1   :  { %1169 = vmatmul.mubr.f32.vlgmr.msra.gmra.mxu1 %v2897_v5  ;;  %1068 = vmatprep.mubr.f32.mxu0 %v2905_v7  ;;  %v1928_v5 = vld [vmem:[%s4270_s2 + $0x730] sm:$0xff]  ;;  %v1943_v7 = vld [vmem:[%s4270_s2 + $0x7a8] sm:$0xff] }
  0xa2   :  { %2378 = vmatprep.subr.mxu1 %v1945_v63  ;;  %1069 = vmatmul.mubr.f32.gmra.mxu0 %v2914_v9  ;;  %v1903_v9 = vld [vmem:[%s4270_s2 + $0x6a8] sm:$0xff]  ;;  %v2627_v63 = vld [vmem:[%s4271_s0 + $0x80] sm:$0xff] }
  0xa3   :  { %2564 = vmatprep.subr.mxu0 %v1904_v61  ;;  %2379 = vmatpush3.msra.mxu1 %v1929_v0  ;;  %v1953_v0 = vld [vmem:[%s4270_s2 + $0x7f8] sm:$0xff] }
  0xa4   :  { %1173 = vmatprep.mubr.f32.mxu1 %v2926_v12  ;;  %2565 = vmatpush3.msra.mxu0 %v1904_v61  ;;  %v1927_v12 = vld [vmem:[%s4270_s2 + $0x728] sm:$0xff]  ;;  %v1969_v61 = vld [vmem:[%s4270_s2 + $0x878] sm:$0xff] }
  0xa5   :  { %2380 = vmatprep.subr.mxu1 %v1944_v2  ;;  %171 = vperm.xlu1 %2620, %v61_v4   ;;  %v1968_v2 = vld [vmem:[%s4270_s2 + $0x870] sm:$0xff] }
  0xa6   :  { %1174 = vmatmul.mubr.f32.gmra.mxu1 %v2936_v14  ;;  %1073 = vmatprep.mubr.f32.mxu0 %v2945_v16  ;;  %v1926_v14 = vld [vmem:[%s4270_s2 + $0x720] sm:$0xff]  ;;  %v1941_v16 = vld [vmem:[%s4270_s2 + $0x798] sm:$0xff]  ;;  %v1984_v4 = vld [vmem:[%s4270_s2 + $0x8f0] sm:$0xff] }
  0xa7   :  { %2381 = vmatpush3.msra.mxu1 %v1928_v5  ;;  %1074 = vmatmul.mubr.f32.gmra.mxu0 %v2953_v18  ;;  %v1902_v18 = vld [vmem:[%s4270_s2 + $0x6a0] sm:$0xff]  ;;  %v2629_v5 = vld [vmem:[%s4271_s0 + $0xa8] sm:$0xff] }
  0xa8   :  { %2382 = vmatprep.subr.mxu1 %v1943_v7  ;;  %2566 = vmatprep.subr.mxu0 %v1903_v9  ;;  %v1952_v7 = vld [vmem:[%s4270_s2 + $0x7f0] sm:$0xff] }
  0xa9   :  { %2383 = vmatpush3.msra.mxu1 %v1927_v12  ;;  %1178 = vmatprep.mubr.f32.mxu1 %v2965_v21  ;;  %v1940_v21 = vld [vmem:[%s4270_s2 + $0x790] sm:$0xff]  ;;  %v1951_v12 = vld [vmem:[%s4270_s2 + $0x7e8] sm:$0xff] }
  0xaa   :  { %2567 = vmatpush3.msra.mxu0 %v1903_v9  ;;  %2384 = vmatprep.subr.mxu1 %v1942_v3  ;;  %v1967_v9 = vld [vmem:[%s4270_s2 + $0x868] sm:$0xff]  ;;  %v2630_v3 = vld [vmem:[%s4271_s0 + $0xa0] sm:$0xff] }
  0xab   :  { %1179 = vmatmul.mubr.f32.gmra.mxu1 %v2975_v23  ;;  %1078 = vmatprep.mubr.f32.mxu0 %v2984_v25  ;;  %v1924_v23 = vld [vmem:[%s4270_s2 + $0x710] sm:$0xff]  ;;  %v1939_v25 = vld [vmem:[%s4270_s2 + $0x788] sm:$0xff] }
  0xac   :  { %2385 = vmatpush3.msra.mxu1 %v1926_v14  ;;  %1079 = vmatmul.mubr.f32.gmra.mxu0 %v2992_v27  ;;  %v1901_v27 = vld [vmem:[%s4270_s2 + $0x698] sm:$0xff]  ;;  %v1966_v14 = vld [vmem:[%s4270_s2 + $0x860] sm:$0xff] }
  0xad   :  { %2386 = vmatprep.subr.mxu1 %v1941_v16  ;;  %2568 = vmatprep.subr.mxu0 %v1902_v18  ;;  %v1983_v16 = vld [vmem:[%s4270_s2 + $0x8e8] sm:$0xff] }
  0xae   :  { %2387 = vmatpush3.msra.mxu1 %v1925_v8  ;;  %1183 = vmatprep.mubr.f32.mxu1 %v3004_v30  ;;  %v1938_v30 = vld [vmem:[%s4270_s2 + $0x780] sm:$0xff] }
  0xaf   :  { %2569 = vmatpush3.msra.mxu0 %v1902_v18  ;;  %2388 = vmatprep.subr.mxu1 %v1940_v21  ;;  %v2631_v18 = vld [vmem:[%s4271_s0 + $0xd0] sm:$0xff]  ;;  %v1950_v8 = vld [vmem:[%s4270_s2 + $0x7e0] sm:$0xff]  ;;  %v1965_v21 = vld [vmem:[%s4270_s2 + $0x858] sm:$0xff] }
  0xb0   :  { %1184 = vmatmul.mubr.f32.gmra.mxu1 %v3014_v32  ;;  %1083 = vmatprep.mubr.f32.mxu0 %v3023_v34  ;;  %v1922_v32 = vld [vmem:[%s4270_s2 + $0x700] sm:$0xff]  ;;  %v1937_v34 = vld [vmem:[%s4270_s2 + $0x778] sm:$0xff] }
  0xb1   :  { %2389 = vmatpush3.msra.mxu1 %v1924_v23  ;;  %1084 = vmatmul.mubr.f32.gmra.mxu0 %v3031_v36  ;;  %v1900_v36 = vld [vmem:[%s4270_s2 + $0x690] sm:$0xff]  ;;  %v1949_v23 = vld [vmem:[%s4270_s2 + $0x7d8] sm:$0xff] }
  0xb2   :  { %2390 = vmatprep.subr.mxu1 %v1939_v25  ;;  %2570 = vmatprep.subr.mxu0 %v1901_v27  ;;  %v1982_v25 = vld [vmem:[%s4270_s2 + $0x8e0] sm:$0xff] }
  0xb3   :  { %2391 = vmatpush3.msra.mxu1 %v1923_v11  ;;  %1188 = vmatprep.mubr.f32.mxu1 %v3043_v39  ;;  %v1936_v39 = vld [vmem:[%s4270_s2 + $0x770] sm:$0xff] }
  0xb4   :  { %2571 = vmatpush3.msra.mxu0 %v1901_v27  ;;  %2392 = vmatprep.subr.mxu1 %v1938_v30  ;;  %v2632_v27 = vld [vmem:[%s4271_s0 + $0xc8] sm:$0xff]  ;;  %v1964_v11 = vld [vmem:[%s4270_s2 + $0x850] sm:$0xff] }
  0xb5   :  { %1189 = vmatmul.mubr.f32.gmra.mxu1 %v3053_v41  ;;  %1088 = vmatprep.mubr.f32.mxu0 %v3062_v43  ;;  %v1920_v41 = vld [vmem:[%s4270_s2 + $0x6f0] sm:$0xff]  ;;  %v1935_v43 = vld [vmem:[%s4270_s2 + $0x768] sm:$0xff] }
  0xb6   :  { %2393 = vmatpush3.msra.mxu1 %v1922_v32  ;;  %1089 = vmatmul.mubr.f32.gmra.mxu0 %v3070_v45  ;;  %v1899_v45 = vld [vmem:[%s4270_s2 + $0x688] sm:$0xff]  ;;  %v1948_v30 = vld [vmem:[%s4270_s2 + $0x7d0] sm:$0xff] }
  0xb7   :  { %2394 = vmatprep.subr.mxu1 %v1937_v34  ;;  %2572 = vmatprep.subr.mxu0 %v1900_v36  ;;  %v1963_v32 = vld [vmem:[%s4270_s2 + $0x848] sm:$0xff]  ;;  %v2633_v34 = vld [vmem:[%s4271_s0 + $0xf8] sm:$0xff] }
  0xb8   :  { %2395 = vmatpush3.msra.mxu1 %v1921_v15  ;;  %1193 = vmatprep.mubr.f32.mxu1 %v3082_v48  ;;  %v1934_v48 = vld [vmem:[%s4270_s2 + $0x760] sm:$0xff]  ;;  %v1947_v15 = vld [vmem:[%s4270_s2 + $0x7c8] sm:$0xff] }
  0xb9   :  { %2573 = vmatpush3.msra.mxu0 %v1900_v36  ;;  %2396 = vmatprep.subr.mxu1 %v1936_v39  ;;  %v1981_v36 = vld [vmem:[%s4270_s2 + $0x8d8] sm:$0xff]  ;;  %v1962_v39 = vld [vmem:[%s4270_s2 + $0x840] sm:$0xff] }
  0xba   :  { %1194 = vmatmul.mubr.f32.gmra.mxu1 %v3092_v50  ;;  %1093 = vmatprep.mubr.f32.mxu0 %v3101_v52  ;;  %v1918_v50 = vld [vmem:[%s4270_s2 + $0x6e0] sm:$0xff]  ;;  %v1933_v52 = vld [vmem:[%s4270_s2 + $0x758] sm:$0xff] }
  0xbb   :  { %2397 = vmatpush3.msra.mxu1 %v1920_v41  ;;  %1094 = vmatmul.mubr.f32.gmra.mxu0 %v3109_v54  ;;  %v1898_v54 = vld [vmem:[%s4270_s2 + $0x680] sm:$0xff] }
  0xbc   :  { %2398 = vmatprep.subr.mxu1 %v1935_v43  ;;  %2574 = vmatprep.subr.mxu0 %v1899_v45  ;;  %v2634_v43 = vld [vmem:[%s4271_s0 + $0xf0] sm:$0xff] }
  0xbd   :  { %2399 = vmatpush3.msra.mxu1 %v1919_v17  ;;  %1198 = vmatprep.mubr.f32.mxu1 %v3121_v57  ;;  %v1932_v57 = vld [vmem:[%s4270_s2 + $0x750] sm:$0xff]  ;;  %v1946_v17 = vld [vmem:[%s4270_s2 + $0x7c0] sm:$0xff] }
  0xbe   :  { %2575 = vmatpush3.msra.mxu0 %v1899_v45  ;;  %2400 = vmatprep.subr.mxu1 %v1934_v48  ;;  %v1980_v45 = vld [vmem:[%s4270_s2 + $0x8d0] sm:$0xff] }
  0xbf   :  { %1199 = vmatmul.mubr.f32.gmra.mxu1 %v3131_v59  ;;  %1098 = vmatprep.mubr.f32.mxu0 %v3140_v62  ;;  %v1916_v59 = vld [vmem:[%s4270_s2 + $0x6d0] sm:$0xff]  ;;  %v1931_v62 = vld [vmem:[%s4270_s2 + $0x748] sm:$0xff] }
  0xc0   :  { %2401 = vmatpush3.msra.mxu1 %v1918_v50  ;;  %1099 = vmatmul.mubr.f32.gmra.mxu0 %v3148_v1  ;;  %v1977_v1 = vld [vmem:[%s4270_s2 + $0x8b8] sm:$0xff] }
  0xc1   :  { %2402 = vmatprep.subr.mxu1 %v1933_v52  ;;  %2576 = vmatprep.subr.mxu0 %v1898_v54 }
  0xc2   :  { %2403 = vmatpush3.msra.mxu1 %v1917_v20  ;;  %1203 = vmatprep.mubr.f32.mxu1 %v3160_v6  ;;  %v1961_v6 = vld [vmem:[%s4270_s2 + $0x838] sm:$0xff]  ;;  %v1979_v20 = vld [vmem:[%s4270_s2 + $0x8c8] sm:$0xff] }
  0xc3   :  { %2577 = vmatpush3.msra.mxu0 %v1898_v54  ;;  %2404 = vmatprep.subr.mxu1 %v1932_v57  ;;  %v2635_v54 = vld [vmem:[%s4271_s0 + $0x120] sm:$0xff]  ;;  %v2636_v57 = vld [vmem:[%s4271_s0 + $0x18] sm:$0xff] }
  0xc4   :  { %1204 = vmatmul.mubr.f32.gmra.mxu1 %v3170_v10  ;;  %2578 = vmatprep.mubr.msk.f32.mxu0 %vm174_vm0, %v3179_v13  ;;  %v1976_v10 = vld [vmem:[%s4270_s2 + $0x8b0] sm:$0xff] }
  0xc5   :  { %2405 = vmatpush3.msra.mxu1 %v1916_v59  ;;  %2434 = vmatprep.subr.mxu0 %v1977_v1  ;;  %v1960_v13 = vld [vmem:[%s4270_s2 + $0x830] sm:$0xff] }
  0xc6   :  { %2406 = vmatprep.subr.mxu1 %v1931_v62  ;;  %2579 = vmatmul.mubr.msk.f32.vlgmr.msra.gmra.mxu0 %vm174_vm0, %v3190_v19  ;;  %v1959_v19 = vld [vmem:[%s4270_s2 + $0x828] sm:$0xff]  ;;  %v2637_v1 = vld [vmem:[%s4271_s0 + $0x10] sm:$0xff] }
  0xc7   :  { %2407 = vmatpush3.msra.mxu1 %v1915_v22  ;;  %2435 = vmatpush3.msra.mxu0 %v1961_v6  ;;  %v1978_v22 = vld [vmem:[%s4270_s2 + $0x8c0] sm:$0xff] }
  0xc8   :  { %2408 = vmatprep.subr.mxu1 %v1930_v24  ;;  %2436 = vmatprep.subr.mxu0 %v1976_v10  ;;  %v2638_v24 = vld [vmem:[%s4271_s0 + $0x118] sm:$0xff] }
  0xc9   :  { %2409 = vmatpush3.msra.mxu1 %v1914_v26  ;;  %1467 = vmatprep.mubr.f32.mxu1 %v2621_v31  ;;  %v2639_v26 = vld [vmem:[%s4271_s0 + $0x40] sm:$0xff] }
  0xca   :  { %2437 = vmatpush3.msra.mxu0 %v1960_v13  ;;  %2581 = vmatprep.mubr.msk.f32.mxu0 %vm174_vm0, %v3215_v29  ;;  %v2623_v29 = vld [vmem:[%s4271_s0 + $0x30] sm:$0xff]  ;;  %v2640_v31 = vld [vmem:[%s4271_s0 + $0x20] sm:$0xff] }
  0xcb   :  { %1468 = vmatmul.mubr.f32.vlgmr.msra.gmra.mxu1 %v2622_v35  ;;  %2438 = vmatprep.subr.mxu0 %v1975_v28 }
  0xcc   :  { %2582 = vmatmul.mubr.msk.f32.gmra.mxu0 %vm174_vm0, %v3224_v33  ;;  %1472 = vmatprep.mubr.f32.mxu1 %v2623_v29  ;;  %v1957_v33 = vld [vmem:[%s4270_s2 + $0x818] sm:$0xff]  ;;  %v2643_v29 = vld [vmem:[%s4271_s0 + $0x68] sm:$0xff] }
  0xcd   :  { %2439 = vmatpush3.msra.mxu0 %v1959_v19  ;;  %2584 = vmatprep.mubr.msk.f32.mxu0 %vm174_vm0, %v3243_v40  ;;  %v1956_v40 = vld [vmem:[%s4270_s2 + $0x810] sm:$0xff]  ;;  %v2641_v19 = vld [vmem:[%s4271_s0 + $0x38] sm:$0xff] }
  0xce   :  { %2440 = vmatprep.subr.mxu0 %v1974_v37  ;;  %2590 = vmatprep.subr.mxu1 %v1985_v60 }
  0xcf   :  { %2441 = vmatpush3.msra.mxu0 %v1958_v38  ;;  %1473 = vmatmul.mubr.f32.gmra.mxu1 %v2624_v46  ;;  %v2642_v38 = vld [vmem:[%s4271_s0 + $0x48] sm:$0xff] }
  0xd0   :  { %2442 = vmatprep.subr.mxu0 %v1973_v42  ;;  %2585 = vmatmul.mubr.msk.f32.gmra.mxu0 %vm174_vm0, %v3252_v44  ;;  %v1955_v44 = vld [vmem:[%s4270_s2 + $0x808] sm:$0xff] }
  0xd1   :  { %2443 = vmatpush3.msra.mxu0 %v1957_v33  ;;  %1477 = vmatprep.mubr.f32.mxu1 %v2625_v49  ;;  %v2644_v33 = vld [vmem:[%s4271_s0 + $0x70] sm:$0xff]  ;;  %v2645_v49 = vld [vmem:[%s4271_s0 + $0x60] sm:$0xff] }
  0xd2   :  { %2444 = vmatprep.subr.mxu0 %v1972_v47  ;;  %2587 = vmatprep.mubr.msk.f32.mxu0 %vm174_vm0, %v3271_v51  ;;  %v1954_v51 = vld [vmem:[%s4270_s2 + $0x800] sm:$0xff] }
  0xd3   :  { %2445 = vmatpush3.msra.mxu0 %v1956_v40  ;;  %1478 = vmatmul.mubr.f32.gmra.mxu1 %v2626_v56 }
  0xd4   :  { %2446 = vmatprep.subr.mxu0 %v1971_v53  ;;  %2588 = vmatmul.mubr.msk.f32.gmra.mxu0 %vm174_vm0, %v3280_v55  ;;  %v2628_v55 = vld [vmem:[%s4271_s0 + $0x78] sm:$0xff]  ;;  %v2646_v53 = vld [vmem:[%s4271_s0 + $0x90] sm:$0xff] }
  0xd5   :  { %2447 = vmatpush3.msra.mxu0 %v1955_v44  ;;  %1482 = vmatprep.mubr.f32.mxu1 %v2627_v63  ;;  %v2647_v44 = vld [vmem:[%s4271_s0 + $0x98] sm:$0xff] }
  0xd6   :  { %2448 = vmatprep.subr.mxu0 %v1970_v58  ;;  %2591 = vmatpush3.msra.mxu1 %v1985_v60  ;;  %v2648_v60 = vld [vmem:[%s4271_s0 + $0xc0] sm:$0xff] }
  0xd7   :  { %2449 = vmatpush3.msra.mxu0 %v1954_v51  ;;  %1483 = vmatmul.mubr.f32.gmra.mxu1 %v2628_v55 }
  0xd8   :  { %2450 = vmatprep.subr.mxu0 %v1969_v61  ;;  %1487 = vmatprep.mubr.f32.mxu1 %v2629_v5  ;;  %v2649_v61 = vld [vmem:[%s4271_s0 + $0x88] sm:$0xff]  ;;  %v2652_v5 = vld [vmem:[%s4271_s0 + $0x110] sm:$0xff] }
  0xd9   :  { %2451 = vmatpush3.msra.mxu0 %v1953_v0  ;;  %2592 = vmatprep.subr.mxu1 %v1984_v4 }
  0xda   :  { %2452 = vmatprep.subr.mxu0 %v1968_v2  ;;  %2593 = vmatpush3.msra.mxu1 %v1984_v4  ;;  %v2650_v2 = vld [vmem:[%s4271_s0 + $0xb8] sm:$0xff]  ;;  %v2651_v4 = vld [vmem:[%s4271_s0 + $0xe8] sm:$0xff] }
  0xdb   :  { %2453 = vmatpush3.msra.mxu0 %v1952_v7  ;;  %1488 = vmatmul.mubr.f32.gmra.mxu1 %v2630_v3 }
  0xdc   :  { %2454 = vmatprep.subr.mxu0 %v1967_v9  ;;  %1492 = vmatprep.mubr.f32.mxu1 %v2631_v18 }
  0xdd   :  { %2455 = vmatpush3.msra.mxu0 %v1951_v12  ;;  %2594 = vmatprep.subr.mxu1 %v1983_v16 }
  0xde   :  { %2456 = vmatprep.subr.mxu0 %v1966_v14  ;;  %2595 = vmatpush3.msra.mxu1 %v1983_v16  ;;  %v2653_v14 = vld [vmem:[%s4271_s0 + $0xb0] sm:$0xff] }
  0xdf   :  { %2457 = vmatpush3.msra.mxu0 %v1950_v8  ;;  %1493 = vmatmul.mubr.f32.gmra.mxu1 %v2632_v27  ;;  %v2654_v8 = vld [vmem:[%s4271_s0 + $0xe0] sm:$0xff] }
  0xe0   :  { %2458 = vmatprep.subr.mxu0 %v1965_v21  ;;  %2596 = vmatprep.subr.mxu1 %v1982_v25  ;;  %v2655_v21 = vld [vmem:[%s4271_s0 + $0x138] sm:$0xff] }
  0xe1   :  { %2459 = vmatpush3.msra.mxu0 %v1949_v23  ;;  %1497 = vmatprep.mubr.f32.mxu1 %v2633_v34 }
  0xe2   :  { %2460 = vmatprep.subr.mxu0 %v1964_v11  ;;  %2597 = vmatpush3.msra.mxu1 %v1982_v25  ;;  %v2026_v41 = vpop.f32.mrf.mxu0 }
  0xe3   :  { %2461 = vmatpush3.msra.mxu0 %v1948_v30  ;;  %1498 = vmatmul.mubr.f32.gmra.mxu1 %v2634_v43 }
  0xe4   :  { %2462 = vmatprep.subr.mxu0 %v1963_v32  ;;  %2598 = vmatprep.subr.mxu1 %v1981_v36  ;;  %v2027_v48 = vpop.f32.mrf.mxu0  ;;  %v2656_v32 = vld [vmem:[%s4271_s0 + $0xd8] sm:$0xff] }
  0xe5   :  { %2463 = vmatpush3.msra.mxu0 %v1947_v15  ;;  %2599 = vmatpush3.msra.mxu1 %v1981_v36  ;;  %v3950_v50 = vadd.f32 %v2027_v48, %v2026_v41  ;;  %v2082_v52 = vpop.f32.mrf.mxu1  ;;  %v2657_v36 = vld [vmem:[%s4271_s0 + $0x108] sm:$0xff] }
  0xe6   :  { %2464 = vmatprep.subr.mxu0 %v1962_v39  ;;  %2600 = vmatprep.subr.mxu1 %v1980_v45 }
  0xe7   :  { %1502 = vmatprep.mubr.f32.mxu1 %v2635_v54  ;;  %2465 = vmatpush3.msra.mxu0 %v1946_v17  ;;  %v2029_v59 = vpop.f32.mrf.mxu0  ;;  %v2083_v62 = vpop.f32.mrf.mxu1  ;;  %v2658_v17 = vld [vmem:[%s4271_s0 + $0x100] sm:$0xff]  ;;  %v2659_v54 = vld [vmem:[%s4271_s0 + $0x130] sm:$0xff] }
  0xe8   :  { %1572 = vmatprep.mubr.f32.mxu0 %v2636_v57  ;;  %2601 = vmatpush3.msra.mxu1 %v1980_v45  ;;  %v3967_v6 = vadd.f32 %v2083_v62, %v2082_v52 }
  0xe9   :  { %1573 = vmatmul.mubr.f32.vlgmr.msra.gmra.mxu0 %v2637_v1  ;;  %1503 = vmatmul.mubr.f32.gmra.mxu1 %v2638_v24  ;;  %v2030_v10 = vpop.f32.mrf.mxu0 }
  0xea   :  { %2602 = vmatprep.subr.mxu1 %v1979_v20  ;;  %1577 = vmatprep.mubr.f32.mxu0 %v2639_v26  ;;  %v3975_v13 = vadd.f32 %v2030_v10, %v2029_v59 }
  0xeb   :  { %2603 = vmatpush3.msra.mxu1 %v1979_v20  ;;  %v2085_v28 = vpop.f32.mrf.mxu1  ;;  %2606 = vmatprep.mubr.msk.f32.mxu1 %vm174_vm0, %v2640_v31 }
  0xec   :  { %2604 = vmatprep.subr.mxu1 %v1978_v22  ;;  %v2032_v35 = vpop.f32.mrf.mxu0 }
  0xed   :  { %2605 = vmatpush3.msra.mxu1 %v1978_v22  ;;  %1578 = vmatmul.mubr.f32.gmra.mxu0 %v2641_v19  ;;  %v2086_v37 = vpop.f32.mrf.mxu1 }
  0xee   :  { %2607 = vmatmul.mubr.msk.f32.vlgmr.msra.gmra.mxu1 %vm174_vm0, %v2642_v38  ;;  %1582 = vmatprep.mubr.f32.mxu0 %v2643_v29  ;;  %v2087_v42 = vadd.f32 %v2086_v37, %v2085_v28  ;;  %v2033_v46 = vpop.f32.mrf.mxu0 }
  0xef   :  { %2609 = vmatprep.mubr.msk.f32.mxu1 %vm174_vm0, %v2644_v33  ;;  %v3995_v47 = vadd.f32 %v2033_v46, %v2032_v35 }
  0xf0   :  { %v2088_v40 = vpop.f32.mrf.mxu1 }
  0xf1   :  { %1583 = vmatmul.mubr.f32.gmra.mxu0 %v2645_v49  ;;  %v2035_v56 = vpop.f32.mrf.mxu0 }
  0xf2   :  { %1587 = vmatprep.mubr.f32.mxu0 %v2646_v53  ;;  %2610 = vmatmul.mubr.msk.f32.gmra.mxu1 %vm174_vm0, %v2647_v44  ;;  %v2089_v58 = vpop.f32.mrf.mxu1 }
  0xf3   :  { %2612 = vmatprep.mubr.msk.f32.mxu1 %vm174_vm0, %v2648_v60  ;;  %v2090_v51 = vadd.f32 %v2089_v58, %v2088_v40  ;;  %v2036_v63 = vpop.f32.mrf.mxu0 }
  0xf4   :  { %v2037_v0 = vadd.f32 %v2036_v63, %v2035_v56 }
  0xf5   :  { %1588 = vmatmul.mubr.f32.gmra.mxu0 %v2649_v61  ;;  %v2091_v55 = vpop.f32.mrf.mxu1 }
  0xf6   :  { %1592 = vmatprep.mubr.f32.mxu0 %v2650_v2  ;;  %2613 = vmatmul.mubr.msk.f32.gmra.mxu1 %vm174_vm0, %v2651_v4  ;;  %v2038_v9 = vpop.f32.mrf.mxu0 }
  0xf7   :  { %2615 = vmatprep.mubr.msk.f32.mxu1 %vm174_vm0, %v2652_v5  ;;  %v4025_v7 = vpop.permute.xlu0 %136  ;;  %v2092_v12 = vpop.f32.mrf.mxu1 }
  0xf8   :  { %v266_v3 = vadd.f32 %v3950_v50, %v4025_v7  ;;  %v2093_v16 = vadd.f32 %v2092_v12, %v2091_v55  ;;  %v2039_v18 = vpop.f32.mrf.mxu0 }
  0xf9   :  { %1593 = vmatmul.mubr.f32.gmra.mxu0 %v2653_v14  ;;  %v2040_v23 = vadd.f32 %v2039_v18, %v2038_v9 }
  0xfa   :  { %1597 = vmatprep.mubr.f32.mxu0 %v2654_v8  ;;  %2616 = vmatmul.mubr.msk.f32.gmra.mxu1 %vm174_vm0, %v2655_v21  ;;  %v2094_v25 = vpop.f32.mrf.mxu1  ;;  %v371_v27 = vadd.f32 %v3967_v6, %v266_v3  ;;  %v2660_v6 = vld [vmem:[%s4271_s0 + $0x128] sm:$0xff] }
  0xfb   :  { %v2041_v11 = vpop.f32.mrf.mxu0 }
  0xfc   :  { %v2095_v30 = vpop.f32.mrf.mxu1 }
  0xfd   :  { %1598 = vmatmul.mubr.f32.gmra.mxu0 %v2656_v32  ;;  %v2096_v34 = vadd.f32 %v2095_v30, %v2094_v25  ;;  %v4046_v15 = vpop.permute.xlu0 %141  ;;  %v2042_v39 = vpop.f32.mrf.mxu0 }
  0xfe   :  { %1602 = vmatprep.mubr.f32.mxu0 %v2657_v36  ;;  %v2043_v41 = vadd.f32 %v2042_v39, %v2041_v11  ;;  %v271_v45 = vadd.f32 %v3975_v13, %v4046_v15 }
  0xff   :  { %v2097_v43 = vpop.f32.mrf.mxu1 }
 0x100   :  { %v2044_v48 = vpop.f32.mrf.mxu0  ;;  %v376_v52 = vadd.f32 %v2087_v42, %v271_v45 }
 0x101   :  { %1603 = vmatmul.mubr.f32.gmra.mxu0 %v2658_v17  ;;  %v2098_v50 = vpop.f32.mrf.mxu1 }
 0x102   :  { %1607 = vmatprep.mubr.f32.mxu0 %v2659_v54  ;;  %v2099_v20 = vadd.f32 %v2098_v50, %v2097_v43  ;;  %v2045_v59 = vpop.f32.mrf.mxu0 }
 0x103   :  { %v4056_v57 = vpop.permute.xlu1 %146  ;;  %v2046_v62 = vadd.f32 %v2045_v59, %v2044_v48 }
 0x104   :  { %v2100_v1 = vpop.f32.mrf.mxu1  ;;  %v276_v22 = vadd.f32 %v3995_v47, %v4056_v57 }
 0x105   :  { %1608 = vmatmul.mubr.f32.gmra.mxu0 %v2660_v6  ;;  %v2047_v24 = vpop.f32.mrf.mxu0 }
 0x106   :  { %v2101_v10 = vpop.f32.mrf.mxu1  ;;  %v381_v26 = vadd.f32 %v2090_v51, %v276_v22 }
 0x107   :  { %v2102_v13 = vadd.f32 %v2101_v10, %v2100_v1  ;;  %v2048_v28 = vpop.f32.mrf.mxu0 }
 0x108   :  { %v2049_v31 = vadd.f32 %v2048_v28, %v2047_v24 }
 0x109   :  { %v2103_v19 = vpop.f32.mrf.mxu1  ;;  %v4063_v35 = vpop.permute.xlu1 %151 }
 0x10a   :  { %v281_v29 = vadd.f32 %v2037_v0, %v4063_v35 }
 0x10b   :  { %v2104_v37 = vpop.f32.mrf.mxu1  ;;  %v2524_v38 = vpop.f32.mrf.mxu0 }
 0x10c   :  { %v2105_v42 = vadd.f32 %v2104_v37, %v2103_v19  ;;  %v4066_v33 = vadd.f32 %v2524_v38, %v376_v52  ;;  %v386_v47 = vadd.f32 %v2093_v16, %v281_v29 }
 0x10d   :  { %v475_v46 = vpop.f32.mrf.mxu0 }
 0x10e   :  { %v4068_v40 = vadd.f32 %v475_v46, %v371_v27  ;;  %v2154_v49 = vpop.f32.mrf.mxu1 }
 0x10f   :  { %v4070_v53 = vpop.permute.xlu0 %156 }
 0x110   :  { %v2527_v44 = vpop.f32.mrf.mxu0  ;;  %v2155_v56 = vpop.f32.mrf.mxu1  ;;  %v286_v58 = vadd.f32 %v2040_v23, %v4070_v53 }
 0x111   :  { %v4073_v60 = vadd.f32 %v2527_v44, %v386_v47  ;;  %v2156_v51 = vadd.f32 %v2155_v56, %v2154_v49  ;;  %v514_v49 = vmax.f32 %v4068_v40, 0.0 }
 0x112   :  { %v485_v63 = vpop.f32.mrf.mxu0  ;;  %v2157_v61 = vpop.f32.mrf.mxu1  ;;  %v391_v0 = vadd.f32 %v2096_v34, %v286_v58 }
 0x113   :  { %v4075_v55 = vadd.f32 %v485_v63, %v381_v26  ;;  %v662_v19 = vadd.f32 %v2156_v51, %v4025_v7 }
 0x114   :  { %v2530_v2 = vpop.f32.mrf.mxu0  ;;  %v2158_v4 = vpop.f32.mrf.mxu1 }
 0x115   :  { %v2159_v5 = vadd.f32 %v2158_v4, %v2157_v61  ;;  %v4077_v9 = vpop.permute.xlu1 %161 }
 0x116   :  { %v495_v12 = vpop.f32.mrf.mxu0  ;;  %v291_v3 = vadd.f32 %v2043_v41, %v4077_v9  ;;  %v2160_v16 = vpop.f32.mrf.mxu1 }
 0x117   :  { %v4080_v14 = vadd.f32 %v495_v12, %v391_v0  ;;  %v667_v44 = vadd.f32 %v2159_v5, %v4046_v15 }
 0x118   :  { %v396_v18 = vadd.f32 %v2099_v20, %v291_v3  ;;  %v2161_v8 = vpop.f32.mrf.mxu1  ;;  %v2533_v21 = vpop.f32.mrf.mxu0  ;;  %v515_v3 = vmax.f32 %v4066_v33, 0.0 }
 0x119   :  { %v2162_v23 = vadd.f32 %v2161_v8, %v2160_v16 }
 0x11a   :  { %v4082_v25 = vadd.f32 %v2530_v2, %v396_v18  ;;  %v2163_v27 = vpop.f32.mrf.mxu1  ;;  %v505_v34 = vpop.f32.mrf.mxu0 }
 0x11b   :  { %v4084_v11 = vpop.permute.xlu0 %166  ;;  %v672_v51 = vadd.f32 %v2162_v23, %v4056_v57 }
 0x11c   :  { %v296_v30 = vadd.f32 %v2046_v62, %v4084_v11  ;;  %v2164_v32 = vpop.f32.mrf.mxu1 }
 0x11d   :  { %v2165_v36 = vadd.f32 %v2164_v32, %v2163_v27 }
 0x11e   :  { %v401_v39 = vadd.f32 %v2102_v13, %v296_v30  ;;  %v2166_v43 = vpop.f32.mrf.mxu1 }
 0x11f   :  { %v677_v30 = vadd.f32 %v2165_v36, %v4063_v35 }
 0x120   :  { %v4087_v41 = vpop.permute.xlu1 %171  ;;  %v4089_v45 = vadd.f32 %v505_v34, %v401_v39  ;;  %v2167_v17 = vpop.f32.mrf.mxu1  ;;  %v516_v39 = vmax.f32 %v4075_v55, 0.0 }
 0x121   :  { %4276 = vst [vmem:[#allocation2_spill] sm:$0xff] %v4087_v41  ;;  %v301_v48 = vadd.f32 %v2049_v31, %v4087_v41  ;;  %v2168_v50 = vadd.f32 %v2167_v17, %v2166_v43 }
 0x122   :  { %v2169_v52 = vpop.f32.mrf.mxu1 }
 0x123   :  { %v406_v54 = vadd.f32 %v2105_v42, %v301_v48 }
 0x124   :  { %v2170_v20 = vpop.f32.mrf.mxu1 }
 0x125   :  { %v4092_v59 = vadd.f32 %v2533_v21, %v406_v54  ;;  %v2171_v1 = vadd.f32 %v2170_v20, %v2169_v52  ;;  %v517_v54 = vmax.f32 %v4073_v60, 0.0  ;;  %v682_v20 = vadd.f32 %v2168_v50, %v4070_v53 }
 0x127   :  { %v2172_v62 = vpop.f32.mrf.mxu1 }
 0x129   :  { %v2173_v22 = vpop.f32.mrf.mxu1 }
 0x12a   :  { %v4094_v6 = vadd.f32 %v2173_v22, %v2172_v62 }
 0x12c   :  { %v2175_v24 = vpop.f32.mrf.mxu1 }
 0x12e   :  { %v2210_v10 = vpop.f32.mrf.mxu0  ;;  %v2176_v26 = vpop.f32.mrf.mxu1 }
 0x12f   :  { %v4096_v13 = vadd.f32 %v2176_v26, %v2175_v24 }
 0x130   :  { %v2211_v28 = vpop.f32.mrf.mxu0 }
 0x131   :  { %v2212_v31 = vadd.f32 %v2211_v28, %v2210_v10 }
 0x133   :  { %v2552_v37 = vpop.f32.mrf.mxu1  ;;  %v767_v38 = vadd.f32 %v2212_v31, %v662_v19  ;;  %v687_v19 = vadd.f32 %v2171_v1, %v4077_v9 }
 0x134   :  { %v2213_v29 = vpop.f32.mrf.mxu0 }
 0x135   :  { %v871_v42 = vpop.f32.mrf.mxu1 }
 0x136   :  { %v872_v46 = vadd.f32 %v871_v42, %v767_v38  ;;  %v2214_v47 = vpop.f32.mrf.mxu0  ;;  %v518_v38 = vmax.f32 %v4080_v14, 0.0 }
 0x137   :  { %v2215_v56 = vadd.f32 %v2214_v47, %v2213_v29 }
 0x138   :  { %v910_v58 = vmax.f32 %v872_v46, 0.0 }
 0x139   :  { %v772_v63 = vadd.f32 %v2215_v56, %v667_v44  ;;  %v2216_v0 = vpop.f32.mrf.mxu0  ;;  %v692_v44 = vadd.f32 %v4094_v6, %v4084_v11 }
 0x13a   :  { %v4101_v61 = vmax.f32 %v514_v49, %v910_v58  ;;  %v519_v49 = vmax.f32 %v4082_v25, 0.0 }
 0x13b   :  { %v877_v2 = vadd.f32 %v2552_v37, %v772_v63  ;;  %v2217_v4 = vpop.f32.mrf.mxu0 }
 0x13c   :  { %v2218_v12 = vadd.f32 %v2217_v4, %v2216_v0 }
 0x13d   :  { %v911_v16 = vmax.f32 %v877_v2, 0.0 }
 0x13e   :  { %v777_v18 = vadd.f32 %v2218_v12, %v672_v51  ;;  %v697_v51 = vadd.f32 %v4096_v13, %v4087_v41 }
 0x13f   :  { %v2219_v8 = vpop.f32.mrf.mxu0  ;;  %v4105_v40 = vmax.f32 %v515_v3, %v911_v16  ;;  %v520_v16 = vmax.f32 %v4089_v45, 0.0 }
 0x140   :  { %v2555_v21 = vpop.f32.mrf.mxu1 }
 0x141   :  { %v2220_v5 = vpop.f32.mrf.mxu0 }
 0x142   :  { %v881_v27 = vpop.f32.mrf.mxu1  ;;  %v2221_v32 = vadd.f32 %v2220_v5, %v2219_v8 }
 0x143   :  { %v882_v34 = vadd.f32 %v881_v27, %v777_v18  ;;  %v521_v27 = vmax.f32 %v4092_v59, 0.0 }
 0x144   :  { %v782_v43 = vadd.f32 %v2221_v32, %v677_v30 }
 0x145   :  { %v912_v17 = vmax.f32 %v882_v34, 0.0  ;;  %v2222_v23 = vpop.f32.mrf.mxu0 }
 0x146   :  { %v887_v48 = vadd.f32 %v2555_v21, %v782_v43 }
 0x147   :  { %v4109_v52 = vmax.f32 %v516_v39, %v912_v17  ;;  %v2223_v33 = vpop.f32.mrf.mxu0 }
 0x148   :  { %v913_v62 = vmax.f32 %v887_v48, 0.0  ;;  %v2224_v22 = vadd.f32 %v2223_v33, %v2222_v23 }
 0x14a   :  { %v787_v24 = vadd.f32 %v2224_v22, %v682_v20  ;;  %v4113_v10 = vmax.f32 %v517_v54, %v913_v62 }
 0x14b   :  { %v2225_v36 = vpop.f32.mrf.mxu0 }
 0x14c   :  { %4277 = vst [vmem:[#allocation3_spill] sm:$0xff] %v4113_v10  ;;  %v2558_v26 = vpop.f32.mrf.mxu1 }
 0x14d   :  { %v2226_v28 = vpop.f32.mrf.mxu0 }
 0x14e   :  { %v891_v55 = vpop.f32.mrf.mxu1  ;;  %v2227_v31 = vadd.f32 %v2226_v28, %v2225_v36 }
 0x14f   :  { %v892_v37 = vadd.f32 %v891_v55, %v787_v24 }
 0x150   :  { %v792_v29 = vadd.f32 %v2227_v31, %v687_v19 }
 0x151   :  { %v914_v42 = vmax.f32 %v892_v37, 0.0  ;;  %v2228_v60 = vpop.f32.mrf.mxu0 }
 0x152   :  { %v897_v46 = vadd.f32 %v2558_v26, %v792_v29 }
 0x153   :  { %v4117_v50 = vmax.f32 %v518_v38, %v914_v42  ;;  %v2229_v47 = vpop.f32.mrf.mxu0 }
 0x154   :  { %v915_v56 = vmax.f32 %v897_v46, 0.0  ;;  %v2230_v58 = vadd.f32 %v2229_v47, %v2228_v60 }
 0x155   :  { %4278 = vst [vmem:[#allocation4_spill] sm:$0xff] %v4117_v50 }
 0x156   :  { %v797_v63 = vadd.f32 %v2230_v58, %v692_v44  ;;  %v4122_v1 = vmax.f32 %v519_v49, %v915_v56 }
 0x157   :  { %v2231_v0 = vpop.f32.mrf.mxu0 }
 0x158   :  { %4279 = vst [vmem:[#allocation5_spill] sm:$0xff] %v4122_v1  ;;  %v2561_v2 = vpop.f32.mrf.mxu1 }
 0x159   :  { %v2232_v14 = vpop.f32.mrf.mxu0 }
 0x15a   :  { %v901_v4 = vpop.f32.mrf.mxu1  ;;  %v2233_v12 = vadd.f32 %v2232_v14, %v2231_v0 }
 0x15b   :  { %v902_v3 = vadd.f32 %v901_v4, %v797_v63 }
 0x15c   :  { %v802_v25 = vadd.f32 %v2233_v12, %v697_v51 }
 0x15d   :  { %v916_v18 = vmax.f32 %v902_v3, 0.0  ;;  %v2282_v8 = vpop.f32.mrf.mxu0 }
 0x15e   :  { %v907_v6 = vadd.f32 %v2561_v2, %v802_v25 }
 0x15f   :  { %v4127_v21 = vmax.f32 %v520_v16, %v916_v18  ;;  %v2283_v5 = vpop.f32.mrf.mxu0 }
 0x160   :  { %v917_v30 = vmax.f32 %v907_v6, 0.0 }
 0x161   :  { %4280 = vst [vmem:[#allocation6_spill] sm:$0xff] %v4127_v21  ;;  %v2338_v32 = vpop.f32.mrf.mxu1  ;;  %v2284_v21 = vadd.f32 %v2283_v5, %v2282_v8 }
 0x162   :  { %v2285_v34 = vpop.f32.mrf.mxu0  ;;  %v4130_v43 = vmax.f32 %v521_v27, %v917_v30 }
 0x163   :  { %v2339_v39 = vpop.f32.mrf.mxu1  ;;  %v1066_v41 = vadd.f32 %v2284_v21, %v4025_v7 }
 0x164   :  { %4281 = vst [vmem:[#allocation7_spill] sm:$0xff] %v4130_v43  ;;  %v2286_v13 = vpop.f32.mrf.mxu0  ;;  %v2340_v10 = vadd.f32 %v2339_v39, %v2338_v32 }
 0x165   :  { %v2287_v50 = vadd.f32 %v2286_v13, %v2285_v34 }
 0x166   :  { %v2341_v17 = vpop.f32.mrf.mxu1  ;;  %v1171_v8 = vadd.f32 %v2340_v10, %v1066_v41 }
 0x167   :  { %v2288_v23 = vpop.f32.mrf.mxu0 }
 0x168   :  { %v2342_v48 = vpop.f32.mrf.mxu1 }
 0x169   :  { %v2289_v45 = vpop.f32.mrf.mxu0 }
 0x16b   :  { %v2344_v33 = vpop.f32.mrf.mxu1 }
 0x16c   :  { %v2291_v54 = vpop.f32.mrf.mxu0 }
 0x16d   :  { %v2345_v20 = vpop.f32.mrf.mxu1 }
 0x16e   :  { %v2292_v62 = vpop.f32.mrf.mxu0  ;;  %v2346_v32 = vadd.f32 %v2345_v20, %v2344_v33 }
 0x170   :  { %v4132_v22 = vpop.f32.mrf.mxu1 }
 0x171   :  { %v4134_v24 = vpop.f32.mrf.mxu0 }
 0x172   :  { %v2348_v59 = vpop.f32.mrf.mxu1 }
 0x173   :  { %v4136_v36 = vpop.f32.mrf.mxu0  ;;  %v2349_v41 = vadd.f32 %v2348_v59, %v4132_v22 }
 0x175   :  { %v4138_v26 = vpop.f32.mrf.mxu1 }
 0x176   :  { %v4140_v28 = vpop.f32.mrf.mxu0 }
 0x177   :  { %v4142_v55 = vpop.f32.mrf.mxu1 }
 0x178   :  { %v4144_v19 = vpop.f32.mrf.mxu0 }
 0x17a   :  { %v4146_v31 = vpop.f32.mrf.mxu1 }
 0x17b   :  { %v4148_v37 = vpop.f32.mrf.mxu0 }
 0x17c   :  { %v4150_v38 = vpop.f32.mrf.mxu1 }
 0x17d   :  { %v4152_v29 = vpop.f32.mrf.mxu0 }
 0x17f   :  { %v4154_v42 = vpop.f32.mrf.mxu1 }
 0x180   :  { %4282 = vst [vmem:[#allocation8_spill] sm:$0xff] %v4154_v42  ;;  %v4158_v46 = vpop.f32.mrf.mxu0 }
 0x181   :  { %v4156_v60 = vpop.f32.mrf.mxu1  ;;  %4284 = vst [vmem:[#allocation10_spill] sm:$0xff] %v4158_v46  ;;  %v2343_v46 = vadd.f32 %v2342_v48, %v2341_v17 }
 0x182   :  { %4283 = vst [vmem:[#allocation9_spill] sm:$0xff] %v4156_v60  ;;  %v4162_v49 = vpop.f32.mrf.mxu0  ;;  %v2290_v60 = vadd.f32 %v2289_v45, %v2288_v23 }
 0x183   :  { %4286 = vst [vmem:[#allocation12_spill] sm:$0xff] %v4162_v49  ;;  %v1071_v49 = vadd.f32 %v2287_v50, %v4046_v15 }
 0x184   :  { %v4160_v47 = vpop.f32.mrf.mxu1  ;;  %v1076_v13 = vadd.f32 %v2290_v60, %v4056_v57 }
 0x185   :  { %4285 = vst [vmem:[#allocation11_spill] sm:$0xff] %v4160_v47 }
 0x186   :  { %v4164_v44 = vpop.f32.mrf.mxu1  ;;  %v2580_v56 = vpop.f32.mrf.mxu0  ;;  %v1181_v33 = vadd.f32 %v2346_v32, %v1076_v13 }
 0x187   :  { %4287 = vst [vmem:[#allocation13_spill] sm:$0xff] %v4164_v44 }
 0x188   :  { %v1275_v0 = vpop.f32.mrf.mxu0 }
 0x18b   :  { %v2410_v58 = vpop.f32.mrf.mxu1 }
 0x18c   :  { %v4166_v4 = vpop.f32.mrf.mxu0 }
 0x18d   :  { %v2411_v63 = vpop.f32.mrf.mxu1 }
 0x18e   :  { %v1285_v3 = vpop.f32.mrf.mxu0 }
 0x18f   :  { %v2413_v2 = vpop.f32.mrf.mxu1 }
 0x190   :  { %v4168_v18 = vpop.f32.mrf.mxu0 }
 0x191   :  { %v2414_v14 = vpop.f32.mrf.mxu1  ;;  %4288 = vst [vmem:[#allocation14_spill] sm:$0xff] %v4168_v18 }
 0x192   :  { %v4174_v30 = vpop.f32.mrf.mxu0 }
 0x193   :  { %v2416_v51 = vpop.f32.mrf.mxu1 }
 0x194   :  { %v4180_v44 = vpop.f32.mrf.mxu0 }
 0x195   :  { %v2417_v12 = vpop.f32.mrf.mxu1  ;;  %4291 = vst [vmem:[#allocation17_spill] sm:$0xff] %v4180_v44  ;;  %v1176_v44 = vadd.f32 %v2343_v46, %v1071_v49 }
 0x196   :  { %v4188_v42 = vpop.f32.mrf.mxu0 }
 0x197   :  { %v2419_v16 = vpop.f32.mrf.mxu1  ;;  %v1281_v10 = vadd.f32 %v2580_v56, %v1176_v44  ;;  %v1286_v44 = vadd.f32 %v1285_v3, %v1181_v33  ;;  %v2355_v3 = vadd.f32 %v4150_v38, %v4146_v31 }
 0x199   :  { %v2420_v25 = vpop.f32.mrf.mxu1  ;;  %v1315_v22 = vmax.f32 %v1281_v10, 0.0  ;;  %v4295_v10 = vld [vmem:[#allocation9_spill] sm:$0xff] }
 0x19b   :  { %v4170_v6 = vpop.f32.mrf.mxu1 }
 0x19d   :  { %v4172_v27 = vpop.f32.mrf.mxu1 }
 0x19f   :  { %v4176_v43 = vpop.f32.mrf.mxu1 }
 0x1a0   :  { %4289 = vst [vmem:[#allocation15_spill] sm:$0xff] %v4176_v43  ;;  %v2412_v43 = vadd.f32 %v2411_v63, %v2410_v58  ;;  %v2299_v58 = vadd.f32 %v4144_v19, %v4140_v28 }
 0x1a1   :  { %v4178_v1 = vpop.f32.mrf.mxu1 }
 0x1a2   :  { %4290 = vst [vmem:[#allocation16_spill] sm:$0xff] %v4178_v1  ;;  %v2293_v1 = vadd.f32 %v2292_v62, %v2291_v54  ;;  %v1470_v39 = vadd.f32 %v2412_v43, %v4025_v7  ;;  %v2296_v62 = vadd.f32 %v4136_v36, %v4134_v24  ;;  %v2418_v43 = vadd.f32 %v2417_v12, %v2416_v51 }
 0x1a3   :  { %v4182_v47 = vpop.f32.mrf.mxu1  ;;  %v2352_v36 = vadd.f32 %v4142_v55, %v4138_v26  ;;  %v2421_v51 = vadd.f32 %v2420_v25, %v2419_v16  ;;  %v1091_v12 = vadd.f32 %v2299_v58, %v4077_v9  ;;  %v1323_v26 = vmax.f32 %v4105_v40, %v1315_v22  ;;  %v4300_v58 = vld [vmem:[#allocation14_spill] sm:$0xff] }
 0x1a4   :  { %4292 = vst [vmem:[#allocation18_spill] sm:$0xff] %v4182_v47  ;;  %v1276_v47 = vadd.f32 %v1275_v0, %v1171_v8  ;;  %v1081_v48 = vadd.f32 %v2293_v1, %v4063_v35  ;;  %v1086_v24 = vadd.f32 %v2296_v62, %v4070_v53  ;;  %v2424_v25 = vadd.f32 %v4172_v27, %v4170_v6  ;;  %v4297_v62 = vld [vmem:[#allocation12_spill] sm:$0xff] }
 0x1a5   :  { %v4185_v18 = vpop.f32.mrf.mxu1  ;;  %v1485_v38 = vadd.f32 %v2421_v51, %v4063_v35  ;;  %v4294_v35 = vld [vmem:[#allocation8_spill] sm:$0xff] }
 0x1a6   :  { %4293 = vst [vmem:[#allocation19_spill] sm:$0xff] %v4185_v18  ;;  %v2415_v18 = vadd.f32 %v2414_v14, %v2413_v2  ;;  %v1314_v60 = vmax.f32 %v1276_v47, 0.0  ;;  %v1186_v59 = vadd.f32 %v2349_v41, %v1081_v48  ;;  %v1480_v14 = vadd.f32 %v2418_v43, %v4056_v57 }
 0x1a7   :  { %v2302_v57 = vadd.f32 %v4152_v29, %v4148_v37  ;;  %v1191_v16 = vadd.f32 %v2352_v36, %v1086_v24  ;;  %v4302_v36 = vld [vmem:[#allocation2_spill] sm:$0xff] }
 0x1a8   :  { %v1475_v7 = vadd.f32 %v2415_v18, %v4046_v15  ;;  %v1322_v15 = vmax.f32 %v4101_v61, %v1314_v60  ;;  %v1291_v18 = vadd.f32 %v4166_v4, %v1186_v59  ;;  %v1316_v61 = vmax.f32 %v1286_v44, 0.0  ;;  %v4301_v59 = vld [vmem:[#allocation3_spill] sm:$0xff] }
 0x1a9   :  { %v2466_v5 = vpop.f32.mrf.mxu0  ;;  %v4190_v34 = vpop.f32.mrf.mxu1  ;;  %v1296_v29 = vadd.f32 %v4174_v30, %v1191_v16  ;;  %v1096_v41 = vadd.f32 %v2302_v57, %v4084_v11 }
 0x1aa   :  { %v1324_v37 = vmax.f32 %v4109_v52, %v1316_v61  ;;  %v4298_v52 = vld [vmem:[#allocation15_spill] sm:$0xff] }
 0x1ab   :  { %v2467_v21 = vpop.f32.mrf.mxu0  ;;  %v4194_v50 = vpop.f32.mrf.mxu1  ;;  %v4305_v51 = vld [vmem:[#allocation18_spill] sm:$0xff] }
 0x1ac   :  { %v2468_v17 = vadd.f32 %v2467_v21, %v2466_v5 }
 0x1ad   :  { %v2469_v23 = vpop.f32.mrf.mxu0 }
 0x1ae   :  { %v2608_v45 = vpop.f32.mrf.mxu1  ;;  %v1575_v54 = vadd.f32 %v2468_v17, %v1470_v39  ;;  %v1317_v39 = vmax.f32 %v1291_v18, 0.0  ;;  %v1196_v17 = vadd.f32 %v2355_v3, %v1091_v12 }
 0x1af   :  { %v2470_v46 = vpop.f32.mrf.mxu0 }
 0x1b0   :  { %v2471_v20 = vadd.f32 %v2470_v46, %v2469_v23  ;;  %v1679_v49 = vpop.f32.mrf.mxu1  ;;  %v1490_v46 = vadd.f32 %v2424_v25, %v4070_v53  ;;  %v1325_v44 = vmax.f32 %v4301_v59, %v1317_v39 }
 0x1b1   :  { %v1680_v1 = vadd.f32 %v1679_v49, %v1575_v54  ;;  %v2472_v63 = vpop.f32.mrf.mxu0  ;;  %v4296_v54 = vld [vmem:[#allocation10_spill] sm:$0xff] }
 0x1b2   :  { %v1580_v56 = vadd.f32 %v2471_v20, %v1475_v7  ;;  %v2611_v0 = vpop.f32.mrf.mxu1  ;;  %v2305_v60 = vadd.f32 %v4297_v62, %v4296_v54  ;;  %v4299_v7 = vld [vmem:[#allocation16_spill] sm:$0xff]  ;;  %v4310_v54 = vld [vmem:[#allocation6_spill] sm:$0xff] }
 0x1b3   :  { %v1718_v47 = vmax.f32 %v1680_v1, 0.0  ;;  %v2473_v2 = vpop.f32.mrf.mxu0  ;;  %v2427_v30 = vadd.f32 %v4299_v7, %v4298_v52  ;;  %v1301_v1 = vadd.f32 %v4300_v58, %v1196_v17  ;;  %v4308_v17 = vld [vmem:[#allocation5_spill] sm:$0xff]  ;;  %v4311_v7 = vld [vmem:[#allocation7_spill] sm:$0xff] }
 0x1b4   :  { %v1685_v28 = vadd.f32 %v2608_v45, %v1580_v56  ;;  %v2474_v19 = vadd.f32 %v2473_v2, %v2472_v63  ;;  %v1689_v13 = vpop.f32.mrf.mxu1  ;;  %v2358_v45 = vadd.f32 %v4295_v10, %v4294_v35  ;;  %v1318_v56 = vmax.f32 %v1296_v29, 0.0  ;;  %v4304_v2 = vld [vmem:[#allocation13_spill] sm:$0xff] }
 0x1b5   :  { %v1726_v8 = vmax.f32 %v1322_v15, %v1718_v47  ;;  %v2475_v5 = vpop.f32.mrf.mxu0  ;;  %v1101_v15 = vadd.f32 %v2305_v60, %v4302_v36  ;;  %v4303_v47 = vld [vmem:[#allocation11_spill] sm:$0xff]  ;;  %v1495_v3 = vadd.f32 %v2427_v30, %v4077_v9  ;;  %v4309_v29 = vld [vmem:[#allocation17_spill] sm:$0xff] }
 0x1b6   :  { %v1719_v55 = vmax.f32 %v1685_v28, 0.0  ;;  %v1585_v21 = vadd.f32 %v2474_v19, %v1480_v14  ;;  %v2614_v48 = vpop.f32.mrf.mxu1  ;;  %v1201_v14 = vadd.f32 %v2358_v45, %v1096_v41  ;;  %v4306_v28 = vld [vmem:[#allocation19_spill] sm:$0xff] }
 0x1b7   :  { %1734 = vst [vmem:[%s4273_s3] sm:$0xff] %v1726_v8  ;;  %v2476_v31 = vpop.f32.mrf.mxu0  ;;  %v2430_v19 = vadd.f32 %v4306_v28, %v4305_v51 }
 0x1b8   :  { %v1727_v4 = vmax.f32 %v1323_v26, %v1719_v55  ;;  %v2477_v32 = vadd.f32 %v2476_v31, %v2475_v5  ;;  %v1690_v40 = vadd.f32 %v1689_v13, %v1585_v21  ;;  %v1699_v22 = vpop.f32.mrf.mxu1  ;;  %v1319_v13 = vmax.f32 %v1301_v1, 0.0  ;;  %v4307_v55 = vld [vmem:[#allocation4_spill] sm:$0xff] }
 0x1b9   :  { %v2478_v23 = vpop.f32.mrf.mxu0  ;;  %v1326_v21 = vmax.f32 %v4307_v55, %v1318_v56  ;;  %v1306_v57 = vadd.f32 %v4188_v42, %v1201_v14 }
 0x1ba   :  { %1735 = vst [vmem:[%s4273_s3 + $0x8] sm:$0xff] %v1727_v4  ;;  %v1590_v6 = vadd.f32 %v2477_v32, %v1485_v38  ;;  %v1720_v27 = vmax.f32 %v1690_v40, 0.0  ;;  %v2617_v61 = vpop.f32.mrf.mxu1  ;;  %v1500_v38 = vadd.f32 %v2430_v19, %v4084_v11  ;;  %v2433_v4 = vadd.f32 %v4194_v50, %v4190_v34 }
 0x1bb   :  { %v2479_v33 = vpop.f32.mrf.mxu0 }
 0x1bc   :  { %v1695_v43 = vadd.f32 %v2611_v0, %v1590_v6  ;;  %v1728_v20 = vmax.f32 %v1324_v37, %v1720_v27  ;;  %v2480_v49 = vadd.f32 %v2479_v33, %v2478_v23  ;;  %v2361_v0 = vadd.f32 %v4304_v2, %v4303_v47  ;;  %v1709_v42 = vpop.f32.mrf.mxu1 }
 0x1bd   :  { %v2481_v63 = vpop.f32.mrf.mxu0  ;;  %v1327_v23 = vmax.f32 %v4308_v17, %v1319_v13  ;;  %v1320_v27 = vmax.f32 %v1306_v57, 0.0  ;;  %v1505_v10 = vadd.f32 %v2433_v4, %v4302_v36 }
 0x1be   :  { %v1721_v24 = vmax.f32 %v1695_v43, 0.0  ;;  %1736 = vst [vmem:[%s4273_s3 + $0x10] sm:$0xff] %v1728_v20  ;;  %v1595_v53 = vadd.f32 %v2480_v49, %v1490_v46  ;;  %v1206_v31 = vadd.f32 %v2361_v0, %v1101_v15 }
 0x1bf   :  { %v2482_v12 = vpop.f32.mrf.mxu0  ;;  %v1328_v62 = vmax.f32 %v4310_v54, %v1320_v27 }
 0x1c0   :  { %v1729_v18 = vmax.f32 %v1325_v44, %v1721_v24  ;;  %v2483_v8 = vadd.f32 %v2482_v12, %v2481_v63  ;;  %v1700_v5 = vadd.f32 %v1699_v22, %v1595_v53  ;;  %v1311_v6 = vadd.f32 %v4309_v29, %v1206_v31 }
 0x1c1   :  { %v2484_v26 = vpop.f32.mrf.mxu0 }
 0x1c2   :  { %1737 = vst [vmem:[%s4273_s3 + $0x18] sm:$0xff] %v1729_v18  ;;  %v1600_v16 = vadd.f32 %v2483_v8, %v1495_v3  ;;  %v1722_v25 = vmax.f32 %v1700_v5, 0.0  ;;  %v1321_v45 = vmax.f32 %v1311_v6, 0.0 }
 0x1c3   :  { %v2485_v9 = vpop.f32.mrf.mxu0 }
 0x1c4   :  { %v1705_v32 = vadd.f32 %v2614_v48, %v1600_v16  ;;  %v1730_v40 = vmax.f32 %v1326_v21, %v1722_v25  ;;  %v2486_v39 = vadd.f32 %v2485_v9, %v2484_v26  ;;  %v1329_v30 = vmax.f32 %v4311_v7, %v1321_v45 }
 0x1c5   :  { %v2487_v37 = vpop.f32.mrf.mxu0 }
 0x1c6   :  { %v1723_v41 = vmax.f32 %v1705_v32, 0.0  ;;  %1738 = vst [vmem:[%s4273_s3 + $0x20] sm:$0xff] %v1730_v40  ;;  %v1605_v11 = vadd.f32 %v2486_v39, %v1500_v38 }
 0x1c7   :  { %v2488_v35 = vpop.f32.mrf.mxu0 }
 0x1c8   :  { %v1731_v34 = vmax.f32 %v1327_v23, %v1723_v41  ;;  %v2489_v50 = vadd.f32 %v2488_v35, %v2487_v37  ;;  %v1710_v48 = vadd.f32 %v1709_v42, %v1605_v11 }
 0x1ca   :  { %1739 = vst [vmem:[%s4273_s3 + $0x28] sm:$0xff] %v1731_v34  ;;  %v1610_v60 = vadd.f32 %v2489_v50, %v1505_v10  ;;  %v1724_v46 = vmax.f32 %v1710_v48, 0.0 }
 0x1cc   :  { %v1715_v33 = vadd.f32 %v2617_v61, %v1610_v60  ;;  %v1732_v52 = vmax.f32 %v1328_v62, %v1724_v46 }
 0x1ce   :  { %v1725_v43 = vmax.f32 %v1715_v33, 0.0  ;;  %1740 = vst [vmem:[%s4273_s3 + $0x30] sm:$0xff] %v1732_v52 }
 0x1d0   :  { %v1733_v20 = vmax.f32 %v1329_v30, %v1725_v43 }
 0x1d2   :  { %1741 = vst [vmem:[%s4273_s3 + $0x38] sm:$0xff] %v1733_v20 }

// kernel: network_forward.8
= control target key start
LH: loop header
LB: loop body
LE: loop exit
PB: predicated region body
PF: predicated region fallthrough
CT: control target
= control target key end

     0   :  { %v551_v3 = vmov 0   ;;  %vm130_vm0 = vcmask 523264   ;;  %s872_s2 = inlined_call_operand.vmem [shape: f32[1,576,128], index: 2, kind: input, shape index: {}]   ;;  %s873_s0 = inlined_call_operand.vmem [shape: f32[32,576], index: 0, kind: input, shape index: {}]   ;;  %s874_s1 = inlined_call_operand.vmem [shape: f32[32,1], index: 1, kind: input, shape index: {}]   ;;  %s875_s3 = inlined_call_operand.vmem [shape: f32[32,128], index: 3, kind: output, shape index: {}]  }
   0x1   :  { %v69_v0 = vld [vmem:[%s872_s2 + $0xf8] sm:$0xff]  ;;  %549 = vset.pattern.permute.xlu0 %v551_v3  ;;  %550 = vset.pattern.permute.xlu1 %v551_v3  ;;  %v68_v5 = vld [vmem:[%s872_s2 + $0xf0] sm:$0xff]  ;;  %v67_v9 = vld [vmem:[%s872_s2 + $0xe8] sm:$0xff] }
   0x2   :  { %v101_v1 = vld [vmem:[%s872_s2 + $0x1f8] sm:$0xff]  ;;  %410 = vmatprep.subr.mxu0 %v69_v0  ;;  %v100_v6 = vld [vmem:[%s872_s2 + $0x1f0] sm:$0xff]  ;;  %v99_v10 = vld [vmem:[%s872_s2 + $0x1e8] sm:$0xff] }
   0x3   :  { %v53_v2 = vld [vmem:[%s872_s2 + $0x78] sm:$0xff]  ;;  %454 = vmatprep.subr.mxu1 %v101_v1  ;;  %v52_v7 = vld [vmem:[%s872_s2 + $0x70] sm:$0xff]  ;;  %v51_v11 = vld [vmem:[%s872_s2 + $0x68] sm:$0xff] }
   0x4   :  { %v85_v4 = vld [vmem:[%s872_s2 + $0x178] sm:$0xff]  ;;  %411 = vmatpush3.msra.mxu0 %v53_v2  ;;  %v84_v8 = vld [vmem:[%s872_s2 + $0x170] sm:$0xff]  ;;  %v83_v12 = vld [vmem:[%s872_s2 + $0x168] sm:$0xff] }
   0x5   :  { %455 = vmatpush3.msra.mxu1 %v85_v4  ;;  %412 = vmatprep.subr.mxu0 %v68_v5  ;;  %v66_v13 = vld [vmem:[%s872_s2 + $0xe0] sm:$0xff]  ;;  %v65_v17 = vld [vmem:[%s872_s2 + $0xd8] sm:$0xff]  ;;  %v64_v21 = vld [vmem:[%s872_s2 + $0xd0] sm:$0xff] }
   0x6   :  { %456 = vmatprep.subr.mxu1 %v100_v6  ;;  %413 = vmatpush3.msra.mxu0 %v52_v7  ;;  %v98_v14 = vld [vmem:[%s872_s2 + $0x1e0] sm:$0xff]  ;;  %v97_v18 = vld [vmem:[%s872_s2 + $0x1d8] sm:$0xff]  ;;  %v96_v22 = vld [vmem:[%s872_s2 + $0x1d0] sm:$0xff] }
   0x7   :  { %457 = vmatpush3.msra.mxu1 %v84_v8  ;;  %414 = vmatprep.subr.mxu0 %v67_v9  ;;  %v50_v15 = vld [vmem:[%s872_s2 + $0x60] sm:$0xff]  ;;  %v49_v19 = vld [vmem:[%s872_s2 + $0x58] sm:$0xff]  ;;  %v48_v23 = vld [vmem:[%s872_s2 + $0x50] sm:$0xff] }
   0x8   :  { %458 = vmatprep.subr.mxu1 %v99_v10  ;;  %v82_v16 = vld [vmem:[%s872_s2 + $0x160] sm:$0xff]  ;;  %415 = vmatpush3.msra.mxu0 %v51_v11  ;;  %v81_v20 = vld [vmem:[%s872_s2 + $0x158] sm:$0xff]  ;;  %v80_v24 = vld [vmem:[%s872_s2 + $0x150] sm:$0xff] }
   0x9   :  { %459 = vmatpush3.msra.mxu1 %v83_v12  ;;  %416 = vmatprep.subr.mxu0 %v66_v13  ;;  %v63_v25 = vld [vmem:[%s872_s2 + $0xc8] sm:$0xff]  ;;  %v62_v29 = vld [vmem:[%s872_s2 + $0xc0] sm:$0xff]  ;;  %v61_v33 = vld [vmem:[%s872_s2 + $0xb8] sm:$0xff] }
   0xa   :  { %460 = vmatprep.subr.mxu1 %v98_v14  ;;  %417 = vmatpush3.msra.mxu0 %v50_v15  ;;  %v95_v26 = vld [vmem:[%s872_s2 + $0x1c8] sm:$0xff]  ;;  %v94_v30 = vld [vmem:[%s872_s2 + $0x1c0] sm:$0xff]  ;;  %v93_v34 = vld [vmem:[%s872_s2 + $0x1b8] sm:$0xff] }
   0xb   :  { %461 = vmatpush3.msra.mxu1 %v82_v16  ;;  %418 = vmatprep.subr.mxu0 %v65_v17  ;;  %v47_v27 = vld [vmem:[%s872_s2 + $0x48] sm:$0xff]  ;;  %v46_v31 = vld [vmem:[%s872_s2 + $0x40] sm:$0xff]  ;;  %v45_v35 = vld [vmem:[%s872_s2 + $0x38] sm:$0xff] }
   0xc   :  { %462 = vmatprep.subr.mxu1 %v97_v18  ;;  %419 = vmatpush3.msra.mxu0 %v49_v19  ;;  %v79_v28 = vld [vmem:[%s872_s2 + $0x148] sm:$0xff]  ;;  %v78_v32 = vld [vmem:[%s872_s2 + $0x140] sm:$0xff]  ;;  %v77_v36 = vld [vmem:[%s872_s2 + $0x138] sm:$0xff] }
   0xd   :  { %463 = vmatpush3.msra.mxu1 %v81_v20  ;;  %420 = vmatprep.subr.mxu0 %v64_v21  ;;  %v60_v37 = vld [vmem:[%s872_s2 + $0xb0] sm:$0xff]  ;;  %v59_v41 = vld [vmem:[%s872_s2 + $0xa8] sm:$0xff]  ;;  %v58_v45 = vld [vmem:[%s872_s2 + $0xa0] sm:$0xff] }
   0xe   :  { %464 = vmatprep.subr.mxu1 %v96_v22  ;;  %421 = vmatpush3.msra.mxu0 %v48_v23  ;;  %v92_v38 = vld [vmem:[%s872_s2 + $0x1b0] sm:$0xff]  ;;  %v91_v42 = vld [vmem:[%s872_s2 + $0x1a8] sm:$0xff]  ;;  %v90_v46 = vld [vmem:[%s872_s2 + $0x1a0] sm:$0xff] }
   0xf   :  { %465 = vmatpush3.msra.mxu1 %v80_v24  ;;  %422 = vmatprep.subr.mxu0 %v63_v25  ;;  %v44_v39 = vld [vmem:[%s872_s2 + $0x30] sm:$0xff]  ;;  %v43_v43 = vld [vmem:[%s872_s2 + $0x28] sm:$0xff]  ;;  %v42_v47 = vld [vmem:[%s872_s2 + $0x20] sm:$0xff] }
  0x10   :  { %466 = vmatprep.subr.mxu1 %v95_v26  ;;  %423 = vmatpush3.msra.mxu0 %v47_v27  ;;  %v76_v40 = vld [vmem:[%s872_s2 + $0x130] sm:$0xff]  ;;  %v75_v44 = vld [vmem:[%s872_s2 + $0x128] sm:$0xff]  ;;  %v74_v48 = vld [vmem:[%s872_s2 + $0x120] sm:$0xff] }
  0x11   :  { %467 = vmatpush3.msra.mxu1 %v79_v28  ;;  %424 = vmatprep.subr.mxu0 %v62_v29  ;;  %v57_v49 = vld [vmem:[%s872_s2 + $0x98] sm:$0xff]  ;;  %v56_v53 = vld [vmem:[%s872_s2 + $0x90] sm:$0xff]  ;;  %v55_v57 = vld [vmem:[%s872_s2 + $0x88] sm:$0xff] }
  0x12   :  { %468 = vmatprep.subr.mxu1 %v94_v30  ;;  %425 = vmatpush3.msra.mxu0 %v46_v31  ;;  %v89_v50 = vld [vmem:[%s872_s2 + $0x198] sm:$0xff]  ;;  %v88_v54 = vld [vmem:[%s872_s2 + $0x190] sm:$0xff]  ;;  %v87_v58 = vld [vmem:[%s872_s2 + $0x188] sm:$0xff] }
  0x13   :  { %469 = vmatpush3.msra.mxu1 %v78_v32  ;;  %426 = vmatprep.subr.mxu0 %v61_v33  ;;  %v41_v51 = vld [vmem:[%s872_s2 + $0x18] sm:$0xff]  ;;  %v40_v55 = vld [vmem:[%s872_s2 + $0x10] sm:$0xff]  ;;  %v39_v59 = vld [vmem:[%s872_s2 + $0x8] sm:$0xff] }
  0x14   :  { %470 = vmatprep.subr.mxu1 %v93_v34  ;;  %427 = vmatpush3.msra.mxu0 %v45_v35  ;;  %v73_v52 = vld [vmem:[%s872_s2 + $0x118] sm:$0xff]  ;;  %v72_v56 = vld [vmem:[%s872_s2 + $0x110] sm:$0xff]  ;;  %v71_v60 = vld [vmem:[%s872_s2 + $0x108] sm:$0xff] }
  0x15   :  { %471 = vmatpush3.msra.mxu1 %v77_v36  ;;  %428 = vmatprep.subr.mxu0 %v60_v37  ;;  %v54_v61 = vld [vmem:[%s872_s2 + $0x80] sm:$0xff]  ;;  %v15_v0 = vld [vmem:[%s873_s0 + $0x8] sm:$0xff]  ;;  %v17_v2 = vld [vmem:[%s873_s0 + $0x18] sm:$0xff] }
  0x16   :  { %472 = vmatprep.subr.mxu1 %v92_v38  ;;  %429 = vmatpush3.msra.mxu0 %v44_v39  ;;  %v86_v62 = vld [vmem:[%s872_s2 + $0x180] sm:$0xff]  ;;  %v16_v4 = vld [vmem:[%s873_s0 + $0x10] sm:$0xff]  ;;  %v109_v5 = vld [vmem:[%s872_s2 + $0x238] sm:$0xff] }
  0x17   :  { %473 = vmatpush3.msra.mxu1 %v76_v40  ;;  %430 = vmatprep.subr.mxu0 %v59_v41  ;;  %v38_v63 = vld [vmem:[%s872_s2] sm:$0xff]  ;;  %v108_v6 = vld [vmem:[%s872_s2 + $0x230] sm:$0xff]  ;;  %v19_v9 = vld [vmem:[%s873_s0 + $0x28] sm:$0xff] }
  0x18   :  { %474 = vmatprep.subr.mxu1 %v91_v42  ;;  %431 = vmatpush3.msra.mxu0 %v43_v43  ;;  %v70_v1 = vld [vmem:[%s872_s2 + $0x100] sm:$0xff]  ;;  %v20_v7 = vld [vmem:[%s873_s0 + $0x30] sm:$0xff]  ;;  %v21_v10 = vld [vmem:[%s873_s0 + $0x38] sm:$0xff] }
  0x19   :  { %475 = vmatpush3.msra.mxu1 %v75_v44  ;;  %432 = vmatprep.subr.mxu0 %v58_v45  ;;  %v14_v3 = vld [vmem:[%s873_s0] sm:$0xff]  ;;  %v107_v11 = vld [vmem:[%s872_s2 + $0x228] sm:$0xff]  ;;  %v25_v13 = vld [vmem:[%s873_s0 + $0x58] sm:$0xff] }
  0x1a   :  { %476 = vmatprep.subr.mxu1 %v90_v46  ;;  %433 = vmatpush3.msra.mxu0 %v42_v47  ;;  %v22_v8 = vld [vmem:[%s873_s0 + $0x40] sm:$0xff]  ;;  %v27_v14 = vld [vmem:[%s873_s0 + $0x68] sm:$0xff]  ;;  %v24_v15 = vld [vmem:[%s873_s0 + $0x50] sm:$0xff] }
  0x1b   :  { %477 = vmatpush3.msra.mxu1 %v74_v48  ;;  %434 = vmatprep.subr.mxu0 %v57_v49  ;;  %v106_v12 = vld [vmem:[%s872_s2 + $0x220] sm:$0xff]  ;;  %v105_v17 = vld [vmem:[%s872_s2 + $0x218] sm:$0xff]  ;;  %v104_v18 = vld [vmem:[%s872_s2 + $0x210] sm:$0xff] }
  0x1c   :  { %478 = vmatprep.subr.mxu1 %v89_v50  ;;  %435 = vmatpush3.msra.mxu0 %v41_v51  ;;  %v26_v16 = vld [vmem:[%s873_s0 + $0x60] sm:$0xff]  ;;  %v32_v20 = vld [vmem:[%s873_s0 + $0x90] sm:$0xff]  ;;  %v29_v21 = vld [vmem:[%s873_s0 + $0x78] sm:$0xff] }
  0x1d   :  { %479 = vmatpush3.msra.mxu1 %v73_v52  ;;  %436 = vmatprep.subr.mxu0 %v56_v53  ;;  %v30_v19 = vld [vmem:[%s873_s0 + $0x80] sm:$0xff]  ;;  %v31_v22 = vld [vmem:[%s873_s0 + $0x88] sm:$0xff]  ;;  %v28_v26 = vld [vmem:[%s873_s0 + $0x70] sm:$0xff] }
  0x1e   :  { %480 = vmatprep.subr.mxu1 %v88_v54  ;;  %437 = vmatpush3.msra.mxu0 %v40_v55  ;;  %v103_v23 = vld [vmem:[%s872_s2 + $0x208] sm:$0xff]  ;;  %v102_v24 = vld [vmem:[%s872_s2 + $0x200] sm:$0xff]  ;;  %v33_v28 = vld [vmem:[%s873_s0 + $0x98] sm:$0xff] }
  0x1f   :  { %481 = vmatpush3.msra.mxu1 %v72_v56  ;;  %438 = vmatprep.subr.mxu0 %v55_v57  ;;  %v18_v25 = vld [vmem:[%s873_s0 + $0x20] sm:$0xff]  ;;  %v23_v27 = vld [vmem:[%s873_s0 + $0x48] sm:$0xff]  ;;  %v36_v30 = vld [vmem:[%s874_s1 + $0x10] sm:$0xff] }
  0x20   :  { %482 = vmatprep.subr.mxu1 %v87_v58  ;;  %439 = vmatpush3.msra.mxu0 %v39_v59  ;;  %v34_v29 = vld [vmem:[%s874_s1] sm:$0xff]  ;;  %v35_v31 = vld [vmem:[%s874_s1 + $0x8] sm:$0xff]  ;;  %v37_v32 = vld [vmem:[%s874_s1 + $0x18] sm:$0xff] }
  0x21   :  { %483 = vmatpush3.msra.mxu1 %v71_v60  ;;  %440 = vmatprep.subr.mxu0 %v54_v61 }
  0x22   :  { %484 = vmatprep.subr.mxu1 %v86_v62  ;;  %441 = vmatpush3.msra.mxu0 %v38_v63 }
  0x23   :  { %207 = vmatprep.mubr.f32.mxu0 %v15_v0  ;;  %485 = vmatpush3.msra.mxu1 %v70_v1 }
  0x24   :  { %292 = vmatprep.mubr.f32.mxu1 %v17_v2  ;;  %208 = vmatmul.mubr.f32.vlgmr.msra.gmra.mxu0 %v14_v3 }
  0x25   :  { %293 = vmatmul.mubr.f32.vlgmr.msra.gmra.mxu1 %v16_v4  ;;  %510 = vmatprep.subr.mxu0 %v109_v5 }
  0x26   :  { %532 = vmatprep.subr.mxu1 %v109_v5  ;;  %511 = vmatpush3.msra.mxu0 %v109_v5 }
  0x27   :  { %540 = vmatpush3.msra.mxu1 %v109_v5  ;;  %512 = vmatprep.subr.mxu0 %v108_v6 }
  0x28   :  { %533 = vmatprep.subr.mxu1 %v108_v6  ;;  %212 = vmatprep.mubr.f32.mxu0 %v20_v7 }
  0x29   :  { %297 = vmatprep.mubr.f32.mxu1 %v22_v8  ;;  %513 = vmatpush3.msra.mxu0 %v108_v6 }
  0x2a   :  { %541 = vmatpush3.msra.mxu1 %v108_v6  ;;  %213 = vmatmul.mubr.f32.gmra.mxu0 %v19_v9 }
  0x2b   :  { %298 = vmatmul.mubr.f32.gmra.mxu1 %v21_v10  ;;  %514 = vmatprep.subr.mxu0 %v107_v11 }
  0x2c   :  { %534 = vmatprep.subr.mxu1 %v107_v11  ;;  %515 = vmatpush3.msra.mxu0 %v107_v11 }
  0x2d   :  { %542 = vmatpush3.msra.mxu1 %v107_v11  ;;  %516 = vmatprep.subr.mxu0 %v106_v12 }
  0x2e   :  { %535 = vmatprep.subr.mxu1 %v106_v12  ;;  %217 = vmatprep.mubr.f32.mxu0 %v25_v13 }
  0x2f   :  { %302 = vmatprep.mubr.f32.mxu1 %v27_v14  ;;  %517 = vmatpush3.msra.mxu0 %v106_v12 }
  0x30   :  { %543 = vmatpush3.msra.mxu1 %v106_v12  ;;  %218 = vmatmul.mubr.f32.gmra.mxu0 %v24_v15 }
  0x31   :  { %303 = vmatmul.mubr.f32.gmra.mxu1 %v26_v16  ;;  %518 = vmatprep.subr.mxu0 %v105_v17 }
  0x32   :  { %536 = vmatprep.subr.mxu1 %v105_v17  ;;  %519 = vmatpush3.msra.mxu0 %v105_v17 }
  0x33   :  { %544 = vmatpush3.msra.mxu1 %v105_v17  ;;  %520 = vmatprep.subr.mxu0 %v104_v18 }
  0x34   :  { %537 = vmatprep.subr.mxu1 %v104_v18  ;;  %222 = vmatprep.mubr.f32.mxu0 %v30_v19 }
  0x35   :  { %307 = vmatprep.mubr.f32.mxu1 %v32_v20  ;;  %521 = vmatpush3.msra.mxu0 %v104_v18 }
  0x36   :  { %545 = vmatpush3.msra.mxu1 %v104_v18  ;;  %223 = vmatmul.mubr.f32.gmra.mxu0 %v29_v21 }
  0x37   :  { %308 = vmatmul.mubr.f32.gmra.mxu1 %v31_v22  ;;  %522 = vmatprep.subr.mxu0 %v103_v23 }
  0x38   :  { %538 = vmatprep.subr.mxu1 %v103_v23  ;;  %523 = vmatpush3.msra.mxu0 %v103_v23 }
  0x39   :  { %546 = vmatpush3.msra.mxu1 %v103_v23  ;;  %524 = vmatprep.subr.mxu0 %v102_v24 }
  0x3a   :  { %539 = vmatprep.subr.mxu1 %v102_v24  ;;  %525 = vmatpush3.msra.mxu0 %v102_v24 }
  0x3b   :  { %547 = vmatpush3.msra.mxu1 %v102_v24  ;;  %526 = vmatprep.mubr.msk.f32.mxu0 %vm130_vm0, %v18_v25 }
  0x3c   :  { %529 = vmatprep.mubr.msk.f32.mxu1 %vm130_vm0, %v28_v26  ;;  %527 = vmatmul.mubr.msk.f32.vlgmr.msra.gmra.mxu0 %vm130_vm0, %v23_v27 }
  0x3d   :  { %530 = vmatmul.mubr.msk.f32.vlgmr.msra.gmra.mxu1 %vm130_vm0, %v33_v28  ;;  %112 = vperm.xlu0 %549, %v34_v29  }
  0x3e   :  { %122 = vperm.xlu1 %550, %v36_v30  }
  0x41   :  { %117 = vperm.xlu0 %549, %v35_v31  }
  0x42   :  { %127 = vperm.xlu1 %550, %v37_v32  }
  0xb8   :  { %v113_v41 = vpop.permute.xlu0 %112 }
  0xb9   :  { %v123_v47 = vpop.permute.xlu1 %122 }
  0xbc   :  { %v118_v48 = vpop.permute.xlu0 %117 }
  0xbd   :  { %v128_v61 = vpop.permute.xlu1 %127 }
  0xe4   :  { %v442_v33 = vpop.f32.mrf.mxu0 }
  0xe5   :  { %v486_v34 = vpop.f32.mrf.mxu1 }
  0xe6   :  { %v443_v35 = vpop.f32.mrf.mxu0 }
  0xe7   :  { %v487_v36 = vpop.f32.mrf.mxu1  ;;  %v444_v49 = vadd.f32 %v443_v35, %v442_v33 }
  0xe8   :  { %v488_v60 = vadd.f32 %v487_v36, %v486_v34 }
  0xe9   :  { %v210_v56 = vadd.f32 %v444_v49, %v113_v41 }
  0xea   :  { %v445_v37 = vpop.f32.mrf.mxu0 }
  0xeb   :  { %v489_v38 = vpop.f32.mrf.mxu1  ;;  %v295_v6 = vadd.f32 %v488_v60, %v210_v56 }
  0xec   :  { %v446_v39 = vpop.f32.mrf.mxu0 }
  0xed   :  { %v490_v40 = vpop.f32.mrf.mxu1  ;;  %v447_v46 = vadd.f32 %v446_v39, %v445_v37 }
  0xee   :  { %v491_v57 = vadd.f32 %v490_v40, %v489_v38 }
  0xef   :  { %v215_v53 = vadd.f32 %v447_v46, %v118_v48 }
  0xf0   :  { %v448_v42 = vpop.f32.mrf.mxu0 }
  0xf1   :  { %v492_v43 = vpop.f32.mrf.mxu1  ;;  %v300_v1 = vadd.f32 %v491_v57, %v215_v53 }
  0xf2   :  { %v449_v44 = vpop.f32.mrf.mxu0 }
  0xf3   :  { %v493_v45 = vpop.f32.mrf.mxu1  ;;  %v450_v50 = vadd.f32 %v449_v44, %v448_v42 }
  0xf4   :  { %v494_v62 = vadd.f32 %v493_v45, %v492_v43 }
  0xf5   :  { %v220_v58 = vadd.f32 %v450_v50, %v123_v47 }
  0xf6   :  { %v451_v51 = vpop.f32.mrf.mxu0 }
  0xf7   :  { %v495_v52 = vpop.f32.mrf.mxu1  ;;  %v305_v7 = vadd.f32 %v494_v62, %v220_v58 }
  0xf8   :  { %v452_v54 = vpop.f32.mrf.mxu0 }
  0xf9   :  { %v496_v55 = vpop.f32.mrf.mxu1  ;;  %v453_v59 = vadd.f32 %v452_v54, %v451_v51 }
  0xfa   :  { %v497_v0 = vadd.f32 %v496_v55, %v495_v52 }
  0xfb   :  { %v225_v63 = vadd.f32 %v453_v59, %v128_v61 }
  0xfc   :  { %v528_v2 = vpop.f32.mrf.mxu0 }
  0xfd   :  { %v531_v3 = vpop.f32.mrf.mxu1  ;;  %v385_v4 = vadd.f32 %v528_v2, %v300_v1  ;;  %v310_v5 = vadd.f32 %v497_v0, %v225_v63 }
  0xfe   :  { %v379_v8 = vpop.f32.mrf.mxu0 }
  0xff   :  { %v389_v9 = vpop.f32.mrf.mxu1  ;;  %399 = vst [vmem:[%s875_s3 + $0x8] sm:$0xff] %v385_v4  ;;  %v395_v10 = vadd.f32 %v531_v3, %v310_v5  ;;  %v380_v11 = vadd.f32 %v379_v8, %v295_v6 }
 0x100   :  { %v390_v12 = vadd.f32 %v389_v9, %v305_v7 }
 0x101   :  { %401 = vst [vmem:[%s875_s3 + $0x18] sm:$0xff] %v395_v10  ;;  %398 = vst [vmem:[%s875_s3] sm:$0xff] %v380_v11 }
 0x102   :  { %400 = vst [vmem:[%s875_s3 + $0x10] sm:$0xff] %v390_v12 }

// kernel: network_forward.9
= control target key start
LH: loop header
LB: loop body
LE: loop exit
PB: predicated region body
PF: predicated region fallthrough
CT: control target
= control target key end

     0   :  { %v508_v3 = vmov 0   ;;  %vm122_vm0 = vcmask 261120   ;;  %s765_s2 = inlined_call_operand.vmem [shape: f32[1,288,128], index: 2, kind: input, shape index: {}]   ;;  %s766_s0 = inlined_call_operand.vmem [shape: f32[64,288], index: 0, kind: input, shape index: {}]   ;;  %s767_s1 = inlined_call_operand.vmem [shape: f32[64,1], index: 1, kind: input, shape index: {}]   ;;  %s768_s3 = inlined_call_operand.vmem [shape: f32[64,128], index: 3, kind: output, shape index: {}]  }
   0x1   :  { %v77_v0 = vld [vmem:[%s765_s2 + $0xf8] sm:$0xff]  ;;  %v76_v2 = vld [vmem:[%s765_s2 + $0xf0] sm:$0xff]  ;;  %506 = vset.pattern.permute.xlu0 %v508_v3  ;;  %507 = vset.pattern.permute.xlu1 %v508_v3  ;;  %v75_v5 = vld [vmem:[%s765_s2 + $0xe8] sm:$0xff] }
   0x2   :  { %v61_v1 = vld [vmem:[%s765_s2 + $0x78] sm:$0xff]  ;;  %385 = vmatprep.subr.mxu0 %v77_v0  ;;  %473 = vmatprep.subr.mxu1 %v77_v0  ;;  %v60_v4 = vld [vmem:[%s765_s2 + $0x70] sm:$0xff]  ;;  %v59_v6 = vld [vmem:[%s765_s2 + $0x68] sm:$0xff] }
   0x3   :  { %386 = vmatpush3.msra.mxu0 %v61_v1  ;;  %489 = vmatpush3.msra.mxu1 %v61_v1  ;;  %v74_v7 = vld [vmem:[%s765_s2 + $0xe0] sm:$0xff]  ;;  %v73_v9 = vld [vmem:[%s765_s2 + $0xd8] sm:$0xff]  ;;  %v72_v11 = vld [vmem:[%s765_s2 + $0xd0] sm:$0xff] }
   0x4   :  { %387 = vmatprep.subr.mxu0 %v76_v2  ;;  %474 = vmatprep.subr.mxu1 %v76_v2  ;;  %v58_v8 = vld [vmem:[%s765_s2 + $0x60] sm:$0xff]  ;;  %v57_v10 = vld [vmem:[%s765_s2 + $0x58] sm:$0xff]  ;;  %v56_v12 = vld [vmem:[%s765_s2 + $0x50] sm:$0xff] }
   0x5   :  { %388 = vmatpush3.msra.mxu0 %v60_v4  ;;  %490 = vmatpush3.msra.mxu1 %v60_v4  ;;  %v71_v13 = vld [vmem:[%s765_s2 + $0xc8] sm:$0xff]  ;;  %v70_v15 = vld [vmem:[%s765_s2 + $0xc0] sm:$0xff]  ;;  %v69_v17 = vld [vmem:[%s765_s2 + $0xb8] sm:$0xff] }
   0x6   :  { %389 = vmatprep.subr.mxu0 %v75_v5  ;;  %475 = vmatprep.subr.mxu1 %v75_v5  ;;  %v55_v14 = vld [vmem:[%s765_s2 + $0x48] sm:$0xff]  ;;  %v54_v16 = vld [vmem:[%s765_s2 + $0x40] sm:$0xff]  ;;  %v53_v18 = vld [vmem:[%s765_s2 + $0x38] sm:$0xff] }
   0x7   :  { %390 = vmatpush3.msra.mxu0 %v59_v6  ;;  %491 = vmatpush3.msra.mxu1 %v59_v6  ;;  %v68_v19 = vld [vmem:[%s765_s2 + $0xb0] sm:$0xff]  ;;  %v67_v21 = vld [vmem:[%s765_s2 + $0xa8] sm:$0xff]  ;;  %v66_v23 = vld [vmem:[%s765_s2 + $0xa0] sm:$0xff] }
   0x8   :  { %391 = vmatprep.subr.mxu0 %v74_v7  ;;  %476 = vmatprep.subr.mxu1 %v74_v7  ;;  %v52_v20 = vld [vmem:[%s765_s2 + $0x30] sm:$0xff]  ;;  %v51_v22 = vld [vmem:[%s765_s2 + $0x28] sm:$0xff]  ;;  %v50_v24 = vld [vmem:[%s765_s2 + $0x20] sm:$0xff] }
   0x9   :  { %392 = vmatpush3.msra.mxu0 %v58_v8  ;;  %492 = vmatpush3.msra.mxu1 %v58_v8  ;;  %v65_v25 = vld [vmem:[%s765_s2 + $0x98] sm:$0xff]  ;;  %v64_v27 = vld [vmem:[%s765_s2 + $0x90] sm:$0xff]  ;;  %v63_v29 = vld [vmem:[%s765_s2 + $0x88] sm:$0xff] }
   0xa   :  { %393 = vmatprep.subr.mxu0 %v73_v9  ;;  %477 = vmatprep.subr.mxu1 %v73_v9  ;;  %v49_v26 = vld [vmem:[%s765_s2 + $0x18] sm:$0xff]  ;;  %v48_v28 = vld [vmem:[%s765_s2 + $0x10] sm:$0xff]  ;;  %v47_v30 = vld [vmem:[%s765_s2 + $0x8] sm:$0xff] }
   0xb   :  { %394 = vmatpush3.msra.mxu0 %v57_v10  ;;  %493 = vmatpush3.msra.mxu1 %v57_v10  ;;  %v62_v31 = vld [vmem:[%s765_s2 + $0x80] sm:$0xff]  ;;  %v15_v33 = vld [vmem:[%s766_s0 + $0x8] sm:$0xff]  ;;  %v33_v34 = vld [vmem:[%s766_s0 + $0x98] sm:$0xff] }
   0xc   :  { %395 = vmatprep.subr.mxu0 %v72_v11  ;;  %478 = vmatprep.subr.mxu1 %v72_v11  ;;  %v46_v32 = vld [vmem:[%s765_s2] sm:$0xff]  ;;  %v32_v36 = vld [vmem:[%s766_s0 + $0x90] sm:$0xff]  ;;  %v81_v37 = vld [vmem:[%s765_s2 + $0x118] sm:$0xff] }
   0xd   :  { %396 = vmatpush3.msra.mxu0 %v56_v12  ;;  %494 = vmatpush3.msra.mxu1 %v56_v12  ;;  %v14_v35 = vld [vmem:[%s766_s0] sm:$0xff]  ;;  %v36_v39 = vld [vmem:[%s766_s0 + $0xb0] sm:$0xff]  ;;  %v17_v42 = vld [vmem:[%s766_s0 + $0x18] sm:$0xff] }
   0xe   :  { %397 = vmatprep.subr.mxu0 %v71_v13  ;;  %479 = vmatprep.subr.mxu1 %v71_v13  ;;  %v18_v38 = vld [vmem:[%s766_s0 + $0x20] sm:$0xff]  ;;  %v80_v40 = vld [vmem:[%s765_s2 + $0x110] sm:$0xff]  ;;  %v35_v43 = vld [vmem:[%s766_s0 + $0xa8] sm:$0xff] }
   0xf   :  { %398 = vmatpush3.msra.mxu0 %v55_v14  ;;  %495 = vmatpush3.msra.mxu1 %v55_v14  ;;  %v38_v41 = vld [vmem:[%s767_s1] sm:$0xff]  ;;  %v79_v44 = vld [vmem:[%s765_s2 + $0x108] sm:$0xff]  ;;  %v21_v45 = vld [vmem:[%s766_s0 + $0x38] sm:$0xff] }
  0x10   :  { %399 = vmatprep.subr.mxu0 %v70_v15  ;;  %480 = vmatprep.subr.mxu1 %v70_v15  ;;  %v78_v46 = vld [vmem:[%s765_s2 + $0x100] sm:$0xff]  ;;  %v16_v47 = vld [vmem:[%s766_s0 + $0x10] sm:$0xff]  ;;  %v19_v49 = vld [vmem:[%s766_s0 + $0x28] sm:$0xff] }
  0x11   :  { %400 = vmatpush3.msra.mxu0 %v54_v16  ;;  %496 = vmatpush3.msra.mxu1 %v54_v16  ;;  %v20_v48 = vld [vmem:[%s766_s0 + $0x30] sm:$0xff]  ;;  %v22_v51 = vld [vmem:[%s766_s0 + $0x40] sm:$0xff]  ;;  %v39_v53 = vld [vmem:[%s767_s1 + $0x8] sm:$0xff] }
  0x12   :  { %401 = vmatprep.subr.mxu0 %v69_v17  ;;  %481 = vmatprep.subr.mxu1 %v69_v17  ;;  %v24_v50 = vld [vmem:[%s766_s0 + $0x50] sm:$0xff]  ;;  %v23_v54 = vld [vmem:[%s766_s0 + $0x48] sm:$0xff]  ;;  %v25_v55 = vld [vmem:[%s766_s0 + $0x58] sm:$0xff] }
  0x13   :  { %402 = vmatpush3.msra.mxu0 %v53_v18  ;;  %497 = vmatpush3.msra.mxu1 %v53_v18  ;;  %v40_v52 = vld [vmem:[%s767_s1 + $0x10] sm:$0xff]  ;;  %v27_v56 = vld [vmem:[%s766_s0 + $0x68] sm:$0xff]  ;;  %v41_v58 = vld [vmem:[%s767_s1 + $0x18] sm:$0xff] }
  0x14   :  { %403 = vmatprep.subr.mxu0 %v68_v19  ;;  %482 = vmatprep.subr.mxu1 %v68_v19  ;;  %v28_v57 = vld [vmem:[%s766_s0 + $0x70] sm:$0xff]  ;;  %v42_v59 = vld [vmem:[%s767_s1 + $0x20] sm:$0xff]  ;;  %v31_v61 = vld [vmem:[%s766_s0 + $0x88] sm:$0xff] }
  0x15   :  { %404 = vmatpush3.msra.mxu0 %v52_v20  ;;  %498 = vmatpush3.msra.mxu1 %v52_v20  ;;  %v26_v60 = vld [vmem:[%s766_s0 + $0x60] sm:$0xff]  ;;  %v43_v0 = vld [vmem:[%s767_s1 + $0x28] sm:$0xff]  ;;  %v44_v1 = vld [vmem:[%s767_s1 + $0x30] sm:$0xff] }
  0x16   :  { %405 = vmatprep.subr.mxu0 %v67_v21  ;;  %483 = vmatprep.subr.mxu1 %v67_v21  ;;  %v30_v62 = vld [vmem:[%s766_s0 + $0x80] sm:$0xff]  ;;  %v29_v2 = vld [vmem:[%s766_s0 + $0x78] sm:$0xff] }
  0x17   :  { %406 = vmatpush3.msra.mxu0 %v51_v22  ;;  %499 = vmatpush3.msra.mxu1 %v51_v22  ;;  %v34_v63 = vld [vmem:[%s766_s0 + $0xa0] sm:$0xff]  ;;  %v37_v3 = vld [vmem:[%s766_s0 + $0xb8] sm:$0xff] }
  0x18   :  { %407 = vmatprep.subr.mxu0 %v66_v23  ;;  %484 = vmatprep.subr.mxu1 %v66_v23  ;;  %v45_v4 = vld [vmem:[%s767_s1 + $0x38] sm:$0xff] }
  0x19   :  { %408 = vmatpush3.msra.mxu0 %v50_v24  ;;  %500 = vmatpush3.msra.mxu1 %v50_v24 }
  0x1a   :  { %409 = vmatprep.subr.mxu0 %v65_v25  ;;  %485 = vmatprep.subr.mxu1 %v65_v25 }
  0x1b   :  { %410 = vmatpush3.msra.mxu0 %v49_v26  ;;  %501 = vmatpush3.msra.mxu1 %v49_v26 }
  0x1c   :  { %411 = vmatprep.subr.mxu0 %v64_v27  ;;  %486 = vmatprep.subr.mxu1 %v64_v27 }
  0x1d   :  { %412 = vmatpush3.msra.mxu0 %v48_v28  ;;  %502 = vmatpush3.msra.mxu1 %v48_v28 }
  0x1e   :  { %413 = vmatprep.subr.mxu0 %v63_v29  ;;  %487 = vmatprep.subr.mxu1 %v63_v29 }
  0x1f   :  { %414 = vmatpush3.msra.mxu0 %v47_v30  ;;  %503 = vmatpush3.msra.mxu1 %v47_v30 }
  0x20   :  { %415 = vmatprep.subr.mxu0 %v62_v31  ;;  %488 = vmatprep.subr.mxu1 %v62_v31 }
  0x21   :  { %416 = vmatpush3.msra.mxu0 %v46_v32  ;;  %504 = vmatpush3.msra.mxu1 %v46_v32 }
  0x22   :  { %211 = vmatprep.mubr.f32.mxu0 %v15_v33  ;;  %241 = vmatprep.mubr.f32.mxu1 %v33_v34 }
  0x23   :  { %212 = vmatmul.mubr.f32.vlgmr.msra.gmra.mxu0 %v14_v35  ;;  %242 = vmatmul.mubr.f32.vlgmr.msra.gmra.mxu1 %v32_v36 }
  0x24   :  { %453 = vmatprep.subr.mxu1 %v81_v37  ;;  %216 = vmatprep.mubr.f32.mxu0 %v18_v38 }
  0x25   :  { %454 = vmatpush3.msra.mxu1 %v81_v37  ;;  %246 = vmatprep.mubr.f32.mxu1 %v36_v39 }
  0x26   :  { %455 = vmatprep.subr.mxu1 %v80_v40  ;;  %84 = vperm.xlu0 %506, %v38_v41  }
  0x27   :  { %456 = vmatpush3.msra.mxu1 %v80_v40  ;;  %217 = vmatmul.mubr.f32.gmra.mxu0 %v17_v42 }
  0x28   :  { %247 = vmatmul.mubr.f32.gmra.mxu1 %v35_v43  ;;  %457 = vmatprep.subr.mxu1 %v79_v44 }
  0x29   :  { %458 = vmatpush3.msra.mxu1 %v79_v44  ;;  %221 = vmatprep.mubr.f32.mxu0 %v21_v45 }
  0x2a   :  { %459 = vmatprep.subr.mxu1 %v78_v46  ;;  %461 = vmatprep.mubr.msk.f32.mxu1 %vm122_vm0, %v16_v47 }
  0x2b   :  { %460 = vmatpush3.msra.mxu1 %v78_v46  ;;  %222 = vmatmul.mubr.f32.gmra.mxu0 %v20_v48 }
  0x2c   :  { %462 = vmatmul.mubr.msk.f32.vlgmr.msra.gmra.mxu1 %vm122_vm0, %v19_v49  ;;  %226 = vmatprep.mubr.f32.mxu0 %v24_v50 }
  0x2d   :  { %464 = vmatprep.mubr.msk.f32.mxu1 %vm122_vm0, %v22_v51  ;;  %94 = vperm.xlu1 %507, %v40_v52  }
  0x2e   :  { %89 = vperm.xlu0 %506, %v39_v53  }
  0x2f   :  { %227 = vmatmul.mubr.f32.gmra.mxu0 %v23_v54 }
  0x30   :  { %465 = vmatmul.mubr.msk.f32.gmra.mxu1 %vm122_vm0, %v25_v55  ;;  %231 = vmatprep.mubr.f32.mxu0 %v27_v56 }
  0x31   :  { %467 = vmatprep.mubr.msk.f32.mxu1 %vm122_vm0, %v28_v57  ;;  %99 = vperm.xlu1 %507, %v41_v58  }
  0x32   :  { %104 = vperm.xlu0 %506, %v42_v59  }
  0x33   :  { %232 = vmatmul.mubr.f32.gmra.mxu0 %v26_v60 }
  0x34   :  { %468 = vmatmul.mubr.msk.f32.gmra.mxu1 %vm122_vm0, %v31_v61  ;;  %236 = vmatprep.mubr.f32.mxu0 %v30_v62 }
  0x35   :  { %470 = vmatprep.mubr.msk.f32.mxu1 %vm122_vm0, %v34_v63  ;;  %109 = vperm.xlu1 %507, %v43_v0  }
  0x36   :  { %114 = vperm.xlu0 %506, %v44_v1  }
  0x37   :  { %237 = vmatmul.mubr.f32.gmra.mxu0 %v29_v2 }
  0x38   :  { %471 = vmatmul.mubr.msk.f32.gmra.mxu1 %vm122_vm0, %v37_v3 }
  0x39   :  { %119 = vperm.xlu1 %507, %v45_v4  }
  0xa1   :  { %v85_v8 = vpop.permute.xlu0 %84 }
  0xa8   :  { %v95_v5 = vpop.permute.xlu1 %94 }
  0xa9   :  { %v90_v16 = vpop.permute.xlu0 %89 }
  0xac   :  { %v100_v12 = vpop.permute.xlu1 %99 }
  0xad   :  { %v105_v30 = vpop.permute.xlu0 %104 }
  0xb0   :  { %v110_v24 = vpop.permute.xlu1 %109 }
  0xb1   :  { %v115_v47 = vpop.permute.xlu0 %114 }
  0xb4   :  { %v120_v41 = vpop.permute.xlu1 %119 }
  0xe3   :  { %v417_v6 = vpop.f32.mrf.mxu0  ;;  %v435_v7 = vpop.f32.mrf.mxu1 }
  0xe5   :  { %v418_v9 = vpop.f32.mrf.mxu0  ;;  %v436_v10 = vpop.f32.mrf.mxu1 }
  0xe6   :  { %v419_v14 = vadd.f32 %v418_v9, %v417_v6  ;;  %v437_v44 = vadd.f32 %v436_v10, %v435_v7 }
  0xe7   :  { %v420_v11 = vpop.f32.mrf.mxu0 }
  0xe8   :  { %v438_v13 = vpop.f32.mrf.mxu1  ;;  %v214_v23 = vadd.f32 %v419_v14, %v85_v8  ;;  %v244_v56 = vadd.f32 %v437_v44, %v115_v47 }
  0xe9   :  { %v421_v15 = vpop.f32.mrf.mxu0 }
  0xea   :  { %v422_v17 = vadd.f32 %v421_v15, %v420_v11  ;;  %v439_v18 = vpop.f32.mrf.mxu1 }
  0xeb   :  { %v423_v19 = vpop.f32.mrf.mxu0  ;;  %v440_v38 = vadd.f32 %v439_v18, %v438_v13 }
  0xec   :  { %v219_v20 = vadd.f32 %v422_v17, %v90_v16  ;;  %v463_v21 = vpop.f32.mrf.mxu1 }
  0xed   :  { %v424_v22 = vpop.f32.mrf.mxu0  ;;  %v249_v51 = vadd.f32 %v440_v38, %v120_v41 }
  0xee   :  { %v324_v25 = vadd.f32 %v463_v21, %v219_v20  ;;  %v425_v26 = vadd.f32 %v424_v22, %v423_v19  ;;  %v318_v27 = vpop.f32.mrf.mxu1 }
  0xef   :  { %v319_v28 = vadd.f32 %v318_v27, %v214_v23  ;;  %v426_v29 = vpop.f32.mrf.mxu0 }
  0xf0   :  { %v358_v31 = vmax.f32 %v324_v25, 0.0  ;;  %v466_v32 = vpop.f32.mrf.mxu1  ;;  %v224_v33 = vadd.f32 %v425_v26, %v95_v5 }
  0xf1   :  { %v357_v34 = vmax.f32 %v319_v28, 0.0  ;;  %v427_v35 = vpop.f32.mrf.mxu0 }
  0xf2   :  { %366 = vst [vmem:[%s768_s3 + $0x8] sm:$0xff] %v358_v31  ;;  %v428_v36 = vadd.f32 %v427_v35, %v426_v29  ;;  %v328_v37 = vpop.f32.mrf.mxu1 }
  0xf3   :  { %365 = vst [vmem:[%s768_s3] sm:$0xff] %v357_v34  ;;  %v329_v39 = vadd.f32 %v328_v37, %v224_v33  ;;  %v429_v40 = vpop.f32.mrf.mxu0 }
  0xf4   :  { %v229_v42 = vadd.f32 %v428_v36, %v100_v12  ;;  %v469_v43 = vpop.f32.mrf.mxu1 }
  0xf5   :  { %v359_v45 = vmax.f32 %v329_v39, 0.0  ;;  %v430_v46 = vpop.f32.mrf.mxu0 }
  0xf6   :  { %v334_v48 = vadd.f32 %v466_v32, %v229_v42  ;;  %v431_v49 = vadd.f32 %v430_v46, %v429_v40  ;;  %v338_v50 = vpop.f32.mrf.mxu1 }
  0xf7   :  { %367 = vst [vmem:[%s768_s3 + $0x10] sm:$0xff] %v359_v45  ;;  %v432_v52 = vpop.f32.mrf.mxu0 }
  0xf8   :  { %v360_v53 = vmax.f32 %v334_v48, 0.0  ;;  %v234_v54 = vadd.f32 %v431_v49, %v105_v30  ;;  %v472_v55 = vpop.f32.mrf.mxu1 }
  0xf9   :  { %v354_v57 = vadd.f32 %v472_v55, %v249_v51  ;;  %v433_v58 = vpop.f32.mrf.mxu0 }
  0xfa   :  { %368 = vst [vmem:[%s768_s3 + $0x18] sm:$0xff] %v360_v53  ;;  %v339_v59 = vadd.f32 %v338_v50, %v234_v54  ;;  %v434_v60 = vadd.f32 %v433_v58, %v432_v52  ;;  %v348_v61 = vpop.f32.mrf.mxu1 }
  0xfb   :  { %v364_v62 = vmax.f32 %v354_v57, 0.0  ;;  %v349_v63 = vadd.f32 %v348_v61, %v244_v56 }
  0xfc   :  { %v361_v0 = vmax.f32 %v339_v59, 0.0  ;;  %v239_v1 = vadd.f32 %v434_v60, %v110_v24 }
  0xfd   :  { %372 = vst [vmem:[%s768_s3 + $0x38] sm:$0xff] %v364_v62  ;;  %v363_v2 = vmax.f32 %v349_v63, 0.0 }
  0xfe   :  { %369 = vst [vmem:[%s768_s3 + $0x20] sm:$0xff] %v361_v0  ;;  %v344_v3 = vadd.f32 %v469_v43, %v239_v1 }
  0xff   :  { %371 = vst [vmem:[%s768_s3 + $0x30] sm:$0xff] %v363_v2 }
 0x100   :  { %v362_v4 = vmax.f32 %v344_v3, 0.0 }
 0x102   :  { %370 = vst [vmem:[%s768_s3 + $0x28] sm:$0xff] %v362_v4 }

// kernel: network_forward.10
= control target key start
LH: loop header
LB: loop body
LE: loop exit
PB: predicated region body
PF: predicated region fallthrough
CT: control target
= control target key end

     0   :  { %s1329_s12 = smov 0   ;;  %s1331_s13 = smov 0   ;;  %s2045_s0 = inlined_call_operand.vmem [shape: f32[64,576], index: 0, kind: input, shape index: {}]   ;;  %s2046_s1 = inlined_call_operand.vmem [shape: f32[64,1], index: 1, kind: input, shape index: {}]   ;;  %s2047_s2 = inlined_call_operand.vmem [shape: f32[1,576,512], index: 2, kind: input, shape index: {}]   ;;  %s2048_s3 = inlined_call_operand.vmem [shape: f32[64,512], index: 3, kind: output, shape index: {}]  }
   0x1   :  { %s1333_s14 = smov 0  }
   0x2 LB: > { %s1214_s15 = sadd.s32 4294967295, %s1305_s14   ;;  %s1346_s16 = sadd.s32 1, %s1305_s14   ;;  %s1305_s14 = sphi %s1333_s14, %s2052_s14   ;;  %s1301_s13 = sphi %s1331_s13, %s2051_s13   ;;  %s1297_s12 = sphi %s1329_s12, %s2050_s12  }
   0x3   : > { %s59_s17 = ssub.s32 %s1305_s14, %s1346_s16  ;;  %s62_s18 = sadd.s32 1, %s1301_s13 }
   0x4   : > { %p60_p0 = scmp.eq.s32.totalorder %s59_s17, 0  ;;  %p69_p1 = scmp.ne.s32.totalorder %s1301_s13, %s1297_s12 }
   0x5   : > { %p70_p2 = scmp.eq.s32.totalorder %s1305_s14, 0  ;;  %p99_p3 = scmp.eq.s32.totalorder %s1214_s15, 1 }
   0x6   : > { %s1357_s19 = scalar_select %p60_p0, %s1301_s13, %s62_s18  }
   0x7   : > { %p71_p4 = por %p70_p2, %p69_p1  ;;  %p1359_p5 = por %p99_p3, %p69_p1 }
   0x8   : > { %p1217_p6 = scmp.ge.s32.totalorder %s1305_s14, 2 }
   0xa   : > { %127 = sbr.rel (%p1217_p6) target bundleno = 91 (0x5b), region = 24 }
   0xf   : > { %130 = sbr.rel (!%p71_p4) target bundleno = 91 (0x5b), region = 28  ;;  %s132_s21 = sand.u32 (%p71_p4), 1, %s1301_s13  }
  0x10   : > { %s1235_s22 = sshll.u32 (%p71_p4), %s1305_s14, 4  ;;  %s1253_s23 = smul.u32 (%p71_p4), 1152, %s132_s21 }
  0x11   : > { %s1369_s26 = scalar_lea.vmem (%p71_p4), %s2047_s2, %s1235_s22 }
  0x12   : > { %v150_v0 = vld [vmem:[%s1369_s26] sm:$0xff] (%p71_p4)  ;;  %v152_v1 = vld [vmem:[%s1369_s26 + $0x8] sm:$0xff] (%p71_p4)  ;;  %s1377_s27 = scalar_lea.vmem (%p71_p4), [#allocation2], %s1253_s23 }
  0x13   : > { %v154_v2 = vld [vmem:[%s1369_s26 + $0x20] sm:$0xff] (%p71_p4)  ;;  %v156_v3 = vld [vmem:[%s1369_s26 + $0x28] sm:$0xff] (%p71_p4)  ;;  %151 = vst [vmem:[%s1377_s27] sm:$0xff] (%p71_p4), %v150_v0  ;;  %153 = vst [vmem:[%s1377_s27 + $0x8] sm:$0xff] (%p71_p4), %v152_v1 }
  0x14   : > { %v158_v4 = vld [vmem:[%s1369_s26 + $0x40] sm:$0xff]  ;;  %v160_v5 = vld [vmem:[%s1369_s26 + $0x48] sm:$0xff]  ;;  %155 = vst [vmem:[%s1377_s27 + $0x10] sm:$0xff] %v154_v2  ;;  %157 = vst [vmem:[%s1377_s27 + $0x18] sm:$0xff] %v156_v3 }
  0x15   : > { %159 = vst [vmem:[%s1377_s27 + $0x20] sm:$0xff] %v158_v4  ;;  %161 = vst [vmem:[%s1377_s27 + $0x28] sm:$0xff] %v160_v5  ;;  %v162_v6 = vld [vmem:[%s1369_s26 + $0x60] sm:$0xff]  ;;  %v164_v7 = vld [vmem:[%s1369_s26 + $0x68] sm:$0xff] }
  0x16   : > { %v166_v8 = vld [vmem:[%s1369_s26 + $0x80] sm:$0xff]  ;;  %163 = vst [vmem:[%s1377_s27 + $0x30] sm:$0xff] %v162_v6  ;;  %165 = vst [vmem:[%s1377_s27 + $0x38] sm:$0xff] %v164_v7  ;;  %v168_v9 = vld [vmem:[%s1369_s26 + $0x88] sm:$0xff] }
  0x17   : > { %167 = vst [vmem:[%s1377_s27 + $0x40] sm:$0xff] %v166_v8  ;;  %v170_v10 = vld [vmem:[%s1369_s26 + $0xa0] sm:$0xff]  ;;  %v172_v11 = vld [vmem:[%s1369_s26 + $0xa8] sm:$0xff]  ;;  %169 = vst [vmem:[%s1377_s27 + $0x48] sm:$0xff] %v168_v9 }
  0x18   : > { %171 = vst [vmem:[%s1377_s27 + $0x50] sm:$0xff] %v170_v10  ;;  %173 = vst [vmem:[%s1377_s27 + $0x58] sm:$0xff] %v172_v11  ;;  %v174_v12 = vld [vmem:[%s1369_s26 + $0xc0] sm:$0xff]  ;;  %v176_v13 = vld [vmem:[%s1369_s26 + $0xc8] sm:$0xff] }
  0x19   : > { %v178_v14 = vld [vmem:[%s1369_s26 + $0xe0] sm:$0xff]  ;;  %175 = vst [vmem:[%s1377_s27 + $0x60] sm:$0xff] %v174_v12  ;;  %177 = vst [vmem:[%s1377_s27 + $0x68] sm:$0xff] %v176_v13  ;;  %v180_v15 = vld [vmem:[%s1369_s26 + $0xe8] sm:$0xff] }
  0x1a   : > { %179 = vst [vmem:[%s1377_s27 + $0x70] sm:$0xff] %v178_v14  ;;  %v182_v16 = vld [vmem:[%s1369_s26 + $0x100] sm:$0xff]  ;;  %v184_v17 = vld [vmem:[%s1369_s26 + $0x108] sm:$0xff]  ;;  %181 = vst [vmem:[%s1377_s27 + $0x78] sm:$0xff] %v180_v15 }
  0x1b   : > { %183 = vst [vmem:[%s1377_s27 + $0x80] sm:$0xff] %v182_v16  ;;  %185 = vst [vmem:[%s1377_s27 + $0x88] sm:$0xff] %v184_v17  ;;  %v186_v18 = vld [vmem:[%s1369_s26 + $0x120] sm:$0xff]  ;;  %v188_v19 = vld [vmem:[%s1369_s26 + $0x128] sm:$0xff] }
  0x1c   : > { %v190_v20 = vld [vmem:[%s1369_s26 + $0x140] sm:$0xff]  ;;  %187 = vst [vmem:[%s1377_s27 + $0x90] sm:$0xff] %v186_v18  ;;  %189 = vst [vmem:[%s1377_s27 + $0x98] sm:$0xff] %v188_v19  ;;  %v192_v21 = vld [vmem:[%s1369_s26 + $0x148] sm:$0xff] }
  0x1d   : > { %191 = vst [vmem:[%s1377_s27 + $0xa0] sm:$0xff] %v190_v20  ;;  %v194_v22 = vld [vmem:[%s1369_s26 + $0x160] sm:$0xff]  ;;  %v196_v23 = vld [vmem:[%s1369_s26 + $0x168] sm:$0xff]  ;;  %193 = vst [vmem:[%s1377_s27 + $0xa8] sm:$0xff] %v192_v21 }
  0x1e   : > { %195 = vst [vmem:[%s1377_s27 + $0xb0] sm:$0xff] %v194_v22  ;;  %197 = vst [vmem:[%s1377_s27 + $0xb8] sm:$0xff] %v196_v23  ;;  %v198_v24 = vld [vmem:[%s1369_s26 + $0x180] sm:$0xff]  ;;  %v200_v25 = vld [vmem:[%s1369_s26 + $0x188] sm:$0xff] }
  0x1f   : > { %v202_v26 = vld [vmem:[%s1369_s26 + $0x1a0] sm:$0xff]  ;;  %199 = vst [vmem:[%s1377_s27 + $0xc0] sm:$0xff] %v198_v24  ;;  %201 = vst [vmem:[%s1377_s27 + $0xc8] sm:$0xff] %v200_v25  ;;  %v204_v27 = vld [vmem:[%s1369_s26 + $0x1a8] sm:$0xff] }
  0x20   : > { %203 = vst [vmem:[%s1377_s27 + $0xd0] sm:$0xff] %v202_v26  ;;  %v206_v28 = vld [vmem:[%s1369_s26 + $0x1c0] sm:$0xff]  ;;  %v208_v29 = vld [vmem:[%s1369_s26 + $0x1c8] sm:$0xff]  ;;  %205 = vst [vmem:[%s1377_s27 + $0xd8] sm:$0xff] %v204_v27 }
  0x21   : > { %207 = vst [vmem:[%s1377_s27 + $0xe0] sm:$0xff] %v206_v28  ;;  %209 = vst [vmem:[%s1377_s27 + $0xe8] sm:$0xff] %v208_v29  ;;  %v210_v30 = vld [vmem:[%s1369_s26 + $0x1e0] sm:$0xff]  ;;  %v212_v31 = vld [vmem:[%s1369_s26 + $0x1e8] sm:$0xff] }
  0x22   : > { %v214_v32 = vld [vmem:[%s1369_s26 + $0x200] sm:$0xff]  ;;  %211 = vst [vmem:[%s1377_s27 + $0xf0] sm:$0xff] %v210_v30  ;;  %213 = vst [vmem:[%s1377_s27 + $0xf8] sm:$0xff] %v212_v31  ;;  %v216_v33 = vld [vmem:[%s1369_s26 + $0x208] sm:$0xff] }
  0x23   : > { %215 = vst [vmem:[%s1377_s27 + $0x100] sm:$0xff] %v214_v32  ;;  %v218_v34 = vld [vmem:[%s1369_s26 + $0x220] sm:$0xff]  ;;  %v220_v35 = vld [vmem:[%s1369_s26 + $0x228] sm:$0xff]  ;;  %217 = vst [vmem:[%s1377_s27 + $0x108] sm:$0xff] %v216_v33 }
  0x24   : > { %219 = vst [vmem:[%s1377_s27 + $0x110] sm:$0xff] %v218_v34  ;;  %221 = vst [vmem:[%s1377_s27 + $0x118] sm:$0xff] %v220_v35  ;;  %v222_v36 = vld [vmem:[%s1369_s26 + $0x240] sm:$0xff]  ;;  %v224_v37 = vld [vmem:[%s1369_s26 + $0x248] sm:$0xff] }
  0x25   : > { %v226_v38 = vld [vmem:[%s1369_s26 + $0x260] sm:$0xff]  ;;  %223 = vst [vmem:[%s1377_s27 + $0x120] sm:$0xff] %v222_v36  ;;  %225 = vst [vmem:[%s1377_s27 + $0x128] sm:$0xff] %v224_v37  ;;  %v228_v39 = vld [vmem:[%s1369_s26 + $0x268] sm:$0xff] }
  0x26   : > { %227 = vst [vmem:[%s1377_s27 + $0x130] sm:$0xff] %v226_v38  ;;  %v230_v40 = vld [vmem:[%s1369_s26 + $0x280] sm:$0xff]  ;;  %v232_v41 = vld [vmem:[%s1369_s26 + $0x288] sm:$0xff]  ;;  %229 = vst [vmem:[%s1377_s27 + $0x138] sm:$0xff] %v228_v39 }
  0x27   : > { %231 = vst [vmem:[%s1377_s27 + $0x140] sm:$0xff] %v230_v40  ;;  %233 = vst [vmem:[%s1377_s27 + $0x148] sm:$0xff] %v232_v41  ;;  %v234_v42 = vld [vmem:[%s1369_s26 + $0x2a0] sm:$0xff]  ;;  %v236_v43 = vld [vmem:[%s1369_s26 + $0x2a8] sm:$0xff] }
  0x28   : > { %v238_v44 = vld [vmem:[%s1369_s26 + $0x2c0] sm:$0xff]  ;;  %235 = vst [vmem:[%s1377_s27 + $0x150] sm:$0xff] %v234_v42  ;;  %237 = vst [vmem:[%s1377_s27 + $0x158] sm:$0xff] %v236_v43  ;;  %v240_v45 = vld [vmem:[%s1369_s26 + $0x2c8] sm:$0xff] }
  0x29   : > { %239 = vst [vmem:[%s1377_s27 + $0x160] sm:$0xff] %v238_v44  ;;  %v242_v46 = vld [vmem:[%s1369_s26 + $0x2e0] sm:$0xff]  ;;  %v244_v47 = vld [vmem:[%s1369_s26 + $0x2e8] sm:$0xff]  ;;  %241 = vst [vmem:[%s1377_s27 + $0x168] sm:$0xff] %v240_v45 }
  0x2a   : > { %243 = vst [vmem:[%s1377_s27 + $0x170] sm:$0xff] %v242_v46  ;;  %245 = vst [vmem:[%s1377_s27 + $0x178] sm:$0xff] %v244_v47  ;;  %v246_v48 = vld [vmem:[%s1369_s26 + $0x300] sm:$0xff]  ;;  %v248_v49 = vld [vmem:[%s1369_s26 + $0x308] sm:$0xff] }
  0x2b   : > { %v250_v50 = vld [vmem:[%s1369_s26 + $0x320] sm:$0xff]  ;;  %247 = vst [vmem:[%s1377_s27 + $0x180] sm:$0xff] %v246_v48  ;;  %249 = vst [vmem:[%s1377_s27 + $0x188] sm:$0xff] %v248_v49  ;;  %v252_v51 = vld [vmem:[%s1369_s26 + $0x328] sm:$0xff] }
  0x2c   : > { %251 = vst [vmem:[%s1377_s27 + $0x190] sm:$0xff] %v250_v50  ;;  %v254_v52 = vld [vmem:[%s1369_s26 + $0x340] sm:$0xff]  ;;  %v256_v53 = vld [vmem:[%s1369_s26 + $0x348] sm:$0xff]  ;;  %253 = vst [vmem:[%s1377_s27 + $0x198] sm:$0xff] %v252_v51 }
  0x2d   : > { %255 = vst [vmem:[%s1377_s27 + $0x1a0] sm:$0xff] %v254_v52  ;;  %257 = vst [vmem:[%s1377_s27 + $0x1a8] sm:$0xff] %v256_v53  ;;  %v258_v54 = vld [vmem:[%s1369_s26 + $0x360] sm:$0xff]  ;;  %v260_v55 = vld [vmem:[%s1369_s26 + $0x368] sm:$0xff] }
  0x2e   : > { %v262_v56 = vld [vmem:[%s1369_s26 + $0x380] sm:$0xff]  ;;  %259 = vst [vmem:[%s1377_s27 + $0x1b0] sm:$0xff] %v258_v54  ;;  %261 = vst [vmem:[%s1377_s27 + $0x1b8] sm:$0xff] %v260_v55  ;;  %v264_v57 = vld [vmem:[%s1369_s26 + $0x388] sm:$0xff] }
  0x2f   : > { %263 = vst [vmem:[%s1377_s27 + $0x1c0] sm:$0xff] %v262_v56  ;;  %v266_v58 = vld [vmem:[%s1369_s26 + $0x3a0] sm:$0xff]  ;;  %v268_v59 = vld [vmem:[%s1369_s26 + $0x3a8] sm:$0xff]  ;;  %265 = vst [vmem:[%s1377_s27 + $0x1c8] sm:$0xff] %v264_v57 }
  0x30   : > { %267 = vst [vmem:[%s1377_s27 + $0x1d0] sm:$0xff] %v266_v58  ;;  %269 = vst [vmem:[%s1377_s27 + $0x1d8] sm:$0xff] %v268_v59  ;;  %v270_v60 = vld [vmem:[%s1369_s26 + $0x3c0] sm:$0xff]  ;;  %v272_v61 = vld [vmem:[%s1369_s26 + $0x3c8] sm:$0xff] }
  0x31   : > { %v274_v62 = vld [vmem:[%s1369_s26 + $0x3e0] sm:$0xff]  ;;  %271 = vst [vmem:[%s1377_s27 + $0x1e0] sm:$0xff] %v270_v60  ;;  %273 = vst [vmem:[%s1377_s27 + $0x1e8] sm:$0xff] %v272_v61  ;;  %v276_v63 = vld [vmem:[%s1369_s26 + $0x3e8] sm:$0xff] }
  0x32   : > { %275 = vst [vmem:[%s1377_s27 + $0x1f0] sm:$0xff] %v274_v62  ;;  %v278_v0 = vld [vmem:[%s1369_s26 + $0x400] sm:$0xff]  ;;  %v280_v1 = vld [vmem:[%s1369_s26 + $0x408] sm:$0xff]  ;;  %277 = vst [vmem:[%s1377_s27 + $0x1f8] sm:$0xff] %v276_v63 }
  0x33   : > { %279 = vst [vmem:[%s1377_s27 + $0x200] sm:$0xff] %v278_v0  ;;  %281 = vst [vmem:[%s1377_s27 + $0x208] sm:$0xff] %v280_v1  ;;  %v282_v2 = vld [vmem:[%s1369_s26 + $0x420] sm:$0xff]  ;;  %v284_v3 = vld [vmem:[%s1369_s26 + $0x428] sm:$0xff] }
  0x34   : > { %v286_v4 = vld [vmem:[%s1369_s26 + $0x440] sm:$0xff]  ;;  %283 = vst [vmem:[%s1377_s27 + $0x210] sm:$0xff] %v282_v2  ;;  %285 = vst [vmem:[%s1377_s27 + $0x218] sm:$0xff] %v284_v3  ;;  %v288_v5 = vld [vmem:[%s1369_s26 + $0x448] sm:$0xff] }
  0x35   : > { %287 = vst [vmem:[%s1377_s27 + $0x220] sm:$0xff] %v286_v4  ;;  %v290_v6 = vld [vmem:[%s1369_s26 + $0x460] sm:$0xff]  ;;  %v292_v7 = vld [vmem:[%s1369_s26 + $0x468] sm:$0xff]  ;;  %289 = vst [vmem:[%s1377_s27 + $0x228] sm:$0xff] %v288_v5 }
  0x36   : > { %291 = vst [vmem:[%s1377_s27 + $0x230] sm:$0xff] %v290_v6  ;;  %293 = vst [vmem:[%s1377_s27 + $0x238] sm:$0xff] %v292_v7  ;;  %v294_v8 = vld [vmem:[%s1369_s26 + $0x480] sm:$0xff]  ;;  %v296_v9 = vld [vmem:[%s1369_s26 + $0x488] sm:$0xff] }
  0x37   : > { %v298_v10 = vld [vmem:[%s1369_s26 + $0x4a0] sm:$0xff]  ;;  %295 = vst [vmem:[%s1377_s27 + $0x240] sm:$0xff] %v294_v8  ;;  %297 = vst [vmem:[%s1377_s27 + $0x248] sm:$0xff] %v296_v9  ;;  %v300_v11 = vld [vmem:[%s1369_s26 + $0x4a8] sm:$0xff] }
  0x38   : > { %299 = vst [vmem:[%s1377_s27 + $0x250] sm:$0xff] %v298_v10  ;;  %v302_v12 = vld [vmem:[%s1369_s26 + $0x4c0] sm:$0xff]  ;;  %v304_v13 = vld [vmem:[%s1369_s26 + $0x4c8] sm:$0xff]  ;;  %301 = vst [vmem:[%s1377_s27 + $0x258] sm:$0xff] %v300_v11 }
  0x39   : > { %303 = vst [vmem:[%s1377_s27 + $0x260] sm:$0xff] %v302_v12  ;;  %305 = vst [vmem:[%s1377_s27 + $0x268] sm:$0xff] %v304_v13  ;;  %v306_v14 = vld [vmem:[%s1369_s26 + $0x4e0] sm:$0xff]  ;;  %v308_v15 = vld [vmem:[%s1369_s26 + $0x4e8] sm:$0xff] }
  0x3a   : > { %v310_v16 = vld [vmem:[%s1369_s26 + $0x500] sm:$0xff]  ;;  %307 = vst [vmem:[%s1377_s27 + $0x270] sm:$0xff] %v306_v14  ;;  %309 = vst [vmem:[%s1377_s27 + $0x278] sm:$0xff] %v308_v15  ;;  %v312_v17 = vld [vmem:[%s1369_s26 + $0x508] sm:$0xff] }
  0x3b   : > { %311 = vst [vmem:[%s1377_s27 + $0x280] sm:$0xff] %v310_v16  ;;  %v314_v18 = vld [vmem:[%s1369_s26 + $0x520] sm:$0xff]  ;;  %v316_v19 = vld [vmem:[%s1369_s26 + $0x528] sm:$0xff]  ;;  %313 = vst [vmem:[%s1377_s27 + $0x288] sm:$0xff] %v312_v17 }
  0x3c   : > { %315 = vst [vmem:[%s1377_s27 + $0x290] sm:$0xff] %v314_v18  ;;  %317 = vst [vmem:[%s1377_s27 + $0x298] sm:$0xff] %v316_v19  ;;  %v318_v20 = vld [vmem:[%s1369_s26 + $0x540] sm:$0xff]  ;;  %v320_v21 = vld [vmem:[%s1369_s26 + $0x548] sm:$0xff] }
  0x3d   : > { %v322_v22 = vld [vmem:[%s1369_s26 + $0x560] sm:$0xff]  ;;  %319 = vst [vmem:[%s1377_s27 + $0x2a0] sm:$0xff] %v318_v20  ;;  %321 = vst [vmem:[%s1377_s27 + $0x2a8] sm:$0xff] %v320_v21  ;;  %v324_v23 = vld [vmem:[%s1369_s26 + $0x568] sm:$0xff] }
  0x3e   : > { %323 = vst [vmem:[%s1377_s27 + $0x2b0] sm:$0xff] %v322_v22  ;;  %v326_v24 = vld [vmem:[%s1369_s26 + $0x580] sm:$0xff]  ;;  %v328_v25 = vld [vmem:[%s1369_s26 + $0x588] sm:$0xff]  ;;  %325 = vst [vmem:[%s1377_s27 + $0x2b8] sm:$0xff] %v324_v23 }
  0x3f   : > { %327 = vst [vmem:[%s1377_s27 + $0x2c0] sm:$0xff] %v326_v24  ;;  %329 = vst [vmem:[%s1377_s27 + $0x2c8] sm:$0xff] %v328_v25  ;;  %v330_v26 = vld [vmem:[%s1369_s26 + $0x5a0] sm:$0xff]  ;;  %v332_v27 = vld [vmem:[%s1369_s26 + $0x5a8] sm:$0xff] }
  0x40   : > { %v334_v28 = vld [vmem:[%s1369_s26 + $0x5c0] sm:$0xff]  ;;  %331 = vst [vmem:[%s1377_s27 + $0x2d0] sm:$0xff] %v330_v26  ;;  %333 = vst [vmem:[%s1377_s27 + $0x2d8] sm:$0xff] %v332_v27  ;;  %v336_v29 = vld [vmem:[%s1369_s26 + $0x5c8] sm:$0xff] }
  0x41   : > { %335 = vst [vmem:[%s1377_s27 + $0x2e0] sm:$0xff] %v334_v28  ;;  %v338_v30 = vld [vmem:[%s1369_s26 + $0x5e0] sm:$0xff]  ;;  %v340_v31 = vld [vmem:[%s1369_s26 + $0x5e8] sm:$0xff]  ;;  %337 = vst [vmem:[%s1377_s27 + $0x2e8] sm:$0xff] %v336_v29 }
  0x42   : > { %339 = vst [vmem:[%s1377_s27 + $0x2f0] sm:$0xff] %v338_v30  ;;  %341 = vst [vmem:[%s1377_s27 + $0x2f8] sm:$0xff] %v340_v31  ;;  %v342_v32 = vld [vmem:[%s1369_s26 + $0x600] sm:$0xff]  ;;  %v344_v33 = vld [vmem:[%s1369_s26 + $0x608] sm:$0xff] }
  0x43   : > { %v346_v34 = vld [vmem:[%s1369_s26 + $0x620] sm:$0xff]  ;;  %343 = vst [vmem:[%s1377_s27 + $0x300] sm:$0xff] %v342_v32  ;;  %345 = vst [vmem:[%s1377_s27 + $0x308] sm:$0xff] %v344_v33  ;;  %v348_v35 = vld [vmem:[%s1369_s26 + $0x628] sm:$0xff] }
  0x44   : > { %347 = vst [vmem:[%s1377_s27 + $0x310] sm:$0xff] %v346_v34  ;;  %v350_v36 = vld [vmem:[%s1369_s26 + $0x640] sm:$0xff]  ;;  %v352_v37 = vld [vmem:[%s1369_s26 + $0x648] sm:$0xff]  ;;  %349 = vst [vmem:[%s1377_s27 + $0x318] sm:$0xff] %v348_v35 }
  0x45   : > { %351 = vst [vmem:[%s1377_s27 + $0x320] sm:$0xff] %v350_v36  ;;  %353 = vst [vmem:[%s1377_s27 + $0x328] sm:$0xff] %v352_v37  ;;  %v354_v38 = vld [vmem:[%s1369_s26 + $0x660] sm:$0xff]  ;;  %v356_v39 = vld [vmem:[%s1369_s26 + $0x668] sm:$0xff] }
  0x46   : > { %v358_v40 = vld [vmem:[%s1369_s26 + $0x680] sm:$0xff]  ;;  %355 = vst [vmem:[%s1377_s27 + $0x330] sm:$0xff] %v354_v38  ;;  %357 = vst [vmem:[%s1377_s27 + $0x338] sm:$0xff] %v356_v39  ;;  %v360_v41 = vld [vmem:[%s1369_s26 + $0x688] sm:$0xff] }
  0x47   : > { %359 = vst [vmem:[%s1377_s27 + $0x340] sm:$0xff] %v358_v40  ;;  %v362_v42 = vld [vmem:[%s1369_s26 + $0x6a0] sm:$0xff]  ;;  %v364_v43 = vld [vmem:[%s1369_s26 + $0x6a8] sm:$0xff]  ;;  %361 = vst [vmem:[%s1377_s27 + $0x348] sm:$0xff] %v360_v41 }
  0x48   : > { %363 = vst [vmem:[%s1377_s27 + $0x350] sm:$0xff] %v362_v42  ;;  %365 = vst [vmem:[%s1377_s27 + $0x358] sm:$0xff] %v364_v43  ;;  %v366_v44 = vld [vmem:[%s1369_s26 + $0x6c0] sm:$0xff]  ;;  %v368_v45 = vld [vmem:[%s1369_s26 + $0x6c8] sm:$0xff] }
  0x49   : > { %v370_v46 = vld [vmem:[%s1369_s26 + $0x6e0] sm:$0xff]  ;;  %367 = vst [vmem:[%s1377_s27 + $0x360] sm:$0xff] %v366_v44  ;;  %369 = vst [vmem:[%s1377_s27 + $0x368] sm:$0xff] %v368_v45  ;;  %v372_v47 = vld [vmem:[%s1369_s26 + $0x6e8] sm:$0xff] }
  0x4a   : > { %371 = vst [vmem:[%s1377_s27 + $0x370] sm:$0xff] %v370_v46  ;;  %v374_v48 = vld [vmem:[%s1369_s26 + $0x700] sm:$0xff]  ;;  %v376_v49 = vld [vmem:[%s1369_s26 + $0x708] sm:$0xff]  ;;  %373 = vst [vmem:[%s1377_s27 + $0x378] sm:$0xff] %v372_v47 }
  0x4b   : > { %375 = vst [vmem:[%s1377_s27 + $0x380] sm:$0xff] %v374_v48  ;;  %377 = vst [vmem:[%s1377_s27 + $0x388] sm:$0xff] %v376_v49  ;;  %v378_v50 = vld [vmem:[%s1369_s26 + $0x720] sm:$0xff]  ;;  %v380_v51 = vld [vmem:[%s1369_s26 + $0x728] sm:$0xff] }
  0x4c   : > { %v382_v52 = vld [vmem:[%s1369_s26 + $0x740] sm:$0xff]  ;;  %379 = vst [vmem:[%s1377_s27 + $0x390] sm:$0xff] %v378_v50  ;;  %381 = vst [vmem:[%s1377_s27 + $0x398] sm:$0xff] %v380_v51  ;;  %v384_v53 = vld [vmem:[%s1369_s26 + $0x748] sm:$0xff] }
  0x4d   : > { %383 = vst [vmem:[%s1377_s27 + $0x3a0] sm:$0xff] %v382_v52  ;;  %v386_v54 = vld [vmem:[%s1369_s26 + $0x760] sm:$0xff]  ;;  %v388_v55 = vld [vmem:[%s1369_s26 + $0x768] sm:$0xff]  ;;  %385 = vst [vmem:[%s1377_s27 + $0x3a8] sm:$0xff] %v384_v53 }
  0x4e   : > { %387 = vst [vmem:[%s1377_s27 + $0x3b0] sm:$0xff] %v386_v54  ;;  %389 = vst [vmem:[%s1377_s27 + $0x3b8] sm:$0xff] %v388_v55  ;;  %v390_v56 = vld [vmem:[%s1369_s26 + $0x780] sm:$0xff]  ;;  %v392_v57 = vld [vmem:[%s1369_s26 + $0x788] sm:$0xff] }
  0x4f   : > { %v394_v58 = vld [vmem:[%s1369_s26 + $0x7a0] sm:$0xff]  ;;  %391 = vst [vmem:[%s1377_s27 + $0x3c0] sm:$0xff] %v390_v56  ;;  %393 = vst [vmem:[%s1377_s27 + $0x3c8] sm:$0xff] %v392_v57  ;;  %v396_v59 = vld [vmem:[%s1369_s26 + $0x7a8] sm:$0xff] }
  0x50   : > { %395 = vst [vmem:[%s1377_s27 + $0x3d0] sm:$0xff] %v394_v58  ;;  %v398_v60 = vld [vmem:[%s1369_s26 + $0x7c0] sm:$0xff]  ;;  %v400_v61 = vld [vmem:[%s1369_s26 + $0x7c8] sm:$0xff]  ;;  %397 = vst [vmem:[%s1377_s27 + $0x3d8] sm:$0xff] %v396_v59 }
  0x51   : > { %399 = vst [vmem:[%s1377_s27 + $0x3e0] sm:$0xff] %v398_v60  ;;  %401 = vst [vmem:[%s1377_s27 + $0x3e8] sm:$0xff] %v400_v61  ;;  %v402_v62 = vld [vmem:[%s1369_s26 + $0x7e0] sm:$0xff]  ;;  %v404_v63 = vld [vmem:[%s1369_s26 + $0x7e8] sm:$0xff] }
  0x52   : > { %v406_v0 = vld [vmem:[%s1369_s26 + $0x800] sm:$0xff]  ;;  %403 = vst [vmem:[%s1377_s27 + $0x3f0] sm:$0xff] %v402_v62  ;;  %405 = vst [vmem:[%s1377_s27 + $0x3f8] sm:$0xff] %v404_v63  ;;  %v408_v1 = vld [vmem:[%s1369_s26 + $0x808] sm:$0xff] }
  0x53   : > { %407 = vst [vmem:[%s1377_s27 + $0x400] sm:$0xff] %v406_v0  ;;  %v410_v2 = vld [vmem:[%s1369_s26 + $0x820] sm:$0xff]  ;;  %v412_v3 = vld [vmem:[%s1369_s26 + $0x828] sm:$0xff]  ;;  %409 = vst [vmem:[%s1377_s27 + $0x408] sm:$0xff] %v408_v1 }
  0x54   : > { %411 = vst [vmem:[%s1377_s27 + $0x410] sm:$0xff] %v410_v2  ;;  %413 = vst [vmem:[%s1377_s27 + $0x418] sm:$0xff] %v412_v3  ;;  %v414_v4 = vld [vmem:[%s1369_s26 + $0x840] sm:$0xff]  ;;  %v416_v5 = vld [vmem:[%s1369_s26 + $0x848] sm:$0xff] }
  0x55   : > { %v418_v6 = vld [vmem:[%s1369_s26 + $0x860] sm:$0xff]  ;;  %415 = vst [vmem:[%s1377_s27 + $0x420] sm:$0xff] %v414_v4  ;;  %417 = vst [vmem:[%s1377_s27 + $0x428] sm:$0xff] %v416_v5  ;;  %v420_v7 = vld [vmem:[%s1369_s26 + $0x868] sm:$0xff] }
  0x56   : > { %419 = vst [vmem:[%s1377_s27 + $0x430] sm:$0xff] %v418_v6  ;;  %v422_v8 = vld [vmem:[%s1369_s26 + $0x880] sm:$0xff]  ;;  %v424_v9 = vld [vmem:[%s1369_s26 + $0x888] sm:$0xff]  ;;  %421 = vst [vmem:[%s1377_s27 + $0x438] sm:$0xff] %v420_v7 }
  0x57   : > { %423 = vst [vmem:[%s1377_s27 + $0x440] sm:$0xff] %v422_v8  ;;  %425 = vst [vmem:[%s1377_s27 + $0x448] sm:$0xff] %v424_v9  ;;  %v426_v10 = vld [vmem:[%s1369_s26 + $0x8a0] sm:$0xff]  ;;  %v428_v11 = vld [vmem:[%s1369_s26 + $0x8a8] sm:$0xff] }
  0x58   : > { %v430_v12 = vld [vmem:[%s1369_s26 + $0x8c0] sm:$0xff]  ;;  %427 = vst [vmem:[%s1377_s27 + $0x450] sm:$0xff] %v426_v10  ;;  %429 = vst [vmem:[%s1377_s27 + $0x458] sm:$0xff] %v428_v11  ;;  %v432_v13 = vld [vmem:[%s1369_s26 + $0x8c8] sm:$0xff] }
  0x59   : > { %431 = vst [vmem:[%s1377_s27 + $0x460] sm:$0xff] %v430_v12  ;;  %v434_v14 = vld [vmem:[%s1369_s26 + $0x8e0] sm:$0xff]  ;;  %v436_v15 = vld [vmem:[%s1369_s26 + $0x8e8] sm:$0xff]  ;;  %433 = vst [vmem:[%s1377_s27 + $0x468] sm:$0xff] %v432_v13 }
  0x5a   : > { %435 = vst [vmem:[%s1377_s27 + $0x470] sm:$0xff] %v434_v14  ;;  %437 = vst [vmem:[%s1377_s27 + $0x478] sm:$0xff] %v436_v15 }
  0x5b PF: > { %p1220_p7 = scmp.ge.s32.totalorder %s1305_s14, 1  ;;  %p442_p8 = scmp.lt.s32.totalorder %s1305_s14, 3 }
  0x5d   : > { %p443_p9 = pnand %p1220_p7, %p442_p8 }
  0x5e   : > { %s449_s28 = sand.u32 (!%p443_p9), 1, %s1297_s12  }
  0x5f   : > { %446 = sbr.rel (%p443_p9) target bundleno = 420 (0x1a4), region = 51  ;;  %s1221_s8 = sshll.u32 (!%p443_p9), %s449_s28, 7 }
  0x60   : > { %s1254_s6 = smul.u32 (!%p443_p9), 1152, %s449_s28  ;;  %s1984_s12 = scalar_lea.vmem (!%p443_p9), [#allocation3], %s1221_s8 }
  0x62   : > { %s1672_s7 = scalar_lea.vmem (!%p443_p9), [#allocation2], %s1254_s6 }
  0x64   : > { %v474_v16 = vld [vmem:[%s2045_s0 + $0x8] sm:$0xff]  ;;  %v476_v17 = vld [vmem:[%s2045_s0 + $0x18] sm:$0xff]  ;;  %v1307_v18 = vmov 0   ;;  %v551_v21 = vld [vmem:[%s1672_s7 + $0xf0] sm:$0xff]  ;;  %vm705_vm0 = vcmask 523264   ;;  %s1236_s28 = sshll.u32 (%p1359_p5), %s1214_s15, 4 }
  0x65   : > { %794 = vmatprep.mubr.f32.mxu0 %v474_v16  ;;  %907 = vmatprep.mubr.f32.mxu1 %v476_v17  ;;  %v552_v19 = vld [vmem:[%s1672_s7 + $0xf8] sm:$0xff]  ;;  %v615_v22 = vld [vmem:[%s1672_s7 + $0x2f0] sm:$0xff]  ;;  %v550_v23 = vld [vmem:[%s1672_s7 + $0xe8] sm:$0xff]  ;;  %s1110_s20 = scalar_lea.vmem (%p1359_p5), %s2048_s3, %s1236_s28 }
  0x66   : > { %1281 = vset.pattern.permute.xlu0 %v1307_v18  ;;  %1282 = vset.pattern.permute.xlu1 %v1307_v18  ;;  %v616_v20 = vld [vmem:[%s1672_s7 + $0x2f8] sm:$0xff]  ;;  %v614_v24 = vld [vmem:[%s1672_s7 + $0x2e8] sm:$0xff]  ;;  %v549_v25 = vld [vmem:[%s1672_s7 + $0xe0] sm:$0xff] }
  0x67   : > { %730 = vmatprep.subr.mxu0 %v552_v19  ;;  %843 = vmatprep.subr.mxu1 %v616_v20  ;;  %v613_v26 = vld [vmem:[%s1672_s7 + $0x2e0] sm:$0xff]  ;;  %v548_v27 = vld [vmem:[%s1672_s7 + $0xd8] sm:$0xff]  ;;  %v547_v29 = vld [vmem:[%s1672_s7 + $0xd0] sm:$0xff] }
  0x68   : > { %731 = vmatpush1.msra.mxu0 %v551_v21  ;;  %844 = vmatpush1.msra.mxu1 %v615_v22  ;;  %v612_v28 = vld [vmem:[%s1672_s7 + $0x2d8] sm:$0xff]  ;;  %v611_v30 = vld [vmem:[%s1672_s7 + $0x2d0] sm:$0xff]  ;;  %v546_v31 = vld [vmem:[%s1672_s7 + $0xc8] sm:$0xff] }
  0x69   : > { %732 = vmatprep.subr.mxu0 %v550_v23  ;;  %845 = vmatprep.subr.mxu1 %v614_v24  ;;  %v610_v32 = vld [vmem:[%s1672_s7 + $0x2c8] sm:$0xff]  ;;  %v545_v33 = vld [vmem:[%s1672_s7 + $0xc0] sm:$0xff]  ;;  %v544_v35 = vld [vmem:[%s1672_s7 + $0xb8] sm:$0xff] }
  0x6a   : > { %733 = vmatpush1.msra.mxu0 %v549_v25  ;;  %846 = vmatpush1.msra.mxu1 %v613_v26  ;;  %v609_v34 = vld [vmem:[%s1672_s7 + $0x2c0] sm:$0xff]  ;;  %v608_v36 = vld [vmem:[%s1672_s7 + $0x2b8] sm:$0xff]  ;;  %v543_v37 = vld [vmem:[%s1672_s7 + $0xb0] sm:$0xff] }
  0x6b   : > { %734 = vmatprep.subr.mxu0 %v548_v27  ;;  %847 = vmatprep.subr.mxu1 %v612_v28  ;;  %v607_v38 = vld [vmem:[%s1672_s7 + $0x2b0] sm:$0xff]  ;;  %v542_v39 = vld [vmem:[%s1672_s7 + $0xa8] sm:$0xff]  ;;  %v541_v41 = vld [vmem:[%s1672_s7 + $0xa0] sm:$0xff] }
  0x6c   : > { %735 = vmatpush1.msra.mxu0 %v547_v29  ;;  %848 = vmatpush1.msra.mxu1 %v611_v30  ;;  %v606_v40 = vld [vmem:[%s1672_s7 + $0x2a8] sm:$0xff]  ;;  %v605_v42 = vld [vmem:[%s1672_s7 + $0x2a0] sm:$0xff]  ;;  %v540_v43 = vld [vmem:[%s1672_s7 + $0x98] sm:$0xff] }
  0x6d   : > { %736 = vmatprep.subr.mxu0 %v546_v31  ;;  %849 = vmatprep.subr.mxu1 %v610_v32  ;;  %v604_v44 = vld [vmem:[%s1672_s7 + $0x298] sm:$0xff]  ;;  %v539_v45 = vld [vmem:[%s1672_s7 + $0x90] sm:$0xff]  ;;  %v538_v47 = vld [vmem:[%s1672_s7 + $0x88] sm:$0xff] }
  0x6e   : > { %737 = vmatpush1.msra.mxu0 %v545_v33  ;;  %850 = vmatpush1.msra.mxu1 %v609_v34  ;;  %v603_v46 = vld [vmem:[%s1672_s7 + $0x290] sm:$0xff]  ;;  %v602_v48 = vld [vmem:[%s1672_s7 + $0x288] sm:$0xff]  ;;  %v537_v49 = vld [vmem:[%s1672_s7 + $0x80] sm:$0xff] }
  0x6f   : > { %738 = vmatprep.subr.mxu0 %v544_v35  ;;  %851 = vmatprep.subr.mxu1 %v608_v36  ;;  %v601_v50 = vld [vmem:[%s1672_s7 + $0x280] sm:$0xff]  ;;  %v536_v51 = vld [vmem:[%s1672_s7 + $0x78] sm:$0xff]  ;;  %v535_v53 = vld [vmem:[%s1672_s7 + $0x70] sm:$0xff] }
  0x70   : > { %739 = vmatpush1.msra.mxu0 %v543_v37  ;;  %852 = vmatpush1.msra.mxu1 %v607_v38  ;;  %v600_v52 = vld [vmem:[%s1672_s7 + $0x278] sm:$0xff]  ;;  %v599_v54 = vld [vmem:[%s1672_s7 + $0x270] sm:$0xff]  ;;  %v534_v55 = vld [vmem:[%s1672_s7 + $0x68] sm:$0xff] }
  0x71   : > { %740 = vmatprep.subr.mxu0 %v542_v39  ;;  %853 = vmatprep.subr.mxu1 %v606_v40  ;;  %v598_v56 = vld [vmem:[%s1672_s7 + $0x268] sm:$0xff]  ;;  %v533_v57 = vld [vmem:[%s1672_s7 + $0x60] sm:$0xff]  ;;  %v532_v59 = vld [vmem:[%s1672_s7 + $0x58] sm:$0xff] }
  0x72   : > { %741 = vmatpush1.msra.mxu0 %v541_v41  ;;  %854 = vmatpush1.msra.mxu1 %v605_v42  ;;  %v597_v58 = vld [vmem:[%s1672_s7 + $0x260] sm:$0xff]  ;;  %v596_v60 = vld [vmem:[%s1672_s7 + $0x258] sm:$0xff]  ;;  %v531_v61 = vld [vmem:[%s1672_s7 + $0x50] sm:$0xff] }
  0x73   : > { %742 = vmatprep.subr.mxu0 %v540_v43  ;;  %855 = vmatprep.subr.mxu1 %v604_v44  ;;  %v595_v62 = vld [vmem:[%s1672_s7 + $0x250] sm:$0xff]  ;;  %v530_v63 = vld [vmem:[%s1672_s7 + $0x48] sm:$0xff]  ;;  %v529_v1 = vld [vmem:[%s1672_s7 + $0x40] sm:$0xff] }
  0x74   : > { %743 = vmatpush1.msra.mxu0 %v539_v45  ;;  %856 = vmatpush1.msra.mxu1 %v603_v46  ;;  %v594_v0 = vld [vmem:[%s1672_s7 + $0x248] sm:$0xff]  ;;  %v593_v2 = vld [vmem:[%s1672_s7 + $0x240] sm:$0xff]  ;;  %v528_v3 = vld [vmem:[%s1672_s7 + $0x38] sm:$0xff] }
  0x75   : > { %744 = vmatprep.subr.mxu0 %v538_v47  ;;  %857 = vmatprep.subr.mxu1 %v602_v48  ;;  %v592_v4 = vld [vmem:[%s1672_s7 + $0x238] sm:$0xff]  ;;  %v527_v5 = vld [vmem:[%s1672_s7 + $0x30] sm:$0xff]  ;;  %v526_v7 = vld [vmem:[%s1672_s7 + $0x28] sm:$0xff] }
  0x76   : > { %745 = vmatpush1.msra.mxu0 %v537_v49  ;;  %858 = vmatpush1.msra.mxu1 %v601_v50  ;;  %v591_v6 = vld [vmem:[%s1672_s7 + $0x230] sm:$0xff]  ;;  %v590_v8 = vld [vmem:[%s1672_s7 + $0x228] sm:$0xff]  ;;  %v525_v9 = vld [vmem:[%s1672_s7 + $0x20] sm:$0xff] }
  0x77   : > { %746 = vmatprep.subr.mxu0 %v536_v51  ;;  %859 = vmatprep.subr.mxu1 %v600_v52  ;;  %v589_v10 = vld [vmem:[%s1672_s7 + $0x220] sm:$0xff]  ;;  %v524_v11 = vld [vmem:[%s1672_s7 + $0x18] sm:$0xff]  ;;  %v523_v13 = vld [vmem:[%s1672_s7 + $0x10] sm:$0xff] }
  0x78   : > { %747 = vmatpush1.msra.mxu0 %v535_v53  ;;  %860 = vmatpush1.msra.mxu1 %v599_v54  ;;  %v588_v12 = vld [vmem:[%s1672_s7 + $0x218] sm:$0xff]  ;;  %v587_v14 = vld [vmem:[%s1672_s7 + $0x210] sm:$0xff]  ;;  %v522_v15 = vld [vmem:[%s1672_s7 + $0x8] sm:$0xff] }
  0x79   : > { %748 = vmatprep.subr.mxu0 %v534_v55  ;;  %861 = vmatprep.subr.mxu1 %v598_v56  ;;  %v586_v16 = vld [vmem:[%s1672_s7 + $0x208] sm:$0xff]  ;;  %v521_v17 = vld [vmem:[%s1672_s7] sm:$0xff]  ;;  %v584_v19 = vld [vmem:[%s1672_s7 + $0x1f8] sm:$0xff] }
  0x7a   : > { %749 = vmatpush1.msra.mxu0 %v533_v57  ;;  %862 = vmatpush1.msra.mxu1 %v597_v58  ;;  %v585_v18 = vld [vmem:[%s1672_s7 + $0x200] sm:$0xff]  ;;  %v648_v20 = vld [vmem:[%s1672_s7 + $0x3f8] sm:$0xff]  ;;  %v583_v21 = vld [vmem:[%s1672_s7 + $0x1f0] sm:$0xff] }
  0x7b   : > { %750 = vmatprep.subr.mxu0 %v532_v59  ;;  %863 = vmatprep.subr.mxu1 %v596_v60  ;;  %v647_v22 = vld [vmem:[%s1672_s7 + $0x3f0] sm:$0xff]  ;;  %v582_v23 = vld [vmem:[%s1672_s7 + $0x1e8] sm:$0xff]  ;;  %v581_v25 = vld [vmem:[%s1672_s7 + $0x1e0] sm:$0xff] }
  0x7c   : > { %751 = vmatpush1.msra.mxu0 %v531_v61  ;;  %864 = vmatpush1.msra.mxu1 %v595_v62  ;;  %v646_v24 = vld [vmem:[%s1672_s7 + $0x3e8] sm:$0xff]  ;;  %v645_v26 = vld [vmem:[%s1672_s7 + $0x3e0] sm:$0xff]  ;;  %v580_v27 = vld [vmem:[%s1672_s7 + $0x1d8] sm:$0xff] }
  0x7d   : > { %752 = vmatprep.subr.mxu0 %v530_v63  ;;  %865 = vmatprep.subr.mxu1 %v594_v0  ;;  %v644_v28 = vld [vmem:[%s1672_s7 + $0x3d8] sm:$0xff]  ;;  %v579_v29 = vld [vmem:[%s1672_s7 + $0x1d0] sm:$0xff]  ;;  %v578_v31 = vld [vmem:[%s1672_s7 + $0x1c8] sm:$0xff] }
  0x7e   : > { %753 = vmatpush1.msra.mxu0 %v529_v1  ;;  %866 = vmatpush1.msra.mxu1 %v593_v2  ;;  %v643_v30 = vld [vmem:[%s1672_s7 + $0x3d0] sm:$0xff]  ;;  %v642_v32 = vld [vmem:[%s1672_s7 + $0x3c8] sm:$0xff]  ;;  %v577_v33 = vld [vmem:[%s1672_s7 + $0x1c0] sm:$0xff] }
  0x7f   : > { %754 = vmatprep.subr.mxu0 %v528_v3  ;;  %867 = vmatprep.subr.mxu1 %v592_v4  ;;  %v641_v34 = vld [vmem:[%s1672_s7 + $0x3c0] sm:$0xff]  ;;  %v576_v35 = vld [vmem:[%s1672_s7 + $0x1b8] sm:$0xff]  ;;  %v575_v37 = vld [vmem:[%s1672_s7 + $0x1b0] sm:$0xff] }
  0x80   : > { %755 = vmatpush1.msra.mxu0 %v527_v5  ;;  %868 = vmatpush1.msra.mxu1 %v591_v6  ;;  %v640_v36 = vld [vmem:[%s1672_s7 + $0x3b8] sm:$0xff]  ;;  %v639_v38 = vld [vmem:[%s1672_s7 + $0x3b0] sm:$0xff]  ;;  %v574_v39 = vld [vmem:[%s1672_s7 + $0x1a8] sm:$0xff] }
  0x81   : > { %756 = vmatprep.subr.mxu0 %v526_v7  ;;  %869 = vmatprep.subr.mxu1 %v590_v8  ;;  %v638_v40 = vld [vmem:[%s1672_s7 + $0x3a8] sm:$0xff]  ;;  %v573_v41 = vld [vmem:[%s1672_s7 + $0x1a0] sm:$0xff]  ;;  %v572_v43 = vld [vmem:[%s1672_s7 + $0x198] sm:$0xff] }
  0x82   : > { %757 = vmatpush1.msra.mxu0 %v525_v9  ;;  %870 = vmatpush1.msra.mxu1 %v589_v10  ;;  %v637_v42 = vld [vmem:[%s1672_s7 + $0x3a0] sm:$0xff]  ;;  %v636_v44 = vld [vmem:[%s1672_s7 + $0x398] sm:$0xff]  ;;  %v571_v45 = vld [vmem:[%s1672_s7 + $0x190] sm:$0xff] }
  0x83   : > { %758 = vmatprep.subr.mxu0 %v524_v11  ;;  %871 = vmatprep.subr.mxu1 %v588_v12  ;;  %v635_v46 = vld [vmem:[%s1672_s7 + $0x390] sm:$0xff]  ;;  %v570_v47 = vld [vmem:[%s1672_s7 + $0x188] sm:$0xff]  ;;  %v569_v49 = vld [vmem:[%s1672_s7 + $0x180] sm:$0xff] }
  0x84   : > { %759 = vmatpush1.msra.mxu0 %v523_v13  ;;  %872 = vmatpush1.msra.mxu1 %v587_v14  ;;  %v634_v48 = vld [vmem:[%s1672_s7 + $0x388] sm:$0xff]  ;;  %v633_v50 = vld [vmem:[%s1672_s7 + $0x380] sm:$0xff]  ;;  %v568_v51 = vld [vmem:[%s1672_s7 + $0x178] sm:$0xff] }
  0x85   : > { %760 = vmatprep.subr.mxu0 %v522_v15  ;;  %873 = vmatprep.subr.mxu1 %v586_v16  ;;  %v632_v52 = vld [vmem:[%s1672_s7 + $0x378] sm:$0xff]  ;;  %v567_v53 = vld [vmem:[%s1672_s7 + $0x170] sm:$0xff]  ;;  %v566_v55 = vld [vmem:[%s1672_s7 + $0x168] sm:$0xff] }
  0x86   : > { %761 = vmatpush1.msra.mxu0 %v521_v17  ;;  %874 = vmatpush1.msra.mxu1 %v585_v18  ;;  %v631_v54 = vld [vmem:[%s1672_s7 + $0x370] sm:$0xff]  ;;  %v630_v56 = vld [vmem:[%s1672_s7 + $0x368] sm:$0xff]  ;;  %v565_v57 = vld [vmem:[%s1672_s7 + $0x160] sm:$0xff] }
  0x87   : > { %762 = vmatprep.subr.mxu0 %v584_v19  ;;  %875 = vmatprep.subr.mxu1 %v648_v20  ;;  %v629_v58 = vld [vmem:[%s1672_s7 + $0x360] sm:$0xff]  ;;  %v564_v59 = vld [vmem:[%s1672_s7 + $0x158] sm:$0xff]  ;;  %v563_v61 = vld [vmem:[%s1672_s7 + $0x150] sm:$0xff] }
  0x88   : > { %763 = vmatpush2.msra.mxu0 %v583_v21  ;;  %876 = vmatpush2.msra.mxu1 %v647_v22  ;;  %v628_v60 = vld [vmem:[%s1672_s7 + $0x358] sm:$0xff]  ;;  %v627_v62 = vld [vmem:[%s1672_s7 + $0x350] sm:$0xff]  ;;  %v562_v63 = vld [vmem:[%s1672_s7 + $0x148] sm:$0xff] }
  0x89   : > { %764 = vmatprep.subr.mxu0 %v582_v23  ;;  %877 = vmatprep.subr.mxu1 %v646_v24  ;;  %v626_v0 = vld [vmem:[%s1672_s7 + $0x348] sm:$0xff]  ;;  %v561_v1 = vld [vmem:[%s1672_s7 + $0x140] sm:$0xff]  ;;  %v560_v3 = vld [vmem:[%s1672_s7 + $0x138] sm:$0xff] }
  0x8a   : > { %765 = vmatpush2.msra.mxu0 %v581_v25  ;;  %878 = vmatpush2.msra.mxu1 %v645_v26  ;;  %v625_v2 = vld [vmem:[%s1672_s7 + $0x340] sm:$0xff]  ;;  %v624_v4 = vld [vmem:[%s1672_s7 + $0x338] sm:$0xff]  ;;  %v559_v5 = vld [vmem:[%s1672_s7 + $0x130] sm:$0xff] }
  0x8b   : > { %766 = vmatprep.subr.mxu0 %v580_v27  ;;  %879 = vmatprep.subr.mxu1 %v644_v28  ;;  %v623_v6 = vld [vmem:[%s1672_s7 + $0x330] sm:$0xff]  ;;  %v558_v7 = vld [vmem:[%s1672_s7 + $0x128] sm:$0xff]  ;;  %v557_v9 = vld [vmem:[%s1672_s7 + $0x120] sm:$0xff] }
  0x8c   : > { %767 = vmatpush2.msra.mxu0 %v579_v29  ;;  %880 = vmatpush2.msra.mxu1 %v643_v30  ;;  %v622_v8 = vld [vmem:[%s1672_s7 + $0x328] sm:$0xff]  ;;  %v621_v10 = vld [vmem:[%s1672_s7 + $0x320] sm:$0xff]  ;;  %v556_v11 = vld [vmem:[%s1672_s7 + $0x118] sm:$0xff] }
  0x8d   : > { %768 = vmatprep.subr.mxu0 %v578_v31  ;;  %881 = vmatprep.subr.mxu1 %v642_v32  ;;  %v620_v12 = vld [vmem:[%s1672_s7 + $0x318] sm:$0xff]  ;;  %v555_v13 = vld [vmem:[%s1672_s7 + $0x110] sm:$0xff]  ;;  %v554_v15 = vld [vmem:[%s1672_s7 + $0x108] sm:$0xff] }
  0x8e   : > { %769 = vmatpush2.msra.mxu0 %v577_v33  ;;  %882 = vmatpush2.msra.mxu1 %v641_v34  ;;  %v619_v14 = vld [vmem:[%s1672_s7 + $0x310] sm:$0xff]  ;;  %v618_v16 = vld [vmem:[%s1672_s7 + $0x308] sm:$0xff]  ;;  %v553_v17 = vld [vmem:[%s1672_s7 + $0x100] sm:$0xff] }
  0x8f   : > { %770 = vmatprep.subr.mxu0 %v576_v35  ;;  %883 = vmatprep.subr.mxu1 %v640_v36  ;;  %v617_v18 = vld [vmem:[%s1672_s7 + $0x300] sm:$0xff]  ;;  %v475_v20 = vld [vmem:[%s2045_s0 + $0x10] sm:$0xff]  ;;  %v664_v21 = vld [vmem:[%s1672_s7 + $0x478] sm:$0xff] }
  0x90   : > { %771 = vmatpush2.msra.mxu0 %v575_v37  ;;  %884 = vmatpush2.msra.mxu1 %v639_v38  ;;  %v473_v19 = vld [vmem:[%s2045_s0] sm:$0xff]  ;;  %v663_v22 = vld [vmem:[%s1672_s7 + $0x470] sm:$0xff]  ;;  %v478_v25 = vld [vmem:[%s2045_s0 + $0x28] sm:$0xff] }
  0x91   : > { %772 = vmatprep.subr.mxu0 %v574_v39  ;;  %885 = vmatprep.subr.mxu1 %v638_v40  ;;  %v479_v23 = vld [vmem:[%s2045_s0 + $0x30] sm:$0xff]  ;;  %v481_v24 = vld [vmem:[%s2045_s0 + $0x40] sm:$0xff]  ;;  %v480_v26 = vld [vmem:[%s2045_s0 + $0x38] sm:$0xff] }
  0x92   : > { %773 = vmatpush2.msra.mxu0 %v573_v41  ;;  %886 = vmatpush2.msra.mxu1 %v637_v42  ;;  %v662_v27 = vld [vmem:[%s1672_s7 + $0x468] sm:$0xff]  ;;  %v661_v28 = vld [vmem:[%s1672_s7 + $0x460] sm:$0xff]  ;;  %v484_v29 = vld [vmem:[%s2045_s0 + $0x58] sm:$0xff] }
  0x93   : > { %774 = vmatprep.subr.mxu0 %v572_v43  ;;  %887 = vmatprep.subr.mxu1 %v636_v44  ;;  %v486_v30 = vld [vmem:[%s2045_s0 + $0x68] sm:$0xff]  ;;  %v483_v31 = vld [vmem:[%s2045_s0 + $0x50] sm:$0xff]  ;;  %v485_v32 = vld [vmem:[%s2045_s0 + $0x60] sm:$0xff] }
  0x94   : > { %775 = vmatpush2.msra.mxu0 %v571_v45  ;;  %888 = vmatpush2.msra.mxu1 %v635_v46  ;;  %v660_v33 = vld [vmem:[%s1672_s7 + $0x458] sm:$0xff]  ;;  %v659_v34 = vld [vmem:[%s1672_s7 + $0x450] sm:$0xff]  ;;  %v489_v35 = vld [vmem:[%s2045_s0 + $0x80] sm:$0xff] }
  0x95   : > { %776 = vmatprep.subr.mxu0 %v570_v47  ;;  %889 = vmatprep.subr.mxu1 %v634_v48  ;;  %v491_v36 = vld [vmem:[%s2045_s0 + $0x90] sm:$0xff]  ;;  %v488_v37 = vld [vmem:[%s2045_s0 + $0x78] sm:$0xff]  ;;  %v490_v38 = vld [vmem:[%s2045_s0 + $0x88] sm:$0xff] }
  0x96   : > { %777 = vmatpush2.msra.mxu0 %v569_v49  ;;  %890 = vmatpush2.msra.mxu1 %v633_v50  ;;  %v658_v39 = vld [vmem:[%s1672_s7 + $0x448] sm:$0xff]  ;;  %v657_v40 = vld [vmem:[%s1672_s7 + $0x440] sm:$0xff]  ;;  %v496_v42 = vld [vmem:[%s2045_s0 + $0xb8] sm:$0xff] }
  0x97   : > { %778 = vmatprep.subr.mxu0 %v568_v51  ;;  %891 = vmatprep.subr.mxu1 %v632_v52  ;;  %v494_v41 = vld [vmem:[%s2045_s0 + $0xa8] sm:$0xff]  ;;  %v493_v43 = vld [vmem:[%s2045_s0 + $0xa0] sm:$0xff]  ;;  %v495_v44 = vld [vmem:[%s2045_s0 + $0xb0] sm:$0xff] }
  0x98   : > { %779 = vmatpush2.msra.mxu0 %v567_v53  ;;  %892 = vmatpush2.msra.mxu1 %v631_v54  ;;  %v656_v45 = vld [vmem:[%s1672_s7 + $0x438] sm:$0xff]  ;;  %v655_v46 = vld [vmem:[%s1672_s7 + $0x430] sm:$0xff]  ;;  %v501_v48 = vld [vmem:[%s2045_s0 + $0xe0] sm:$0xff] }
  0x99   : > { %780 = vmatprep.subr.mxu0 %v566_v55  ;;  %893 = vmatprep.subr.mxu1 %v630_v56  ;;  %v499_v47 = vld [vmem:[%s2045_s0 + $0xd0] sm:$0xff]  ;;  %v498_v49 = vld [vmem:[%s2045_s0 + $0xc8] sm:$0xff]  ;;  %v500_v50 = vld [vmem:[%s2045_s0 + $0xd8] sm:$0xff] }
  0x9a   : > { %781 = vmatpush2.msra.mxu0 %v565_v57  ;;  %894 = vmatpush2.msra.mxu1 %v629_v58  ;;  %v654_v51 = vld [vmem:[%s1672_s7 + $0x428] sm:$0xff]  ;;  %v653_v52 = vld [vmem:[%s1672_s7 + $0x420] sm:$0xff]  ;;  %v504_v53 = vld [vmem:[%s2045_s0 + $0xf8] sm:$0xff] }
  0x9b   : > { %782 = vmatprep.subr.mxu0 %v564_v59  ;;  %895 = vmatprep.subr.mxu1 %v628_v60  ;;  %v506_v54 = vld [vmem:[%s2045_s0 + $0x108] sm:$0xff]  ;;  %v503_v55 = vld [vmem:[%s2045_s0 + $0xf0] sm:$0xff]  ;;  %v505_v56 = vld [vmem:[%s2045_s0 + $0x100] sm:$0xff] }
  0x9c   : > { %783 = vmatpush2.msra.mxu0 %v563_v61  ;;  %896 = vmatpush2.msra.mxu1 %v627_v62  ;;  %v652_v57 = vld [vmem:[%s1672_s7 + $0x418] sm:$0xff]  ;;  %v651_v58 = vld [vmem:[%s1672_s7 + $0x410] sm:$0xff]  ;;  %v509_v59 = vld [vmem:[%s2045_s0 + $0x120] sm:$0xff] }
  0x9d   : > { %784 = vmatprep.subr.mxu0 %v562_v63  ;;  %897 = vmatprep.subr.mxu1 %v626_v0  ;;  %v511_v60 = vld [vmem:[%s2045_s0 + $0x130] sm:$0xff]  ;;  %v508_v61 = vld [vmem:[%s2045_s0 + $0x118] sm:$0xff]  ;;  %v510_v62 = vld [vmem:[%s2045_s0 + $0x128] sm:$0xff] }
  0x9e   : > { %785 = vmatpush2.msra.mxu0 %v561_v1  ;;  %898 = vmatpush2.msra.mxu1 %v625_v2  ;;  %v650_v63 = vld [vmem:[%s1672_s7 + $0x408] sm:$0xff]  ;;  %v649_v0 = vld [vmem:[%s1672_s7 + $0x400] sm:$0xff] }
  0x9f   : > { %786 = vmatprep.subr.mxu0 %v560_v3  ;;  %899 = vmatprep.subr.mxu1 %v624_v4  ;;  %v477_v1 = vld [vmem:[%s2045_s0 + $0x20] sm:$0xff]  ;;  %v1308_v3 = vmov 0.0  }
  0xa0   : > { %787 = vmatpush2.msra.mxu0 %v559_v5  ;;  %900 = vmatpush2.msra.mxu1 %v623_v6  ;;  %v497_v2 = vld [vmem:[%s2045_s0 + $0xc0] sm:$0xff]  ;;  %v515_v5 = vld [vmem:[%s2046_s1 + $0x10] sm:$0xff]  ;;  %v482_v6 = vld [vmem:[%s2045_s0 + $0x48] sm:$0xff] }
  0xa1   : > { %788 = vmatprep.subr.mxu0 %v558_v7  ;;  %901 = vmatprep.subr.mxu1 %v622_v8  ;;  %v513_v4 = vld [vmem:[%s2046_s1] sm:$0xff]  ;;  %v502_v7 = vld [vmem:[%s2045_s0 + $0xe8] sm:$0xff] }
  0xa2   : > { %789 = vmatpush2.msra.mxu0 %v557_v9  ;;  %902 = vmatpush2.msra.mxu1 %v621_v10  ;;  %v514_v8 = vld [vmem:[%s2046_s1 + $0x8] sm:$0xff]  ;;  %v516_v9 = vld [vmem:[%s2046_s1 + $0x18] sm:$0xff]  ;;  %v487_v10 = vld [vmem:[%s2045_s0 + $0x70] sm:$0xff] }
  0xa3   : > { %790 = vmatprep.subr.mxu0 %v556_v11  ;;  %903 = vmatprep.subr.mxu1 %v620_v12  ;;  %v507_v11 = vld [vmem:[%s2045_s0 + $0x110] sm:$0xff]  ;;  %v517_v12 = vld [vmem:[%s2046_s1 + $0x20] sm:$0xff] }
  0xa4   : > { %791 = vmatpush2.msra.mxu0 %v555_v13  ;;  %904 = vmatpush2.msra.mxu1 %v619_v14  ;;  %v518_v13 = vld [vmem:[%s2046_s1 + $0x28] sm:$0xff]  ;;  %v492_v14 = vld [vmem:[%s2045_s0 + $0x98] sm:$0xff] }
  0xa5   : > { %792 = vmatprep.subr.mxu0 %v554_v15  ;;  %905 = vmatprep.subr.mxu1 %v618_v16  ;;  %v512_v15 = vld [vmem:[%s2045_s0 + $0x138] sm:$0xff]  ;;  %v519_v16 = vld [vmem:[%s2046_s1 + $0x30] sm:$0xff] }
  0xa6   : > { %793 = vmatpush2.msra.mxu0 %v553_v17  ;;  %906 = vmatpush2.msra.mxu1 %v617_v18  ;;  %v520_v17 = vld [vmem:[%s2046_s1 + $0x38] sm:$0xff] }
  0xa7   : > { %795 = vmatmul.mubr.f32.vlgmr.msra.gmra.mxu0 %v473_v19  ;;  %908 = vmatmul.mubr.f32.vlgmr.msra.gmra.mxu1 %v475_v20 }
  0xa8   : > { %972 = vmatprep.subr.mxu0 %v664_v21  ;;  %1237 = vmatprep.subr.mxu1 %v664_v21 }
  0xa9   : > { %973 = vmatpush1.msra.mxu0 %v663_v22  ;;  %1245 = vmatpush1.msra.mxu1 %v663_v22 }
  0xaa   : > { %800 = vmatprep.mubr.f32.mxu0 %v479_v23  ;;  %913 = vmatprep.mubr.f32.mxu1 %v481_v24 }
  0xab   : > { %801 = vmatmul.mubr.f32.gmra.mxu0 %v478_v25  ;;  %914 = vmatmul.mubr.f32.gmra.mxu1 %v480_v26 }
  0xac   : > { %974 = vmatprep.subr.mxu0 %v662_v27  ;;  %1238 = vmatprep.subr.mxu1 %v662_v27 }
  0xad   : > { %975 = vmatpush1.msra.mxu0 %v661_v28  ;;  %1246 = vmatpush1.msra.mxu1 %v661_v28 }
  0xae   : > { %806 = vmatprep.mubr.f32.mxu0 %v484_v29  ;;  %919 = vmatprep.mubr.f32.mxu1 %v486_v30 }
  0xaf   : > { %807 = vmatmul.mubr.f32.gmra.mxu0 %v483_v31  ;;  %920 = vmatmul.mubr.f32.gmra.mxu1 %v485_v32 }
  0xb0   : > { %976 = vmatprep.subr.mxu0 %v660_v33  ;;  %1239 = vmatprep.subr.mxu1 %v660_v33 }
  0xb1   : > { %977 = vmatpush1.msra.mxu0 %v659_v34  ;;  %1247 = vmatpush1.msra.mxu1 %v659_v34 }
  0xb2   : > { %812 = vmatprep.mubr.f32.mxu0 %v489_v35  ;;  %925 = vmatprep.mubr.f32.mxu1 %v491_v36 }
  0xb3   : > { %813 = vmatmul.mubr.f32.gmra.mxu0 %v488_v37  ;;  %926 = vmatmul.mubr.f32.gmra.mxu1 %v490_v38 }
  0xb4   : > { %978 = vmatprep.subr.mxu0 %v658_v39  ;;  %1240 = vmatprep.subr.mxu1 %v658_v39 }
  0xb5   : > { %979 = vmatpush1.msra.mxu0 %v657_v40  ;;  %1248 = vmatpush1.msra.mxu1 %v657_v40 }
  0xb6   : > { %818 = vmatprep.mubr.f32.mxu0 %v494_v41  ;;  %931 = vmatprep.mubr.f32.mxu1 %v496_v42 }
  0xb7   : > { %819 = vmatmul.mubr.f32.gmra.mxu0 %v493_v43  ;;  %932 = vmatmul.mubr.f32.gmra.mxu1 %v495_v44 }
  0xb8   : > { %980 = vmatprep.subr.mxu0 %v656_v45  ;;  %1241 = vmatprep.subr.mxu1 %v656_v45 }
  0xb9   : > { %981 = vmatpush1.msra.mxu0 %v655_v46  ;;  %1249 = vmatpush1.msra.mxu1 %v655_v46 }
  0xba   : > { %824 = vmatprep.mubr.f32.mxu0 %v499_v47  ;;  %937 = vmatprep.mubr.f32.mxu1 %v501_v48 }
  0xbb   : > { %825 = vmatmul.mubr.f32.gmra.mxu0 %v498_v49  ;;  %938 = vmatmul.mubr.f32.gmra.mxu1 %v500_v50 }
  0xbc   : > { %982 = vmatprep.subr.mxu0 %v654_v51  ;;  %1242 = vmatprep.subr.mxu1 %v654_v51 }
  0xbd   : > { %983 = vmatpush1.msra.mxu0 %v653_v52  ;;  %1250 = vmatpush1.msra.mxu1 %v653_v52 }
  0xbe   : > { %830 = vmatprep.mubr.f32.mxu0 %v504_v53  ;;  %943 = vmatprep.mubr.f32.mxu1 %v506_v54 }
  0xbf   : > { %831 = vmatmul.mubr.f32.gmra.mxu0 %v503_v55  ;;  %944 = vmatmul.mubr.f32.gmra.mxu1 %v505_v56 }
  0xc0   : > { %984 = vmatprep.subr.mxu0 %v652_v57  ;;  %1243 = vmatprep.subr.mxu1 %v652_v57 }
  0xc1   : > { %985 = vmatpush1.msra.mxu0 %v651_v58  ;;  %1251 = vmatpush1.msra.mxu1 %v651_v58 }
  0xc2   : > { %836 = vmatprep.mubr.f32.mxu0 %v509_v59  ;;  %949 = vmatprep.mubr.f32.mxu1 %v511_v60 }
  0xc3   : > { %837 = vmatmul.mubr.f32.gmra.mxu0 %v508_v61  ;;  %950 = vmatmul.mubr.f32.gmra.mxu1 %v510_v62 }
  0xc4   : > { %986 = vmatprep.subr.mxu0 %v650_v63  ;;  %1244 = vmatprep.subr.mxu1 %v650_v63 }
  0xc5   : > { %987 = vmatpush1.msra.mxu0 %v649_v0  ;;  %1252 = vmatpush1.msra.mxu1 %v649_v0 }
  0xc6   : > { %1020 = vmatprep.mubr.f32.mxu0 %v1308_v3  ;;  %1044 = vmatprep.mubr.f32.mxu1 %v1308_v3 }
  0xc7   : > { %1222 = vmatmul.mubr.msk.f32.vlgmr.msra.gmra.mxu0 %vm705_vm0, %v477_v1  ;;  %1226 = vmatmul.mubr.msk.f32.vlgmr.msra.gmra.mxu1 %vm705_vm0, %v497_v2 }
  0xc8   : > { %1026 = vmatprep.mubr.f32.mxu0 %v1308_v3  ;;  %1050 = vmatprep.mubr.f32.mxu1 %v1308_v3 }
  0xc9   : > { %667 = vperm.xlu0 %1281, %v513_v4   ;;  %677 = vperm.xlu1 %1282, %v515_v5  }
  0xcb   : > { %1223 = vmatmul.mubr.msk.f32.gmra.mxu0 %vm705_vm0, %v482_v6  ;;  %1227 = vmatmul.mubr.msk.f32.gmra.mxu1 %vm705_vm0, %v502_v7 }
  0xcc   : > { %1032 = vmatprep.mubr.f32.mxu0 %v1308_v3  ;;  %1056 = vmatprep.mubr.f32.mxu1 %v1308_v3 }
  0xcd   : > { %672 = vperm.xlu0 %1281, %v514_v8   ;;  %682 = vperm.xlu1 %1282, %v516_v9  }
  0xcf   : > { %1224 = vmatmul.mubr.msk.f32.gmra.mxu0 %vm705_vm0, %v487_v10  ;;  %1228 = vmatmul.mubr.msk.f32.gmra.mxu1 %vm705_vm0, %v507_v11 }
  0xd0   : > { %1038 = vmatprep.mubr.f32.mxu0 %v1308_v3  ;;  %1062 = vmatprep.mubr.f32.mxu1 %v1308_v3 }
  0xd1   : > { %687 = vperm.xlu0 %1281, %v517_v12   ;;  %692 = vperm.xlu1 %1282, %v518_v13  }
  0xd3   : > { %1225 = vmatmul.mubr.msk.f32.gmra.mxu0 %vm705_vm0, %v492_v14  ;;  %1229 = vmatmul.mubr.msk.f32.gmra.mxu1 %vm705_vm0, %v512_v15 }
  0xd5   : > { %697 = vperm.xlu0 %1281, %v519_v16   ;;  %702 = vperm.xlu1 %1282, %v520_v17  }
 0x144   : > { %v668_v32 = vpop.permute.xlu0 %667  ;;  %v678_v37 = vpop.permute.xlu1 %677 }
 0x148   : > { %v673_v40 = vpop.permute.xlu0 %672  ;;  %v1976_v45 = vpop.permute.xlu1 %682 }
 0x14c   : > { %v688_v46 = vpop.permute.xlu0 %687  ;;  %v693_v53 = vpop.permute.xlu1 %692 }
 0x150   : > { %v698_v0 = vpop.permute.xlu0 %697  ;;  %v703_v15 = vpop.permute.xlu1 %702 }
 0x167   : > { %v796_v18 = vpop.f32.mrf.mxu0  ;;  %v909_v19 = vpop.f32.mrf.mxu1 }
 0x168   : > { %v797_v51 = vadd.f32 %v796_v18, %v668_v32 }
 0x169   : > { %v798_v20 = vpop.f32.mrf.mxu0  ;;  %v911_v21 = vpop.f32.mrf.mxu1 }
 0x16a   : > { %v799_v56 = vadd.f32 %v798_v20, %v668_v32  ;;  %v910_v62 = vadd.f32 %v909_v19, %v797_v51 }
 0x16b   : > { %v802_v22 = vpop.f32.mrf.mxu0  ;;  %v915_v23 = vpop.f32.mrf.mxu1 }
 0x16c   : > { %v803_v58 = vadd.f32 %v802_v22, %v673_v40  ;;  %v912_v5 = vadd.f32 %v911_v21, %v799_v56 }
 0x16d   : > { %v804_v24 = vpop.f32.mrf.mxu0  ;;  %v917_v25 = vpop.f32.mrf.mxu1 }
 0x16e   : > { %v805_v1 = vadd.f32 %v804_v24, %v673_v40  ;;  %v916_v9 = vadd.f32 %v915_v23, %v803_v58 }
 0x16f   : > { %v808_v26 = vpop.f32.mrf.mxu0  ;;  %v1964_v27 = vpop.f32.mrf.mxu1 }
 0x170   : > { %v809_v10 = vadd.f32 %v808_v26, %v678_v37  ;;  %v918_v20 = vadd.f32 %v917_v25, %v805_v1 }
 0x171   : > { %v810_v28 = vpop.f32.mrf.mxu0  ;;  %v1966_v29 = vpop.f32.mrf.mxu1 }
 0x172   : > { %v811_v22 = vadd.f32 %v810_v28, %v678_v37 }
 0x173   : > { %v1968_v30 = vpop.f32.mrf.mxu0  ;;  %v1970_v31 = vpop.f32.mrf.mxu1 }
 0x174   : > { %v815_v25 = vadd.f32 %v1968_v30, %v1976_v45 }
 0x175   : > { %v1972_v33 = vpop.f32.mrf.mxu0  ;;  %v1974_v34 = vpop.f32.mrf.mxu1 }
 0x177   : > { %v820_v35 = vpop.f32.mrf.mxu0  ;;  %v933_v36 = vpop.f32.mrf.mxu1 }
 0x178   : > { %v821_v52 = vadd.f32 %v820_v35, %v688_v46 }
 0x179   : > { %v822_v38 = vpop.f32.mrf.mxu0  ;;  %v935_v39 = vpop.f32.mrf.mxu1 }
 0x17a   : > { %v823_v57 = vadd.f32 %v822_v38, %v688_v46  ;;  %v934_v63 = vadd.f32 %v933_v36, %v821_v52 }
 0x17b   : > { %v826_v41 = vpop.f32.mrf.mxu0  ;;  %v939_v42 = vpop.f32.mrf.mxu1 }
 0x17c   : > { %v827_v59 = vadd.f32 %v826_v41, %v693_v53  ;;  %v936_v6 = vadd.f32 %v935_v39, %v823_v57  ;;  %v922_v39 = vadd.f32 %v1964_v27, %v809_v10  ;;  %v817_v27 = vadd.f32 %v1972_v33, %v1976_v45 }
 0x17d   : > { %v828_v43 = vpop.f32.mrf.mxu0  ;;  %v941_v44 = vpop.f32.mrf.mxu1  ;;  %v928_v57 = vadd.f32 %v1970_v31, %v815_v25 }
 0x17e   : > { %v829_v2 = vadd.f32 %v828_v43, %v693_v53  ;;  %v940_v11 = vadd.f32 %v939_v42, %v827_v59 }
 0x17f   : > { %v832_v47 = vpop.f32.mrf.mxu0  ;;  %v945_v48 = vpop.f32.mrf.mxu1 }
 0x180   : > { %v833_v12 = vadd.f32 %v832_v47, %v698_v0  ;;  %v942_v24 = vadd.f32 %v941_v44, %v829_v2  ;;  %v924_v47 = vadd.f32 %v1966_v29, %v811_v22 }
 0x181   : > { %v834_v49 = vpop.f32.mrf.mxu0  ;;  %v947_v50 = vpop.f32.mrf.mxu1 }
 0x182   : > { %v835_v32 = vadd.f32 %v834_v49, %v698_v0  ;;  %v946_v28 = vadd.f32 %v945_v48, %v833_v12 }
 0x183   : > { %v838_v54 = vpop.f32.mrf.mxu0  ;;  %v1978_v55 = vpop.f32.mrf.mxu1 }
 0x184   : > { %v839_v37 = vadd.f32 %v838_v54, %v703_v15  ;;  %v948_v30 = vadd.f32 %v947_v50, %v835_v32 }
 0x185   : > { %v840_v60 = vpop.f32.mrf.mxu0  ;;  %v1980_v61 = vpop.f32.mrf.mxu1 }
 0x186   : > { %v841_v48 = vadd.f32 %v840_v60, %v703_v15  ;;  %v952_v29 = vadd.f32 %v1978_v55, %v839_v37 }
 0x187   : > { %v1022_v3 = vpop.f32.mrf.mxu0  ;;  %v1046_v4 = vpop.f32.mrf.mxu1 }
 0x188   : > { %v1023_v7 = vadd.f32 %v1022_v3, %v910_v62  ;;  %v1047_v8 = vadd.f32 %v1046_v4, %v934_v63  ;;  %v930_v62 = vadd.f32 %v1974_v34, %v817_v27  ;;  %v954_v63 = vadd.f32 %v1980_v61, %v841_v48 }
 0x189   : > { %v1024_v13 = vpop.f32.mrf.mxu0  ;;  %v1048_v14 = vpop.f32.mrf.mxu1 }
 0x18a   : > { %v1069_v16 = vmax.f32 %v1023_v7, 0.0  ;;  %v1077_v17 = vmax.f32 %v1047_v8, 0.0  ;;  %v1025_v18 = vadd.f32 %v1024_v13, %v912_v5  ;;  %v1049_v19 = vadd.f32 %v1048_v14, %v936_v6 }
 0x18b   : > { %v1028_v35 = vpop.f32.mrf.mxu0  ;;  %v1052_v21 = vpop.f32.mrf.mxu1 }
 0x18c   : > { %1085 = vst [vmem:[%s1984_s12] sm:$0xff] %v1069_v16  ;;  %1093 = vst [vmem:[%s1984_s12 + $0x40] sm:$0xff] %v1077_v17  ;;  %v1070_v23 = vmax.f32 %v1025_v18, 0.0  ;;  %v1078_v26 = vmax.f32 %v1049_v19, 0.0  ;;  %v1029_v36 = vadd.f32 %v1028_v35, %v916_v9  ;;  %v1053_v38 = vadd.f32 %v1052_v21, %v940_v11 }
 0x18d   : > { %v1030_v40 = vpop.f32.mrf.mxu0  ;;  %v1054_v41 = vpop.f32.mrf.mxu1 }
 0x18e   : > { %1086 = vst [vmem:[%s1984_s12 + $0x8] sm:$0xff] %v1070_v23  ;;  %1094 = vst [vmem:[%s1984_s12 + $0x48] sm:$0xff] %v1078_v26  ;;  %v1071_v42 = vmax.f32 %v1029_v36, 0.0  ;;  %v1079_v43 = vmax.f32 %v1053_v38, 0.0  ;;  %v1031_v44 = vadd.f32 %v1030_v40, %v918_v20  ;;  %v1055_v46 = vadd.f32 %v1054_v41, %v942_v24 }
 0x18f   : > { %v1034_v49 = vpop.f32.mrf.mxu0  ;;  %v1058_v51 = vpop.f32.mrf.mxu1 }
 0x190   : > { %1087 = vst [vmem:[%s1984_s12 + $0x10] sm:$0xff] %v1071_v42  ;;  %1095 = vst [vmem:[%s1984_s12 + $0x50] sm:$0xff] %v1079_v43  ;;  %v1072_v52 = vmax.f32 %v1031_v44, 0.0  ;;  %v1080_v53 = vmax.f32 %v1055_v46, 0.0  ;;  %v1035_v54 = vadd.f32 %v1034_v49, %v922_v39  ;;  %v1059_v56 = vadd.f32 %v1058_v51, %v946_v28 }
 0x191   : > { %v1036_v58 = vpop.f32.mrf.mxu0  ;;  %v1060_v59 = vpop.f32.mrf.mxu1 }
 0x192   : > { %1088 = vst [vmem:[%s1984_s12 + $0x18] sm:$0xff] %v1072_v52  ;;  %1096 = vst [vmem:[%s1984_s12 + $0x58] sm:$0xff] %v1080_v53  ;;  %v1073_v33 = vmax.f32 %v1035_v54, 0.0  ;;  %v1081_v45 = vmax.f32 %v1059_v56, 0.0  ;;  %v1037_v50 = vadd.f32 %v1036_v58, %v924_v47  ;;  %v1061_v60 = vadd.f32 %v1060_v59, %v948_v30 }
 0x193   : > { %v1040_v0 = vpop.f32.mrf.mxu0  ;;  %v1064_v1 = vpop.f32.mrf.mxu1  ;;  %v1123_v10 = vld [vmem:[%s1984_s12] sm:$0xff] (%p1359_p5) }
 0x194   : > { %1089 = vst [vmem:[%s1984_s12 + $0x20] sm:$0xff] %v1073_v33  ;;  %1097 = vst [vmem:[%s1984_s12 + $0x60] sm:$0xff] %v1081_v45  ;;  %v1074_v31 = vmax.f32 %v1037_v50, 0.0  ;;  %v1082_v55 = vmax.f32 %v1061_v60, 0.0  ;;  %v1041_v2 = vadd.f32 %v1040_v0, %v928_v57  ;;  %v1065_v3 = vadd.f32 %v1064_v1, %v952_v29  ;;  %v1139_v18 = vld [vmem:[%s1984_s12 + $0x40] sm:$0xff] (%p1359_p5) }
 0x195   : > { %v1042_v4 = vpop.f32.mrf.mxu0  ;;  %v1066_v5 = vpop.f32.mrf.mxu1  ;;  %v1125_v11 = vld [vmem:[%s1984_s12 + $0x8] sm:$0xff] (%p1359_p5)  ;;  %1124 = vst [vmem:[%s1110_s20] sm:$0xff] (%p1359_p5), %v1123_v10  ;;  %1140 = vst [vmem:[%s1110_s20 + $0x80] sm:$0xff] (%p1359_p5), %v1139_v18 }
 0x196   : > { %1090 = vst [vmem:[%s1984_s12 + $0x28] sm:$0xff] %v1074_v31  ;;  %1098 = vst [vmem:[%s1984_s12 + $0x68] sm:$0xff] %v1082_v55  ;;  %v1075_v6 = vmax.f32 %v1041_v2, 0.0  ;;  %v1083_v34 = vmax.f32 %v1065_v3, 0.0  ;;  %v1043_v7 = vadd.f32 %v1042_v4, %v930_v62  ;;  %v1067_v61 = vadd.f32 %v1066_v5, %v954_v63  ;;  %1107 = sbr.rel (!%p1359_p5) target bundleno = 420 (0x1a4), region = 59  ;;  %v1141_v19 = vld [vmem:[%s1984_s12 + $0x48] sm:$0xff] (%p1359_p5) }
 0x197   : > { %v1127_v12 = vld [vmem:[%s1984_s12 + $0x10] sm:$0xff] (%p1359_p5)  ;;  %1126 = vst [vmem:[%s1110_s20 + $0x8] sm:$0xff] (%p1359_p5), %v1125_v11  ;;  %1142 = vst [vmem:[%s1110_s20 + $0x88] sm:$0xff] (%p1359_p5), %v1141_v19 }
 0x198   : > { %1091 = vst [vmem:[%s1984_s12 + $0x30] sm:$0xff] %v1075_v6  ;;  %1099 = vst [vmem:[%s1984_s12 + $0x70] sm:$0xff] %v1083_v34  ;;  %v1076_v8 = vmax.f32 %v1043_v7, 0.0  ;;  %v1084_v9 = vmax.f32 %v1067_v61, 0.0  ;;  %v1143_v20 = vld [vmem:[%s1984_s12 + $0x50] sm:$0xff] (%p1359_p5) }
 0x199   : > { %v1129_v13 = vld [vmem:[%s1984_s12 + $0x18] sm:$0xff] (%p1359_p5)  ;;  %1128 = vst [vmem:[%s1110_s20 + $0x20] sm:$0xff] (%p1359_p5), %v1127_v12  ;;  %1144 = vst [vmem:[%s1110_s20 + $0xa0] sm:$0xff] (%p1359_p5), %v1143_v20 }
 0x19a   : > { %1092 = vst [vmem:[%s1984_s12 + $0x38] sm:$0xff] %v1076_v8  ;;  %1100 = vst [vmem:[%s1984_s12 + $0x78] sm:$0xff] %v1084_v9  ;;  %v1145_v22 = vld [vmem:[%s1984_s12 + $0x58] sm:$0xff] (%p1359_p5) }
 0x19b   : > { %v1131_v14 = vld [vmem:[%s1984_s12 + $0x20] sm:$0xff]  ;;  %1130 = vst [vmem:[%s1110_s20 + $0x28] sm:$0xff] %v1129_v13  ;;  %1146 = vst [vmem:[%s1110_s20 + $0xa8] sm:$0xff] %v1145_v22 }
 0x19c   : > { %1132 = vst [vmem:[%s1110_s20 + $0x40] sm:$0xff] %v1131_v14  ;;  %v1147_v24 = vld [vmem:[%s1984_s12 + $0x60] sm:$0xff] }
 0x19d   : > { %v1133_v15 = vld [vmem:[%s1984_s12 + $0x28] sm:$0xff]  ;;  %1148 = vst [vmem:[%s1110_s20 + $0xc0] sm:$0xff] %v1147_v24 }
 0x19e   : > { %1134 = vst [vmem:[%s1110_s20 + $0x48] sm:$0xff] %v1133_v15  ;;  %v1149_v32 = vld [vmem:[%s1984_s12 + $0x68] sm:$0xff] }
 0x19f   : > { %v1135_v16 = vld [vmem:[%s1984_s12 + $0x30] sm:$0xff]  ;;  %1150 = vst [vmem:[%s1110_s20 + $0xc8] sm:$0xff] %v1149_v32 }
 0x1a0   : > { %1136 = vst [vmem:[%s1110_s20 + $0x60] sm:$0xff] %v1135_v16  ;;  %v1151_v35 = vld [vmem:[%s1984_s12 + $0x70] sm:$0xff] }
 0x1a1   : > { %v1137_v17 = vld [vmem:[%s1984_s12 + $0x38] sm:$0xff]  ;;  %1152 = vst [vmem:[%s1110_s20 + $0xe0] sm:$0xff] %v1151_v35 }
 0x1a2   : > { %1138 = vst [vmem:[%s1110_s20 + $0x68] sm:$0xff] %v1137_v17  ;;  %v1153_v21 = vld [vmem:[%s1984_s12 + $0x78] sm:$0xff] }
 0x1a3   : > { %1154 = vst [vmem:[%s1110_s20 + $0xe8] sm:$0xff] %v1153_v21 }
 0x1a4 PF: > { %p10_p10 = scmp.ge.s32.totalorder %s1346_s16, 4   ;;  %s2050_s12 = smov %s1301_s13 }
 0x1a5   : > { %s2051_s13 = smov %s1357_s19  ;;  %s2052_s14 = smov %s1346_s16 }
 0x1a6   :  { %12 = sbr.rel (!%p10_p10) target bundleno = 2 (0x2), region = 113 }

// kernel: network_forward.11
= control target key start
LH: loop header
LB: loop body
LE: loop exit
PB: predicated region body
PF: predicated region fallthrough
CT: control target
= control target key end

     0   :  { %s1003_s12 = smov 0   ;;  %s1005_s13 = smov 0   ;;  %s1511_s0 = inlined_call_operand.vmem [shape: f32[8,576], index: 0, kind: input, shape index: {}]   ;;  %s1512_s1 = inlined_call_operand.vmem [shape: f32[8,1], index: 1, kind: input, shape index: {}]   ;;  %s1513_s2 = inlined_call_operand.vmem [shape: f32[1,576,1792], index: 2, kind: input, shape index: {}]   ;;  %s1514_s3 = inlined_call_operand.vmem [shape: f32[8,1792], index: 3, kind: output, shape index: {}]  }
   0x1   :  { %s1007_s14 = smov 0  }
   0x2 LB: > { %s915_s15 = sadd.s32 4294967295, %s979_s14   ;;  %s1020_s16 = sadd.s32 1, %s979_s14   ;;  %s979_s14 = sphi %s1007_s14, %s1517_s14   ;;  %s975_s13 = sphi %s1005_s13, %s1516_s13   ;;  %s971_s12 = sphi %s1003_s12, %s1515_s12  }
   0x3   : > { %s59_s17 = ssub.s32 %s979_s14, %s1020_s16  ;;  %s62_s18 = sadd.s32 1, %s975_s13 }
   0x4   : > { %p60_p0 = scmp.eq.s32.totalorder %s59_s17, 0  ;;  %p69_p1 = scmp.ne.s32.totalorder %s975_s13, %s971_s12 }
   0x5   : > { %p70_p2 = scmp.eq.s32.totalorder %s979_s14, 0  ;;  %p918_p4 = scmp.ge.s32.totalorder %s979_s14, 7 }
   0x6   : > { %s1029_s19 = scalar_select %p60_p0, %s975_s13, %s62_s18  }
   0x7   : > { %p71_p3 = por %p70_p2, %p69_p1  ;;  %127 = sbr.rel (%p918_p4) target bundleno = 89 (0x59), region = 24 }
   0xc   : > { %130 = sbr.rel (!%p71_p3) target bundleno = 89 (0x59), region = 28  ;;  %s132_s20 = sand.u32 (%p71_p3), 1, %s975_s13  }
   0xd   : > { %s927_s21 = sshll.u32 (%p71_p3), %s979_s14, 4  ;;  %s928_s22 = smul.u32 (%p71_p3), 1152, %s132_s20 }
   0xe   : > { %s1037_s25 = scalar_lea.vmem (%p71_p3), %s1513_s2, %s927_s21 }
   0xf   : > { %v150_v0 = vld [vmem:[%s1037_s25] sm:$0xff] (%p71_p3)  ;;  %v152_v1 = vld [vmem:[%s1037_s25 + $0x8] sm:$0xff] (%p71_p3)  ;;  %v154_v2 = vld [vmem:[%s1037_s25 + $0x70] sm:$0xff] (%p71_p3)  ;;  %s1045_s26 = scalar_lea.vmem (%p71_p3), [#allocation2], %s928_s22 }
  0x10   : > { %v156_v3 = vld [vmem:[%s1037_s25 + $0x78] sm:$0xff] (%p71_p3)  ;;  %v158_v4 = vld [vmem:[%s1037_s25 + $0xe0] sm:$0xff] (%p71_p3)  ;;  %v160_v5 = vld [vmem:[%s1037_s25 + $0xe8] sm:$0xff] (%p71_p3)  ;;  %151 = vst [vmem:[%s1045_s26] sm:$0xff] (%p71_p3), %v150_v0 }
  0x11   : > { %153 = vst [vmem:[%s1045_s26 + $0x8] sm:$0xff] %v152_v1  ;;  %155 = vst [vmem:[%s1045_s26 + $0x10] sm:$0xff] %v154_v2  ;;  %v162_v6 = vld [vmem:[%s1037_s25 + $0x150] sm:$0xff]  ;;  %v164_v7 = vld [vmem:[%s1037_s25 + $0x158] sm:$0xff] }
  0x12   : > { %157 = vst [vmem:[%s1045_s26 + $0x18] sm:$0xff] %v156_v3  ;;  %159 = vst [vmem:[%s1045_s26 + $0x20] sm:$0xff] %v158_v4  ;;  %v166_v8 = vld [vmem:[%s1037_s25 + $0x1c0] sm:$0xff]  ;;  %v168_v9 = vld [vmem:[%s1037_s25 + $0x1c8] sm:$0xff] }
  0x13   : > { %161 = vst [vmem:[%s1045_s26 + $0x28] sm:$0xff] %v160_v5  ;;  %163 = vst [vmem:[%s1045_s26 + $0x30] sm:$0xff] %v162_v6  ;;  %v170_v10 = vld [vmem:[%s1037_s25 + $0x230] sm:$0xff]  ;;  %v172_v11 = vld [vmem:[%s1037_s25 + $0x238] sm:$0xff] }
  0x14   : > { %165 = vst [vmem:[%s1045_s26 + $0x38] sm:$0xff] %v164_v7  ;;  %167 = vst [vmem:[%s1045_s26 + $0x40] sm:$0xff] %v166_v8  ;;  %v174_v12 = vld [vmem:[%s1037_s25 + $0x2a0] sm:$0xff]  ;;  %v176_v13 = vld [vmem:[%s1037_s25 + $0x2a8] sm:$0xff] }
  0x15   : > { %169 = vst [vmem:[%s1045_s26 + $0x48] sm:$0xff] %v168_v9  ;;  %171 = vst [vmem:[%s1045_s26 + $0x50] sm:$0xff] %v170_v10  ;;  %v178_v14 = vld [vmem:[%s1037_s25 + $0x310] sm:$0xff]  ;;  %v180_v15 = vld [vmem:[%s1037_s25 + $0x318] sm:$0xff] }
  0x16   : > { %173 = vst [vmem:[%s1045_s26 + $0x58] sm:$0xff] %v172_v11  ;;  %175 = vst [vmem:[%s1045_s26 + $0x60] sm:$0xff] %v174_v12  ;;  %v182_v16 = vld [vmem:[%s1037_s25 + $0x380] sm:$0xff]  ;;  %v184_v17 = vld [vmem:[%s1037_s25 + $0x388] sm:$0xff] }
  0x17   : > { %177 = vst [vmem:[%s1045_s26 + $0x68] sm:$0xff] %v176_v13  ;;  %179 = vst [vmem:[%s1045_s26 + $0x70] sm:$0xff] %v178_v14  ;;  %v186_v18 = vld [vmem:[%s1037_s25 + $0x3f0] sm:$0xff]  ;;  %v188_v19 = vld [vmem:[%s1037_s25 + $0x3f8] sm:$0xff] }
  0x18   : > { %181 = vst [vmem:[%s1045_s26 + $0x78] sm:$0xff] %v180_v15  ;;  %183 = vst [vmem:[%s1045_s26 + $0x80] sm:$0xff] %v182_v16  ;;  %v190_v20 = vld [vmem:[%s1037_s25 + $0x460] sm:$0xff]  ;;  %v192_v21 = vld [vmem:[%s1037_s25 + $0x468] sm:$0xff] }
  0x19   : > { %185 = vst [vmem:[%s1045_s26 + $0x88] sm:$0xff] %v184_v17  ;;  %187 = vst [vmem:[%s1045_s26 + $0x90] sm:$0xff] %v186_v18  ;;  %v194_v22 = vld [vmem:[%s1037_s25 + $0x4d0] sm:$0xff]  ;;  %v196_v23 = vld [vmem:[%s1037_s25 + $0x4d8] sm:$0xff] }
  0x1a   : > { %189 = vst [vmem:[%s1045_s26 + $0x98] sm:$0xff] %v188_v19  ;;  %191 = vst [vmem:[%s1045_s26 + $0xa0] sm:$0xff] %v190_v20  ;;  %v198_v24 = vld [vmem:[%s1037_s25 + $0x540] sm:$0xff]  ;;  %v200_v25 = vld [vmem:[%s1037_s25 + $0x548] sm:$0xff] }
  0x1b   : > { %193 = vst [vmem:[%s1045_s26 + $0xa8] sm:$0xff] %v192_v21  ;;  %195 = vst [vmem:[%s1045_s26 + $0xb0] sm:$0xff] %v194_v22  ;;  %v202_v26 = vld [vmem:[%s1037_s25 + $0x5b0] sm:$0xff]  ;;  %v204_v27 = vld [vmem:[%s1037_s25 + $0x5b8] sm:$0xff] }
  0x1c   : > { %197 = vst [vmem:[%s1045_s26 + $0xb8] sm:$0xff] %v196_v23  ;;  %199 = vst [vmem:[%s1045_s26 + $0xc0] sm:$0xff] %v198_v24  ;;  %v206_v28 = vld [vmem:[%s1037_s25 + $0x620] sm:$0xff]  ;;  %v208_v29 = vld [vmem:[%s1037_s25 + $0x628] sm:$0xff] }
  0x1d   : > { %201 = vst [vmem:[%s1045_s26 + $0xc8] sm:$0xff] %v200_v25  ;;  %203 = vst [vmem:[%s1045_s26 + $0xd0] sm:$0xff] %v202_v26  ;;  %v210_v30 = vld [vmem:[%s1037_s25 + $0x690] sm:$0xff]  ;;  %v212_v31 = vld [vmem:[%s1037_s25 + $0x698] sm:$0xff] }
  0x1e   : > { %205 = vst [vmem:[%s1045_s26 + $0xd8] sm:$0xff] %v204_v27  ;;  %207 = vst [vmem:[%s1045_s26 + $0xe0] sm:$0xff] %v206_v28  ;;  %v214_v32 = vld [vmem:[%s1037_s25 + $0x700] sm:$0xff]  ;;  %v216_v33 = vld [vmem:[%s1037_s25 + $0x708] sm:$0xff] }
  0x1f   : > { %209 = vst [vmem:[%s1045_s26 + $0xe8] sm:$0xff] %v208_v29  ;;  %211 = vst [vmem:[%s1045_s26 + $0xf0] sm:$0xff] %v210_v30  ;;  %v218_v34 = vld [vmem:[%s1037_s25 + $0x770] sm:$0xff]  ;;  %v220_v35 = vld [vmem:[%s1037_s25 + $0x778] sm:$0xff] }
  0x20   : > { %213 = vst [vmem:[%s1045_s26 + $0xf8] sm:$0xff] %v212_v31  ;;  %215 = vst [vmem:[%s1045_s26 + $0x100] sm:$0xff] %v214_v32  ;;  %v222_v36 = vld [vmem:[%s1037_s25 + $0x7e0] sm:$0xff]  ;;  %v224_v37 = vld [vmem:[%s1037_s25 + $0x7e8] sm:$0xff] }
  0x21   : > { %217 = vst [vmem:[%s1045_s26 + $0x108] sm:$0xff] %v216_v33  ;;  %219 = vst [vmem:[%s1045_s26 + $0x110] sm:$0xff] %v218_v34  ;;  %v226_v38 = vld [vmem:[%s1037_s25 + $0x850] sm:$0xff]  ;;  %v228_v39 = vld [vmem:[%s1037_s25 + $0x858] sm:$0xff] }
  0x22   : > { %221 = vst [vmem:[%s1045_s26 + $0x118] sm:$0xff] %v220_v35  ;;  %223 = vst [vmem:[%s1045_s26 + $0x120] sm:$0xff] %v222_v36  ;;  %v230_v40 = vld [vmem:[%s1037_s25 + $0x8c0] sm:$0xff]  ;;  %v232_v41 = vld [vmem:[%s1037_s25 + $0x8c8] sm:$0xff] }
  0x23   : > { %225 = vst [vmem:[%s1045_s26 + $0x128] sm:$0xff] %v224_v37  ;;  %227 = vst [vmem:[%s1045_s26 + $0x130] sm:$0xff] %v226_v38  ;;  %v234_v42 = vld [vmem:[%s1037_s25 + $0x930] sm:$0xff]  ;;  %v236_v43 = vld [vmem:[%s1037_s25 + $0x938] sm:$0xff] }
  0x24   : > { %229 = vst [vmem:[%s1045_s26 + $0x138] sm:$0xff] %v228_v39  ;;  %231 = vst [vmem:[%s1045_s26 + $0x140] sm:$0xff] %v230_v40  ;;  %v238_v44 = vld [vmem:[%s1037_s25 + $0x9a0] sm:$0xff]  ;;  %v240_v45 = vld [vmem:[%s1037_s25 + $0x9a8] sm:$0xff] }
  0x25   : > { %233 = vst [vmem:[%s1045_s26 + $0x148] sm:$0xff] %v232_v41  ;;  %235 = vst [vmem:[%s1045_s26 + $0x150] sm:$0xff] %v234_v42  ;;  %v242_v46 = vld [vmem:[%s1037_s25 + $0xa10] sm:$0xff]  ;;  %v244_v47 = vld [vmem:[%s1037_s25 + $0xa18] sm:$0xff] }
  0x26   : > { %237 = vst [vmem:[%s1045_s26 + $0x158] sm:$0xff] %v236_v43  ;;  %239 = vst [vmem:[%s1045_s26 + $0x160] sm:$0xff] %v238_v44  ;;  %v246_v48 = vld [vmem:[%s1037_s25 + $0xa80] sm:$0xff]  ;;  %v248_v49 = vld [vmem:[%s1037_s25 + $0xa88] sm:$0xff] }
  0x27   : > { %241 = vst [vmem:[%s1045_s26 + $0x168] sm:$0xff] %v240_v45  ;;  %243 = vst [vmem:[%s1045_s26 + $0x170] sm:$0xff] %v242_v46  ;;  %v250_v50 = vld [vmem:[%s1037_s25 + $0xaf0] sm:$0xff]  ;;  %v252_v51 = vld [vmem:[%s1037_s25 + $0xaf8] sm:$0xff] }
  0x28   : > { %245 = vst [vmem:[%s1045_s26 + $0x178] sm:$0xff] %v244_v47  ;;  %247 = vst [vmem:[%s1045_s26 + $0x180] sm:$0xff] %v246_v48  ;;  %v254_v52 = vld [vmem:[%s1037_s25 + $0xb60] sm:$0xff]  ;;  %v256_v53 = vld [vmem:[%s1037_s25 + $0xb68] sm:$0xff] }
  0x29   : > { %249 = vst [vmem:[%s1045_s26 + $0x188] sm:$0xff] %v248_v49  ;;  %251 = vst [vmem:[%s1045_s26 + $0x190] sm:$0xff] %v250_v50  ;;  %v258_v54 = vld [vmem:[%s1037_s25 + $0xbd0] sm:$0xff]  ;;  %v260_v55 = vld [vmem:[%s1037_s25 + $0xbd8] sm:$0xff] }
  0x2a   : > { %253 = vst [vmem:[%s1045_s26 + $0x198] sm:$0xff] %v252_v51  ;;  %255 = vst [vmem:[%s1045_s26 + $0x1a0] sm:$0xff] %v254_v52  ;;  %v262_v56 = vld [vmem:[%s1037_s25 + $0xc40] sm:$0xff]  ;;  %v264_v57 = vld [vmem:[%s1037_s25 + $0xc48] sm:$0xff] }
  0x2b   : > { %257 = vst [vmem:[%s1045_s26 + $0x1a8] sm:$0xff] %v256_v53  ;;  %259 = vst [vmem:[%s1045_s26 + $0x1b0] sm:$0xff] %v258_v54  ;;  %v266_v58 = vld [vmem:[%s1037_s25 + $0xcb0] sm:$0xff]  ;;  %v268_v59 = vld [vmem:[%s1037_s25 + $0xcb8] sm:$0xff] }
  0x2c   : > { %261 = vst [vmem:[%s1045_s26 + $0x1b8] sm:$0xff] %v260_v55  ;;  %263 = vst [vmem:[%s1045_s26 + $0x1c0] sm:$0xff] %v262_v56  ;;  %v270_v60 = vld [vmem:[%s1037_s25 + $0xd20] sm:$0xff]  ;;  %v272_v61 = vld [vmem:[%s1037_s25 + $0xd28] sm:$0xff] }
  0x2d   : > { %265 = vst [vmem:[%s1045_s26 + $0x1c8] sm:$0xff] %v264_v57  ;;  %267 = vst [vmem:[%s1045_s26 + $0x1d0] sm:$0xff] %v266_v58  ;;  %v274_v62 = vld [vmem:[%s1037_s25 + $0xd90] sm:$0xff]  ;;  %v276_v63 = vld [vmem:[%s1037_s25 + $0xd98] sm:$0xff] }
  0x2e   : > { %269 = vst [vmem:[%s1045_s26 + $0x1d8] sm:$0xff] %v268_v59  ;;  %271 = vst [vmem:[%s1045_s26 + $0x1e0] sm:$0xff] %v270_v60  ;;  %v278_v0 = vld [vmem:[%s1037_s25 + $0xe00] sm:$0xff]  ;;  %v280_v1 = vld [vmem:[%s1037_s25 + $0xe08] sm:$0xff] }
  0x2f   : > { %273 = vst [vmem:[%s1045_s26 + $0x1e8] sm:$0xff] %v272_v61  ;;  %275 = vst [vmem:[%s1045_s26 + $0x1f0] sm:$0xff] %v274_v62  ;;  %v282_v2 = vld [vmem:[%s1037_s25 + $0xe70] sm:$0xff]  ;;  %v284_v3 = vld [vmem:[%s1037_s25 + $0xe78] sm:$0xff] }
  0x30   : > { %277 = vst [vmem:[%s1045_s26 + $0x1f8] sm:$0xff] %v276_v63  ;;  %279 = vst [vmem:[%s1045_s26 + $0x200] sm:$0xff] %v278_v0  ;;  %v286_v4 = vld [vmem:[%s1037_s25 + $0xee0] sm:$0xff]  ;;  %v288_v5 = vld [vmem:[%s1037_s25 + $0xee8] sm:$0xff] }
  0x31   : > { %281 = vst [vmem:[%s1045_s26 + $0x208] sm:$0xff] %v280_v1  ;;  %283 = vst [vmem:[%s1045_s26 + $0x210] sm:$0xff] %v282_v2  ;;  %v290_v6 = vld [vmem:[%s1037_s25 + $0xf50] sm:$0xff]  ;;  %v292_v7 = vld [vmem:[%s1037_s25 + $0xf58] sm:$0xff] }
  0x32   : > { %285 = vst [vmem:[%s1045_s26 + $0x218] sm:$0xff] %v284_v3  ;;  %287 = vst [vmem:[%s1045_s26 + $0x220] sm:$0xff] %v286_v4  ;;  %v294_v8 = vld [vmem:[%s1037_s25 + $0xfc0] sm:$0xff]  ;;  %v296_v9 = vld [vmem:[%s1037_s25 + $0xfc8] sm:$0xff] }
  0x33   : > { %289 = vst [vmem:[%s1045_s26 + $0x228] sm:$0xff] %v288_v5  ;;  %291 = vst [vmem:[%s1045_s26 + $0x230] sm:$0xff] %v290_v6  ;;  %v298_v10 = vld [vmem:[%s1037_s25 + $0x1030] sm:$0xff]  ;;  %v300_v11 = vld [vmem:[%s1037_s25 + $0x1038] sm:$0xff] }
  0x34   : > { %293 = vst [vmem:[%s1045_s26 + $0x238] sm:$0xff] %v292_v7  ;;  %295 = vst [vmem:[%s1045_s26 + $0x240] sm:$0xff] %v294_v8  ;;  %v302_v12 = vld [vmem:[%s1037_s25 + $0x10a0] sm:$0xff]  ;;  %v304_v13 = vld [vmem:[%s1037_s25 + $0x10a8] sm:$0xff] }
  0x35   : > { %297 = vst [vmem:[%s1045_s26 + $0x248] sm:$0xff] %v296_v9  ;;  %299 = vst [vmem:[%s1045_s26 + $0x250] sm:$0xff] %v298_v10  ;;  %v306_v14 = vld [vmem:[%s1037_s25 + $0x1110] sm:$0xff]  ;;  %v308_v15 = vld [vmem:[%s1037_s25 + $0x1118] sm:$0xff] }
  0x36   : > { %301 = vst [vmem:[%s1045_s26 + $0x258] sm:$0xff] %v300_v11  ;;  %303 = vst [vmem:[%s1045_s26 + $0x260] sm:$0xff] %v302_v12  ;;  %v310_v16 = vld [vmem:[%s1037_s25 + $0x1180] sm:$0xff]  ;;  %v312_v17 = vld [vmem:[%s1037_s25 + $0x1188] sm:$0xff] }
  0x37   : > { %305 = vst [vmem:[%s1045_s26 + $0x268] sm:$0xff] %v304_v13  ;;  %307 = vst [vmem:[%s1045_s26 + $0x270] sm:$0xff] %v306_v14  ;;  %v314_v18 = vld [vmem:[%s1037_s25 + $0x11f0] sm:$0xff]  ;;  %v316_v19 = vld [vmem:[%s1037_s25 + $0x11f8] sm:$0xff] }
  0x38   : > { %309 = vst [vmem:[%s1045_s26 + $0x278] sm:$0xff] %v308_v15  ;;  %311 = vst [vmem:[%s1045_s26 + $0x280] sm:$0xff] %v310_v16  ;;  %v318_v20 = vld [vmem:[%s1037_s25 + $0x1260] sm:$0xff]  ;;  %v320_v21 = vld [vmem:[%s1037_s25 + $0x1268] sm:$0xff] }
  0x39   : > { %313 = vst [vmem:[%s1045_s26 + $0x288] sm:$0xff] %v312_v17  ;;  %315 = vst [vmem:[%s1045_s26 + $0x290] sm:$0xff] %v314_v18  ;;  %v322_v22 = vld [vmem:[%s1037_s25 + $0x12d0] sm:$0xff]  ;;  %v324_v23 = vld [vmem:[%s1037_s25 + $0x12d8] sm:$0xff] }
  0x3a   : > { %317 = vst [vmem:[%s1045_s26 + $0x298] sm:$0xff] %v316_v19  ;;  %319 = vst [vmem:[%s1045_s26 + $0x2a0] sm:$0xff] %v318_v20  ;;  %v326_v24 = vld [vmem:[%s1037_s25 + $0x1340] sm:$0xff]  ;;  %v328_v25 = vld [vmem:[%s1037_s25 + $0x1348] sm:$0xff] }
  0x3b   : > { %321 = vst [vmem:[%s1045_s26 + $0x2a8] sm:$0xff] %v320_v21  ;;  %323 = vst [vmem:[%s1045_s26 + $0x2b0] sm:$0xff] %v322_v22  ;;  %v330_v26 = vld [vmem:[%s1037_s25 + $0x13b0] sm:$0xff]  ;;  %v332_v27 = vld [vmem:[%s1037_s25 + $0x13b8] sm:$0xff] }
  0x3c   : > { %325 = vst [vmem:[%s1045_s26 + $0x2b8] sm:$0xff] %v324_v23  ;;  %327 = vst [vmem:[%s1045_s26 + $0x2c0] sm:$0xff] %v326_v24  ;;  %v334_v28 = vld [vmem:[%s1037_s25 + $0x1420] sm:$0xff]  ;;  %v336_v29 = vld [vmem:[%s1037_s25 + $0x1428] sm:$0xff] }
  0x3d   : > { %329 = vst [vmem:[%s1045_s26 + $0x2c8] sm:$0xff] %v328_v25  ;;  %331 = vst [vmem:[%s1045_s26 + $0x2d0] sm:$0xff] %v330_v26  ;;  %v338_v30 = vld [vmem:[%s1037_s25 + $0x1490] sm:$0xff]  ;;  %v340_v31 = vld [vmem:[%s1037_s25 + $0x1498] sm:$0xff] }
  0x3e   : > { %333 = vst [vmem:[%s1045_s26 + $0x2d8] sm:$0xff] %v332_v27  ;;  %335 = vst [vmem:[%s1045_s26 + $0x2e0] sm:$0xff] %v334_v28  ;;  %v342_v32 = vld [vmem:[%s1037_s25 + $0x1500] sm:$0xff]  ;;  %v344_v33 = vld [vmem:[%s1037_s25 + $0x1508] sm:$0xff] }
  0x3f   : > { %337 = vst [vmem:[%s1045_s26 + $0x2e8] sm:$0xff] %v336_v29  ;;  %339 = vst [vmem:[%s1045_s26 + $0x2f0] sm:$0xff] %v338_v30  ;;  %v346_v34 = vld [vmem:[%s1037_s25 + $0x1570] sm:$0xff]  ;;  %v348_v35 = vld [vmem:[%s1037_s25 + $0x1578] sm:$0xff] }
  0x40   : > { %341 = vst [vmem:[%s1045_s26 + $0x2f8] sm:$0xff] %v340_v31  ;;  %343 = vst [vmem:[%s1045_s26 + $0x300] sm:$0xff] %v342_v32  ;;  %v350_v36 = vld [vmem:[%s1037_s25 + $0x15e0] sm:$0xff]  ;;  %v352_v37 = vld [vmem:[%s1037_s25 + $0x15e8] sm:$0xff] }
  0x41   : > { %345 = vst [vmem:[%s1045_s26 + $0x308] sm:$0xff] %v344_v33  ;;  %347 = vst [vmem:[%s1045_s26 + $0x310] sm:$0xff] %v346_v34  ;;  %v354_v38 = vld [vmem:[%s1037_s25 + $0x1650] sm:$0xff]  ;;  %v356_v39 = vld [vmem:[%s1037_s25 + $0x1658] sm:$0xff] }
  0x42   : > { %349 = vst [vmem:[%s1045_s26 + $0x318] sm:$0xff] %v348_v35  ;;  %351 = vst [vmem:[%s1045_s26 + $0x320] sm:$0xff] %v350_v36  ;;  %v358_v40 = vld [vmem:[%s1037_s25 + $0x16c0] sm:$0xff]  ;;  %v360_v41 = vld [vmem:[%s1037_s25 + $0x16c8] sm:$0xff] }
  0x43   : > { %353 = vst [vmem:[%s1045_s26 + $0x328] sm:$0xff] %v352_v37  ;;  %355 = vst [vmem:[%s1045_s26 + $0x330] sm:$0xff] %v354_v38  ;;  %v362_v42 = vld [vmem:[%s1037_s25 + $0x1730] sm:$0xff]  ;;  %v364_v43 = vld [vmem:[%s1037_s25 + $0x1738] sm:$0xff] }
  0x44   : > { %357 = vst [vmem:[%s1045_s26 + $0x338] sm:$0xff] %v356_v39  ;;  %359 = vst [vmem:[%s1045_s26 + $0x340] sm:$0xff] %v358_v40  ;;  %v366_v44 = vld [vmem:[%s1037_s25 + $0x17a0] sm:$0xff]  ;;  %v368_v45 = vld [vmem:[%s1037_s25 + $0x17a8] sm:$0xff] }
  0x45   : > { %361 = vst [vmem:[%s1045_s26 + $0x348] sm:$0xff] %v360_v41  ;;  %363 = vst [vmem:[%s1045_s26 + $0x350] sm:$0xff] %v362_v42  ;;  %v370_v46 = vld [vmem:[%s1037_s25 + $0x1810] sm:$0xff]  ;;  %v372_v47 = vld [vmem:[%s1037_s25 + $0x1818] sm:$0xff] }
  0x46   : > { %365 = vst [vmem:[%s1045_s26 + $0x358] sm:$0xff] %v364_v43  ;;  %367 = vst [vmem:[%s1045_s26 + $0x360] sm:$0xff] %v366_v44  ;;  %v374_v48 = vld [vmem:[%s1037_s25 + $0x1880] sm:$0xff]  ;;  %v376_v49 = vld [vmem:[%s1037_s25 + $0x1888] sm:$0xff] }
  0x47   : > { %369 = vst [vmem:[%s1045_s26 + $0x368] sm:$0xff] %v368_v45  ;;  %371 = vst [vmem:[%s1045_s26 + $0x370] sm:$0xff] %v370_v46  ;;  %v378_v50 = vld [vmem:[%s1037_s25 + $0x18f0] sm:$0xff]  ;;  %v380_v51 = vld [vmem:[%s1037_s25 + $0x18f8] sm:$0xff] }
  0x48   : > { %373 = vst [vmem:[%s1045_s26 + $0x378] sm:$0xff] %v372_v47  ;;  %375 = vst [vmem:[%s1045_s26 + $0x380] sm:$0xff] %v374_v48  ;;  %v382_v52 = vld [vmem:[%s1037_s25 + $0x1960] sm:$0xff]  ;;  %v384_v53 = vld [vmem:[%s1037_s25 + $0x1968] sm:$0xff] }
  0x49   : > { %377 = vst [vmem:[%s1045_s26 + $0x388] sm:$0xff] %v376_v49  ;;  %379 = vst [vmem:[%s1045_s26 + $0x390] sm:$0xff] %v378_v50  ;;  %v386_v54 = vld [vmem:[%s1037_s25 + $0x19d0] sm:$0xff]  ;;  %v388_v55 = vld [vmem:[%s1037_s25 + $0x19d8] sm:$0xff] }
  0x4a   : > { %381 = vst [vmem:[%s1045_s26 + $0x398] sm:$0xff] %v380_v51  ;;  %383 = vst [vmem:[%s1045_s26 + $0x3a0] sm:$0xff] %v382_v52  ;;  %v390_v56 = vld [vmem:[%s1037_s25 + $0x1a40] sm:$0xff]  ;;  %v392_v57 = vld [vmem:[%s1037_s25 + $0x1a48] sm:$0xff] }
  0x4b   : > { %385 = vst [vmem:[%s1045_s26 + $0x3a8] sm:$0xff] %v384_v53  ;;  %387 = vst [vmem:[%s1045_s26 + $0x3b0] sm:$0xff] %v386_v54  ;;  %v394_v58 = vld [vmem:[%s1037_s25 + $0x1ab0] sm:$0xff]  ;;  %v396_v59 = vld [vmem:[%s1037_s25 + $0x1ab8] sm:$0xff] }
  0x4c   : > { %389 = vst [vmem:[%s1045_s26 + $0x3b8] sm:$0xff] %v388_v55  ;;  %391 = vst [vmem:[%s1045_s26 + $0x3c0] sm:$0xff] %v390_v56  ;;  %v398_v60 = vld [vmem:[%s1037_s25 + $0x1b20] sm:$0xff]  ;;  %v400_v61 = vld [vmem:[%s1037_s25 + $0x1b28] sm:$0xff] }
  0x4d   : > { %393 = vst [vmem:[%s1045_s26 + $0x3c8] sm:$0xff] %v392_v57  ;;  %395 = vst [vmem:[%s1045_s26 + $0x3d0] sm:$0xff] %v394_v58  ;;  %v402_v62 = vld [vmem:[%s1037_s25 + $0x1b90] sm:$0xff]  ;;  %v404_v63 = vld [vmem:[%s1037_s25 + $0x1b98] sm:$0xff] }
  0x4e   : > { %397 = vst [vmem:[%s1045_s26 + $0x3d8] sm:$0xff] %v396_v59  ;;  %399 = vst [vmem:[%s1045_s26 + $0x3e0] sm:$0xff] %v398_v60  ;;  %v406_v0 = vld [vmem:[%s1037_s25 + $0x1c00] sm:$0xff]  ;;  %v408_v1 = vld [vmem:[%s1037_s25 + $0x1c08] sm:$0xff] }
  0x4f   : > { %401 = vst [vmem:[%s1045_s26 + $0x3e8] sm:$0xff] %v400_v61  ;;  %403 = vst [vmem:[%s1045_s26 + $0x3f0] sm:$0xff] %v402_v62  ;;  %v410_v2 = vld [vmem:[%s1037_s25 + $0x1c70] sm:$0xff]  ;;  %v412_v3 = vld [vmem:[%s1037_s25 + $0x1c78] sm:$0xff] }
  0x50   : > { %405 = vst [vmem:[%s1045_s26 + $0x3f8] sm:$0xff] %v404_v63  ;;  %407 = vst [vmem:[%s1045_s26 + $0x400] sm:$0xff] %v406_v0  ;;  %v414_v4 = vld [vmem:[%s1037_s25 + $0x1ce0] sm:$0xff]  ;;  %v416_v5 = vld [vmem:[%s1037_s25 + $0x1ce8] sm:$0xff] }
  0x51   : > { %409 = vst [vmem:[%s1045_s26 + $0x408] sm:$0xff] %v408_v1  ;;  %411 = vst [vmem:[%s1045_s26 + $0x410] sm:$0xff] %v410_v2  ;;  %v418_v6 = vld [vmem:[%s1037_s25 + $0x1d50] sm:$0xff]  ;;  %v420_v7 = vld [vmem:[%s1037_s25 + $0x1d58] sm:$0xff] }
  0x52   : > { %413 = vst [vmem:[%s1045_s26 + $0x418] sm:$0xff] %v412_v3  ;;  %415 = vst [vmem:[%s1045_s26 + $0x420] sm:$0xff] %v414_v4  ;;  %v422_v8 = vld [vmem:[%s1037_s25 + $0x1dc0] sm:$0xff]  ;;  %v424_v9 = vld [vmem:[%s1037_s25 + $0x1dc8] sm:$0xff] }
  0x53   : > { %417 = vst [vmem:[%s1045_s26 + $0x428] sm:$0xff] %v416_v5  ;;  %419 = vst [vmem:[%s1045_s26 + $0x430] sm:$0xff] %v418_v6  ;;  %v426_v10 = vld [vmem:[%s1037_s25 + $0x1e30] sm:$0xff]  ;;  %v428_v11 = vld [vmem:[%s1037_s25 + $0x1e38] sm:$0xff] }
  0x54   : > { %421 = vst [vmem:[%s1045_s26 + $0x438] sm:$0xff] %v420_v7  ;;  %423 = vst [vmem:[%s1045_s26 + $0x440] sm:$0xff] %v422_v8  ;;  %v430_v12 = vld [vmem:[%s1037_s25 + $0x1ea0] sm:$0xff]  ;;  %v432_v13 = vld [vmem:[%s1037_s25 + $0x1ea8] sm:$0xff] }
  0x55   : > { %425 = vst [vmem:[%s1045_s26 + $0x448] sm:$0xff] %v424_v9  ;;  %427 = vst [vmem:[%s1045_s26 + $0x450] sm:$0xff] %v426_v10  ;;  %v434_v14 = vld [vmem:[%s1037_s25 + $0x1f10] sm:$0xff]  ;;  %v436_v15 = vld [vmem:[%s1037_s25 + $0x1f18] sm:$0xff] }
  0x56   : > { %429 = vst [vmem:[%s1045_s26 + $0x458] sm:$0xff] %v428_v11  ;;  %431 = vst [vmem:[%s1045_s26 + $0x460] sm:$0xff] %v430_v12 }
  0x57   : > { %433 = vst [vmem:[%s1045_s26 + $0x468] sm:$0xff] %v432_v13  ;;  %435 = vst [vmem:[%s1045_s26 + $0x470] sm:$0xff] %v434_v14 }
  0x58   : > { %437 = vst [vmem:[%s1045_s26 + $0x478] sm:$0xff] %v436_v15 }
  0x59 PF: > { %p921_p5 = scmp.ge.s32.totalorder %s979_s14, 1  ;;  %p442_p6 = scmp.lt.s32.totalorder %s979_s14, 8 }
  0x5b   : > { %p443_p7 = pnand %p921_p5, %p442_p6 }
  0x5c   : > { %s449_s27 = sand.u32 (!%p443_p7), 1, %s971_s12   ;;  %s922_s20 = sshll.u32 (!%p443_p7), %s915_s15, 1 }
  0x5d   : > { %446 = sbr.rel (%p443_p7) target bundleno = 379 (0x17b), region = 51  ;;  %p474_p8 = scmp.lt.s32.totalorder (!%p443_p7), %s922_s20, 13 }
  0x5e   : > { %s929_s5 = smul.u32 (!%p443_p7), 1152, %s449_s27 }
  0x60   : > { %s1341_s8 = scalar_lea.vmem (!%p443_p7), [#allocation2], %s929_s5 }
  0x62   : > { %v480_v16 = vld [vmem:[%s1511_s0 + $0x8] sm:$0xff]  ;;  %v482_v17 = vld [vmem:[%s1511_s0 + $0x18] sm:$0xff]  ;;  %v484_v18 = vld [vmem:[%s1512_s1] sm:$0xff]  ;;  %v981_v19 = vmov 0   ;;  %vm634_vm0 = vcmask 523264   ;;  %s1519_s20 = smov (!%p474_p8, %s922_s20), 13 }
  0x63   : > { %702 = vmatprep.mubr.f32.mxu0 %v480_v16  ;;  %773 = vmatprep.mubr.f32.mxu1 %v482_v17  ;;  %v516_v20 = vld [vmem:[%s1341_s8 + $0xf8] sm:$0xff]  ;;  %v515_v21 = vld [vmem:[%s1341_s8 + $0xf0] sm:$0xff]  ;;  %v514_v22 = vld [vmem:[%s1341_s8 + $0xe8] sm:$0xff]  ;;  %s923_s21 = sshll.u32 %s1519_s20, 3 }
  0x64   : > { %956 = vset.pattern.permute.xlu0 %v981_v19  ;;  %638 = vmatprep.subr.mxu0 %v516_v20  ;;  %v580_v23 = vld [vmem:[%s1341_s8 + $0x2f8] sm:$0xff]  ;;  %v513_v24 = vld [vmem:[%s1341_s8 + $0xe0] sm:$0xff]  ;;  %v579_v25 = vld [vmem:[%s1341_s8 + $0x2f0] sm:$0xff]  ;;  %s477_s24 = scalar_lea.vmem %s1514_s3, %s923_s21 }
  0x65   : > { %631 = vperm.xlu0 %956, %v484_v18   ;;  %639 = vmatpush1.msra.mxu0 %v515_v21  ;;  %v512_v26 = vld [vmem:[%s1341_s8 + $0xd8] sm:$0xff]  ;;  %v578_v27 = vld [vmem:[%s1341_s8 + $0x2e8] sm:$0xff]  ;;  %v511_v28 = vld [vmem:[%s1341_s8 + $0xd0] sm:$0xff] }
  0x66   : > { %709 = vmatprep.subr.mxu1 %v580_v23  ;;  %640 = vmatprep.subr.mxu0 %v514_v22  ;;  %v577_v29 = vld [vmem:[%s1341_s8 + $0x2e0] sm:$0xff]  ;;  %v576_v30 = vld [vmem:[%s1341_s8 + $0x2d8] sm:$0xff]  ;;  %v510_v31 = vld [vmem:[%s1341_s8 + $0xc8] sm:$0xff] }
  0x67   : > { %710 = vmatpush1.msra.mxu1 %v579_v25  ;;  %641 = vmatpush1.msra.mxu0 %v513_v24  ;;  %v575_v32 = vld [vmem:[%s1341_s8 + $0x2d0] sm:$0xff]  ;;  %v509_v33 = vld [vmem:[%s1341_s8 + $0xc0] sm:$0xff]  ;;  %v574_v34 = vld [vmem:[%s1341_s8 + $0x2c8] sm:$0xff] }
  0x68   : > { %711 = vmatprep.subr.mxu1 %v578_v27  ;;  %642 = vmatprep.subr.mxu0 %v512_v26  ;;  %v508_v35 = vld [vmem:[%s1341_s8 + $0xb8] sm:$0xff]  ;;  %v573_v36 = vld [vmem:[%s1341_s8 + $0x2c0] sm:$0xff]  ;;  %v507_v37 = vld [vmem:[%s1341_s8 + $0xb0] sm:$0xff] }
  0x69   : > { %712 = vmatpush1.msra.mxu1 %v577_v29  ;;  %643 = vmatpush1.msra.mxu0 %v511_v28  ;;  %v572_v38 = vld [vmem:[%s1341_s8 + $0x2b8] sm:$0xff]  ;;  %v506_v39 = vld [vmem:[%s1341_s8 + $0xa8] sm:$0xff]  ;;  %v571_v40 = vld [vmem:[%s1341_s8 + $0x2b0] sm:$0xff] }
  0x6a   : > { %713 = vmatprep.subr.mxu1 %v576_v30  ;;  %644 = vmatprep.subr.mxu0 %v510_v31  ;;  %v505_v41 = vld [vmem:[%s1341_s8 + $0xa0] sm:$0xff]  ;;  %v570_v42 = vld [vmem:[%s1341_s8 + $0x2a8] sm:$0xff]  ;;  %v504_v43 = vld [vmem:[%s1341_s8 + $0x98] sm:$0xff] }
  0x6b   : > { %714 = vmatpush1.msra.mxu1 %v575_v32  ;;  %645 = vmatpush1.msra.mxu0 %v509_v33  ;;  %v569_v44 = vld [vmem:[%s1341_s8 + $0x2a0] sm:$0xff]  ;;  %v503_v45 = vld [vmem:[%s1341_s8 + $0x90] sm:$0xff]  ;;  %v568_v46 = vld [vmem:[%s1341_s8 + $0x298] sm:$0xff] }
  0x6c   : > { %715 = vmatprep.subr.mxu1 %v574_v34  ;;  %646 = vmatprep.subr.mxu0 %v508_v35  ;;  %v502_v47 = vld [vmem:[%s1341_s8 + $0x88] sm:$0xff]  ;;  %v567_v48 = vld [vmem:[%s1341_s8 + $0x290] sm:$0xff]  ;;  %v501_v49 = vld [vmem:[%s1341_s8 + $0x80] sm:$0xff] }
  0x6d   : > { %716 = vmatpush1.msra.mxu1 %v573_v36  ;;  %647 = vmatpush1.msra.mxu0 %v507_v37  ;;  %v566_v50 = vld [vmem:[%s1341_s8 + $0x288] sm:$0xff]  ;;  %v500_v51 = vld [vmem:[%s1341_s8 + $0x78] sm:$0xff]  ;;  %v565_v52 = vld [vmem:[%s1341_s8 + $0x280] sm:$0xff] }
  0x6e   : > { %717 = vmatprep.subr.mxu1 %v572_v38  ;;  %648 = vmatprep.subr.mxu0 %v506_v39  ;;  %v499_v53 = vld [vmem:[%s1341_s8 + $0x70] sm:$0xff]  ;;  %v564_v54 = vld [vmem:[%s1341_s8 + $0x278] sm:$0xff]  ;;  %v498_v55 = vld [vmem:[%s1341_s8 + $0x68] sm:$0xff] }
  0x6f   : > { %718 = vmatpush1.msra.mxu1 %v571_v40  ;;  %649 = vmatpush1.msra.mxu0 %v505_v41  ;;  %v563_v56 = vld [vmem:[%s1341_s8 + $0x270] sm:$0xff]  ;;  %v497_v57 = vld [vmem:[%s1341_s8 + $0x60] sm:$0xff]  ;;  %v562_v58 = vld [vmem:[%s1341_s8 + $0x268] sm:$0xff] }
  0x70   : > { %719 = vmatprep.subr.mxu1 %v570_v42  ;;  %650 = vmatprep.subr.mxu0 %v504_v43  ;;  %v496_v59 = vld [vmem:[%s1341_s8 + $0x58] sm:$0xff]  ;;  %v561_v60 = vld [vmem:[%s1341_s8 + $0x260] sm:$0xff]  ;;  %v495_v61 = vld [vmem:[%s1341_s8 + $0x50] sm:$0xff] }
  0x71   : > { %720 = vmatpush1.msra.mxu1 %v569_v44  ;;  %651 = vmatpush1.msra.mxu0 %v503_v45  ;;  %v560_v62 = vld [vmem:[%s1341_s8 + $0x258] sm:$0xff]  ;;  %v494_v63 = vld [vmem:[%s1341_s8 + $0x48] sm:$0xff]  ;;  %v559_v0 = vld [vmem:[%s1341_s8 + $0x250] sm:$0xff] }
  0x72   : > { %721 = vmatprep.subr.mxu1 %v568_v46  ;;  %652 = vmatprep.subr.mxu0 %v502_v47  ;;  %v493_v1 = vld [vmem:[%s1341_s8 + $0x40] sm:$0xff]  ;;  %v558_v2 = vld [vmem:[%s1341_s8 + $0x248] sm:$0xff]  ;;  %v492_v3 = vld [vmem:[%s1341_s8 + $0x38] sm:$0xff] }
  0x73   : > { %722 = vmatpush1.msra.mxu1 %v567_v48  ;;  %653 = vmatpush1.msra.mxu0 %v501_v49  ;;  %v557_v4 = vld [vmem:[%s1341_s8 + $0x240] sm:$0xff]  ;;  %v491_v5 = vld [vmem:[%s1341_s8 + $0x30] sm:$0xff]  ;;  %v556_v6 = vld [vmem:[%s1341_s8 + $0x238] sm:$0xff] }
  0x74   : > { %723 = vmatprep.subr.mxu1 %v566_v50  ;;  %654 = vmatprep.subr.mxu0 %v500_v51  ;;  %v490_v7 = vld [vmem:[%s1341_s8 + $0x28] sm:$0xff]  ;;  %v555_v8 = vld [vmem:[%s1341_s8 + $0x230] sm:$0xff]  ;;  %v489_v9 = vld [vmem:[%s1341_s8 + $0x20] sm:$0xff] }
  0x75   : > { %724 = vmatpush1.msra.mxu1 %v565_v52  ;;  %655 = vmatpush1.msra.mxu0 %v499_v53  ;;  %v554_v10 = vld [vmem:[%s1341_s8 + $0x228] sm:$0xff]  ;;  %v488_v11 = vld [vmem:[%s1341_s8 + $0x18] sm:$0xff]  ;;  %v553_v12 = vld [vmem:[%s1341_s8 + $0x220] sm:$0xff] }
  0x76   : > { %725 = vmatprep.subr.mxu1 %v564_v54  ;;  %656 = vmatprep.subr.mxu0 %v498_v55  ;;  %v487_v13 = vld [vmem:[%s1341_s8 + $0x10] sm:$0xff]  ;;  %v552_v14 = vld [vmem:[%s1341_s8 + $0x218] sm:$0xff]  ;;  %v486_v15 = vld [vmem:[%s1341_s8 + $0x8] sm:$0xff] }
  0x77   : > { %726 = vmatpush1.msra.mxu1 %v563_v56  ;;  %657 = vmatpush1.msra.mxu0 %v497_v57  ;;  %v551_v16 = vld [vmem:[%s1341_s8 + $0x210] sm:$0xff]  ;;  %v485_v17 = vld [vmem:[%s1341_s8] sm:$0xff]  ;;  %v550_v18 = vld [vmem:[%s1341_s8 + $0x208] sm:$0xff] }
  0x78   : > { %727 = vmatprep.subr.mxu1 %v562_v58  ;;  %658 = vmatprep.subr.mxu0 %v496_v59  ;;  %v548_v19 = vld [vmem:[%s1341_s8 + $0x1f8] sm:$0xff]  ;;  %v549_v20 = vld [vmem:[%s1341_s8 + $0x200] sm:$0xff]  ;;  %v547_v21 = vld [vmem:[%s1341_s8 + $0x1f0] sm:$0xff] }
  0x79   : > { %728 = vmatpush1.msra.mxu1 %v561_v60  ;;  %659 = vmatpush1.msra.mxu0 %v495_v61  ;;  %v612_v22 = vld [vmem:[%s1341_s8 + $0x3f8] sm:$0xff]  ;;  %v546_v23 = vld [vmem:[%s1341_s8 + $0x1e8] sm:$0xff]  ;;  %v611_v24 = vld [vmem:[%s1341_s8 + $0x3f0] sm:$0xff] }
  0x7a   : > { %729 = vmatprep.subr.mxu1 %v560_v62  ;;  %660 = vmatprep.subr.mxu0 %v494_v63  ;;  %v545_v25 = vld [vmem:[%s1341_s8 + $0x1e0] sm:$0xff]  ;;  %v610_v26 = vld [vmem:[%s1341_s8 + $0x3e8] sm:$0xff]  ;;  %v544_v27 = vld [vmem:[%s1341_s8 + $0x1d8] sm:$0xff] }
  0x7b   : > { %730 = vmatpush1.msra.mxu1 %v559_v0  ;;  %661 = vmatpush1.msra.mxu0 %v493_v1  ;;  %v609_v28 = vld [vmem:[%s1341_s8 + $0x3e0] sm:$0xff]  ;;  %v543_v29 = vld [vmem:[%s1341_s8 + $0x1d0] sm:$0xff]  ;;  %v608_v30 = vld [vmem:[%s1341_s8 + $0x3d8] sm:$0xff] }
  0x7c   : > { %731 = vmatprep.subr.mxu1 %v558_v2  ;;  %662 = vmatprep.subr.mxu0 %v492_v3  ;;  %v542_v31 = vld [vmem:[%s1341_s8 + $0x1c8] sm:$0xff]  ;;  %v607_v32 = vld [vmem:[%s1341_s8 + $0x3d0] sm:$0xff]  ;;  %v541_v33 = vld [vmem:[%s1341_s8 + $0x1c0] sm:$0xff] }
  0x7d   : > { %732 = vmatpush1.msra.mxu1 %v557_v4  ;;  %663 = vmatpush1.msra.mxu0 %v491_v5  ;;  %v606_v34 = vld [vmem:[%s1341_s8 + $0x3c8] sm:$0xff]  ;;  %v540_v35 = vld [vmem:[%s1341_s8 + $0x1b8] sm:$0xff]  ;;  %v605_v36 = vld [vmem:[%s1341_s8 + $0x3c0] sm:$0xff] }
  0x7e   : > { %733 = vmatprep.subr.mxu1 %v556_v6  ;;  %664 = vmatprep.subr.mxu0 %v490_v7  ;;  %v539_v37 = vld [vmem:[%s1341_s8 + $0x1b0] sm:$0xff]  ;;  %v604_v38 = vld [vmem:[%s1341_s8 + $0x3b8] sm:$0xff]  ;;  %v538_v39 = vld [vmem:[%s1341_s8 + $0x1a8] sm:$0xff] }
  0x7f   : > { %734 = vmatpush1.msra.mxu1 %v555_v8  ;;  %665 = vmatpush1.msra.mxu0 %v489_v9  ;;  %v603_v40 = vld [vmem:[%s1341_s8 + $0x3b0] sm:$0xff]  ;;  %v537_v41 = vld [vmem:[%s1341_s8 + $0x1a0] sm:$0xff]  ;;  %v602_v42 = vld [vmem:[%s1341_s8 + $0x3a8] sm:$0xff] }
  0x80   : > { %735 = vmatprep.subr.mxu1 %v554_v10  ;;  %666 = vmatprep.subr.mxu0 %v488_v11  ;;  %v536_v43 = vld [vmem:[%s1341_s8 + $0x198] sm:$0xff]  ;;  %v601_v44 = vld [vmem:[%s1341_s8 + $0x3a0] sm:$0xff]  ;;  %v535_v45 = vld [vmem:[%s1341_s8 + $0x190] sm:$0xff] }
  0x81   : > { %736 = vmatpush1.msra.mxu1 %v553_v12  ;;  %667 = vmatpush1.msra.mxu0 %v487_v13  ;;  %v600_v46 = vld [vmem:[%s1341_s8 + $0x398] sm:$0xff]  ;;  %v534_v47 = vld [vmem:[%s1341_s8 + $0x188] sm:$0xff]  ;;  %v599_v48 = vld [vmem:[%s1341_s8 + $0x390] sm:$0xff] }
  0x82   : > { %737 = vmatprep.subr.mxu1 %v552_v14  ;;  %668 = vmatprep.subr.mxu0 %v486_v15  ;;  %v533_v49 = vld [vmem:[%s1341_s8 + $0x180] sm:$0xff]  ;;  %v598_v50 = vld [vmem:[%s1341_s8 + $0x388] sm:$0xff]  ;;  %v532_v51 = vld [vmem:[%s1341_s8 + $0x178] sm:$0xff] }
  0x83   : > { %738 = vmatpush1.msra.mxu1 %v551_v16  ;;  %669 = vmatpush1.msra.mxu0 %v485_v17  ;;  %v597_v52 = vld [vmem:[%s1341_s8 + $0x380] sm:$0xff]  ;;  %v531_v53 = vld [vmem:[%s1341_s8 + $0x170] sm:$0xff]  ;;  %v596_v54 = vld [vmem:[%s1341_s8 + $0x378] sm:$0xff] }
  0x84   : > { %739 = vmatprep.subr.mxu1 %v550_v18  ;;  %670 = vmatprep.subr.mxu0 %v548_v19  ;;  %v530_v55 = vld [vmem:[%s1341_s8 + $0x168] sm:$0xff]  ;;  %v595_v56 = vld [vmem:[%s1341_s8 + $0x370] sm:$0xff]  ;;  %v529_v57 = vld [vmem:[%s1341_s8 + $0x160] sm:$0xff] }
  0x85   : > { %740 = vmatpush1.msra.mxu1 %v549_v20  ;;  %671 = vmatpush2.msra.mxu0 %v547_v21  ;;  %v594_v58 = vld [vmem:[%s1341_s8 + $0x368] sm:$0xff]  ;;  %v528_v59 = vld [vmem:[%s1341_s8 + $0x158] sm:$0xff]  ;;  %v593_v60 = vld [vmem:[%s1341_s8 + $0x360] sm:$0xff] }
  0x86   : > { %741 = vmatprep.subr.mxu1 %v612_v22  ;;  %672 = vmatprep.subr.mxu0 %v546_v23  ;;  %v527_v61 = vld [vmem:[%s1341_s8 + $0x150] sm:$0xff]  ;;  %v592_v62 = vld [vmem:[%s1341_s8 + $0x358] sm:$0xff]  ;;  %v526_v63 = vld [vmem:[%s1341_s8 + $0x148] sm:$0xff] }
  0x87   : > { %742 = vmatpush2.msra.mxu1 %v611_v24  ;;  %673 = vmatpush2.msra.mxu0 %v545_v25  ;;  %v591_v0 = vld [vmem:[%s1341_s8 + $0x350] sm:$0xff]  ;;  %v525_v1 = vld [vmem:[%s1341_s8 + $0x140] sm:$0xff]  ;;  %v590_v2 = vld [vmem:[%s1341_s8 + $0x348] sm:$0xff] }
  0x88   : > { %743 = vmatprep.subr.mxu1 %v610_v26  ;;  %674 = vmatprep.subr.mxu0 %v544_v27  ;;  %v524_v3 = vld [vmem:[%s1341_s8 + $0x138] sm:$0xff]  ;;  %v589_v4 = vld [vmem:[%s1341_s8 + $0x340] sm:$0xff]  ;;  %v523_v5 = vld [vmem:[%s1341_s8 + $0x130] sm:$0xff] }
  0x89   : > { %744 = vmatpush2.msra.mxu1 %v609_v28  ;;  %675 = vmatpush2.msra.mxu0 %v543_v29  ;;  %v588_v6 = vld [vmem:[%s1341_s8 + $0x338] sm:$0xff]  ;;  %v522_v7 = vld [vmem:[%s1341_s8 + $0x128] sm:$0xff]  ;;  %v587_v8 = vld [vmem:[%s1341_s8 + $0x330] sm:$0xff]  ;;  %v982_v29 = vmov 0.0  }
  0x8a   : > { %745 = vmatprep.subr.mxu1 %v608_v30  ;;  %676 = vmatprep.subr.mxu0 %v542_v31  ;;  %v521_v9 = vld [vmem:[%s1341_s8 + $0x120] sm:$0xff]  ;;  %v586_v10 = vld [vmem:[%s1341_s8 + $0x328] sm:$0xff]  ;;  %v520_v11 = vld [vmem:[%s1341_s8 + $0x118] sm:$0xff] }
  0x8b   : > { %746 = vmatpush2.msra.mxu1 %v607_v32  ;;  %677 = vmatpush2.msra.mxu0 %v541_v33  ;;  %v585_v12 = vld [vmem:[%s1341_s8 + $0x320] sm:$0xff]  ;;  %v519_v13 = vld [vmem:[%s1341_s8 + $0x110] sm:$0xff]  ;;  %v584_v14 = vld [vmem:[%s1341_s8 + $0x318] sm:$0xff] }
  0x8c   : > { %747 = vmatprep.subr.mxu1 %v606_v34  ;;  %678 = vmatprep.subr.mxu0 %v540_v35  ;;  %v518_v15 = vld [vmem:[%s1341_s8 + $0x108] sm:$0xff]  ;;  %v583_v16 = vld [vmem:[%s1341_s8 + $0x310] sm:$0xff]  ;;  %v517_v17 = vld [vmem:[%s1341_s8 + $0x100] sm:$0xff] }
  0x8d   : > { %748 = vmatpush2.msra.mxu1 %v605_v36  ;;  %679 = vmatpush2.msra.mxu0 %v539_v37  ;;  %v582_v18 = vld [vmem:[%s1341_s8 + $0x308] sm:$0xff]  ;;  %v479_v19 = vld [vmem:[%s1511_s0] sm:$0xff]  ;;  %v628_v20 = vld [vmem:[%s1341_s8 + $0x478] sm:$0xff] }
  0x8e   : > { %749 = vmatprep.subr.mxu1 %v604_v38  ;;  %680 = vmatprep.subr.mxu0 %v538_v39  ;;  %v581_v21 = vld [vmem:[%s1341_s8 + $0x300] sm:$0xff]  ;;  %v627_v22 = vld [vmem:[%s1341_s8 + $0x470] sm:$0xff]  ;;  %v626_v24 = vld [vmem:[%s1341_s8 + $0x468] sm:$0xff] }
  0x8f   : > { %750 = vmatpush2.msra.mxu1 %v603_v40  ;;  %681 = vmatpush2.msra.mxu0 %v537_v41  ;;  %v481_v23 = vld [vmem:[%s1511_s0 + $0x10] sm:$0xff]  ;;  %v625_v25 = vld [vmem:[%s1341_s8 + $0x460] sm:$0xff]  ;;  %v624_v26 = vld [vmem:[%s1341_s8 + $0x458] sm:$0xff] }
  0x90   : > { %751 = vmatprep.subr.mxu1 %v602_v42  ;;  %682 = vmatprep.subr.mxu0 %v536_v43  ;;  %v623_v27 = vld [vmem:[%s1341_s8 + $0x450] sm:$0xff]  ;;  %v622_v28 = vld [vmem:[%s1341_s8 + $0x448] sm:$0xff]  ;;  %v621_v30 = vld [vmem:[%s1341_s8 + $0x440] sm:$0xff] }
  0x91   : > { %752 = vmatpush2.msra.mxu1 %v601_v44  ;;  %683 = vmatpush2.msra.mxu0 %v535_v45  ;;  %v620_v31 = vld [vmem:[%s1341_s8 + $0x438] sm:$0xff]  ;;  %v619_v32 = vld [vmem:[%s1341_s8 + $0x430] sm:$0xff]  ;;  %v618_v33 = vld [vmem:[%s1341_s8 + $0x428] sm:$0xff] }
  0x92   : > { %753 = vmatprep.subr.mxu1 %v600_v46  ;;  %684 = vmatprep.subr.mxu0 %v534_v47  ;;  %v617_v34 = vld [vmem:[%s1341_s8 + $0x420] sm:$0xff]  ;;  %v616_v35 = vld [vmem:[%s1341_s8 + $0x418] sm:$0xff]  ;;  %v615_v36 = vld [vmem:[%s1341_s8 + $0x410] sm:$0xff] }
  0x93   : > { %754 = vmatpush2.msra.mxu1 %v599_v48  ;;  %685 = vmatpush2.msra.mxu0 %v533_v49  ;;  %v614_v37 = vld [vmem:[%s1341_s8 + $0x408] sm:$0xff]  ;;  %v613_v38 = vld [vmem:[%s1341_s8 + $0x400] sm:$0xff] }
  0x94   : > { %755 = vmatprep.subr.mxu1 %v598_v50  ;;  %686 = vmatprep.subr.mxu0 %v532_v51  ;;  %v483_v39 = vld [vmem:[%s1511_s0 + $0x20] sm:$0xff] }
  0x95   : > { %756 = vmatpush2.msra.mxu1 %v597_v52  ;;  %687 = vmatpush2.msra.mxu0 %v531_v53 }
  0x96   : > { %757 = vmatprep.subr.mxu1 %v596_v54  ;;  %688 = vmatprep.subr.mxu0 %v530_v55 }
  0x97   : > { %758 = vmatpush2.msra.mxu1 %v595_v56  ;;  %689 = vmatpush2.msra.mxu0 %v529_v57 }
  0x98   : > { %759 = vmatprep.subr.mxu1 %v594_v58  ;;  %690 = vmatprep.subr.mxu0 %v528_v59 }
  0x99   : > { %760 = vmatpush2.msra.mxu1 %v593_v60  ;;  %691 = vmatpush2.msra.mxu0 %v527_v61 }
  0x9a   : > { %761 = vmatprep.subr.mxu1 %v592_v62  ;;  %692 = vmatprep.subr.mxu0 %v526_v63 }
  0x9b   : > { %762 = vmatpush2.msra.mxu1 %v591_v0  ;;  %693 = vmatpush2.msra.mxu0 %v525_v1 }
  0x9c   : > { %763 = vmatprep.subr.mxu1 %v590_v2  ;;  %694 = vmatprep.subr.mxu0 %v524_v3 }
  0x9d   : > { %764 = vmatpush2.msra.mxu1 %v589_v4  ;;  %695 = vmatpush2.msra.mxu0 %v523_v5 }
  0x9e   : > { %765 = vmatprep.subr.mxu1 %v588_v6  ;;  %696 = vmatprep.subr.mxu0 %v522_v7 }
  0x9f   : > { %766 = vmatpush2.msra.mxu1 %v587_v8  ;;  %697 = vmatpush2.msra.mxu0 %v521_v9 }
  0xa0   : > { %767 = vmatprep.subr.mxu1 %v586_v10  ;;  %698 = vmatprep.subr.mxu0 %v520_v11 }
  0xa1   : > { %768 = vmatpush2.msra.mxu1 %v585_v12  ;;  %699 = vmatpush2.msra.mxu0 %v519_v13 }
  0xa2   : > { %769 = vmatprep.subr.mxu1 %v584_v14  ;;  %700 = vmatprep.subr.mxu0 %v518_v15 }
  0xa3   : > { %770 = vmatpush2.msra.mxu1 %v583_v16  ;;  %701 = vmatpush2.msra.mxu0 %v517_v17 }
  0xa4   : > { %771 = vmatprep.subr.mxu1 %v582_v18  ;;  %703 = vmatmul.mubr.f32.vlgmr.msra.gmra.mxu0 %v479_v19 }
  0xa5   : > { %796 = vmatprep.subr.mxu0 %v628_v20  ;;  %772 = vmatpush2.msra.mxu1 %v581_v21 }
  0xa6   : > { %797 = vmatpush1.msra.mxu0 %v627_v22  ;;  %774 = vmatmul.mubr.f32.vlgmr.msra.gmra.mxu1 %v481_v23 }
  0xa7   : > { %798 = vmatprep.subr.mxu0 %v626_v24  ;;  %844 = vmatprep.mubr.f32.mxu0 %v982_v29 }
  0xa8   : > { %799 = vmatpush1.msra.mxu0 %v625_v25 }
  0xa9   : > { %800 = vmatprep.subr.mxu0 %v624_v26 }
  0xaa   : > { %801 = vmatpush1.msra.mxu0 %v623_v27 }
  0xab   : > { %802 = vmatprep.subr.mxu0 %v622_v28 }
  0xac   : > { %803 = vmatpush1.msra.mxu0 %v621_v30 }
  0xad   : > { %804 = vmatprep.subr.mxu0 %v620_v31 }
  0xae   : > { %805 = vmatpush1.msra.mxu0 %v619_v32 }
  0xaf   : > { %806 = vmatprep.subr.mxu0 %v618_v33 }
  0xb0   : > { %807 = vmatpush1.msra.mxu0 %v617_v34 }
  0xb1   : > { %808 = vmatprep.subr.mxu0 %v616_v35 }
  0xb2   : > { %809 = vmatpush1.msra.mxu0 %v615_v36 }
  0xb3   : > { %810 = vmatprep.subr.mxu0 %v614_v37 }
  0xb4   : > { %811 = vmatpush1.msra.mxu0 %v613_v38 }
  0xb5   : > { %924 = vmatmul.mubr.msk.f32.vlgmr.msra.gmra.mxu0 %vm634_vm0, %v483_v39 }
  0xe0   : > { %v632_v41 = vpop.permute.xlu0 %631 }
 0x164   : > { %v704_v40 = vpop.f32.mrf.mxu0 }
 0x165   : > { %v705_v44 = vadd.f32 %v704_v40, %v632_v41 }
 0x166   : > { %v706_v42 = vpop.f32.mrf.mxu0  ;;  %v775_v43 = vpop.f32.mrf.mxu1 }
 0x167   : > { %v707_v45 = vadd.f32 %v706_v42, %v632_v41  ;;  %v776_v47 = vadd.f32 %v775_v43, %v705_v44 }
 0x168   : > { %v777_v46 = vpop.f32.mrf.mxu1 }
 0x169   : > { %v778_v49 = vadd.f32 %v777_v46, %v707_v45 }
 0x175   : > { %v846_v48 = vpop.f32.mrf.mxu0 }
 0x176   : > { %v847_v50 = vadd.f32 %v846_v48, %v776_v47 }
 0x177   : > { %v848_v51 = vpop.f32.mrf.mxu0 }
 0x178   : > { %851 = vst [vmem:[%s477_s24] sm:$0xff] %v847_v50  ;;  %v849_v52 = vadd.f32 %v848_v51, %v778_v49 }
 0x17a   : > { %852 = vst [vmem:[%s477_s24 + $0x8] sm:$0xff] %v849_v52 }
 0x17b PF: > { %p10_p9 = scmp.ge.s32.totalorder %s1020_s16, 9   ;;  %s1515_s12 = smov %s975_s13 }
 0x17c   : > { %s1516_s13 = smov %s1029_s19  ;;  %s1517_s14 = smov %s1020_s16 }
 0x17d   :  { %12 = sbr.rel (!%p10_p9) target bundleno = 2 (0x2), region = 90 }

</bundles_post_ra>
